<compile_context>
chip_gen: v6e
topology: v6e:2x2x1
jax: 0.10.0
libtpu: 0.0.40
codegen_flags: <defaults>
</compile_context>

<pallas_src>
import jax
import jax.numpy as jnp
from jax import lax
from jax.experimental import pallas as pl
from jax.experimental.pallas import tpu as pltpu

# MXU operand dtype. jnp.float32 keeps parity with the f32 PyTorch reference; switch to
# jnp.bfloat16 on v6e/v7x for ~2x MXU throughput if operand quantization is acceptable
# (accumulation stays f32 either way, and the element-wise epilogue stays f32 for v5e).
MXU_DTYPE = jnp.float32

LANES = 128          # TPU lane width; channel dims are zero-padded to a multiple of this.
NEG_SLOPE = 0.2      # LeakyReLU slope
EPS2 = 1e-24         # (F.normalize eps)^2 : x/max(||x||,1e-12) == x*rsqrt(max(||x||^2,1e-24))


def _round_up(x, m):
    return (x + m - 1) // m * m


def _make_fused_kernel(n_layers, offsets, guard, srow):
    """Builds the fused DomainNet kernel for a fixed layer count / spatial geometry."""

    def kernel(*refs):
        x_ref, mask_ref = refs[0], refs[1]
        layer_refs = refs[2:2 + 2 * n_layers]          # (w0, b0, w1, b1, ...)
        wh_ref = refs[2 + 2 * n_layers]                # (1, CP, CP) cosine weight for this batch
        cos_ref = refs[3 + 2 * n_layers]               # (srow, CP) output (lane-dense)
        feat_ref = refs[4 + 2 * n_layers]              # (srow, CP) output (lane-dense)
        act_ref = refs[5 + 2 * n_layers]               # (guard + srow + guard, CP) VMEM scratch

        # Zero the guard rows (vertical halo for the shifted tap reads) and drop the spatially
        # padded, channel-padded input into the scratch interior.
        act_ref[...] = jnp.zeros_like(act_ref)
        act_ref[pl.ds(guard, srow), :] = x_ref[...]

        mask = mask_ref[...]                           # (srow, 1): 1 on real pixels, 0 on pad rows

        for l in range(n_layers):
            w_ref, b_ref = layer_refs[2 * l], layer_refs[2 * l + 1]
            # In-kernel im2col: 9 shifted row-windows of the padded activation concatenated on the
            # lane axis -> a single (srow, 9*CP) operand => ONE MXU matmul per layer.
            taps = [act_ref[pl.ds(guard + off, srow), :] for off in offsets]
            patches = jnp.concatenate(taps, axis=1)
            z = jnp.dot(patches.astype(MXU_DTYPE), w_ref[...].astype(MXU_DTYPE),
                        preferred_element_type=jnp.float32)
            z = z + b_ref[...]                                     # bias (f32, VPU)
            a = jnp.where(z >= 0, z, NEG_SLOPE * z) * mask         # LeakyReLU(0.2) + re-zero pads
            act_ref[pl.ds(guard, srow), :] = a

        feat = act_ref[pl.ds(guard, srow), :]          # (srow, CP); real features in [:D] lanes
        feat_ref[...] = feat

        # Cosine head: torch.bmm(F.normalize(x), F.normalize(weight[dom])) * 40.
        # F.normalize default dim=1 => x is normalized over the *spatial* axis (rows here) and
        # weight[dom] over its D axis (rows of wh).  Padded rows/lanes are exact zeros so the
        # reductions are unaffected; rsqrt runs on the EUP.
        xss = jnp.sum(feat * feat, axis=0, keepdims=True)          # (1, CP)
        xn = feat * lax.rsqrt(jnp.maximum(xss, EPS2))
        wb = wh_ref[0]                                              # (CP, CP)
        wss = jnp.sum(wb * wb, axis=0, keepdims=True)
        wn = wb * lax.rsqrt(jnp.maximum(wss, EPS2))
        cos = jnp.dot(xn.astype(MXU_DTYPE), wn.astype(MXU_DTYPE),
                      preferred_element_type=jnp.float32) * 40.0
        cos_ref[...] = cos.astype(cos_ref.dtype)

    return kernel


def domain_net_forward(params, x_nchw, dom):
    """Pallas forward of DomainNet. Returns (cosine, x_feat, weight) like the PyTorch module."""
    convs = params["convs"]
    n_layers = len(convs)
    B, C0, H, W = x_nchw.shape
    Hp, Wp = H + 2, W + 2                       # zero-padded spatial extent (padding=1)
    srow = _round_up(Hp * Wp, 8)                # per-image row stride, sublane aligned
    guard = _round_up(Wp + 1, 8)                # halo rows (>= max |tap row shift| = Wp+1)
    D = convs[-1][0].shape[-1]                  # channels[-2]
    K = params["weight"].shape[-1]              # channels[-1]
    cp = _round_up(max([C0, D, K] + [w.shape[-1] for (w, _) in convs]), LANES)
    f32 = jnp.float32

    # ---- wrapper-side layout plumbing (pure XLA, tiny): lane-dense, row-aligned slabs ----
    h = jnp.transpose(x_nchw, (0, 2, 3, 1)).astype(f32)                    # NCHW -> NHWC
    h = jnp.pad(h, ((0, 0), (1, 1), (1, 1), (0, cp - C0)))                 # spatial + channel pad
    h = jnp.pad(h.reshape(B, Hp * Wp, cp), ((0, 0), (0, srow - Hp * Wp), (0, 0)))
    x_flat = h.reshape(B * srow, cp)                                       # (B*srow, cp)

    mask = jnp.zeros((Hp, Wp), f32).at[1:H + 1, 1:W + 1].set(1.0)          # interior-pixel mask
    mask = jnp.pad(mask.reshape(Hp * Wp, 1), ((0, srow - Hp * Wp), (0, 0)))

    layer_args = []
    for (w, bias) in convs:                                                # w: (3,3,cin,cout) HWIO
        cin, cout = w.shape[2], w.shape[3]
        wp = jnp.pad(w.astype(f32), ((0, 0), (0, 0), (0, cp - cin), (0, cp - cout)))
        layer_args.append(wp.reshape(9 * cp, cp))                          # rows: (tap, cin)
        layer_args.append(jnp.pad(bias.astype(f32), (0, cp - cout)).reshape(1, cp))

    w_sel = params["weight"][dom]                                          # (B, D, K)
    wh = jnp.pad(w_sel.astype(f32), ((0, 0), (0, cp - D), (0, cp - K)))    # (B, cp, cp)

    # tap row-offsets inside the flat padded image, torch cross-correlation order (ky-major)
    offsets = tuple((ky - 1) * Wp + (kx - 1) for ky in range(3) for kx in range(3))

    kernel = _make_fused_kernel(n_layers, offsets, guard, srow)
    in_specs = (
        [pl.BlockSpec((srow, cp), lambda i: (i, 0)),            # input slab  (per batch)
         pl.BlockSpec((srow, 1), lambda i: (0, 0))]             # mask        (shared)
        + [pl.BlockSpec((9 * cp, cp), lambda i: (0, 0)),        # conv weight (shared, resident)
           pl.BlockSpec((1, cp), lambda i: (0, 0))] * n_layers  # conv bias   (shared, resident)
        + [pl.BlockSpec((1, cp, cp), lambda i: (i, 0, 0))]      # cosine weight (per batch)
    )
    cos_flat, feat_flat = pl.pallas_call(
        kernel,
        out_shape=(jax.ShapeDtypeStruct((B * srow, cp), f32),
                   jax.ShapeDtypeStruct((B * srow, cp), f32)),
        grid=(B,),
        in_specs=in_specs,
        out_specs=(pl.BlockSpec((srow, cp), lambda i: (i, 0)),
                   pl.BlockSpec((srow, cp), lambda i: (i, 0))),
        scratch_shapes=[pltpu.VMEM((guard + srow + guard, cp), f32)],
        compiler_params=pltpu.CompilerParams(
            dimension_semantics=("parallel",),                  # batch-parallel => v7x megacore
            vmem_limit_bytes=32 * 1024 * 1024),
    )(x_flat, mask, *layer_args, wh)

    # ---- slice the lane/row padding back off (pure XLA) ----
    def unpad(flat, nch):
        y = flat.reshape(B, srow, cp)[:, :Hp * Wp, :].reshape(B, Hp, Wp, cp)
        return y[:, 1:H + 1, 1:W + 1, :nch]

    cosine = jnp.transpose(unpad(cos_flat, K), (0, 3, 1, 2))               # (B, K, H, W)
    x_feat = unpad(feat_flat, D).reshape(B, H * W, D)                      # (B, H*W, D)
    return cosine, x_feat, params["weight"]
    # TODO(synk): norm_type in {'bn','in','ln','adain'} and spectral_norm are not implemented;
    # this reproduces the norm_type='none' configuration (check_freeze is training-only).


def init_domain_net_params(key, channels, num_doms):
    """Deterministic init mirroring the PyTorch module (Conv2d default init + xavier_uniform_)."""
    params = {"convs": []}
    for i in range(len(channels) - 2):
        key, kw, kb = jax.random.split(key, 3)
        cin, cout = channels[i], channels[i + 1]
        bound = (1.0 / (cin * 9)) ** 0.5                       # U(-1/sqrt(fan_in), 1/sqrt(fan_in))
        w = jax.random.uniform(kw, (3, 3, cin, cout), jnp.float32, -bound, bound)   # HWIO
        b = jax.random.uniform(kb, (cout,), jnp.float32, -bound, bound)
        params["convs"].append((w, b))
    D, K = channels[-2], channels[-1]
    fan_in, fan_out = D * K, num_doms * K                      # xavier_uniform_ on (num_doms,D,K)
    limit = (6.0 / (fan_in + fan_out)) ** 0.5
    key, kw = jax.random.split(key)
    params["weight"] = jax.random.uniform(kw, (num_doms, D, K), jnp.float32, -limit, limit)
    return params


def _reference_forward(params, x_nchw, dom):
    """Pure-JAX (XLA) reference, used only for a numerical self-check."""
    h = jnp.transpose(x_nchw, (0, 2, 3, 1))
    for (w, b) in params["convs"]:
        h = lax.conv_general_dilated(h, w, (1, 1), ((1, 1), (1, 1)),
                                     dimension_numbers=("NHWC", "HWIO", "NHWC"),
                                     precision=lax.Precision.HIGHEST) + b
        h = jnp.where(h >= 0, h, NEG_SLOPE * h)
    B, H, W, D = h.shape
    xf = h.reshape(B, H * W, D)
    wd = params["weight"][dom]
    xn = xf / jnp.maximum(jnp.linalg.norm(xf, axis=1, keepdims=True), 1e-12)   # F.normalize dim=1
    wn = wd / jnp.maximum(jnp.linalg.norm(wd, axis=1, keepdims=True), 1e-12)
    cos = jnp.einsum("bnd,bdk->bnk", xn, wn, precision=lax.Precision.HIGHEST) * 40.0
    cosine = jnp.transpose(cos.reshape(B, H, W, -1), (0, 3, 1, 2))
    return cosine, xf, params["weight"]


if __name__ == "__main__":
    net_conf = {"channels": [4, 8, 16, 32], "norm_type": "none", "num_doms": 3}
    key = jax.random.PRNGKey(0)
    params = init_domain_net_params(key, net_conf["channels"], net_conf["num_doms"])

    B, C, H, W = 2, net_conf["channels"][0], 16, 16
    kx, _ = jax.random.split(jax.random.PRNGKey(0))
    x = jax.random.normal(kx, (B, C, H, W), jnp.float32)
    dom = jnp.array([0, 2], dtype=jnp.int32)

    fwd = jax.jit(domain_net_forward)
    cosine, feats, weight = fwd(params, x, dom)
    jax.block_until_ready((cosine, feats, weight))

    assert cosine.shape == (B, net_conf["channels"][-1], H, W)
    assert feats.shape == (B, H * W, net_conf["channels"][-2])
    assert weight.shape == (net_conf["num_doms"], net_conf["channels"][-2],
                            net_conf["channels"][-1])

    # Numerical self-check against the pure-JAX reference (loose tolerance: robust to MXU
    # precision mode, still catches structural bugs which give O(1)+ errors).
    ref_cos, ref_feat, _ = _reference_forward(params, x, dom)
    assert float(jnp.max(jnp.abs(feats - ref_feat))) < 2e-2
    assert float(jnp.max(jnp.abs(cosine - ref_cos))) < 2e-1

    print("KERNEL_OK")
</pallas_src>

<mosaic_0001>
module attributes {stable_mosaic.version = 11 : i64} {
  func.func @kernel(%arg0: i32, %arg1: memref<328x128xf32, #tpu.memory_space<vmem>>, %arg2: memref<328x1xf32, #tpu.memory_space<vmem>>, %arg3: memref<1152x128xf32, #tpu.memory_space<vmem>>, %arg4: memref<1x128xf32, #tpu.memory_space<vmem>>, %arg5: memref<1152x128xf32, #tpu.memory_space<vmem>>, %arg6: memref<1x128xf32, #tpu.memory_space<vmem>>, %arg7: memref<1x128x128xf32, #tpu.memory_space<vmem>>, %arg8: memref<328x128xf32, #tpu.memory_space<vmem>>, %arg9: memref<328x128xf32, #tpu.memory_space<vmem>>, %arg10: memref<376x128xf32, #tpu.memory_space<vmem>>) attributes {dimension_semantics = [#tpu.dimension_semantics<parallel>], iteration_bounds = array<i64: 2>, scalar_prefetch = 0 : i64, scratch_operands = 1 : i64, tpu.core_type = #tpu.core_type<tc>, window_params = [{transform_indices = @transform_0, window_bounds = array<i64: 328, 128>}, {pipeline_mode = #tpu.pipeline_mode<synchronous>, transform_indices = @transform_1, window_bounds = array<i64: 328, 1>}, {pipeline_mode = #tpu.pipeline_mode<synchronous>, transform_indices = @transform_2, window_bounds = array<i64: 1152, 128>}, {pipeline_mode = #tpu.pipeline_mode<synchronous>, transform_indices = @transform_3, window_bounds = array<i64: 1, 128>}, {pipeline_mode = #tpu.pipeline_mode<synchronous>, transform_indices = @transform_4, window_bounds = array<i64: 1152, 128>}, {pipeline_mode = #tpu.pipeline_mode<synchronous>, transform_indices = @transform_5, window_bounds = array<i64: 1, 128>}, {transform_indices = @transform_6, window_bounds = array<i64: 1, 128, 128>}, {transform_indices = @transform_7, window_bounds = array<i64: 328, 128>}, {transform_indices = @transform_8, window_bounds = array<i64: 328, 128>}]} {
    %cst = arith.constant 0.000000e+00 : f32
    %0 = vector.broadcast %cst : f32 to vector<376x128xf32>
    %c0 = arith.constant 0 : index
    %c0_0 = arith.constant 0 : index
    %1 = vector.load %arg10[%c0, %c0_0] : memref<376x128xf32, #tpu.memory_space<vmem>>, vector<376x128xf32>
    tpu.vector_store %arg10[%c0, %c0_0], %0 {strides = array<i32>} : memref<376x128xf32, #tpu.memory_space<vmem>>, vector<376x128xf32>,
    %c0_1 = arith.constant 0 : index
    %c0_2 = arith.constant 0 : index
    %2 = vector.load %arg1[%c0_1, %c0_2] : memref<328x128xf32, #tpu.memory_space<vmem>>, vector<328x128xf32>
    %c24 = arith.constant 24 : index
    %c0_3 = arith.constant 0 : index
    %3 = vector.load %arg10[%c24, %c0_3] : memref<376x128xf32, #tpu.memory_space<vmem>>, vector<328x128xf32>
    tpu.vector_store %arg10[%c24, %c0_3], %2 {strides = array<i32>} : memref<376x128xf32, #tpu.memory_space<vmem>>, vector<328x128xf32>,
    %c0_4 = arith.constant 0 : index
    %c0_5 = arith.constant 0 : index
    %4 = vector.load %arg2[%c0_4, %c0_5] : memref<328x1xf32, #tpu.memory_space<vmem>>, vector<328x1xf32>
    %c5 = arith.constant 5 : index
    %c0_6 = arith.constant 0 : index
    %5 = vector.load %arg10[%c5, %c0_6] : memref<376x128xf32, #tpu.memory_space<vmem>>, vector<328x128xf32>
    %c6 = arith.constant 6 : index
    %c0_7 = arith.constant 0 : index
    %6 = vector.load %arg10[%c6, %c0_7] : memref<376x128xf32, #tpu.memory_space<vmem>>, vector<328x128xf32>
    %c7 = arith.constant 7 : index
    %c0_8 = arith.constant 0 : index
    %7 = vector.load %arg10[%c7, %c0_8] : memref<376x128xf32, #tpu.memory_space<vmem>>, vector<328x128xf32>
    %c23 = arith.constant 23 : index
    %c0_9 = arith.constant 0 : index
    %8 = vector.load %arg10[%c23, %c0_9] : memref<376x128xf32, #tpu.memory_space<vmem>>, vector<328x128xf32>
    %c24_10 = arith.constant 24 : index
    %c0_11 = arith.constant 0 : index
    %9 = vector.load %arg10[%c24_10, %c0_11] : memref<376x128xf32, #tpu.memory_space<vmem>>, vector<328x128xf32>
    %c25 = arith.constant 25 : index
    %c0_12 = arith.constant 0 : index
    %10 = vector.load %arg10[%c25, %c0_12] : memref<376x128xf32, #tpu.memory_space<vmem>>, vector<328x128xf32>
    %c41 = arith.constant 41 : index
    %c0_13 = arith.constant 0 : index
    %11 = vector.load %arg10[%c41, %c0_13] : memref<376x128xf32, #tpu.memory_space<vmem>>, vector<328x128xf32>
    %c42 = arith.constant 42 : index
    %c0_14 = arith.constant 0 : index
    %12 = vector.load %arg10[%c42, %c0_14] : memref<376x128xf32, #tpu.memory_space<vmem>>, vector<328x128xf32>
    %c43 = arith.constant 43 : index
    %c0_15 = arith.constant 0 : index
    %13 = vector.load %arg10[%c43, %c0_15] : memref<376x128xf32, #tpu.memory_space<vmem>>, vector<328x128xf32>
    %14 = tpu.concatenate %5, %6, %7, %8, %9, %10, %11, %12, %13 in 1 : vector<328x128xf32>, vector<328x128xf32>, vector<328x128xf32>, vector<328x128xf32>, vector<328x128xf32>, vector<328x128xf32>, vector<328x128xf32>, vector<328x128xf32>, vector<328x128xf32> -> vector<328x1152xf32>
    %c0_16 = arith.constant 0 : index
    %c0_17 = arith.constant 0 : index
    %15 = vector.load %arg3[%c0_16, %c0_17] : memref<1152x128xf32, #tpu.memory_space<vmem>>, vector<1152x128xf32>
    %cst_18 = arith.constant dense<0.000000e+00> : vector<328x128xf32>
    %16 = tpu.matmul %14, %15, %cst_18 {dimension_numbers = #tpu.dot_dimension_numbers<[1], [0], [0], [1], [0, 0, 1, 1], [], []>} : vector<328x1152xf32>, vector<1152x128xf32>, vector<328x128xf32> -> vector<328x128xf32>
    %c0_19 = arith.constant 0 : index
    %c0_20 = arith.constant 0 : index
    %17 = vector.load %arg4[%c0_19, %c0_20] : memref<1x128xf32, #tpu.memory_space<vmem>>, vector<1x128xf32>
    %18 = vector.broadcast %17 : vector<1x128xf32> to vector<328x128xf32>
    %19 = arith.addf %16, %18 : vector<328x128xf32>
    %cst_21 = arith.constant 0.000000e+00 : f32
    %20 = vector.broadcast %cst_21 : f32 to vector<328x128xf32>
    %21 = arith.cmpf oge, %19, %20 : vector<328x128xf32>
    %cst_22 = arith.constant 2.000000e-01 : f32
    %22 = vector.broadcast %cst_22 : f32 to vector<328x128xf32>
    %23 = arith.mulf %22, %19 : vector<328x128xf32>
    %24 = arith.select %21, %19, %23 : vector<328x128xi1>, vector<328x128xf32>
    %25 = vector.broadcast %4 : vector<328x1xf32> to vector<328x128xf32>
    %26 = arith.mulf %24, %25 : vector<328x128xf32>
    %c24_23 = arith.constant 24 : index
    %c0_24 = arith.constant 0 : index
    %27 = vector.load %arg10[%c24_23, %c0_24] : memref<376x128xf32, #tpu.memory_space<vmem>>, vector<328x128xf32>
    tpu.vector_store %arg10[%c24_23, %c0_24], %26 {strides = array<i32>} : memref<376x128xf32, #tpu.memory_space<vmem>>, vector<328x128xf32>,
    %c5_25 = arith.constant 5 : index
    %c0_26 = arith.constant 0 : index
    %28 = vector.load %arg10[%c5_25, %c0_26] : memref<376x128xf32, #tpu.memory_space<vmem>>, vector<328x128xf32>
    %c6_27 = arith.constant 6 : index
    %c0_28 = arith.constant 0 : index
    %29 = vector.load %arg10[%c6_27, %c0_28] : memref<376x128xf32, #tpu.memory_space<vmem>>, vector<328x128xf32>
    %c7_29 = arith.constant 7 : index
    %c0_30 = arith.constant 0 : index
    %30 = vector.load %arg10[%c7_29, %c0_30] : memref<376x128xf32, #tpu.memory_space<vmem>>, vector<328x128xf32>
    %c23_31 = arith.constant 23 : index
    %c0_32 = arith.constant 0 : index
    %31 = vector.load %arg10[%c23_31, %c0_32] : memref<376x128xf32, #tpu.memory_space<vmem>>, vector<328x128xf32>
    %c24_33 = arith.constant 24 : index
    %c0_34 = arith.constant 0 : index
    %32 = vector.load %arg10[%c24_33, %c0_34] : memref<376x128xf32, #tpu.memory_space<vmem>>, vector<328x128xf32>
    %c25_35 = arith.constant 25 : index
    %c0_36 = arith.constant 0 : index
    %33 = vector.load %arg10[%c25_35, %c0_36] : memref<376x128xf32, #tpu.memory_space<vmem>>, vector<328x128xf32>
    %c41_37 = arith.constant 41 : index
    %c0_38 = arith.constant 0 : index
    %34 = vector.load %arg10[%c41_37, %c0_38] : memref<376x128xf32, #tpu.memory_space<vmem>>, vector<328x128xf32>
    %c42_39 = arith.constant 42 : index
    %c0_40 = arith.constant 0 : index
    %35 = vector.load %arg10[%c42_39, %c0_40] : memref<376x128xf32, #tpu.memory_space<vmem>>, vector<328x128xf32>
    %c43_41 = arith.constant 43 : index
    %c0_42 = arith.constant 0 : index
    %36 = vector.load %arg10[%c43_41, %c0_42] : memref<376x128xf32, #tpu.memory_space<vmem>>, vector<328x128xf32>
    %37 = tpu.concatenate %28, %29, %30, %31, %32, %33, %34, %35, %36 in 1 : vector<328x128xf32>, vector<328x128xf32>, vector<328x128xf32>, vector<328x128xf32>, vector<328x128xf32>, vector<328x128xf32>, vector<328x128xf32>, vector<328x128xf32>, vector<328x128xf32> -> vector<328x1152xf32>
    %c0_43 = arith.constant 0 : index
    %c0_44 = arith.constant 0 : index
    %38 = vector.load %arg5[%c0_43, %c0_44] : memref<1152x128xf32, #tpu.memory_space<vmem>>, vector<1152x128xf32>
    %cst_45 = arith.constant dense<0.000000e+00> : vector<328x128xf32>
    %39 = tpu.matmul %37, %38, %cst_45 {dimension_numbers = #tpu.dot_dimension_numbers<[1], [0], [0], [1], [0, 0, 1, 1], [], []>} : vector<328x1152xf32>, vector<1152x128xf32>, vector<328x128xf32> -> vector<328x128xf32>
    %c0_46 = arith.constant 0 : index
    %c0_47 = arith.constant 0 : index
    %40 = vector.load %arg6[%c0_46, %c0_47] : memref<1x128xf32, #tpu.memory_space<vmem>>, vector<1x128xf32>
    %41 = vector.broadcast %40 : vector<1x128xf32> to vector<328x128xf32>
    %42 = arith.addf %39, %41 : vector<328x128xf32>
    %cst_48 = arith.constant 0.000000e+00 : f32
    %43 = vector.broadcast %cst_48 : f32 to vector<328x128xf32>
    %44 = arith.cmpf oge, %42, %43 : vector<328x128xf32>
    %cst_49 = arith.constant 2.000000e-01 : f32
    %45 = vector.broadcast %cst_49 : f32 to vector<328x128xf32>
    %46 = arith.mulf %45, %42 : vector<328x128xf32>
    %47 = arith.select %44, %42, %46 : vector<328x128xi1>, vector<328x128xf32>
    %48 = vector.broadcast %4 : vector<328x1xf32> to vector<328x128xf32>
    %49 = arith.mulf %47, %48 : vector<328x128xf32>
    %c24_50 = arith.constant 24 : index
    %c0_51 = arith.constant 0 : index
    %50 = vector.load %arg10[%c24_50, %c0_51] : memref<376x128xf32, #tpu.memory_space<vmem>>, vector<328x128xf32>
    tpu.vector_store %arg10[%c24_50, %c0_51], %49 {strides = array<i32>} : memref<376x128xf32, #tpu.memory_space<vmem>>, vector<328x128xf32>,
    %c24_52 = arith.constant 24 : index
    %c0_53 = arith.constant 0 : index
    %51 = vector.load %arg10[%c24_52, %c0_53] : memref<376x128xf32, #tpu.memory_space<vmem>>, vector<328x128xf32>
    %c0_54 = arith.constant 0 : index
    %c0_55 = arith.constant 0 : index
    %52 = vector.load %arg9[%c0_54, %c0_55] : memref<328x128xf32, #tpu.memory_space<vmem>>, vector<328x128xf32>
    tpu.vector_store %arg9[%c0_54, %c0_55], %51 {strides = array<i32>} : memref<328x128xf32, #tpu.memory_space<vmem>>, vector<328x128xf32>,
    %53 = arith.mulf %51, %51 : vector<328x128xf32>
    %cst_56 = arith.constant dense<0.000000e+00> : vector<128xf32>
    %54 = vector.multi_reduction <add>, %53, %cst_56 [0] : vector<328x128xf32> to vector<128xf32>
    %55 = vector.shape_cast %54 : vector<128xf32> to vector<1x128xf32>
    %cst_57 = arith.constant 1.000000e-24 : f32
    %56 = vector.broadcast %cst_57 : f32 to vector<1x128xf32>
    %57 = arith.maximumf %55, %56 : vector<1x128xf32>
    %58 = math.rsqrt %57 : vector<1x128xf32>
    %59 = vector.broadcast %58 : vector<1x128xf32> to vector<328x128xf32>
    %60 = arith.mulf %51, %59 : vector<328x128xf32>
    %c0_58 = arith.constant 0 : index
    %c0_59 = arith.constant 0 : index
    %c0_60 = arith.constant 0 : index
    %61 = vector.load %arg7[%c0_58, %c0_59, %c0_60] : memref<1x128x128xf32, #tpu.memory_space<vmem>>, vector<1x128x128xf32>
    %62 = vector.shape_cast %61 : vector<1x128x128xf32> to vector<128x128xf32>
    %63 = arith.mulf %62, %62 : vector<128x128xf32>
    %cst_61 = arith.constant dense<0.000000e+00> : vector<128xf32>
    %64 = vector.multi_reduction <add>, %63, %cst_61 [0] : vector<128x128xf32> to vector<128xf32>
    %65 = vector.shape_cast %64 : vector<128xf32> to vector<1x128xf32>
    %cst_62 = arith.constant 1.000000e-24 : f32
    %66 = vector.broadcast %cst_62 : f32 to vector<1x128xf32>
    %67 = arith.maximumf %65, %66 : vector<1x128xf32>
    %68 = math.rsqrt %67 : vector<1x128xf32>
    %69 = vector.broadcast %68 : vector<1x128xf32> to vector<128x128xf32>
    %70 = arith.mulf %62, %69 : vector<128x128xf32>
    %cst_63 = arith.constant dense<0.000000e+00> : vector<328x128xf32>
    %71 = tpu.matmul %60, %70, %cst_63 {dimension_numbers = #tpu.dot_dimension_numbers<[1], [0], [0], [1], [0, 0, 1, 1], [], []>} : vector<328x128xf32>, vector<128x128xf32>, vector<328x128xf32> -> vector<328x128xf32>
    %cst_64 = arith.constant 4.000000e+01 : f32
    %72 = vector.broadcast %cst_64 : f32 to vector<328x128xf32>
    %73 = arith.mulf %71, %72 : vector<328x128xf32>
    %c0_65 = arith.constant 0 : index
    %c0_66 = arith.constant 0 : index
    %74 = vector.load %arg8[%c0_65, %c0_66] : memref<328x128xf32, #tpu.memory_space<vmem>>, vector<328x128xf32>
    tpu.vector_store %arg8[%c0_65, %c0_66], %73 {strides = array<i32>} : memref<328x128xf32, #tpu.memory_space<vmem>>, vector<328x128xf32>,
    return
  }
  func.func @transform_0(%arg0: i32) -> (i32, i32) {
    %c0_i32 = arith.constant 0 : i32
    %c0_i32_0 = arith.constant 0 : i32
    return %arg0, %c0_i32 : i32, i32
  }
  func.func @transform_1(%arg0: i32) -> (i32, i32) {
    %c0_i32 = arith.constant 0 : i32
    %c0_i32_0 = arith.constant 0 : i32
    %c0_i32_1 = arith.constant 0 : i32
    return %c0_i32, %c0_i32_0 : i32, i32
  }
  func.func @transform_2(%arg0: i32) -> (i32, i32) {
    %c0_i32 = arith.constant 0 : i32
    %c0_i32_0 = arith.constant 0 : i32
    %c0_i32_1 = arith.constant 0 : i32
    return %c0_i32, %c0_i32_0 : i32, i32
  }
  func.func @transform_3(%arg0: i32) -> (i32, i32) {
    %c0_i32 = arith.constant 0 : i32
    %c0_i32_0 = arith.constant 0 : i32
    %c0_i32_1 = arith.constant 0 : i32
    return %c0_i32, %c0_i32_0 : i32, i32
  }
  func.func @transform_4(%arg0: i32) -> (i32, i32) {
    %c0_i32 = arith.constant 0 : i32
    %c0_i32_0 = arith.constant 0 : i32
    %c0_i32_1 = arith.constant 0 : i32
    return %c0_i32, %c0_i32_0 : i32, i32
  }
  func.func @transform_5(%arg0: i32) -> (i32, i32) {
    %c0_i32 = arith.constant 0 : i32
    %c0_i32_0 = arith.constant 0 : i32
    %c0_i32_1 = arith.constant 0 : i32
    return %c0_i32, %c0_i32_0 : i32, i32
  }
  func.func @transform_6(%arg0: i32) -> (i32, i32, i32) {
    %c0_i32 = arith.constant 0 : i32
    %c0_i32_0 = arith.constant 0 : i32
    %c0_i32_1 = arith.constant 0 : i32
    return %arg0, %c0_i32, %c0_i32_0 : i32, i32, i32
  }
  func.func @transform_7(%arg0: i32) -> (i32, i32) {
    %c0_i32 = arith.constant 0 : i32
    %c0_i32_0 = arith.constant 0 : i32
    return %arg0, %c0_i32 : i32, i32
  }
  func.func @transform_8(%arg0: i32) -> (i32, i32) {
    %c0_i32 = arith.constant 0 : i32
    %c0_i32_0 = arith.constant 0 : i32
    return %arg0, %c0_i32 : i32, i32
  }
}

</mosaic_0001>

<bundles_post_ra>
// kernel: domain_net_forward.1
= control target key start
LH: loop header
LB: loop body
LE: loop exit
PB: predicated region body
PF: predicated region fallthrough
CT: control target
= control target key end

     0   :  { %s6304_s27 = smov 0   ;;  %s9288_s0 = inlined_call_operand.vmem [shape: f32[656,128], index: 0, kind: input, shape index: {}]   ;;  %s9289_s1 = inlined_call_operand.vmem [shape: f32[328,1], index: 1, kind: input, shape index: {}]   ;;  %s9290_s2 = inlined_call_operand.vmem [shape: f32[1152,128], index: 2, kind: input, shape index: {}]   ;;  %s9291_s3 = inlined_call_operand.vmem [shape: f32[1,128], index: 3, kind: input, shape index: {}]   ;;  %s9292_s4 = inlined_call_operand.vmem [shape: f32[1152,128], index: 4, kind: input, shape index: {}]   ;;  %s9293_s5 = inlined_call_operand.vmem [shape: f32[1,128], index: 5, kind: input, shape index: {}]   ;;  %s9294_s6 = inlined_call_operand.vmem [shape: f32[2,128,128], index: 6, kind: input, shape index: {}]   ;;  %s9295_s7 = inlined_call_operand.vmem [shape: f32[656,128], index: 7, kind: output, shape index: {0}]   ;;  %s9296_s8 = inlined_call_operand.vmem [shape: f32[656,128], index: 8, kind: output, shape index: {1}]  }
   0x1 LB: > { %s6310_s28 = sadd.s32 4294967295, %s6254_s27   ;;  %p5453_p0 = scmp.ge.s32.totalorder %s6254_s27, 1  ;;  %s6254_s27 = sphi %s6304_s27, %s19_s27  }
   0x2   : > { %p276_p1 = scmp.lt.s32.totalorder %s6254_s27, 3 }
   0x4   : > { %p277_p2 = pnand %p5453_p0, %p276_p1 }
   0x6   : > { %280 = sbr.rel (%p277_p2) target bundleno = 1628 (0x65c), region = 48 }
   0xb   : > { %v819_v0 = vld [vmem:[%s9290_s2 + $0x78] sm:$0xff]  ;;  %s320_s9 = smul.u32 41, %s6310_s28  ;;  %v6256_v1 = vmov 0.0   ;;  %v818_v2 = vld [vmem:[%s9290_s2 + $0x70] sm:$0xff]  ;;  %v817_v3 = vld [vmem:[%s9290_s2 + $0x68] sm:$0xff]  ;;  %vm6258_vm0 = vmmov 0  }
   0xc   : > { %955 = vmatprep.subr.mxu0 %v6256_v1  ;;  %343 = vst [vmem:[#allocation2] sm:$0xff] %v6256_v1  ;;  %344 = vst [vmem:[#allocation2 + $0x8] sm:$0xff] %v6256_v1  ;;  %6100 = vmatprep.subr.mxu1 %v6256_v1  ;;  %v816_v4 = vld [vmem:[%s9290_s2 + $0x60] sm:$0xff]  ;;  %v815_v5 = vld [vmem:[%s9290_s2 + $0x58] sm:$0xff]  ;;  %p326_p4 = scmp.lt.s32.totalorder %s6310_s28, 1 }
   0xd   : > { %345 = vst [vmem:[#allocation2 + $0x10] sm:$0xff] %v6256_v1  ;;  %387 = vst [vmem:[#allocation2 + $0x160] sm:$0xff] %v6256_v1  ;;  %956 = vmatpush1.msra.mxu0 %v819_v0  ;;  %6132 = vmatpush1.msra.mxu1 %v819_v0  ;;  %p321_p3 = scmp.lt.s32.totalorder %s320_s9, 81  ;;  %v814_v6 = vld [vmem:[%s9290_s2 + $0x50] sm:$0xff]  ;;  %v813_v7 = vld [vmem:[%s9290_s2 + $0x48] sm:$0xff] }
   0xe   : > { %388 = vst [vmem:[#allocation2 + $0x168] sm:$0xff] %v6256_v1  ;;  %389 = vst [vmem:[#allocation2 + $0x170] sm:$0xff] %v6256_v1  ;;  %957 = vmatprep.subr.mxu0 %v6256_v1  ;;  %6101 = vmatprep.subr.mxu1 %v6256_v1  ;;  %v812_v11 = vld [vmem:[%s9290_s2 + $0x40] sm:$0xff]  ;;  %v811_v14 = vld [vmem:[%s9290_s2 + $0x38] sm:$0xff]  ;;  %s9442_s28 = smov (!%p326_p4, %s6310_s28), 1 }
   0xf   : > { %958 = vmatpush1.msra.mxu0 %v818_v2  ;;  %6133 = vmatpush1.msra.mxu1 %v818_v2  ;;  %s9440_s9 = smov (!%p321_p3, %s320_s9), 81  ;;  %v810_v17 = vld [vmem:[%s9290_s2 + $0x30] sm:$0xff]  ;;  %v809_v20 = vld [vmem:[%s9290_s2 + $0x28] sm:$0xff]  ;;  %v808_v21 = vld [vmem:[%s9290_s2 + $0x20] sm:$0xff]  ;;  %s5463_s24 = sshll.u32 %s9442_s28, 7 }
  0x10   : > { %959 = vmatprep.subr.mxu0 %v6256_v1  ;;  %6102 = vmatprep.subr.mxu1 %v6256_v1  ;;  %s6339_s16 = sshll.u32 %s9440_s9, 3  ;;  %v807_v24 = vld [vmem:[%s9290_s2 + $0x18] sm:$0xff]  ;;  %v806_v25 = vld [vmem:[%s9290_s2 + $0x10] sm:$0xff]  ;;  %v805_v27 = vld [vmem:[%s9290_s2 + $0x8] sm:$0xff]  ;;  %s8498_s29 = scalar_lea.vmem %s9294_s6, %s5463_s24 }
  0x11   : > { %960 = vmatpush1.msra.mxu0 %v817_v3  ;;  %6134 = vmatpush1.msra.mxu1 %v817_v3  ;;  %s6350_s21 = scalar_lea.vmem %s9288_s0, %s6339_s16  ;;  %v804_v31 = vld [vmem:[%s9290_s2] sm:$0xff]  ;;  %v835_v32 = vld [vmem:[%s9290_s2 + $0xf8] sm:$0xff]  ;;  %v834_v35 = vld [vmem:[%s9290_s2 + $0xf0] sm:$0xff]  ;;  %s8682_s9 = scalar_lea.vmem %s9296_s8, %s6339_s16 }
  0x12   : > { %961 = vmatprep.subr.mxu0 %v6256_v1  ;;  %6103 = vmatprep.subr.mxu1 %v6256_v1  ;;  %v408_v8 = vld [vmem:[%s6350_s21 + $0x90] sm:$0xff]  ;;  %v409_v9 = vld [vmem:[%s6350_s21 + $0x98] sm:$0xff]  ;;  %v410_v10 = vld [vmem:[%s6350_s21 + $0xa0] sm:$0xff] }
  0x13   : > { %962 = vmatpush1.msra.mxu0 %v816_v4  ;;  %6135 = vmatpush1.msra.mxu1 %v816_v4  ;;  %449 = vst [vmem:[#allocation2 + $0xa8] sm:$0xff] %v408_v8  ;;  %450 = vst [vmem:[#allocation2 + $0xb0] sm:$0xff] %v409_v9  ;;  %v390_v12 = vld [vmem:[%s6350_s21] sm:$0xff]  ;;  %v411_v13 = vld [vmem:[%s6350_s21 + $0xa8] sm:$0xff] }
  0x14   : > { %963 = vmatprep.subr.mxu0 %v6256_v1  ;;  %6104 = vmatprep.subr.mxu1 %v6256_v1  ;;  %451 = vst [vmem:[#allocation2 + $0xb8] sm:$0xff] %v410_v10  ;;  %431 = vst [vmem:[#allocation2 + $0x18] sm:$0xff] %v390_v12  ;;  %v391_v15 = vld [vmem:[%s6350_s21 + $0x8] sm:$0xff]  ;;  %v412_v16 = vld [vmem:[%s6350_s21 + $0xb0] sm:$0xff] }
  0x15   : > { %964 = vmatpush1.msra.mxu0 %v815_v5  ;;  %6136 = vmatpush1.msra.mxu1 %v815_v5  ;;  %452 = vst [vmem:[#allocation2 + $0xc0] sm:$0xff] %v411_v13  ;;  %432 = vst [vmem:[#allocation2 + $0x20] sm:$0xff] %v391_v15  ;;  %v392_v18 = vld [vmem:[%s6350_s21 + $0x10] sm:$0xff]  ;;  %v413_v19 = vld [vmem:[%s6350_s21 + $0xb8] sm:$0xff] }
  0x16   : > { %965 = vmatprep.subr.mxu0 %v6256_v1  ;;  %6105 = vmatprep.subr.mxu1 %v6256_v1  ;;  %453 = vst [vmem:[#allocation2 + $0xc8] sm:$0xff] %v412_v16  ;;  %433 = vst [vmem:[#allocation2 + $0x28] sm:$0xff] %v392_v18  ;;  %v393_v22 = vld [vmem:[%s6350_s21 + $0x18] sm:$0xff]  ;;  %v414_v23 = vld [vmem:[%s6350_s21 + $0xc0] sm:$0xff] }
  0x17   : > { %966 = vmatpush1.msra.mxu0 %v814_v6  ;;  %6137 = vmatpush1.msra.mxu1 %v814_v6  ;;  %454 = vst [vmem:[#allocation2 + $0xd0] sm:$0xff] %v413_v19  ;;  %434 = vst [vmem:[#allocation2 + $0x30] sm:$0xff] %v393_v22  ;;  %v394_v26 = vld [vmem:[%s6350_s21 + $0x20] sm:$0xff]  ;;  %v415_v28 = vld [vmem:[%s6350_s21 + $0xc8] sm:$0xff] }
  0x18   : > { %967 = vmatprep.subr.mxu0 %v6256_v1  ;;  %6106 = vmatprep.subr.mxu1 %v6256_v1  ;;  %455 = vst [vmem:[#allocation2 + $0xd8] sm:$0xff] %v414_v23  ;;  %435 = vst [vmem:[#allocation2 + $0x38] sm:$0xff] %v394_v26  ;;  %v395_v29 = vld [vmem:[%s6350_s21 + $0x28] sm:$0xff]  ;;  %v416_v30 = vld [vmem:[%s6350_s21 + $0xd0] sm:$0xff] }
  0x19   : > { %968 = vmatpush1.msra.mxu0 %v813_v7  ;;  %6138 = vmatpush1.msra.mxu1 %v813_v7  ;;  %456 = vst [vmem:[#allocation2 + $0xe0] sm:$0xff] %v415_v28  ;;  %436 = vst [vmem:[#allocation2 + $0x40] sm:$0xff] %v395_v29  ;;  %v396_v33 = vld [vmem:[%s6350_s21 + $0x30] sm:$0xff]  ;;  %v417_v34 = vld [vmem:[%s6350_s21 + $0xd8] sm:$0xff] }
  0x1a   : > { %969 = vmatprep.subr.mxu0 %v6256_v1  ;;  %6107 = vmatprep.subr.mxu1 %v6256_v1  ;;  %457 = vst [vmem:[#allocation2 + $0xe8] sm:$0xff] %v416_v30  ;;  %437 = vst [vmem:[#allocation2 + $0x48] sm:$0xff] %v396_v33  ;;  %v397_v36 = vld [vmem:[%s6350_s21 + $0x38] sm:$0xff]  ;;  %v418_v37 = vld [vmem:[%s6350_s21 + $0xe0] sm:$0xff] }
  0x1b   : > { %970 = vmatpush1.msra.mxu0 %v812_v11  ;;  %6139 = vmatpush1.msra.mxu1 %v812_v11  ;;  %458 = vst [vmem:[#allocation2 + $0xf0] sm:$0xff] %v417_v34  ;;  %438 = vst [vmem:[#allocation2 + $0x50] sm:$0xff] %v397_v36  ;;  %v833_v38 = vld [vmem:[%s9290_s2 + $0xe8] sm:$0xff]  ;;  %v832_v39 = vld [vmem:[%s9290_s2 + $0xe0] sm:$0xff] }
  0x1c   : > { %971 = vmatprep.subr.mxu0 %v6256_v1  ;;  %6108 = vmatprep.subr.mxu1 %v6256_v1  ;;  %459 = vst [vmem:[#allocation2 + $0xf8] sm:$0xff] %v418_v37  ;;  %v398_v40 = vld [vmem:[%s6350_s21 + $0x40] sm:$0xff]  ;;  %v419_v41 = vld [vmem:[%s6350_s21 + $0xe8] sm:$0xff]  ;;  %v831_v42 = vld [vmem:[%s9290_s2 + $0xd8] sm:$0xff] }
  0x1d   : > { %972 = vmatpush1.msra.mxu0 %v811_v14  ;;  %6140 = vmatpush1.msra.mxu1 %v811_v14  ;;  %439 = vst [vmem:[#allocation2 + $0x58] sm:$0xff] %v398_v40  ;;  %460 = vst [vmem:[#allocation2 + $0x100] sm:$0xff] %v419_v41  ;;  %v399_v43 = vld [vmem:[%s6350_s21 + $0x48] sm:$0xff]  ;;  %v420_v44 = vld [vmem:[%s6350_s21 + $0xf0] sm:$0xff] }
  0x1e   : > { %973 = vmatprep.subr.mxu0 %v6256_v1  ;;  %6109 = vmatprep.subr.mxu1 %v6256_v1  ;;  %v830_v45 = vld [vmem:[%s9290_s2 + $0xd0] sm:$0xff]  ;;  %440 = vst [vmem:[#allocation2 + $0x60] sm:$0xff] %v399_v43  ;;  %461 = vst [vmem:[#allocation2 + $0x108] sm:$0xff] %v420_v44  ;;  %v829_v46 = vld [vmem:[%s9290_s2 + $0xc8] sm:$0xff] }
  0x1f   : > { %974 = vmatpush1.msra.mxu0 %v810_v17  ;;  %6141 = vmatpush1.msra.mxu1 %v810_v17  ;;  %v400_v47 = vld [vmem:[%s6350_s21 + $0x50] sm:$0xff]  ;;  %v421_v48 = vld [vmem:[%s6350_s21 + $0xf8] sm:$0xff]  ;;  %v828_v49 = vld [vmem:[%s9290_s2 + $0xc0] sm:$0xff] }
  0x20   : > { %975 = vmatprep.subr.mxu0 %v6256_v1  ;;  %6110 = vmatprep.subr.mxu1 %v6256_v1  ;;  %441 = vst [vmem:[#allocation2 + $0x68] sm:$0xff] %v400_v47  ;;  %462 = vst [vmem:[#allocation2 + $0x110] sm:$0xff] %v421_v48  ;;  %v401_v50 = vld [vmem:[%s6350_s21 + $0x58] sm:$0xff]  ;;  %v422_v51 = vld [vmem:[%s6350_s21 + $0x100] sm:$0xff] }
  0x21   : > { %976 = vmatpush1.msra.mxu0 %v809_v20  ;;  %6142 = vmatpush1.msra.mxu1 %v809_v20  ;;  %442 = vst [vmem:[#allocation2 + $0x70] sm:$0xff] %v401_v50  ;;  %v827_v52 = vld [vmem:[%s9290_s2 + $0xb8] sm:$0xff]  ;;  %463 = vst [vmem:[#allocation2 + $0x118] sm:$0xff] %v422_v51  ;;  %v826_v53 = vld [vmem:[%s9290_s2 + $0xb0] sm:$0xff] }
  0x22   : > { %977 = vmatprep.subr.mxu0 %v6256_v1  ;;  %6111 = vmatprep.subr.mxu1 %v6256_v1  ;;  %v402_v54 = vld [vmem:[%s6350_s21 + $0x60] sm:$0xff]  ;;  %v423_v55 = vld [vmem:[%s6350_s21 + $0x108] sm:$0xff]  ;;  %v424_v59 = vld [vmem:[%s6350_s21 + $0x110] sm:$0xff] }
  0x23   : > { %978 = vmatpush1.msra.mxu0 %v808_v21  ;;  %6143 = vmatpush1.msra.mxu1 %v808_v21  ;;  %443 = vst [vmem:[#allocation2 + $0x78] sm:$0xff] %v402_v54  ;;  %v825_v56 = vld [vmem:[%s9290_s2 + $0xa8] sm:$0xff]  ;;  %464 = vst [vmem:[#allocation2 + $0x120] sm:$0xff] %v423_v55  ;;  %v824_v58 = vld [vmem:[%s9290_s2 + $0xa0] sm:$0xff] }
  0x24   : > { %979 = vmatprep.subr.mxu0 %v6256_v1  ;;  %6112 = vmatprep.subr.mxu1 %v6256_v1  ;;  %v403_v57 = vld [vmem:[%s6350_s21 + $0x68] sm:$0xff]  ;;  %465 = vst [vmem:[#allocation2 + $0x128] sm:$0xff] %v424_v59  ;;  %v823_v60 = vld [vmem:[%s9290_s2 + $0x98] sm:$0xff]  ;;  %v404_v61 = vld [vmem:[%s6350_s21 + $0x70] sm:$0xff] }
  0x25   : > { %980 = vmatpush1.msra.mxu0 %v807_v24  ;;  %6144 = vmatpush1.msra.mxu1 %v807_v24  ;;  %444 = vst [vmem:[#allocation2 + $0x80] sm:$0xff] %v403_v57  ;;  %445 = vst [vmem:[#allocation2 + $0x88] sm:$0xff] %v404_v61  ;;  %v425_v62 = vld [vmem:[%s6350_s21 + $0x118] sm:$0xff]  ;;  %v822_v63 = vld [vmem:[%s9290_s2 + $0x90] sm:$0xff] }
  0x26   : > { %981 = vmatprep.subr.mxu0 %v6256_v1  ;;  %6113 = vmatprep.subr.mxu1 %v6256_v1  ;;  %466 = vst [vmem:[#allocation2 + $0x130] sm:$0xff] %v425_v62  ;;  %v405_v0 = vld [vmem:[%s6350_s21 + $0x78] sm:$0xff]  ;;  %v821_v2 = vld [vmem:[%s9290_s2 + $0x88] sm:$0xff]  ;;  %v426_v3 = vld [vmem:[%s6350_s21 + $0x120] sm:$0xff] }
  0x27   : > { %982 = vmatpush1.msra.mxu0 %v806_v25  ;;  %6145 = vmatpush1.msra.mxu1 %v806_v25  ;;  %446 = vst [vmem:[#allocation2 + $0x90] sm:$0xff] %v405_v0  ;;  %467 = vst [vmem:[#allocation2 + $0x138] sm:$0xff] %v426_v3  ;;  %v820_v4 = vld [vmem:[%s9290_s2 + $0x80] sm:$0xff]  ;;  %v575_v7 = vld [vmem:[#allocation2 + $0xae] sm:$0xff] }
  0x28   : > { %983 = vmatprep.subr.mxu0 %v6256_v1  ;;  %6114 = vmatprep.subr.mxu1 %v6256_v1  ;;  %v406_v5 = vld [vmem:[%s6350_s21 + $0x80] sm:$0xff]  ;;  %v427_v8 = vld [vmem:[%s6350_s21 + $0x128] sm:$0xff]  ;;  %v883_v12 = vld [vmem:[%s9290_s2 + $0x278] sm:$0xff] }
  0x29   : > { %984 = vmatpush1.msra.mxu0 %v805_v27  ;;  %6146 = vmatpush1.msra.mxu1 %v805_v27  ;;  %v554_v6 = vld [vmem:[#allocation2 + $0x6] sm:$0xff]  ;;  %447 = vst [vmem:[#allocation2 + $0x98] sm:$0xff] %v406_v5  ;;  %468 = vst [vmem:[#allocation2 + $0x140] sm:$0xff] %v427_v8  ;;  %v555_v13 = vld [vmem:[#allocation2 + $0xe] sm:$0xff] }
  0x2a   : > { %985 = vmatprep.subr.mxu0 %v6256_v1  ;;  %6115 = vmatprep.subr.mxu1 %v6256_v1  ;;  %v513_v9 = vld [vmem:[#allocation2 + $0x5] sm:$0xff]  ;;  %v534_v10 = vld [vmem:[#allocation2 + $0xad] sm:$0xff]  ;;  %v576_v15 = vld [vmem:[#allocation2 + $0xb6] sm:$0xff] }
  0x2b   : > { %986 = vmatpush1.msra.mxu0 %v804_v31  ;;  %6147 = vmatpush1.msra.mxu1 %v804_v31  ;;  %v407_v11 = vld [vmem:[%s6350_s21 + $0x88] sm:$0xff]  ;;  %v428_v14 = vld [vmem:[%s6350_s21 + $0x130] sm:$0xff]  ;;  %v851_v16 = vld [vmem:[%s9290_s2 + $0x178] sm:$0xff] }
  0x2c   : > { %987 = vmatprep.subr.mxu0 %v6256_v1  ;;  %6116 = vmatprep.subr.mxu1 %v6256_v1  ;;  %448 = vst [vmem:[#allocation2 + $0xa0] sm:$0xff] %v407_v11  ;;  %469 = vst [vmem:[#allocation2 + $0x148] sm:$0xff] %v428_v14  ;;  %v514_v17 = vld [vmem:[#allocation2 + $0xd] sm:$0xff]  ;;  %v535_v18 = vld [vmem:[#allocation2 + $0xb5] sm:$0xff] }
  0x2d   : > { %988 = vmatpush2.msra.mxu0 %v835_v32  ;;  %6148 = vmatpush2.msra.mxu1 %v835_v32  ;;  %v882_v19 = vld [vmem:[%s9290_s2 + $0x270] sm:$0xff]  ;;  %v577_v22 = vld [vmem:[#allocation2 + $0xbe] sm:$0xff]  ;;  %v881_v23 = vld [vmem:[%s9290_s2 + $0x268] sm:$0xff] }
  0x2e   : > { %989 = vmatprep.subr.mxu0 %v6256_v1  ;;  %6117 = vmatprep.subr.mxu1 %v6256_v1  ;;  %v850_v20 = vld [vmem:[%s9290_s2 + $0x170] sm:$0xff]  ;;  %v536_v24 = vld [vmem:[#allocation2 + $0xbd] sm:$0xff]  ;;  %v849_v26 = vld [vmem:[%s9290_s2 + $0x168] sm:$0xff] }
  0x2f   : > { %990 = vmatpush2.msra.mxu0 %v834_v35  ;;  %6149 = vmatpush2.msra.mxu1 %v834_v35  ;;  %v556_v21 = vld [vmem:[#allocation2 + $0x16] sm:$0xff]  ;;  %v880_v27 = vld [vmem:[%s9290_s2 + $0x260] sm:$0xff]  ;;  %v579_v36 = vld [vmem:[#allocation2 + $0xce] sm:$0xff] }
  0x30   : > { %991 = vmatprep.subr.mxu0 %v6256_v1  ;;  %6118 = vmatprep.subr.mxu1 %v6256_v1  ;;  %v515_v25 = vld [vmem:[#allocation2 + $0x15] sm:$0xff]  ;;  %v557_v28 = vld [vmem:[#allocation2 + $0x1e] sm:$0xff]  ;;  %v578_v29 = vld [vmem:[#allocation2 + $0xc6] sm:$0xff] }
  0x31   : > { %992 = vmatpush2.msra.mxu0 %v833_v38  ;;  %6150 = vmatpush2.msra.mxu1 %v833_v38  ;;  %v848_v30 = vld [vmem:[%s9290_s2 + $0x160] sm:$0xff]  ;;  %v879_v33 = vld [vmem:[%s9290_s2 + $0x258] sm:$0xff]  ;;  %v878_v37 = vld [vmem:[%s9290_s2 + $0x250] sm:$0xff] }
  0x32   : > { %993 = vmatprep.subr.mxu0 %v6256_v1  ;;  %6119 = vmatprep.subr.mxu1 %v6256_v1  ;;  %v516_v31 = vld [vmem:[#allocation2 + $0x1d] sm:$0xff]  ;;  %v537_v32 = vld [vmem:[#allocation2 + $0xc5] sm:$0xff]  ;;  %v538_v38 = vld [vmem:[#allocation2 + $0xcd] sm:$0xff] }
  0x33   : > { %994 = vmatpush2.msra.mxu0 %v832_v39  ;;  %6151 = vmatpush2.msra.mxu1 %v832_v39  ;;  %v847_v34 = vld [vmem:[%s9290_s2 + $0x158] sm:$0xff]  ;;  %v558_v35 = vld [vmem:[#allocation2 + $0x26] sm:$0xff]  ;;  %v846_v40 = vld [vmem:[%s9290_s2 + $0x150] sm:$0xff] }
  0x34   : > { %995 = vmatprep.subr.mxu0 %v6256_v1  ;;  %6120 = vmatprep.subr.mxu1 %v6256_v1  ;;  %v517_v39 = vld [vmem:[#allocation2 + $0x25] sm:$0xff]  ;;  %v559_v43 = vld [vmem:[#allocation2 + $0x2e] sm:$0xff]  ;;  %v580_v44 = vld [vmem:[#allocation2 + $0xd6] sm:$0xff] }
  0x35   : > { %996 = vmatpush2.msra.mxu0 %v831_v42  ;;  %6152 = vmatpush2.msra.mxu1 %v831_v42  ;;  %v877_v41 = vld [vmem:[%s9290_s2 + $0x248] sm:$0xff]  ;;  %v876_v47 = vld [vmem:[%s9290_s2 + $0x240] sm:$0xff]  ;;  %v560_v50 = vld [vmem:[#allocation2 + $0x36] sm:$0xff] }
  0x36   : > { %997 = vmatprep.subr.mxu0 %v6256_v1  ;;  %6121 = vmatprep.subr.mxu1 %v6256_v1  ;;  %v845_v42 = vld [vmem:[%s9290_s2 + $0x148] sm:$0xff]  ;;  %v844_v48 = vld [vmem:[%s9290_s2 + $0x140] sm:$0xff]  ;;  %v874_v55 = vld [vmem:[%s9290_s2 + $0x230] sm:$0xff] }
  0x37   : > { %998 = vmatpush2.msra.mxu0 %v830_v45  ;;  %6153 = vmatpush2.msra.mxu1 %v830_v45  ;;  %v518_v45 = vld [vmem:[#allocation2 + $0x2d] sm:$0xff]  ;;  %v581_v51 = vld [vmem:[#allocation2 + $0xde] sm:$0xff]  ;;  %v543_v11 = vld [vmem:[#allocation2 + $0xf5] sm:$0xff] }
  0x38   : > { %999 = vmatprep.subr.mxu0 %v6256_v1  ;;  %6122 = vmatprep.subr.mxu1 %v6256_v1  ;;  %v540_v54 = vld [vmem:[#allocation2 + $0xdd] sm:$0xff]  ;;  %v841_v61 = vld [vmem:[%s9290_s2 + $0x128] sm:$0xff] }
  0x39   : > { %1000 = vmatpush2.msra.mxu0 %v829_v46  ;;  %6154 = vmatpush2.msra.mxu1 %v829_v46  ;;  %v539_v46 = vld [vmem:[#allocation2 + $0xd5] sm:$0xff]  ;;  %v561_v57 = vld [vmem:[#allocation2 + $0x3e] sm:$0xff]  ;;  %v873_v62 = vld [vmem:[%s9290_s2 + $0x228] sm:$0xff] }
  0x3a   : > { %1001 = vmatprep.subr.mxu0 %v6256_v1  ;;  %6123 = vmatprep.subr.mxu1 %v6256_v1  ;;  %v520_v59 = vld [vmem:[#allocation2 + $0x3d] sm:$0xff]  ;;  %v562_v0 = vld [vmem:[#allocation2 + $0x46] sm:$0xff]  ;;  %v563_v8 = vld [vmem:[#allocation2 + $0x4e] sm:$0xff] }
  0x3b   : > { %1002 = vmatpush2.msra.mxu0 %v828_v49  ;;  %6155 = vmatpush2.msra.mxu1 %v828_v49  ;;  %v875_v49 = vld [vmem:[%s9290_s2 + $0x238] sm:$0xff]  ;;  %v840_v3 = vld [vmem:[%s9290_s2 + $0x120] sm:$0xff]  ;;  %v542_v5 = vld [vmem:[#allocation2 + $0xed] sm:$0xff] }
  0x3c   : > { %1003 = vmatprep.subr.mxu0 %v6256_v1  ;;  %6124 = vmatprep.subr.mxu1 %v6256_v1  ;;  %v837_v14 = vld [vmem:[%s9290_s2 + $0x108] sm:$0xff] }
  0x3d   : > { %1004 = vmatpush2.msra.mxu0 %v827_v52  ;;  %6156 = vmatpush2.msra.mxu1 %v827_v52  ;;  %v843_v52 = vld [vmem:[%s9290_s2 + $0x138] sm:$0xff] }
  0x3e   : > { %1005 = vmatprep.subr.mxu0 %v6256_v1  ;;  %6125 = vmatprep.subr.mxu1 %v6256_v1 }
  0x3f   : > { %1006 = vmatpush2.msra.mxu0 %v826_v53  ;;  %6157 = vmatpush2.msra.mxu1 %v826_v53  ;;  %v519_v53 = vld [vmem:[#allocation2 + $0x35] sm:$0xff] }
  0x40   : > { %1007 = vmatprep.subr.mxu0 %v6256_v1  ;;  %6126 = vmatprep.subr.mxu1 %v6256_v1 }
  0x41   : > { %1008 = vmatpush2.msra.mxu0 %v825_v56  ;;  %6158 = vmatpush2.msra.mxu1 %v825_v56  ;;  %v842_v56 = vld [vmem:[%s9290_s2 + $0x130] sm:$0xff] }
  0x42   : > { %1009 = vmatprep.subr.mxu0 %v6256_v1  ;;  %6127 = vmatprep.subr.mxu1 %v6256_v1 }
  0x43   : > { %1010 = vmatpush2.msra.mxu0 %v824_v58  ;;  %6159 = vmatpush2.msra.mxu1 %v824_v58  ;;  %v582_v58 = vld [vmem:[#allocation2 + $0xe6] sm:$0xff] }
  0x44   : > { %1011 = vmatprep.subr.mxu0 %v6256_v1  ;;  %6128 = vmatprep.subr.mxu1 %v6256_v1 }
  0x45   : > { %1012 = vmatpush2.msra.mxu0 %v823_v60  ;;  %6160 = vmatpush2.msra.mxu1 %v823_v60  ;;  %v541_v60 = vld [vmem:[#allocation2 + $0xe5] sm:$0xff] }
  0x46   : > { %1013 = vmatprep.subr.mxu0 %v6256_v1  ;;  %6129 = vmatprep.subr.mxu1 %v6256_v1 }
  0x47   : > { %1014 = vmatpush2.msra.mxu0 %v822_v63  ;;  %6161 = vmatpush2.msra.mxu1 %v822_v63  ;;  %v872_v63 = vld [vmem:[%s9290_s2 + $0x220] sm:$0xff] }
  0x48   : > { %1015 = vmatprep.subr.mxu0 %v6256_v1  ;;  %6130 = vmatprep.subr.mxu1 %v6256_v1 }
  0x49   : > { %1016 = vmatpush2.msra.mxu0 %v821_v2  ;;  %6162 = vmatpush2.msra.mxu1 %v821_v2  ;;  %v583_v2 = vld [vmem:[#allocation2 + $0xee] sm:$0xff] }
  0x4a   : > { %1017 = vmatprep.subr.mxu0 %v6256_v1  ;;  %6131 = vmatprep.subr.mxu1 %v6256_v1 }
  0x4b   : > { %1018 = vmatpush2.msra.mxu0 %v820_v4  ;;  %6163 = vmatpush2.msra.mxu1 %v820_v4  ;;  %v521_v4 = vld [vmem:[#allocation2 + $0x45] sm:$0xff] }
  0x4c   : > { %1019 = vmatprep.mubr.f32.mxu0 %v554_v6  ;;  %1124 = vmatprep.mubr.f32.mxu1 %v575_v7  ;;  %v839_v6 = vld [vmem:[%s9290_s2 + $0x118] sm:$0xff] }
  0x4d   : > { %1020 = vmatmul.mubr.f32.vlgmr.msra.gmra.mxu0 %v513_v9  ;;  %1125 = vmatmul.mubr.f32.vlgmr.msra.gmra.mxu1 %v534_v10  ;;  %v871_v7 = vld [vmem:[%s9290_s2 + $0x218] sm:$0xff]  ;;  %v522_v10 = vld [vmem:[#allocation2 + $0x4d] sm:$0xff] }
  0x4e   : > { %1495 = vmatprep.subr.mxu0 %v6256_v1  ;;  %1225 = vmatprep.subr.mxu1 %v6256_v1  ;;  %v584_v9 = vld [vmem:[#allocation2 + $0xf6] sm:$0xff] }
  0x4f   : > { %1496 = vmatpush1.msra.mxu0 %v883_v12  ;;  %1024 = vmatprep.mubr.f32.mxu0 %v555_v13  ;;  %v838_v12 = vld [vmem:[%s9290_s2 + $0x110] sm:$0xff] }
  0x50   : > { %1129 = vmatprep.mubr.f32.mxu1 %v576_v15  ;;  %1226 = vmatpush1.msra.mxu1 %v851_v16  ;;  %v870_v13 = vld [vmem:[%s9290_s2 + $0x210] sm:$0xff]  ;;  %v869_v15 = vld [vmem:[%s9290_s2 + $0x208] sm:$0xff] }
  0x51   : > { %1497 = vmatprep.subr.mxu0 %v6256_v1  ;;  %1025 = vmatmul.mubr.f32.gmra.mxu0 %v514_v17  ;;  %v564_v16 = vld [vmem:[#allocation2 + $0x56] sm:$0xff]  ;;  %v585_v17 = vld [vmem:[#allocation2 + $0xfe] sm:$0xff] }
  0x52   : > { %1130 = vmatmul.mubr.f32.gmra.mxu1 %v535_v18  ;;  %1498 = vmatpush1.msra.mxu0 %v882_v19  ;;  %v523_v18 = vld [vmem:[#allocation2 + $0x55] sm:$0xff]  ;;  %v544_v19 = vld [vmem:[#allocation2 + $0xfd] sm:$0xff] }
  0x53   : > { %1227 = vmatprep.subr.mxu1 %v6256_v1  ;;  %1499 = vmatprep.subr.mxu0 %v6256_v1 }
  0x54   : > { %1228 = vmatpush1.msra.mxu1 %v850_v20  ;;  %1029 = vmatprep.mubr.f32.mxu0 %v556_v21  ;;  %v836_v20 = vld [vmem:[%s9290_s2 + $0x100] sm:$0xff] }
  0x55   : > { %1134 = vmatprep.mubr.f32.mxu1 %v577_v22  ;;  %1229 = vmatprep.subr.mxu1 %v6256_v1  ;;  %v868_v21 = vld [vmem:[%s9290_s2 + $0x200] sm:$0xff] }
  0x56   : > { %1500 = vmatpush1.msra.mxu0 %v881_v23  ;;  %1135 = vmatmul.mubr.f32.gmra.mxu1 %v536_v24  ;;  %v565_v22 = vld [vmem:[#allocation2 + $0x5e] sm:$0xff]  ;;  %v586_v23 = vld [vmem:[#allocation2 + $0x106] sm:$0xff] }
  0x57   : > { %1030 = vmatmul.mubr.f32.gmra.mxu0 %v515_v25  ;;  %1230 = vmatpush1.msra.mxu1 %v849_v26  ;;  %v867_v24 = vld [vmem:[%s9290_s2 + $0x1f8] sm:$0xff] }
  0x58   : > { %1501 = vmatprep.subr.mxu0 %v6256_v1  ;;  %1231 = vmatprep.subr.mxu1 %v6256_v1  ;;  %v899_v25 = vld [vmem:[%s9290_s2 + $0x2f8] sm:$0xff] }
  0x59   : > { %1502 = vmatpush1.msra.mxu0 %v880_v27  ;;  %1034 = vmatprep.mubr.f32.mxu0 %v557_v28  ;;  %v524_v26 = vld [vmem:[#allocation2 + $0x5d] sm:$0xff]  ;;  %v545_v27 = vld [vmem:[#allocation2 + $0x105] sm:$0xff]  ;;  %v866_v28 = vld [vmem:[%s9290_s2 + $0x1f0] sm:$0xff] }
  0x5a   : > { %1139 = vmatprep.mubr.f32.mxu1 %v578_v29  ;;  %1232 = vmatpush1.msra.mxu1 %v848_v30  ;;  %v898_v29 = vld [vmem:[%s9290_s2 + $0x2f0] sm:$0xff]  ;;  %v566_v30 = vld [vmem:[#allocation2 + $0x66] sm:$0xff] }
  0x5b   : > { %1503 = vmatprep.subr.mxu0 %v6256_v1  ;;  %1035 = vmatmul.mubr.f32.gmra.mxu0 %v516_v31  ;;  %v587_v31 = vld [vmem:[#allocation2 + $0x10e] sm:$0xff] }
  0x5c   : > { %1140 = vmatmul.mubr.f32.gmra.mxu1 %v537_v32  ;;  %1233 = vmatprep.subr.mxu1 %v6256_v1  ;;  %v525_v32 = vld [vmem:[#allocation2 + $0x65] sm:$0xff] }
  0x5d   : > { %1504 = vmatpush1.msra.mxu0 %v879_v33  ;;  %1234 = vmatpush1.msra.mxu1 %v847_v34  ;;  %v546_v33 = vld [vmem:[#allocation2 + $0x10d] sm:$0xff] }
  0x5e   : > { %1505 = vmatprep.subr.mxu0 %v6256_v1  ;;  %1039 = vmatprep.mubr.f32.mxu0 %v558_v35  ;;  %v865_v34 = vld [vmem:[%s9290_s2 + $0x1e8] sm:$0xff] }
  0x5f   : > { %1144 = vmatprep.mubr.f32.mxu1 %v579_v36  ;;  %1235 = vmatprep.subr.mxu1 %v6256_v1  ;;  %v897_v35 = vld [vmem:[%s9290_s2 + $0x2e8] sm:$0xff] }
  0x60   : > { %1506 = vmatpush1.msra.mxu0 %v878_v37  ;;  %1145 = vmatmul.mubr.f32.gmra.mxu1 %v538_v38  ;;  %v567_v36 = vld [vmem:[#allocation2 + $0x6e] sm:$0xff]  ;;  %v588_v37 = vld [vmem:[#allocation2 + $0x116] sm:$0xff]  ;;  %v864_v38 = vld [vmem:[%s9290_s2 + $0x1e0] sm:$0xff] }
  0x61   : > { %1040 = vmatmul.mubr.f32.gmra.mxu0 %v517_v39  ;;  %1236 = vmatpush1.msra.mxu1 %v846_v40  ;;  %v896_v39 = vld [vmem:[%s9290_s2 + $0x2e0] sm:$0xff]  ;;  %v526_v40 = vld [vmem:[#allocation2 + $0x6d] sm:$0xff] }
  0x62   : > { %1507 = vmatprep.subr.mxu0 %v6256_v1  ;;  %1237 = vmatprep.subr.mxu1 %v6256_v1 }
  0x63   : > { %1508 = vmatpush1.msra.mxu0 %v877_v41  ;;  %1238 = vmatpush1.msra.mxu1 %v845_v42  ;;  %v547_v41 = vld [vmem:[#allocation2 + $0x115] sm:$0xff] }
  0x64   : > { %1044 = vmatprep.mubr.f32.mxu0 %v559_v43  ;;  %1149 = vmatprep.mubr.f32.mxu1 %v580_v44  ;;  %v863_v42 = vld [vmem:[%s9290_s2 + $0x1d8] sm:$0xff] }
  0x65   : > { %1509 = vmatprep.subr.mxu0 %v6256_v1  ;;  %1045 = vmatmul.mubr.f32.gmra.mxu0 %v518_v45  ;;  %v895_v43 = vld [vmem:[%s9290_s2 + $0x2d8] sm:$0xff] }
  0x66   : > { %1150 = vmatmul.mubr.f32.gmra.mxu1 %v539_v46  ;;  %1239 = vmatprep.subr.mxu1 %v6256_v1  ;;  %v568_v44 = vld [vmem:[#allocation2 + $0x76] sm:$0xff]  ;;  %v589_v45 = vld [vmem:[#allocation2 + $0x11e] sm:$0xff] }
  0x67   : > { %1510 = vmatpush1.msra.mxu0 %v876_v47  ;;  %1240 = vmatpush1.msra.mxu1 %v844_v48  ;;  %v527_v46 = vld [vmem:[#allocation2 + $0x75] sm:$0xff]  ;;  %v548_v47 = vld [vmem:[#allocation2 + $0x11d] sm:$0xff] }
  0x68   : > { %1511 = vmatprep.subr.mxu0 %v6256_v1  ;;  %1241 = vmatprep.subr.mxu1 %v6256_v1  ;;  %v862_v48 = vld [vmem:[%s9290_s2 + $0x1d0] sm:$0xff] }
  0x69   : > { %1512 = vmatpush1.msra.mxu0 %v875_v49  ;;  %1049 = vmatprep.mubr.f32.mxu0 %v560_v50  ;;  %v894_v49 = vld [vmem:[%s9290_s2 + $0x2d0] sm:$0xff]  ;;  %v861_v50 = vld [vmem:[%s9290_s2 + $0x1c8] sm:$0xff] }
  0x6a   : > { %1154 = vmatprep.mubr.f32.mxu1 %v581_v51  ;;  %1242 = vmatpush1.msra.mxu1 %v843_v52  ;;  %v569_v51 = vld [vmem:[#allocation2 + $0x7e] sm:$0xff]  ;;  %v590_v52 = vld [vmem:[#allocation2 + $0x126] sm:$0xff] }
  0x6b   : > { %1050 = vmatmul.mubr.f32.gmra.mxu0 %v519_v53  ;;  %1155 = vmatmul.mubr.f32.gmra.mxu1 %v540_v54  ;;  %v893_v53 = vld [vmem:[%s9290_s2 + $0x2c8] sm:$0xff]  ;;  %v528_v54 = vld [vmem:[#allocation2 + $0x7d] sm:$0xff] }
  0x6c   : > { %1513 = vmatprep.subr.mxu0 %v6256_v1  ;;  %1243 = vmatprep.subr.mxu1 %v6256_v1 }
  0x6d   : > { %1514 = vmatpush1.msra.mxu0 %v874_v55  ;;  %1244 = vmatpush1.msra.mxu1 %v842_v56  ;;  %v549_v55 = vld [vmem:[#allocation2 + $0x125] sm:$0xff] }
  0x6e   : > { %1054 = vmatprep.mubr.f32.mxu0 %v561_v57  ;;  %1159 = vmatprep.mubr.f32.mxu1 %v582_v58  ;;  %v860_v56 = vld [vmem:[%s9290_s2 + $0x1c0] sm:$0xff] }
  0x6f   : > { %1245 = vmatprep.subr.mxu1 %v6256_v1  ;;  %1515 = vmatprep.subr.mxu0 %v6256_v1  ;;  %v892_v57 = vld [vmem:[%s9290_s2 + $0x2c0] sm:$0xff] }
  0x70   : > { %1055 = vmatmul.mubr.f32.gmra.mxu0 %v520_v59  ;;  %1160 = vmatmul.mubr.f32.gmra.mxu1 %v541_v60  ;;  %v570_v58 = vld [vmem:[#allocation2 + $0x86] sm:$0xff]  ;;  %v859_v60 = vld [vmem:[%s9290_s2 + $0x1b8] sm:$0xff] }
  0x71   : > { %1246 = vmatpush1.msra.mxu1 %v841_v61  ;;  %1516 = vmatpush1.msra.mxu0 %v873_v62  ;;  %v6718_v59 = vld [vmem:[#allocation2] sm:$0xff]  ;;  %v550_v62 = vld [vmem:[#allocation2 + $0x12d] sm:$0xff] }
  0x72   : > { %1517 = vmatprep.subr.mxu0 %v6256_v1  ;;  %1247 = vmatprep.subr.mxu1 %v6256_v1  ;;  %v529_v61 = vld [vmem:[#allocation2 + $0x85] sm:$0xff] }
  0x73   : > { %1518 = vmatpush1.msra.mxu0 %v872_v63  ;;  %1059 = vmatprep.mubr.f32.mxu0 %v562_v0  ;;  %v891_v63 = vld [vmem:[%s9290_s2 + $0x2b8] sm:$0xff]  ;;  %v858_v0 = vld [vmem:[%s9290_s2 + $0x1b0] sm:$0xff] }
  0x74   : > { %1164 = vmatprep.mubr.f32.mxu1 %v583_v2  ;;  %1248 = vmatpush1.msra.mxu1 %v840_v3  ;;  %v571_v2 = vld [vmem:[#allocation2 + $0x8e] sm:$0xff]  ;;  %v592_v3 = vld [vmem:[#allocation2 + $0x136] sm:$0xff] }
  0x75   : > { %1060 = vmatmul.mubr.f32.gmra.mxu0 %v521_v4  ;;  %1165 = vmatmul.mubr.f32.gmra.mxu1 %v542_v5  ;;  %v890_v4 = vld [vmem:[%s9290_s2 + $0x2b0] sm:$0xff] }
  0x76   : > { %1249 = vmatprep.subr.mxu1 %v6256_v1  ;;  %1519 = vmatprep.subr.mxu0 %v6256_v1  ;;  %v551_v5 = vld [vmem:[#allocation2 + $0x135] sm:$0xff] }
  0x77   : > { %1250 = vmatpush1.msra.mxu1 %v839_v6  ;;  %1520 = vmatpush1.msra.mxu0 %v871_v7  ;;  %v530_v6 = vld [vmem:[#allocation2 + $0x8d] sm:$0xff] }
  0x78   : > { %1064 = vmatprep.mubr.f32.mxu0 %v563_v8  ;;  %1169 = vmatprep.mubr.f32.mxu1 %v584_v9  ;;  %v857_v7 = vld [vmem:[%s9290_s2 + $0x1a8] sm:$0xff]  ;;  %v572_v9 = vld [vmem:[#allocation2 + $0x96] sm:$0xff] }
  0x79   : > { %1251 = vmatprep.subr.mxu1 %v6256_v1  ;;  %1521 = vmatprep.subr.mxu0 %v6256_v1  ;;  %v889_v8 = vld [vmem:[%s9290_s2 + $0x2a8] sm:$0xff] }
  0x7a   : > { %1065 = vmatmul.mubr.f32.gmra.mxu0 %v522_v10  ;;  %1170 = vmatmul.mubr.f32.gmra.mxu1 %v543_v11  ;;  %v593_v10 = vld [vmem:[#allocation2 + $0x13e] sm:$0xff] }
  0x7b   : > { %1252 = vmatpush1.msra.mxu1 %v838_v12  ;;  %1522 = vmatpush1.msra.mxu0 %v870_v13  ;;  %v856_v11 = vld [vmem:[%s9290_s2 + $0x1a0] sm:$0xff]  ;;  %v531_v12 = vld [vmem:[#allocation2 + $0x95] sm:$0xff] }
  0x7c   : > { %1253 = vmatprep.subr.mxu1 %v6256_v1  ;;  %1523 = vmatprep.subr.mxu0 %v6256_v1  ;;  %v552_v13 = vld [vmem:[#allocation2 + $0x13d] sm:$0xff] }
  0x7d   : > { %1254 = vmatpush1.msra.mxu1 %v837_v14  ;;  %1524 = vmatpush1.msra.mxu0 %v869_v15  ;;  %v888_v14 = vld [vmem:[%s9290_s2 + $0x2a0] sm:$0xff]  ;;  %v855_v15 = vld [vmem:[%s9290_s2 + $0x198] sm:$0xff] }
  0x7e   : > { %1069 = vmatprep.mubr.f32.mxu0 %v564_v16  ;;  %1174 = vmatprep.mubr.f32.mxu1 %v585_v17  ;;  %v573_v16 = vld [vmem:[#allocation2 + $0x9e] sm:$0xff]  ;;  %v594_v17 = vld [vmem:[#allocation2 + $0x146] sm:$0xff] }
  0x7f   : > { %1070 = vmatmul.mubr.f32.gmra.mxu0 %v523_v18  ;;  %1175 = vmatmul.mubr.f32.gmra.mxu1 %v544_v19  ;;  %v854_v18 = vld [vmem:[%s9290_s2 + $0x190] sm:$0xff]  ;;  %v887_v19 = vld [vmem:[%s9290_s2 + $0x298] sm:$0xff] }
  0x80   : > { %1255 = vmatprep.subr.mxu1 %v6256_v1  ;;  %1525 = vmatprep.subr.mxu0 %v6256_v1 }
  0x81   : > { %1256 = vmatpush1.msra.mxu1 %v836_v20  ;;  %1526 = vmatpush1.msra.mxu0 %v868_v21  ;;  %v532_v20 = vld [vmem:[#allocation2 + $0x9d] sm:$0xff]  ;;  %v553_v21 = vld [vmem:[#allocation2 + $0x145] sm:$0xff] }
  0x82   : > { %1257 = vmatprep.subr.mxu1 %v6256_v1  ;;  %1527 = vmatprep.subr.mxu0 %v6256_v1 }
  0x83   : > { %1074 = vmatprep.mubr.f32.mxu0 %v565_v22  ;;  %1179 = vmatprep.mubr.f32.mxu1 %v586_v23  ;;  %v853_v22 = vld [vmem:[%s9290_s2 + $0x188] sm:$0xff]  ;;  %v886_v23 = vld [vmem:[%s9290_s2 + $0x290] sm:$0xff] }
  0x84   : > { %1258 = vmatpush2.msra.mxu1 %v867_v24  ;;  %1528 = vmatpush2.msra.mxu0 %v899_v25  ;;  %v574_v24 = vld [vmem:[#allocation2 + $0xa6] sm:$0xff] }
  0x85   : > { %1075 = vmatmul.mubr.f32.gmra.mxu0 %v524_v26  ;;  %1180 = vmatmul.mubr.f32.gmra.mxu1 %v545_v27  ;;  %v852_v25 = vld [vmem:[%s9290_s2 + $0x180] sm:$0xff]  ;;  %v597_v26 = vld [vmem:[#allocation2 + $0x17] sm:$0xff] }
  0x86   : > { %1259 = vmatprep.subr.mxu1 %v6256_v1  ;;  %1529 = vmatprep.subr.mxu0 %v6256_v1  ;;  %v533_v27 = vld [vmem:[#allocation2 + $0xa5] sm:$0xff] }
  0x87   : > { %1260 = vmatpush2.msra.mxu1 %v866_v28  ;;  %1530 = vmatpush2.msra.mxu0 %v898_v29  ;;  %v595_v28 = vld [vmem:[#allocation2 + $0x7] sm:$0xff] }
  0x88   : > { %1079 = vmatprep.mubr.f32.mxu0 %v566_v30  ;;  %1184 = vmatprep.mubr.f32.mxu1 %v587_v31  ;;  %v885_v29 = vld [vmem:[%s9290_s2 + $0x288] sm:$0xff]  ;;  %v598_v30 = vld [vmem:[#allocation2 + $0x1f] sm:$0xff] }
  0x89   : > { %1261 = vmatprep.subr.mxu1 %v6256_v1  ;;  %1080 = vmatmul.mubr.f32.gmra.mxu0 %v525_v32  ;;  %v884_v31 = vld [vmem:[%s9290_s2 + $0x280] sm:$0xff] }
  0x8a   : > { %1185 = vmatmul.mubr.f32.gmra.mxu1 %v546_v33  ;;  %1531 = vmatprep.subr.mxu0 %v6256_v1  ;;  %v679_v32 = vld [vmem:[#allocation2 + $0x19] sm:$0xff] }
  0x8b   : > { %1262 = vmatpush2.msra.mxu1 %v865_v34  ;;  %1532 = vmatpush2.msra.mxu0 %v897_v35  ;;  %v915_v33 = vld [vmem:[%s9290_s2 + $0x378] sm:$0xff]  ;;  %v596_v34 = vld [vmem:[#allocation2 + $0xf] sm:$0xff]  ;;  %v599_v35 = vld [vmem:[#allocation2 + $0x27] sm:$0xff] }
  0x8c   : > { %1263 = vmatprep.subr.mxu1 %v6256_v1  ;;  %1533 = vmatprep.subr.mxu0 %v6256_v1 }
  0x8d   : > { %1084 = vmatprep.mubr.f32.mxu0 %v567_v36  ;;  %1189 = vmatprep.mubr.f32.mxu1 %v588_v37  ;;  %v947_v36 = vld [vmem:[%s9290_s2 + $0x478] sm:$0xff]  ;;  %v680_v37 = vld [vmem:[#allocation2 + $0x21] sm:$0xff] }
  0x8e   : > { %1264 = vmatpush2.msra.mxu1 %v864_v38  ;;  %1534 = vmatpush2.msra.mxu0 %v896_v39  ;;  %v6182_v38 = vld [vmem:[#allocation2 + $0x18] sm:$0xff]  ;;  %v914_v39 = vld [vmem:[%s9290_s2 + $0x370] sm:$0xff] }
  0x8f   : > { %1085 = vmatmul.mubr.f32.gmra.mxu0 %v526_v40  ;;  %1190 = vmatmul.mubr.f32.gmra.mxu1 %v547_v41  ;;  %v600_v40 = vld [vmem:[#allocation2 + $0x2f] sm:$0xff] }
  0x90   : > { %1265 = vmatprep.subr.mxu1 %v6256_v1  ;;  %1535 = vmatprep.subr.mxu0 %v6256_v1  ;;  %v681_v41 = vld [vmem:[#allocation2 + $0x29] sm:$0xff] }
  0x91   : > { %1266 = vmatpush2.msra.mxu1 %v863_v42  ;;  %1536 = vmatpush2.msra.mxu0 %v895_v43  ;;  %v6183_v42 = vld [vmem:[#allocation2 + $0x20] sm:$0xff]  ;;  %v913_v43 = vld [vmem:[%s9290_s2 + $0x368] sm:$0xff] }
  0x92   : > { %1089 = vmatprep.mubr.f32.mxu0 %v568_v44  ;;  %1194 = vmatprep.mubr.f32.mxu1 %v589_v45  ;;  %v946_v44 = vld [vmem:[%s9290_s2 + $0x470] sm:$0xff] }
  0x93   : > { %1267 = vmatprep.subr.mxu1 %v6256_v1  ;;  %1090 = vmatmul.mubr.f32.gmra.mxu0 %v527_v46  ;;  %v601_v45 = vld [vmem:[#allocation2 + $0x37] sm:$0xff] }
  0x94   : > { %1195 = vmatmul.mubr.f32.gmra.mxu1 %v548_v47  ;;  %1537 = vmatprep.subr.mxu0 %v6256_v1  ;;  %v682_v46 = vld [vmem:[#allocation2 + $0x31] sm:$0xff]  ;;  %v6184_v47 = vld [vmem:[#allocation2 + $0x28] sm:$0xff] }
  0x95   : > { %1268 = vmatpush2.msra.mxu1 %v862_v48  ;;  %1538 = vmatpush2.msra.mxu0 %v894_v49  ;;  %v912_v48 = vld [vmem:[%s9290_s2 + $0x360] sm:$0xff]  ;;  %v945_v49 = vld [vmem:[%s9290_s2 + $0x468] sm:$0xff] }
  0x96   : > { %1269 = vmatprep.subr.mxu1 %v6256_v1  ;;  %1539 = vmatprep.subr.mxu0 %v6256_v1  ;;  %v591_v1 = vld [vmem:[#allocation2 + $0x12e] sm:$0xff] }
  0x97   : > { %1270 = vmatpush2.msra.mxu1 %v861_v50  ;;  %1094 = vmatprep.mubr.f32.mxu0 %v569_v51  ;;  %v602_v50 = vld [vmem:[#allocation2 + $0x3f] sm:$0xff] }
  0x98   : > { %1199 = vmatprep.mubr.f32.mxu1 %v590_v52  ;;  %1540 = vmatpush2.msra.mxu0 %v893_v53  ;;  %v683_v51 = vld [vmem:[#allocation2 + $0x39] sm:$0xff]  ;;  %v6185_v52 = vld [vmem:[#allocation2 + $0x30] sm:$0xff] }
  0x99   : > { %1095 = vmatmul.mubr.f32.gmra.mxu0 %v528_v54  ;;  %1200 = vmatmul.mubr.f32.gmra.mxu1 %v549_v55  ;;  %v911_v53 = vld [vmem:[%s9290_s2 + $0x358] sm:$0xff]  ;;  %v944_v54 = vld [vmem:[%s9290_s2 + $0x460] sm:$0xff] }
  0x9a   : > { %1271 = vmatprep.subr.mxu1 %v6718_v59  ;;  %1541 = vmatprep.subr.mxu0 %v6718_v59  ;;  %v603_v55 = vld [vmem:[#allocation2 + $0x47] sm:$0xff] }
  0x9b   : > { %1272 = vmatpush2.msra.mxu1 %v860_v56  ;;  %1542 = vmatpush2.msra.mxu0 %v892_v57  ;;  %v684_v56 = vld [vmem:[#allocation2 + $0x41] sm:$0xff]  ;;  %v6823_v57 = vld [vmem:[%s6350_s21 + $0x138] sm:$0xff] }
  0x9c   : > { %1273 = vmatprep.subr.mxu1 %v6718_v59  ;;  %1099 = vmatprep.mubr.f32.mxu0 %v570_v58  ;;  %470 = vst [vmem:[#allocation2 + $0x150] sm:$0xff] %v6823_v57  ;;  %v6186_v58 = vld [vmem:[#allocation2 + $0x38] sm:$0xff] }
  0x9d   : > { %1204 = vmatprep.mubr.f32.mxu1 %v591_v1  ;;  %1274 = vmatpush2.msra.mxu1 %v859_v60  ;;  %v910_v1 = vld [vmem:[%s9290_s2 + $0x350] sm:$0xff]  ;;  %v943_v60 = vld [vmem:[%s9290_s2 + $0x458] sm:$0xff] }
  0x9e   : > { %1543 = vmatprep.subr.mxu0 %v6718_v59  ;;  %1100 = vmatmul.mubr.f32.gmra.mxu0 %v529_v61  ;;  %v604_v61 = vld [vmem:[#allocation2 + $0x4f] sm:$0xff] }
  0x9f   : > { %1205 = vmatmul.mubr.f32.gmra.mxu1 %v550_v62  ;;  %1544 = vmatpush2.msra.mxu0 %v891_v63  ;;  %v685_v62 = vld [vmem:[#allocation2 + $0x49] sm:$0xff]  ;;  %v6835_v63 = vld [vmem:[%s6350_s21 + $0x140] sm:$0xff]  ;;  %s9242_s21 = scalar_lea.vmem %s9295_s7, %s6339_s16 }
  0xa0   : > { %1275 = vmatprep.subr.mxu1 %v6718_v59  ;;  %1545 = vmatprep.subr.mxu0 %v6718_v59  ;;  %471 = vst [vmem:[#allocation2 + $0x158] sm:$0xff] %v6835_v63 }
  0xa1   : > { %1276 = vmatpush2.msra.mxu1 %v858_v0  ;;  %1104 = vmatprep.mubr.f32.mxu0 %v571_v2  ;;  %v6187_v0 = vld [vmem:[#allocation2 + $0x40] sm:$0xff]  ;;  %v909_v2 = vld [vmem:[%s9290_s2 + $0x348] sm:$0xff] }
  0xa2   : > { %1209 = vmatprep.mubr.f32.mxu1 %v592_v3  ;;  %1277 = vmatprep.subr.mxu1 %v6718_v59  ;;  %v942_v3 = vld [vmem:[%s9290_s2 + $0x450] sm:$0xff] }
  0xa3   : > { %1546 = vmatpush2.msra.mxu0 %v890_v4  ;;  %1210 = vmatmul.mubr.f32.gmra.mxu1 %v551_v5  ;;  %v605_v4 = vld [vmem:[#allocation2 + $0x57] sm:$0xff] }
  0xa4   : > { %1105 = vmatmul.mubr.f32.gmra.mxu0 %v530_v6  ;;  %1278 = vmatpush2.msra.mxu1 %v857_v7  ;;  %v686_v5 = vld [vmem:[#allocation2 + $0x51] sm:$0xff]  ;;  %v6188_v6 = vld [vmem:[#allocation2 + $0x48] sm:$0xff]  ;;  %v908_v7 = vld [vmem:[%s9290_s2 + $0x340] sm:$0xff] }
  0xa5   : > { %1547 = vmatprep.subr.mxu0 %v6718_v59  ;;  %1279 = vmatprep.subr.mxu1 %v6718_v59 }
  0xa6   : > { %1548 = vmatpush2.msra.mxu0 %v889_v8  ;;  %1109 = vmatprep.mubr.f32.mxu0 %v572_v9  ;;  %v941_v8 = vld [vmem:[%s9290_s2 + $0x448] sm:$0xff]  ;;  %v606_v9 = vld [vmem:[#allocation2 + $0x5f] sm:$0xff] }
  0xa7   : > { %1214 = vmatprep.mubr.f32.mxu1 %v593_v10  ;;  %1280 = vmatpush2.msra.mxu1 %v856_v11  ;;  %v687_v10 = vld [vmem:[#allocation2 + $0x59] sm:$0xff]  ;;  %v6189_v11 = vld [vmem:[#allocation2 + $0x50] sm:$0xff] }
  0xa8   : > { %1549 = vmatprep.subr.mxu0 %v6718_v59  ;;  %1110 = vmatmul.mubr.f32.gmra.mxu0 %v531_v12  ;;  %v907_v12 = vld [vmem:[%s9290_s2 + $0x338] sm:$0xff] }
  0xa9   : > { %1215 = vmatmul.mubr.f32.gmra.mxu1 %v552_v13  ;;  %1281 = vmatprep.subr.mxu1 %v6718_v59  ;;  %v940_v13 = vld [vmem:[%s9290_s2 + $0x440] sm:$0xff] }
  0xaa   : > { %1550 = vmatpush2.msra.mxu0 %v888_v14  ;;  %1282 = vmatpush2.msra.mxu1 %v855_v15  ;;  %v607_v14 = vld [vmem:[#allocation2 + $0x67] sm:$0xff] }
  0xab   : > { %1283 = vmatprep.subr.mxu1 %v6718_v59  ;;  %1551 = vmatprep.subr.mxu0 %v6718_v59  ;;  %v688_v15 = vld [vmem:[#allocation2 + $0x61] sm:$0xff] }
  0xac   : > { %1114 = vmatprep.mubr.f32.mxu0 %v573_v16  ;;  %1219 = vmatprep.mubr.f32.mxu1 %v594_v17  ;;  %v6190_v16 = vld [vmem:[#allocation2 + $0x58] sm:$0xff]  ;;  %v906_v17 = vld [vmem:[%s9290_s2 + $0x330] sm:$0xff] }
  0xad   : > { %1284 = vmatpush2.msra.mxu1 %v854_v18  ;;  %1552 = vmatpush2.msra.mxu0 %v887_v19  ;;  %v939_v18 = vld [vmem:[%s9290_s2 + $0x438] sm:$0xff]  ;;  %v608_v19 = vld [vmem:[#allocation2 + $0x6f] sm:$0xff] }
  0xae   : > { %1115 = vmatmul.mubr.f32.gmra.mxu0 %v532_v20  ;;  %1220 = vmatmul.mubr.f32.gmra.mxu1 %v553_v21  ;;  %v689_v20 = vld [vmem:[#allocation2 + $0x69] sm:$0xff]  ;;  %v6191_v21 = vld [vmem:[#allocation2 + $0x60] sm:$0xff] }
  0xaf   : > { %1285 = vmatprep.subr.mxu1 %v6718_v59  ;;  %1553 = vmatprep.subr.mxu0 %v6718_v59 }
  0xb0   : > { %1286 = vmatpush2.msra.mxu1 %v853_v22  ;;  %1554 = vmatpush2.msra.mxu0 %v886_v23  ;;  %v905_v22 = vld [vmem:[%s9290_s2 + $0x328] sm:$0xff]  ;;  %v938_v23 = vld [vmem:[%s9290_s2 + $0x430] sm:$0xff] }
  0xb1   : > { %1287 = vmatprep.subr.mxu1 %v6718_v59  ;;  %1119 = vmatprep.mubr.f32.mxu0 %v574_v24  ;;  %v609_v24 = vld [vmem:[#allocation2 + $0x77] sm:$0xff] }
  0xb2   : > { %1288 = vmatpush2.msra.mxu1 %v852_v25  ;;  %1289 = vmatprep.mubr.f32.mxu1 %v597_v26  ;;  %v690_v25 = vld [vmem:[#allocation2 + $0x71] sm:$0xff] }
  0xb3   : > { %1555 = vmatprep.subr.mxu0 %v6718_v59  ;;  %1120 = vmatmul.mubr.f32.gmra.mxu0 %v533_v27  ;;  %v904_v27 = vld [vmem:[%s9290_s2 + $0x320] sm:$0xff] }
  0xb4   : > { %1290 = vmatmul.mubr.f32.vlgmr.msra.gmra.mxu1 %v595_v28  ;;  %1556 = vmatpush2.msra.mxu0 %v885_v29  ;;  %v937_v28 = vld [vmem:[%s9290_s2 + $0x428] sm:$0xff]  ;;  %v610_v29 = vld [vmem:[#allocation2 + $0x7f] sm:$0xff] }
  0xb5   : > { %1557 = vmatprep.subr.mxu0 %v6718_v59  ;;  %1765 = vmatprep.subr.mxu1 %v6718_v59 }
  0xb6   : > { %1294 = vmatprep.mubr.f32.mxu1 %v598_v30  ;;  %1558 = vmatpush2.msra.mxu0 %v884_v31  ;;  %v6193_v31 = vld [vmem:[#allocation2 + $0x70] sm:$0xff] }
  0xb7   : > { %1559 = vmatprep.mubr.f32.mxu0 %v679_v32  ;;  %1766 = vmatpush1.msra.mxu1 %v915_v33  ;;  %v903_v32 = vld [vmem:[%s9290_s2 + $0x318] sm:$0xff]  ;;  %v936_v33 = vld [vmem:[%s9290_s2 + $0x420] sm:$0xff] }
  0xb8   : > { %1295 = vmatmul.mubr.f32.gmra.mxu1 %v596_v34  ;;  %1560 = vmatmul.mubr.f32.vlgmr.msra.gmra.mxu0 %v6182_v38  ;;  %v611_v34 = vld [vmem:[#allocation2 + $0x87] sm:$0xff]  ;;  %v935_v38 = vld [vmem:[%s9290_s2 + $0x418] sm:$0xff] }
  0xb9   : > { %5635 = vmatprep.subr.mxu0 %v6718_v59  ;;  %1299 = vmatprep.mubr.f32.mxu1 %v599_v35 }
  0xba   : > { %5636 = vmatpush3.msra.mxu0 %v947_v36  ;;  %1564 = vmatprep.mubr.f32.mxu0 %v680_v37  ;;  %v6194_v36 = vld [vmem:[#allocation2 + $0x78] sm:$0xff]  ;;  %v902_v37 = vld [vmem:[%s9290_s2 + $0x310] sm:$0xff] }
  0xbb   : > { %1767 = vmatprep.subr.mxu1 %v6718_v59  ;;  %5637 = vmatprep.subr.mxu0 %v6718_v59 }
  0xbc   : > { %1300 = vmatmul.mubr.f32.gmra.mxu1 %v597_v26  ;;  %1565 = vmatmul.mubr.f32.gmra.mxu0 %v6183_v42  ;;  %v6192_v26 = vld [vmem:[#allocation2 + $0x68] sm:$0xff] }
  0xbd   : > { %1768 = vmatpush1.msra.mxu1 %v914_v39  ;;  %1304 = vmatprep.mubr.f32.mxu1 %v600_v40  ;;  %v612_v39 = vld [vmem:[#allocation2 + $0x8f] sm:$0xff] }
  0xbe   : > { %1569 = vmatprep.mubr.f32.mxu0 %v681_v41  ;;  %1769 = vmatprep.subr.mxu1 %v6718_v59  ;;  %v6195_v41 = vld [vmem:[#allocation2 + $0x80] sm:$0xff]  ;;  %v901_v42 = vld [vmem:[%s9290_s2 + $0x308] sm:$0xff] }
  0xbf   : > { %1770 = vmatpush1.msra.mxu1 %v913_v43  ;;  %5638 = vmatpush3.msra.mxu0 %v946_v44  ;;  %v934_v43 = vld [vmem:[%s9290_s2 + $0x410] sm:$0xff] }
  0xc0   : > { %1305 = vmatmul.mubr.f32.gmra.mxu1 %v598_v30  ;;  %1570 = vmatmul.mubr.f32.gmra.mxu0 %v6184_v47  ;;  %v691_v30 = vld [vmem:[#allocation2 + $0x79] sm:$0xff] }
  0xc1   : > { %1309 = vmatprep.mubr.f32.mxu1 %v601_v45  ;;  %1574 = vmatprep.mubr.f32.mxu0 %v682_v46  ;;  %v613_v44 = vld [vmem:[#allocation2 + $0x97] sm:$0xff]  ;;  %v6196_v46 = vld [vmem:[#allocation2 + $0x88] sm:$0xff]  ;;  %v900_v47 = vld [vmem:[%s9290_s2 + $0x300] sm:$0xff] }
  0xc2   : > { %1771 = vmatprep.subr.mxu1 %v6718_v59  ;;  %5639 = vmatprep.subr.mxu0 %v6718_v59 }
  0xc3   : > { %1772 = vmatpush1.msra.mxu1 %v912_v48  ;;  %5640 = vmatpush3.msra.mxu0 %v945_v49  ;;  %v933_v48 = vld [vmem:[%s9290_s2 + $0x408] sm:$0xff]  ;;  %v614_v49 = vld [vmem:[#allocation2 + $0x9f] sm:$0xff] }
  0xc4   : > { %1310 = vmatmul.mubr.f32.gmra.mxu1 %v599_v35  ;;  %1575 = vmatmul.mubr.f32.gmra.mxu0 %v6185_v52  ;;  %v692_v35 = vld [vmem:[#allocation2 + $0x81] sm:$0xff]  ;;  %v931_v52 = vld [vmem:[%s9290_s2 + $0x3f8] sm:$0xff] }
  0xc5   : > { %1314 = vmatprep.mubr.f32.mxu1 %v602_v50  ;;  %1579 = vmatprep.mubr.f32.mxu0 %v683_v51  ;;  %v6197_v51 = vld [vmem:[#allocation2 + $0x90] sm:$0xff] }
  0xc6   : > { %1773 = vmatprep.subr.mxu1 %v6718_v59  ;;  %5641 = vmatprep.subr.mxu0 %v6718_v59 }
  0xc7   : > { %1774 = vmatpush1.msra.mxu1 %v911_v53  ;;  %5642 = vmatpush3.msra.mxu0 %v944_v54  ;;  %v932_v53 = vld [vmem:[%s9290_s2 + $0x400] sm:$0xff] }
  0xc8   : > { %1315 = vmatmul.mubr.f32.gmra.mxu1 %v600_v40  ;;  %1580 = vmatmul.mubr.f32.gmra.mxu0 %v6186_v58  ;;  %v693_v40 = vld [vmem:[#allocation2 + $0x89] sm:$0xff] }
  0xc9   : > { %1319 = vmatprep.mubr.f32.mxu1 %v603_v55  ;;  %1584 = vmatprep.mubr.f32.mxu0 %v684_v56  ;;  %v615_v54 = vld [vmem:[#allocation2 + $0xa7] sm:$0xff]  ;;  %v6198_v56 = vld [vmem:[#allocation2 + $0x98] sm:$0xff]  ;;  %v930_v58 = vld [vmem:[%s9290_s2 + $0x3f0] sm:$0xff] }
  0xca   : > { %1775 = vmatprep.subr.mxu1 %v6718_v59  ;;  %5643 = vmatprep.subr.mxu0 %v6718_v59 }
  0xcb   : > { %1776 = vmatpush1.msra.mxu1 %v910_v1  ;;  %5644 = vmatpush3.msra.mxu0 %v943_v60  ;;  %v472_v1 = vld [vmem:[%s9289_s1] sm:$0xff]  ;;  %v616_v60 = vld [vmem:[#allocation2 + $0xaf] sm:$0xff] }
  0xcc   : > { %1320 = vmatmul.mubr.f32.gmra.mxu1 %v601_v45  ;;  %1585 = vmatmul.mubr.f32.gmra.mxu0 %v6187_v0  ;;  %v694_v45 = vld [vmem:[#allocation2 + $0x91] sm:$0xff]  ;;  %v6199_v0 = vld [vmem:[#allocation2 + $0xa0] sm:$0xff] }
  0xcd   : > { %1324 = vmatprep.mubr.f32.mxu1 %v604_v61  ;;  %1589 = vmatprep.mubr.f32.mxu0 %v685_v62  ;;  %v6257_v62 = vmov 0  }
  0xce   : > { %1777 = vmatprep.subr.mxu1 %v6718_v59  ;;  %5645 = vmatprep.subr.mxu0 %v6718_v59 }
  0xcf   : > { %1778 = vmatpush1.msra.mxu1 %v909_v2  ;;  %5646 = vmatpush3.msra.mxu0 %v942_v3  ;;  %v929_v2 = vld [vmem:[%s9290_s2 + $0x3e8] sm:$0xff] }
  0xd0   : > { %1325 = vmatmul.mubr.f32.gmra.mxu1 %v602_v50  ;;  %1590 = vmatmul.mubr.f32.gmra.mxu0 %v6188_v6  ;;  %v695_v50 = vld [vmem:[#allocation2 + $0x99] sm:$0xff]  ;;  %v473_v3 = vld [vmem:[%s9289_s1 + $0x8] sm:$0xff]  ;;  %v698_v6 = vld [vmem:[#allocation2 + $0xb1] sm:$0xff] }
  0xd1   : > { %1329 = vmatprep.mubr.f32.mxu1 %v605_v4  ;;  %1594 = vmatprep.mubr.f32.mxu0 %v686_v5  ;;  %v617_v5 = vld [vmem:[#allocation2 + $0xb7] sm:$0xff] }
  0xd2   : > { %1779 = vmatprep.subr.mxu1 %v6718_v59  ;;  %5647 = vmatprep.subr.mxu0 %v6718_v59 }
  0xd3   : > { %1780 = vmatpush1.msra.mxu1 %v908_v7  ;;  %5648 = vmatpush3.msra.mxu0 %v941_v8  ;;  %v474_v7 = vld [vmem:[%s9289_s1 + $0x10] sm:$0xff]  ;;  %v928_v8 = vld [vmem:[%s9290_s2 + $0x3e0] sm:$0xff] }
  0xd4   : > { %1330 = vmatmul.mubr.f32.gmra.mxu1 %v603_v55  ;;  %1595 = vmatmul.mubr.f32.gmra.mxu0 %v6189_v11  ;;  %v696_v55 = vld [vmem:[#allocation2 + $0xa1] sm:$0xff] }
  0xd5   : > { %1334 = vmatprep.mubr.f32.mxu1 %v606_v9  ;;  %1599 = vmatprep.mubr.f32.mxu0 %v687_v10  ;;  %v657_v10 = vld [vmem:[#allocation2 + $0xb0] sm:$0xff]  ;;  %v618_v11 = vld [vmem:[#allocation2 + $0xbf] sm:$0xff] }
  0xd6   : > { %1781 = vmatprep.subr.mxu1 %v6718_v59  ;;  %5649 = vmatprep.subr.mxu0 %v6718_v59 }
  0xd7   : > { %1782 = vmatpush1.msra.mxu1 %v907_v12  ;;  %5650 = vmatpush3.msra.mxu0 %v940_v13  ;;  %v699_v12 = vld [vmem:[#allocation2 + $0xb9] sm:$0xff] }
  0xd8   : > { %1335 = vmatmul.mubr.f32.gmra.mxu1 %v604_v61  ;;  %1600 = vmatmul.mubr.f32.gmra.mxu0 %v6190_v16  ;;  %v697_v61 = vld [vmem:[#allocation2 + $0xa9] sm:$0xff]  ;;  %v475_v13 = vld [vmem:[%s9289_s1 + $0x18] sm:$0xff] }
  0xd9   : > { %1339 = vmatprep.mubr.f32.mxu1 %v607_v14  ;;  %1604 = vmatprep.mubr.f32.mxu0 %v688_v15  ;;  %v478_v15 = vld [vmem:[%s9289_s1 + $0x30] sm:$0xff]  ;;  %v658_v16 = vld [vmem:[#allocation2 + $0xb8] sm:$0xff] }
  0xda   : > { %1783 = vmatprep.subr.mxu1 %v6718_v59  ;;  %5651 = vmatprep.subr.mxu0 %v6718_v59 }
  0xdb   : > { %1784 = vmatpush1.msra.mxu1 %v906_v17  ;;  %5652 = vmatpush3.msra.mxu0 %v939_v18  ;;  %v619_v17 = vld [vmem:[#allocation2 + $0xc7] sm:$0xff] }
  0xdc   : > { %1340 = vmatmul.mubr.f32.gmra.mxu1 %v605_v4  ;;  %1605 = vmatmul.mubr.f32.gmra.mxu0 %v6191_v21  ;;  %v656_v4 = vld [vmem:[#allocation2 + $0xa8] sm:$0xff]  ;;  %v480_v21 = vld [vmem:[%s9289_s1 + $0x40] sm:$0xff] }
  0xdd   : > { %1344 = vmatprep.mubr.f32.mxu1 %v608_v19  ;;  %1609 = vmatprep.mubr.f32.mxu0 %v689_v20  ;;  %v700_v18 = vld [vmem:[#allocation2 + $0xc1] sm:$0xff]  ;;  %v926_v20 = vld [vmem:[%s9290_s2 + $0x3d0] sm:$0xff] }
  0xde   : > { %1785 = vmatprep.subr.mxu1 %v6718_v59  ;;  %5653 = vmatprep.subr.mxu0 %v6718_v59 }
  0xdf   : > { %1786 = vmatpush1.msra.mxu1 %v905_v22  ;;  %5654 = vmatpush3.msra.mxu0 %v938_v23  ;;  %v659_v22 = vld [vmem:[#allocation2 + $0xc0] sm:$0xff]  ;;  %v620_v23 = vld [vmem:[#allocation2 + $0xcf] sm:$0xff] }
  0xe0   : > { %1345 = vmatmul.mubr.f32.gmra.mxu1 %v606_v9  ;;  %1610 = vmatmul.mubr.f32.gmra.mxu0 %v6192_v26  ;;  %v476_v9 = vld [vmem:[%s9289_s1 + $0x20] sm:$0xff]  ;;  %v925_v26 = vld [vmem:[%s9290_s2 + $0x3c8] sm:$0xff] }
  0xe1   : > { %1349 = vmatprep.mubr.f32.mxu1 %v609_v24  ;;  %1614 = vmatprep.mubr.f32.mxu0 %v690_v25  ;;  %v479_v25 = vld [vmem:[%s9289_s1 + $0x38] sm:$0xff] }
  0xe2   : > { %1787 = vmatprep.subr.mxu1 %v6718_v59  ;;  %5655 = vmatprep.subr.mxu0 %v6718_v59 }
  0xe3   : > { %1788 = vmatpush1.msra.mxu1 %v904_v27  ;;  %5656 = vmatpush3.msra.mxu0 %v937_v28  ;;  %v482_v27 = vld [vmem:[%s9289_s1 + $0x50] sm:$0xff]  ;;  %v660_v28 = vld [vmem:[#allocation2 + $0xc8] sm:$0xff] }
  0xe4   : > { %1350 = vmatmul.mubr.f32.gmra.mxu1 %v607_v14  ;;  %1615 = vmatmul.mubr.f32.gmra.mxu0 %v6193_v31  ;;  %v927_v14 = vld [vmem:[%s9290_s2 + $0x3d8] sm:$0xff] }
  0xe5   : > { %1354 = vmatprep.mubr.f32.mxu1 %v610_v29  ;;  %1619 = vmatprep.mubr.f32.mxu0 %v691_v30  ;;  %v621_v31 = vld [vmem:[#allocation2 + $0xd7] sm:$0xff] }
  0xe6   : > { %1789 = vmatprep.subr.mxu1 %v6718_v59  ;;  %5657 = vmatprep.subr.mxu0 %v6718_v59 }
  0xe7   : > { %1790 = vmatpush1.msra.mxu1 %v903_v32  ;;  %5658 = vmatpush3.msra.mxu0 %v936_v33  ;;  %v702_v32 = vld [vmem:[#allocation2 + $0xd1] sm:$0xff] }
  0xe8   : > { %1355 = vmatmul.mubr.f32.gmra.mxu1 %v608_v19  ;;  %1620 = vmatmul.mubr.f32.gmra.mxu0 %v6194_v36  ;;  %v477_v19 = vld [vmem:[%s9289_s1 + $0x28] sm:$0xff]  ;;  %v924_v36 = vld [vmem:[%s9290_s2 + $0x3c0] sm:$0xff] }
  0xe9   : > { %1359 = vmatprep.mubr.f32.mxu1 %v611_v34  ;;  %1624 = vmatprep.mubr.f32.mxu0 %v692_v35  ;;  %v481_v35 = vld [vmem:[%s9289_s1 + $0x48] sm:$0xff] }
  0xea   : > { %1791 = vmatprep.subr.mxu1 %v6718_v59  ;;  %5659 = vmatprep.subr.mxu0 %v6718_v59 }
  0xeb   : > { %1792 = vmatpush1.msra.mxu1 %v902_v37  ;;  %5660 = vmatpush3.msra.mxu0 %v935_v38  ;;  %v484_v37 = vld [vmem:[%s9289_s1 + $0x60] sm:$0xff]  ;;  %v661_v38 = vld [vmem:[#allocation2 + $0xd0] sm:$0xff] }
  0xec   : > { %1360 = vmatmul.mubr.f32.gmra.mxu1 %v609_v24  ;;  %1625 = vmatmul.mubr.f32.gmra.mxu0 %v6195_v41  ;;  %v701_v24 = vld [vmem:[#allocation2 + $0xc9] sm:$0xff]  ;;  %v703_v41 = vld [vmem:[#allocation2 + $0xd9] sm:$0xff] }
  0xed   : > { %1364 = vmatprep.mubr.f32.mxu1 %v612_v39  ;;  %1629 = vmatprep.mubr.f32.mxu0 %v693_v40  ;;  %v622_v40 = vld [vmem:[#allocation2 + $0xdf] sm:$0xff] }
  0xee   : > { %1793 = vmatprep.subr.mxu1 %v6718_v59  ;;  %5661 = vmatprep.subr.mxu0 %v6718_v59 }
  0xef   : > { %1794 = vmatpush1.msra.mxu1 %v901_v42  ;;  %5662 = vmatpush3.msra.mxu0 %v934_v43 }
  0xf0   : > { %1365 = vmatmul.mubr.f32.gmra.mxu1 %v610_v29  ;;  %1630 = vmatmul.mubr.f32.gmra.mxu0 %v6196_v46  ;;  %v923_v46 = vld [vmem:[%s9290_s2 + $0x3b8] sm:$0xff] }
  0xf1   : > { %1369 = vmatprep.mubr.f32.mxu1 %v613_v44  ;;  %1634 = vmatprep.mubr.f32.mxu0 %v694_v45 }
  0xf2   : > { %1795 = vmatprep.subr.mxu1 %v6718_v59  ;;  %5663 = vmatprep.subr.mxu0 %v6718_v59 }
  0xf3   : > { %1796 = vmatpush1.msra.mxu1 %v900_v47  ;;  %5664 = vmatpush3.msra.mxu0 %v933_v48  ;;  %v486_v47 = vld [vmem:[%s9289_s1 + $0x70] sm:$0xff]  ;;  %v662_v48 = vld [vmem:[#allocation2 + $0xd8] sm:$0xff] }
  0xf4   : > { %1370 = vmatmul.mubr.f32.gmra.mxu1 %v611_v34  ;;  %1635 = vmatmul.mubr.f32.gmra.mxu0 %v6197_v51 }
  0xf5   : > { %1374 = vmatprep.mubr.f32.mxu1 %v614_v49  ;;  %1639 = vmatprep.mubr.f32.mxu0 %v695_v50  ;;  %v704_v50 = vld [vmem:[#allocation2 + $0xe1] sm:$0xff] }
  0xf6   : > { %1797 = vmatprep.subr.mxu1 %v6718_v59  ;;  %5665 = vmatprep.subr.mxu0 %v6718_v59 }
  0xf7   : > { %1798 = vmatpush2.msra.mxu1 %v931_v52  ;;  %5666 = vmatpush3.msra.mxu0 %v932_v53  ;;  %v485_v53 = vld [vmem:[%s9289_s1 + $0x68] sm:$0xff] }
  0xf8   : > { %1375 = vmatmul.mubr.f32.gmra.mxu1 %v612_v39  ;;  %1640 = vmatmul.mubr.f32.gmra.mxu0 %v6198_v56  ;;  %v488_v56 = vld [vmem:[%s9289_s1 + $0x80] sm:$0xff] }
  0xf9   : > { %1379 = vmatprep.mubr.f32.mxu1 %v615_v54  ;;  %1644 = vmatprep.mubr.f32.mxu0 %v696_v55  ;;  %v922_v55 = vld [vmem:[%s9290_s2 + $0x3b0] sm:$0xff] }
  0xfa   : > { %1799 = vmatprep.subr.mxu1 %v6718_v59  ;;  %6175 = vset.pattern.permute.xlu0 %v6257_v62 }
  0xfb   : > { %1800 = vmatpush2.msra.mxu1 %v930_v58  ;;  %2430 = vperm.xlu0 %6175, %v472_v1   ;;  %v663_v58 = vld [vmem:[#allocation2 + $0xe0] sm:$0xff] }
  0xfc   : > { %1380 = vmatmul.mubr.f32.gmra.mxu1 %v613_v44  ;;  %1645 = vmatmul.mubr.f32.gmra.mxu0 %v6199_v0  ;;  %v483_v44 = vld [vmem:[%s9289_s1 + $0x58] sm:$0xff] }
  0xfd   : > { %1384 = vmatprep.mubr.f32.mxu1 %v616_v60  ;;  %1649 = vmatprep.mubr.f32.mxu0 %v697_v61  ;;  %v705_v61 = vld [vmem:[#allocation2 + $0xe9] sm:$0xff]  ;;  %v487_v0 = vld [vmem:[%s9289_s1 + $0x78] sm:$0xff] }
  0xfe   : > { %1801 = vmatprep.subr.mxu1 %v6718_v59  ;;  %6176 = vset.pattern.permute.xlu1 %v6257_v62 }
  0xff   : > { %1802 = vmatpush2.msra.mxu1 %v929_v2  ;;  %2435 = vperm.xlu0 %6175, %v473_v3   ;;  %v921_v3 = vld [vmem:[%s9290_s2 + $0x3a8] sm:$0xff] }
 0x100   : > { %1385 = vmatmul.mubr.f32.gmra.mxu1 %v614_v49  ;;  %1650 = vmatmul.mubr.f32.gmra.mxu0 %v656_v4  ;;  %v623_v49 = vld [vmem:[#allocation2 + $0xe7] sm:$0xff]  ;;  %v490_v4 = vld [vmem:[%s9289_s1 + $0x90] sm:$0xff] }
 0x101   : > { %1389 = vmatprep.mubr.f32.mxu1 %v617_v5  ;;  %1654 = vmatprep.mubr.f32.mxu0 %v698_v6 }
 0x102   : > { %1803 = vmatprep.subr.mxu1 %v6718_v59  ;;  %2440 = vperm.xlu1 %6176, %v474_v7   ;;  %v625_v7 = vld [vmem:[#allocation2 + $0xf7] sm:$0xff] }
 0x103   : > { %1804 = vmatpush2.msra.mxu1 %v928_v8  ;;  %2450 = vperm.xlu0 %6175, %v476_v9   ;;  %v706_v8 = vld [vmem:[#allocation2 + $0xf1] sm:$0xff] }
 0x104   : > { %1390 = vmatmul.mubr.f32.gmra.mxu1 %v615_v54  ;;  %1655 = vmatmul.mubr.f32.gmra.mxu0 %v657_v10  ;;  %v489_v10 = vld [vmem:[%s9289_s1 + $0x88] sm:$0xff] }
 0x105   : > { %1394 = vmatprep.mubr.f32.mxu1 %v618_v11  ;;  %1659 = vmatprep.mubr.f32.mxu0 %v699_v12  ;;  %v920_v12 = vld [vmem:[%s9290_s2 + $0x3a0] sm:$0xff] }
 0x106   : > { %1805 = vmatprep.subr.mxu1 %v6718_v59  ;;  %2445 = vperm.xlu1 %6176, %v475_v13   ;;  %v492_v13 = vld [vmem:[%s9289_s1 + $0xa0] sm:$0xff] }
 0x107   : > { %1806 = vmatpush2.msra.mxu1 %v927_v14  ;;  %2460 = vperm.xlu0 %6175, %v478_v15   ;;  %v665_v14 = vld [vmem:[#allocation2 + $0xf0] sm:$0xff] }
 0x108   : > { %1395 = vmatmul.mubr.f32.gmra.mxu1 %v616_v60  ;;  %1660 = vmatmul.mubr.f32.gmra.mxu0 %v658_v16  ;;  %v624_v60 = vld [vmem:[#allocation2 + $0xef] sm:$0xff]  ;;  %v626_v16 = vld [vmem:[#allocation2 + $0xff] sm:$0xff] }
 0x109   : > { %1399 = vmatprep.mubr.f32.mxu1 %v619_v17  ;;  %1664 = vmatprep.mubr.f32.mxu0 %v700_v18 }
 0x10a   : > { %1807 = vmatprep.subr.mxu1 %v6718_v59  ;;  %2455 = vperm.xlu1 %6176, %v477_v19  }
 0x10b   : > { %1808 = vmatpush2.msra.mxu1 %v926_v20  ;;  %2470 = vperm.xlu0 %6175, %v480_v21   ;;  %v491_v20 = vld [vmem:[%s9289_s1 + $0x98] sm:$0xff] }
 0x10c   : > { %1400 = vmatmul.mubr.f32.gmra.mxu1 %v617_v5  ;;  %1665 = vmatmul.mubr.f32.gmra.mxu0 %v659_v22  ;;  %v664_v5 = vld [vmem:[#allocation2 + $0xe8] sm:$0xff]  ;;  %v919_v21 = vld [vmem:[%s9290_s2 + $0x398] sm:$0xff]  ;;  %v494_v22 = vld [vmem:[%s9289_s1 + $0xb0] sm:$0xff] }
 0x10d   : > { %1404 = vmatprep.mubr.f32.mxu1 %v620_v23  ;;  %1669 = vmatprep.mubr.f32.mxu0 %v701_v24  ;;  %v6979_v29 = vpop.f32.mrf.mxu0  ;;  %v6981_v30 = vpop.f32.mrf.mxu1 }
 0x10e   : > { %1809 = vmatprep.subr.mxu1 %v6718_v59  ;;  %2465 = vperm.xlu1 %6176, %v479_v25   ;;  %v627_v25 = vld [vmem:[#allocation2 + $0x107] sm:$0xff] }
 0x10f   : > { %v1023_v33 = vpop.f32.mrf.mxu0  ;;  %v1128_v34 = vpop.f32.mrf.mxu1  ;;  %1810 = vmatpush2.msra.mxu1 %v925_v26  ;;  %2480 = vperm.xlu0 %6175, %v482_v27   ;;  %v708_v26 = vld [vmem:[#allocation2 + $0x101] sm:$0xff] }
 0x110   : > { %1405 = vmatmul.mubr.f32.gmra.mxu1 %v618_v11  ;;  %1670 = vmatmul.mubr.f32.gmra.mxu0 %v660_v28  ;;  %v918_v33 = vld [vmem:[%s9290_s2 + $0x390] sm:$0xff]  ;;  %v496_v34 = vld [vmem:[%s9289_s1 + $0xc0] sm:$0xff] }
 0x111   : > { %1409 = vmatprep.mubr.f32.mxu1 %v621_v31  ;;  %1674 = vmatprep.mubr.f32.mxu0 %v702_v32  ;;  %v6993_v39 = vpop.f32.mrf.mxu0 }
 0x112   : > { %v6995_v42 = vpop.f32.mrf.mxu1  ;;  %1811 = vmatprep.subr.mxu1 %v6718_v59  ;;  %2475 = vperm.xlu1 %6176, %v481_v35   ;;  %v667_v35 = vld [vmem:[#allocation2 + $0x100] sm:$0xff] }
 0x113   : > { %v1028_v43 = vpop.f32.mrf.mxu0  ;;  %1812 = vmatpush2.msra.mxu1 %v924_v36  ;;  %2490 = vperm.xlu0 %6175, %v484_v37   ;;  %v628_v36 = vld [vmem:[#allocation2 + $0x10f] sm:$0xff] }
 0x114   : > { %1410 = vmatmul.mubr.f32.gmra.mxu1 %v619_v17  ;;  %1675 = vmatmul.mubr.f32.gmra.mxu0 %v661_v38  ;;  %v1133_v45 = vpop.f32.mrf.mxu1  ;;  %v707_v17 = vld [vmem:[#allocation2 + $0xf9] sm:$0xff]  ;;  %v709_v37 = vld [vmem:[#allocation2 + $0x109] sm:$0xff] }
 0x115   : > { %1414 = vmatprep.mubr.f32.mxu1 %v622_v40  ;;  %1679 = vmatprep.mubr.f32.mxu0 %v703_v41  ;;  %v495_v41 = vld [vmem:[%s9289_s1 + $0xb8] sm:$0xff]  ;;  %v917_v43 = vld [vmem:[%s9290_s2 + $0x388] sm:$0xff] }
 0x116   : > { %v7007_v51 = vpop.f32.mrf.mxu1  ;;  %1813 = vmatprep.subr.mxu1 %v6718_v59  ;;  %2485 = vperm.xlu1 %6176, %v483_v44   ;;  %v668_v44 = vld [vmem:[#allocation2 + $0x108] sm:$0xff] }
 0x117   : > { %v7010_v52 = vpop.f32.mrf.mxu0  ;;  %1814 = vmatpush2.msra.mxu1 %v923_v46  ;;  %2500 = vperm.xlu0 %6175, %v486_v47   ;;  %v629_v47 = vld [vmem:[#allocation2 + $0x117] sm:$0xff] }
 0x118   : > { %1415 = vmatmul.mubr.f32.gmra.mxu1 %v620_v23  ;;  %1680 = vmatmul.mubr.f32.gmra.mxu0 %v662_v48  ;;  %v1138_v54 = vpop.f32.mrf.mxu1  ;;  %v666_v23 = vld [vmem:[#allocation2 + $0xf8] sm:$0xff] }
 0x119   : > { %1419 = vmatprep.mubr.f32.mxu1 %v623_v49  ;;  %1684 = vmatprep.mubr.f32.mxu0 %v704_v50  ;;  %v1033_v1 = vpop.f32.mrf.mxu0  ;;  %v710_v48 = vld [vmem:[#allocation2 + $0x111] sm:$0xff]  ;;  %v497_v50 = vld [vmem:[%s9289_s1 + $0xc8] sm:$0xff] }
 0x11a   : > { %1815 = vmatprep.subr.mxu1 %v6718_v59  ;;  %2495 = vperm.xlu1 %6176, %v485_v53   ;;  %v630_v1 = vld [vmem:[#allocation2 + $0x11f] sm:$0xff] }
 0x11b   : > { %v7022_v62 = vpop.f32.mrf.mxu0  ;;  %1816 = vmatpush2.msra.mxu1 %v922_v55  ;;  %2510 = vperm.xlu0 %6175, %v488_v56   ;;  %v916_v55 = vld [vmem:[%s9290_s2 + $0x380] sm:$0xff] }
 0x11c   : > { %1420 = vmatmul.mubr.f32.gmra.mxu1 %v621_v31  ;;  %1685 = vmatmul.mubr.f32.gmra.mxu0 %v663_v58  ;;  %v7027_v2 = vpop.f32.mrf.mxu1  ;;  %v493_v31 = vld [vmem:[%s9289_s1 + $0xa8] sm:$0xff]  ;;  %v500_v56 = vld [vmem:[%s9289_s1 + $0xe0] sm:$0xff]  ;;  %v669_v58 = vld [vmem:[#allocation2 + $0x110] sm:$0xff] }
 0x11d   : > { %1424 = vmatprep.mubr.f32.mxu1 %v624_v60  ;;  %1689 = vmatprep.mubr.f32.mxu0 %v705_v61  ;;  %v1038_v6 = vpop.f32.mrf.mxu0 }
 0x11e   : > { %v1143_v9 = vpop.f32.mrf.mxu1  ;;  %1817 = vmatprep.subr.mxu1 %v6718_v59  ;;  %2505 = vperm.xlu1 %6176, %v487_v0  }
 0x11f   : > { %1818 = vmatpush2.msra.mxu1 %v921_v3  ;;  %2520 = vperm.xlu0 %6175, %v490_v4   ;;  %v499_v3 = vld [vmem:[%s9289_s1 + $0xd8] sm:$0xff]  ;;  %v502_v4 = vld [vmem:[%s9289_s1 + $0xf0] sm:$0xff]  ;;  %v712_v9 = vld [vmem:[#allocation2 + $0x121] sm:$0xff] }
 0x120   : > { %1425 = vmatmul.mubr.f32.gmra.mxu1 %v622_v40  ;;  %1690 = vmatmul.mubr.f32.gmra.mxu0 %v664_v5  ;;  %v7039_v11 = vpop.f32.mrf.mxu1  ;;  %v670_v5 = vld [vmem:[#allocation2 + $0x118] sm:$0xff] }
 0x121   : > { %1429 = vmatprep.mubr.f32.mxu1 %v625_v7  ;;  %1694 = vmatprep.mubr.f32.mxu0 %v706_v8  ;;  %v7047_v15 = vpop.f32.mrf.mxu0  ;;  %v631_v8 = vld [vmem:[#allocation2 + $0x127] sm:$0xff] }
 0x122   : > { %v1148_v18 = vpop.f32.mrf.mxu1  ;;  %1819 = vmatprep.subr.mxu1 %v6718_v59  ;;  %2515 = vperm.xlu1 %6176, %v489_v10  }
 0x123   : > { %v1043_v19 = vpop.f32.mrf.mxu0  ;;  %1820 = vmatpush2.msra.mxu1 %v920_v12  ;;  %2530 = vperm.xlu0 %6175, %v492_v13   ;;  %v501_v13 = vld [vmem:[%s9289_s1 + $0xe8] sm:$0xff] }
 0x124   : > { %1430 = vmatmul.mubr.f32.gmra.mxu1 %v623_v49  ;;  %1695 = vmatmul.mubr.f32.gmra.mxu0 %v665_v14  ;;  %v7087_v49 = vld [vmem:[#allocation2] sm:$0xff]  ;;  %v713_v18 = vld [vmem:[#allocation2 + $0x129] sm:$0xff] }
 0x125   : > { %1434 = vmatprep.mubr.f32.mxu1 %v626_v16  ;;  %1699 = vmatprep.mubr.f32.mxu0 %v707_v17  ;;  %v7059_v24 = vpop.f32.mrf.mxu0  ;;  %v504_v14 = vld [vmem:[%s9289_s1 + $0x100] sm:$0xff]  ;;  %v632_v17 = vld [vmem:[#allocation2 + $0x12f] sm:$0xff] }
 0x126   : > { %v7061_v27 = vpop.f32.mrf.mxu1  ;;  %1821 = vmatprep.subr.mxu1 %v6718_v59  ;;  %2525 = vperm.xlu1 %6176, %v491_v20  }
 0x127   : > { %v1048_v28 = vpop.f32.mrf.mxu0  ;;  %1822 = vmatpush2.msra.mxu1 %v919_v21  ;;  %2540 = vperm.xlu0 %6175, %v494_v22   ;;  %v503_v21 = vld [vmem:[%s9289_s1 + $0xf8] sm:$0xff] }
 0x128   : > { %1435 = vmatmul.mubr.f32.gmra.mxu1 %v624_v60  ;;  %1700 = vmatmul.mubr.f32.gmra.mxu0 %v666_v23  ;;  %v1153_v32 = vpop.f32.mrf.mxu1  ;;  %v711_v60 = vld [vmem:[#allocation2 + $0x119] sm:$0xff] }
 0x129   : > { %1439 = vmatprep.mubr.f32.mxu1 %v627_v25  ;;  %1704 = vmatprep.mubr.f32.mxu0 %v708_v26  ;;  %v672_v26 = vld [vmem:[#allocation2 + $0x128] sm:$0xff]  ;;  %v633_v28 = vld [vmem:[#allocation2 + $0x137] sm:$0xff] }
 0x12a   : > { %1823 = vmatprep.subr.mxu1 %v6718_v59  ;;  %2535 = vperm.xlu1 %6176, %v493_v31   ;;  %v498_v59 = vld [vmem:[%s9289_s1 + $0xd0] sm:$0xff] }
 0x12b   : > { %v7074_v38 = vpop.f32.mrf.mxu0  ;;  %v7076_v40 = vpop.f32.mrf.mxu1  ;;  %1824 = vmatpush2.msra.mxu1 %v918_v33  ;;  %2550 = vperm.xlu0 %6175, %v496_v34   ;;  %v714_v31 = vld [vmem:[#allocation2 + $0x131] sm:$0xff]  ;;  %v505_v34 = vld [vmem:[%s9289_s1 + $0x108] sm:$0xff] }
 0x12c   : > { %1440 = vmatmul.mubr.f32.gmra.mxu1 %v625_v7  ;;  %1705 = vmatmul.mubr.f32.gmra.mxu0 %v667_v35  ;;  %v508_v35 = vld [vmem:[%s9289_s1 + $0x120] sm:$0xff] }
 0x12d   : > { %1444 = vmatprep.mubr.f32.mxu1 %v628_v36  ;;  %1709 = vmatprep.mubr.f32.mxu0 %v709_v37  ;;  %v1053_v45 = vpop.f32.mrf.mxu0  ;;  %v1158_v46 = vpop.f32.mrf.mxu1 }
 0x12e   : > { %1825 = vmatprep.subr.mxu1 %v7087_v49  ;;  %2545 = vperm.xlu1 %6176, %v495_v41   ;;  %v510_v45 = vld [vmem:[%s9289_s1 + $0x130] sm:$0xff]  ;;  %v674_v46 = vld [vmem:[#allocation2 + $0x138] sm:$0xff] }
 0x12f   : > { %1826 = vmatpush2.msra.mxu1 %v917_v43  ;;  %2560 = vperm.xlu0 %6175, %v498_v59   ;;  %v634_v43 = vld [vmem:[#allocation2 + $0x13f] sm:$0xff] }
 0x130   : > { %1445 = vmatmul.mubr.f32.gmra.mxu1 %v626_v16  ;;  %1710 = vmatmul.mubr.f32.gmra.mxu0 %v668_v44  ;;  %v7093_v53 = vpop.f32.mrf.mxu0  ;;  %v7095_v54 = vpop.f32.mrf.mxu1  ;;  %v671_v16 = vld [vmem:[#allocation2 + $0x120] sm:$0xff]  ;;  %v507_v44 = vld [vmem:[%s9289_s1 + $0x118] sm:$0xff] }
 0x131   : > { %1449 = vmatprep.mubr.f32.mxu1 %v629_v47  ;;  %1714 = vmatprep.mubr.f32.mxu0 %v710_v48  ;;  %v715_v59 = vld [vmem:[#allocation2 + $0x139] sm:$0xff] }
 0x132   : > { %v1058_v61 = vpop.f32.mrf.mxu0  ;;  %v1163_v0 = vpop.f32.mrf.mxu1  ;;  %1827 = vmatprep.subr.mxu1 %v7087_v49  ;;  %2555 = vperm.xlu1 %6176, %v497_v50   ;;  %v635_v50 = vld [vmem:[#allocation2 + $0x147] sm:$0xff] }
 0x133   : > { %1828 = vmatpush2.msra.mxu1 %v916_v55  ;;  %2570 = vperm.xlu0 %6175, %v500_v56   ;;  %v716_v55 = vld [vmem:[#allocation2 + $0x141] sm:$0xff] }
 0x134   : > { %1450 = vmatmul.mubr.f32.gmra.mxu1 %v627_v25  ;;  %1715 = vmatmul.mubr.f32.gmra.mxu0 %v669_v58  ;;  %v506_v25 = vld [vmem:[%s9289_s1 + $0x110] sm:$0xff]  ;;  %v675_v61 = vld [vmem:[#allocation2 + $0x140] sm:$0xff] }
 0x135   : > { %1454 = vmatprep.mubr.f32.mxu1 %v630_v1  ;;  %1719 = vmatprep.mubr.f32.mxu0 %v711_v60  ;;  %v7110_v6 = vpop.f32.mrf.mxu0  ;;  %v7112_v7 = vpop.f32.mrf.mxu1  ;;  %v512_v60 = vld [vmem:[%s9289_s1 + $0x140] sm:$0xff] }
 0x136   : > { %3157 = vmatprep.subr.mxu1 %v7087_v49  ;;  %2565 = vperm.xlu1 %6176, %v499_v3   ;;  %v636_v3 = vld [vmem:[#allocation2 + $0x14f] sm:$0xff] }
 0x137   : > { %v1063_v10 = vpop.f32.mrf.mxu0  ;;  %v1168_v12 = vpop.f32.mrf.mxu1  ;;  %2580 = vperm.xlu0 %6175, %v502_v4   ;;  %3427 = vmatprep.subr.mxu0 %v7087_v49  ;;  %v717_v4 = vld [vmem:[#allocation2 + $0x149] sm:$0xff] }
 0x138   : > { %1455 = vmatmul.mubr.f32.gmra.mxu1 %v628_v36  ;;  %1720 = vmatmul.mubr.f32.gmra.mxu0 %v670_v5  ;;  %v673_v36 = vld [vmem:[#allocation2 + $0x130] sm:$0xff]  ;;  %v676_v12 = vld [vmem:[#allocation2 + $0x148] sm:$0xff] }
 0x139   : > { %1459 = vmatprep.mubr.f32.mxu1 %v631_v8  ;;  %1724 = vmatprep.mubr.f32.mxu0 %v712_v9  ;;  %v511_v9 = vld [vmem:[%s9289_s1 + $0x138] sm:$0xff] }
 0x13a   : > { %v7122_v19 = vpop.f32.mrf.mxu0  ;;  %v7124_v20 = vpop.f32.mrf.mxu1  ;;  %2575 = vperm.xlu1 %6176, %v501_v13   ;;  %v637_v13 = vld [vmem:[#allocation2 + $0x157] sm:$0xff] }
 0x13b   : > { %2590 = vperm.xlu0 %6175, %v504_v14   ;;  %v718_v14 = vld [vmem:[#allocation2 + $0x151] sm:$0xff] }
 0x13c   : > { %1460 = vmatmul.mubr.f32.gmra.mxu1 %v629_v47  ;;  %1725 = vmatmul.mubr.f32.gmra.mxu0 %v671_v16  ;;  %v1068_v22 = vpop.f32.mrf.mxu0  ;;  %v1173_v23 = vpop.f32.mrf.mxu1 }
 0x13d   : > { %1464 = vmatprep.mubr.f32.mxu1 %v632_v17  ;;  %1729 = vmatprep.mubr.f32.mxu0 %v713_v18  ;;  %v719_v22 = vld [vmem:[#allocation2 + $0x159] sm:$0xff]  ;;  %v722_v23 = vld [vmem:[#allocation2 + $0x2a] sm:$0xff] }
 0x13e   : > { %2585 = vperm.xlu1 %6176, %v503_v21  }
 0x13f   : > { %v7132_v32 = vpop.f32.mrf.mxu0  ;;  %v7134_v33 = vpop.f32.mrf.mxu1  ;;  %2600 = vperm.xlu0 %6175, %v506_v25  }
 0x140   : > { %1465 = vmatmul.mubr.f32.gmra.mxu1 %v630_v1  ;;  %1730 = vmatmul.mubr.f32.gmra.mxu0 %v672_v26  ;;  %v509_v1 = vld [vmem:[%s9289_s1 + $0x128] sm:$0xff] }
 0x141   : > { %1469 = vmatprep.mubr.f32.mxu1 %v633_v28  ;;  %1734 = vmatprep.mubr.f32.mxu0 %v714_v31  ;;  %v1073_v37 = vpop.f32.mrf.mxu0  ;;  %v1178_v41 = vpop.f32.mrf.mxu1  ;;  %v723_v31 = vld [vmem:[#allocation2 + $0x32] sm:$0xff] }
 0x142   : > { %2595 = vperm.xlu1 %6176, %v505_v34  }
 0x143   : > { %2610 = vperm.xlu0 %6175, %v508_v35   ;;  %v3021_v35 = vld [vmem:[%s9292_s4 + $0x78] sm:$0xff] }
 0x144   : > { %1470 = vmatmul.mubr.f32.gmra.mxu1 %v631_v8  ;;  %1735 = vmatmul.mubr.f32.gmra.mxu0 %v673_v36  ;;  %v6201_v36 = vld [vmem:[#allocation2 + $0x29] sm:$0xff] }
 0x145   : > { %1474 = vmatprep.mubr.f32.mxu1 %v634_v43  ;;  %1739 = vmatprep.mubr.f32.mxu0 %v715_v59  ;;  %v7148_v47 = vpop.f32.mrf.mxu0  ;;  %v7150_v48 = vpop.f32.mrf.mxu1 }
 0x146   : > { %2605 = vperm.xlu1 %6176, %v507_v44  }
 0x147   : > { %v1078_v56 = vpop.f32.mrf.mxu0  ;;  %v1183_v58 = vpop.f32.mrf.mxu1  ;;  %2620 = vperm.xlu0 %6175, %v510_v45   ;;  %v6202_v45 = vld [vmem:[#allocation2 + $0x31] sm:$0xff] }
 0x148   : > { %1475 = vmatmul.mubr.f32.gmra.mxu1 %v632_v17  ;;  %1740 = vmatmul.mubr.f32.gmra.mxu0 %v674_v46  ;;  %v764_v46 = vld [vmem:[#allocation2 + $0x33] sm:$0xff]  ;;  %v3019_v58 = vld [vmem:[%s9292_s4 + $0x68] sm:$0xff] }
 0x149   : > { %1479 = vmatprep.mubr.f32.mxu1 %v635_v50  ;;  %1744 = vmatprep.mubr.f32.mxu0 %v716_v55  ;;  %v7158_v0 = vpop.f32.mrf.mxu0 }
 0x14a   : > { %v7160_v5 = vpop.f32.mrf.mxu1  ;;  %2615 = vperm.xlu1 %6176, %v509_v1   ;;  %v6203_v1 = vld [vmem:[#allocation2 + $0x39] sm:$0xff] }
 0x14b   : > { %v1083_v8 = vpop.f32.mrf.mxu0  ;;  %2630 = vperm.xlu0 %6175, %v512_v60  }
 0x14c   : > { %1480 = vmatmul.mubr.f32.gmra.mxu1 %v633_v28  ;;  %1745 = vmatmul.mubr.f32.gmra.mxu0 %v675_v61  ;;  %v1188_v10 = vpop.f32.mrf.mxu1  ;;  %v765_v61 = vld [vmem:[#allocation2 + $0x3b] sm:$0xff] }
 0x14d   : > { %1484 = vmatprep.mubr.f32.mxu1 %v636_v3  ;;  %1749 = vmatprep.mubr.f32.mxu0 %v717_v4  ;;  %v726_v4 = vld [vmem:[#allocation2 + $0x4a] sm:$0xff]  ;;  %v6204_v10 = vld [vmem:[#allocation2 + $0x41] sm:$0xff] }
 0x14e   : > { %2625 = vperm.xlu1 %6176, %v511_v9   ;;  %v3018_v9 = vld [vmem:[%s9292_s4 + $0x60] sm:$0xff] }
 0x14f   : > { %v7165_v16 = vpop.f32.mrf.mxu0  ;;  %v7167_v17 = vpop.f32.mrf.mxu1 }
 0x150   : > { %1485 = vmatmul.mubr.f32.gmra.mxu1 %v634_v43  ;;  %1750 = vmatmul.mubr.f32.gmra.mxu0 %v676_v12  ;;  %v724_v43 = vld [vmem:[#allocation2 + $0x3a] sm:$0xff] }
 0x151   : > { %1489 = vmatprep.mubr.f32.mxu1 %v637_v13  ;;  %1754 = vmatprep.mubr.f32.mxu0 %v718_v14  ;;  %v1088_v18 = vpop.f32.mrf.mxu0  ;;  %v1193_v21 = vpop.f32.mrf.mxu1  ;;  %v766_v13 = vld [vmem:[#allocation2 + $0x43] sm:$0xff] }
 0x152   : > { %v727_v21 = vld [vmem:[#allocation2 + $0x52] sm:$0xff] }
 0x153   : > { %v7169_v25 = vpop.f32.mrf.mxu0 }
 0x154   : > { %1490 = vmatmul.mubr.f32.gmra.mxu1 %v635_v50  ;;  %1755 = vmatmul.mubr.f32.gmra.mxu0 %v6823_v57  ;;  %v7172_v26 = vpop.f32.mrf.mxu1  ;;  %v763_v57 = vld [vmem:[#allocation2 + $0x2b] sm:$0xff]  ;;  %v725_v50 = vld [vmem:[#allocation2 + $0x42] sm:$0xff] }
 0x155   : > { %1759 = vmatprep.mubr.f32.mxu0 %v719_v22  ;;  %1829 = vmatprep.mubr.f32.mxu1 %v722_v23  ;;  %v1093_v28 = vpop.f32.mrf.mxu0  ;;  %v3017_v22 = vld [vmem:[%s9292_s4 + $0x58] sm:$0xff]  ;;  %v6205_v23 = vld [vmem:[#allocation2 + $0x49] sm:$0xff] }
 0x156   : > { %v1198_v34 = vpop.f32.mrf.mxu1 }
 0x157   : > { %v767_v34 = vld [vmem:[#allocation2 + $0x4b] sm:$0xff] }
 0x158   : > { %1760 = vmatmul.mubr.f32.gmra.mxu0 %v6835_v63  ;;  %1830 = vmatmul.mubr.f32.vlgmr.msra.gmra.mxu1 %v6201_v36  ;;  %v3020_v63 = vld [vmem:[%s9292_s4 + $0x70] sm:$0xff]  ;;  %v728_v36 = vld [vmem:[#allocation2 + $0x5a] sm:$0xff] }
 0x159   : > { %1834 = vmatprep.mubr.f32.mxu1 %v723_v31  ;;  %5667 = vmatprep.mubr.msk.f32.mxu0 %vm6258_vm0, %v7087_v49  ;;  %v7180_v37 = vpop.f32.mrf.mxu0  ;;  %v7182_v41 = vpop.f32.mrf.mxu1 }
 0x15a   : > { %3158 = vmatpush1.msra.mxu1 %v3021_v35 }
 0x15b   : > { %v1098_v59 = vpop.f32.mrf.mxu0  ;;  %v1203_v44 = vpop.f32.mrf.mxu1  ;;  %3159 = vmatprep.subr.mxu1 %v7087_v49 }
 0x15c   : > { %1835 = vmatmul.mubr.f32.gmra.mxu1 %v6202_v45  ;;  %5668 = vmatmul.mubr.f32.vlgmr.msra.gmra.mxu0 %v763_v57  ;;  %v6206_v59 = vld [vmem:[#allocation2 + $0x51] sm:$0xff] }
 0x15d   : > { %1839 = vmatprep.mubr.f32.mxu1 %v724_v43  ;;  %5670 = vmatprep.mubr.msk.f32.mxu0 %vm6258_vm0, %v7087_v49  ;;  %v3016_v43 = vld [vmem:[%s9292_s4 + $0x50] sm:$0xff] }
 0x15e   : > { %v7190_v55 = vpop.f32.mrf.mxu0  ;;  %3160 = vmatpush1.msra.mxu1 %v3020_v63  ;;  %v768_v44 = vld [vmem:[#allocation2 + $0x53] sm:$0xff] }
 0x15f   : > { %v7192_v56 = vpop.f32.mrf.mxu1  ;;  %3161 = vmatprep.subr.mxu1 %v7087_v49  ;;  %v3053_v63 = vld [vmem:[%s9292_s4 + $0x178] sm:$0xff] }
 0x160   : > { %1840 = vmatmul.mubr.f32.gmra.mxu1 %v6203_v1  ;;  %5671 = vmatmul.mubr.f32.gmra.mxu0 %v764_v46  ;;  %v1103_v60 = vpop.f32.mrf.mxu0  ;;  %v3052_v1 = vld [vmem:[%s9292_s4 + $0x170] sm:$0xff] }
 0x161   : > { %1844 = vmatprep.mubr.f32.mxu1 %v725_v50  ;;  %5673 = vmatprep.mubr.msk.f32.mxu0 %vm6258_vm0, %v7087_v49  ;;  %v1208_v3 = vpop.f32.mrf.mxu1  ;;  %v729_v50 = vld [vmem:[#allocation2 + $0x62] sm:$0xff]  ;;  %v7244_v60 = vld [vmem:[%s9291_s3] ss:$0 sm:$0xff] }
 0x162   : > { %3162 = vmatpush1.msra.mxu1 %v3019_v58  ;;  %3428 = vmatpush1.msra.mxu0 %v3053_v63  ;;  %v3015_v58 = vld [vmem:[%s9292_s4 + $0x48] sm:$0xff] }
 0x163   : > { %v7200_v8 = vpop.f32.mrf.mxu1  ;;  %3163 = vmatprep.subr.mxu1 %v7087_v49  ;;  %3429 = vmatprep.subr.mxu0 %v7087_v49 }
 0x164   : > { %1845 = vmatmul.mubr.f32.gmra.mxu1 %v6204_v10  ;;  %5674 = vmatmul.mubr.f32.gmra.mxu0 %v765_v61  ;;  %v7206_v12 = vpop.f32.mrf.mxu0  ;;  %v6207_v61 = vld [vmem:[#allocation2 + $0x59] sm:$0xff]  ;;  %v730_v10 = vld [vmem:[#allocation2 + $0x6a] sm:$0xff] }
 0x165   : > { %1849 = vmatprep.mubr.f32.mxu1 %v726_v4  ;;  %5676 = vmatprep.mubr.msk.f32.mxu0 %vm6258_vm0, %v7087_v49  ;;  %v1213_v14 = vpop.f32.mrf.mxu1 }
 0x166   : > { %v1108_v18 = vpop.f32.mrf.mxu0  ;;  %3164 = vmatpush1.msra.mxu1 %v3018_v9  ;;  %v769_v9 = vld [vmem:[#allocation2 + $0x5b] sm:$0xff]  ;;  %3430 = vmatpush1.msra.mxu0 %v3052_v1 }
 0x167   : > { %3165 = vmatprep.subr.mxu1 %v7087_v49  ;;  %v3014_v18 = vld [vmem:[%s9292_s4 + $0x40] sm:$0xff]  ;;  %3431 = vmatprep.subr.mxu0 %v7087_v49 }
 0x168   : > { %1850 = vmatmul.mubr.f32.gmra.mxu1 %v6205_v23  ;;  %5677 = vmatmul.mubr.f32.gmra.mxu0 %v766_v13  ;;  %v7214_v28 = vpop.f32.mrf.mxu0  ;;  %v1022_v13 = vadd.f32 %v7244_v60, %v6979_v29  ;;  %v6208_v23 = vld [vmem:[#allocation2 + $0x61] sm:$0xff] }
 0x169   : > { %1854 = vmatprep.mubr.f32.mxu1 %v727_v21  ;;  %5679 = vmatprep.mubr.msk.f32.mxu0 %vm6258_vm0, %v7087_v49  ;;  %v7218_v31 = vpop.f32.mrf.mxu1  ;;  %v3051_v21 = vld [vmem:[%s9292_s4 + $0x168] sm:$0xff] }
 0x16a   : > { %v1113_v35 = vpop.f32.mrf.mxu0  ;;  %3166 = vmatpush1.msra.mxu1 %v3017_v22  ;;  %3432 = vmatpush1.msra.mxu0 %v3051_v21 }
 0x16b   : > { %v1218_v57 = vpop.f32.mrf.mxu1  ;;  %3167 = vmatprep.subr.mxu1 %v7087_v49  ;;  %v770_v35 = vld [vmem:[#allocation2 + $0x63] sm:$0xff]  ;;  %3433 = vmatprep.subr.mxu0 %v7087_v49 }
 0x16c   : > { %1855 = vmatmul.mubr.f32.gmra.mxu1 %v6206_v59  ;;  %5680 = vmatmul.mubr.f32.gmra.mxu0 %v767_v34  ;;  %v731_v57 = vld [vmem:[#allocation2 + $0x72] sm:$0xff] }
 0x16d   : > { %1859 = vmatprep.mubr.f32.mxu1 %v728_v36  ;;  %5682 = vmatprep.mubr.msk.f32.mxu0 %vm6258_vm0, %v7087_v49  ;;  %v3013_v59 = vld [vmem:[%s9292_s4 + $0x38] sm:$0xff] }
 0x16e   : > { %v7229_v45 = vpop.f32.mrf.mxu0  ;;  %v7231_v46 = vpop.f32.mrf.mxu1  ;;  %3168 = vmatpush1.msra.mxu1 %v3016_v43  ;;  %v1027_v43 = vadd.f32 %v7244_v60, %v6993_v39  ;;  %v771_v39 = vld [vmem:[#allocation2 + $0x6b] sm:$0xff] }
 0x16f   : > { %3169 = vmatprep.subr.mxu1 %v7087_v49 }
 0x170   : > { %1860 = vmatmul.mubr.f32.gmra.mxu1 %v6207_v61  ;;  %5683 = vmatmul.mubr.f32.gmra.mxu0 %v768_v44  ;;  %v1118_v3 = vpop.f32.mrf.mxu0  ;;  %v1223_v4 = vpop.f32.mrf.mxu1  ;;  %v3050_v44 = vld [vmem:[%s9292_s4 + $0x160] sm:$0xff] }
 0x171   : > { %1864 = vmatprep.mubr.f32.mxu1 %v729_v50  ;;  %5685 = vmatprep.mubr.msk.f32.mxu0 %vm6258_vm0, %v7087_v49 }
 0x172   : > { %3170 = vmatpush1.msra.mxu1 %v3015_v58  ;;  %v6209_v58 = vld [vmem:[#allocation2 + $0x69] sm:$0xff]  ;;  %3434 = vmatpush1.msra.mxu0 %v3050_v44 }
 0x173   : > { %v7250_v14 = vpop.f32.mrf.mxu0  ;;  %3171 = vmatprep.subr.mxu1 %v7087_v49  ;;  %3435 = vmatprep.subr.mxu0 %v7087_v49  ;;  %v3048_v44 = vld [vmem:[%s9292_s4 + $0x150] sm:$0xff] }
 0x174   : > { %v1291_v22 = vpop.f32.mrf.mxu1  ;;  %1865 = vmatmul.mubr.f32.gmra.mxu1 %v6208_v23  ;;  %5686 = vmatmul.mubr.f32.gmra.mxu0 %v769_v9  ;;  %v732_v9 = vld [vmem:[#allocation2 + $0x7a] sm:$0xff]  ;;  %v6210_v23 = vld [vmem:[#allocation2 + $0x71] sm:$0xff] }
 0x175   : > { %v1292_v34 = vadd.f32 %v1291_v22, %v1022_v13  ;;  %v1123_v29 = vpop.f32.mrf.mxu0  ;;  %1869 = vmatprep.mubr.f32.mxu1 %v730_v10  ;;  %5688 = vmatprep.mubr.msk.f32.mxu0 %vm6258_vm0, %v7087_v49  ;;  %v1032_v10 = vadd.f32 %v7244_v60, %v7010_v52  ;;  %v3012_v13 = vld [vmem:[%s9292_s4 + $0x30] sm:$0xff] }
 0x176   : > { %v1293_v36 = vpop.f32.mrf.mxu1  ;;  %3172 = vmatpush1.msra.mxu1 %v3014_v18  ;;  %v3049_v18 = vld [vmem:[%s9292_s4 + $0x158] sm:$0xff] }
 0x177   : > { %3173 = vmatprep.subr.mxu1 %v7087_v49  ;;  %v772_v52 = vld [vmem:[#allocation2 + $0x73] sm:$0xff]  ;;  %3436 = vmatpush1.msra.mxu0 %v3049_v18  ;;  %v3047_v18 = vld [vmem:[%s9292_s4 + $0x148] sm:$0xff] }
 0x178   : > { %v1296_v63 = vpop.f32.mrf.mxu1  ;;  %v1561_v50 = vpop.f32.mrf.mxu0  ;;  %1870 = vmatmul.mubr.f32.gmra.mxu1 %v6209_v58  ;;  %5689 = vmatmul.mubr.f32.gmra.mxu0 %v770_v35  ;;  %v6211_v58 = vld [vmem:[#allocation2 + $0x79] sm:$0xff] }
 0x179   : > { %v1297_v1 = vadd.f32 %v1296_v63, %v1027_v43  ;;  %v7272_v61 = vadd.f32 %v1561_v50, %v1292_v34  ;;  %1874 = vmatprep.mubr.f32.mxu1 %v731_v57  ;;  %5691 = vmatprep.mubr.msk.f32.mxu0 %vm6258_vm0, %v7087_v49  ;;  %v733_v57 = vld [vmem:[#allocation2 + $0x82] sm:$0xff]  ;;  %v1037_v43 = vadd.f32 %v7244_v60, %v7022_v62 }
 0x17a   : > { %v1298_v3 = vpop.f32.mrf.mxu1  ;;  %v1563_v4 = vpop.f32.mrf.mxu0  ;;  %3174 = vmatpush1.msra.mxu1 %v3013_v59  ;;  %v3011_v59 = vld [vmem:[%s9292_s4 + $0x28] sm:$0xff]  ;;  %3437 = vmatprep.subr.mxu0 %v7087_v49  ;;  %v773_v62 = vld [vmem:[#allocation2 + $0x7b] sm:$0xff] }
 0x17b   : > { %3175 = vmatprep.subr.mxu1 %v7087_v49  ;;  %3438 = vmatpush1.msra.mxu0 %v3048_v44  ;;  %v3046_v44 = vld [vmem:[%s9292_s4 + $0x140] sm:$0xff] }
 0x17c   : > { %v1301_v21 = vpop.f32.mrf.mxu1  ;;  %v1566_v22 = vpop.f32.mrf.mxu0  ;;  %1875 = vmatmul.mubr.f32.gmra.mxu1 %v6210_v23  ;;  %5692 = vmatmul.mubr.f32.gmra.mxu0 %v771_v39  ;;  %v6212_v23 = vld [vmem:[#allocation2 + $0x81] sm:$0xff] }
 0x17d   : > { %v1302_v34 = vadd.f32 %v1301_v21, %v1032_v10  ;;  %v7286_v29 = vadd.f32 %v1566_v22, %v1297_v1  ;;  %1879 = vmatprep.mubr.f32.mxu1 %v732_v9  ;;  %5694 = vmatprep.mubr.msk.f32.mxu0 %vm6258_vm0, %v7087_v49  ;;  %v734_v9 = vld [vmem:[#allocation2 + $0x8a] sm:$0xff]  ;;  %v1042_v10 = vadd.f32 %v7244_v60, %v7047_v15 }
 0x17e   : > { %v1303_v35 = vpop.f32.mrf.mxu1  ;;  %v1568_v36 = vpop.f32.mrf.mxu0  ;;  %3176 = vmatpush1.msra.mxu1 %v3012_v13  ;;  %v3010_v13 = vld [vmem:[%s9292_s4 + $0x20] sm:$0xff]  ;;  %3439 = vmatprep.subr.mxu0 %v7087_v49 }
 0x17f   : > { %3177 = vmatprep.subr.mxu1 %v7087_v49  ;;  %v774_v15 = vld [vmem:[#allocation2 + $0x83] sm:$0xff]  ;;  %3440 = vmatpush1.msra.mxu0 %v3047_v18  ;;  %v3045_v18 = vld [vmem:[%s9292_s4 + $0x138] sm:$0xff] }
 0x180   : > { %v1306_v63 = vpop.f32.mrf.mxu1  ;;  %v1571_v50 = vpop.f32.mrf.mxu0  ;;  %1880 = vmatmul.mubr.f32.gmra.mxu1 %v6211_v58  ;;  %5695 = vmatmul.mubr.f32.gmra.mxu0 %v772_v52  ;;  %v6213_v58 = vld [vmem:[#allocation2 + $0x89] sm:$0xff] }
 0x181   : > { %v1307_v1 = vadd.f32 %v1306_v63, %v1037_v43  ;;  %v7300_v39 = vadd.f32 %v1571_v50, %v1302_v34  ;;  %1884 = vmatprep.mubr.f32.mxu1 %v733_v57  ;;  %5697 = vmatprep.mubr.msk.f32.mxu0 %vm6258_vm0, %v7087_v49  ;;  %v735_v57 = vld [vmem:[#allocation2 + $0x92] sm:$0xff]  ;;  %v1047_v43 = vadd.f32 %v7244_v60, %v7059_v24 }
 0x182   : > { %v1308_v3 = vpop.f32.mrf.mxu1  ;;  %v1573_v4 = vpop.f32.mrf.mxu0  ;;  %3178 = vmatpush1.msra.mxu1 %v3011_v59  ;;  %v3009_v59 = vld [vmem:[%s9292_s4 + $0x18] sm:$0xff]  ;;  %3441 = vmatprep.subr.mxu0 %v7087_v49  ;;  %v775_v24 = vld [vmem:[#allocation2 + $0x8b] sm:$0xff] }
 0x183   : > { %3179 = vmatprep.subr.mxu1 %v7087_v49  ;;  %3442 = vmatpush1.msra.mxu0 %v3046_v44  ;;  %v3044_v44 = vld [vmem:[%s9292_s4 + $0x130] sm:$0xff] }
 0x184   : > { %v1311_v21 = vpop.f32.mrf.mxu1  ;;  %v1576_v22 = vpop.f32.mrf.mxu0  ;;  %1885 = vmatmul.mubr.f32.gmra.mxu1 %v6212_v23  ;;  %5698 = vmatmul.mubr.f32.gmra.mxu0 %v773_v62  ;;  %v6214_v23 = vld [vmem:[#allocation2 + $0x91] sm:$0xff] }
 0x185   : > { %v1312_v34 = vadd.f32 %v1311_v21, %v1042_v10  ;;  %v7314_v52 = vadd.f32 %v1576_v22, %v1307_v1  ;;  %1889 = vmatprep.mubr.f32.mxu1 %v734_v9  ;;  %5700 = vmatprep.mubr.msk.f32.mxu0 %vm6258_vm0, %v7087_v49  ;;  %v736_v9 = vld [vmem:[#allocation2 + $0x9a] sm:$0xff]  ;;  %v1052_v10 = vadd.f32 %v7244_v60, %v7074_v38 }
 0x186   : > { %v1313_v35 = vpop.f32.mrf.mxu1  ;;  %v1578_v36 = vpop.f32.mrf.mxu0  ;;  %3180 = vmatpush1.msra.mxu1 %v3010_v13  ;;  %v3008_v13 = vld [vmem:[%s9292_s4 + $0x10] sm:$0xff]  ;;  %3443 = vmatprep.subr.mxu0 %v7087_v49 }
 0x187   : > { %3181 = vmatprep.subr.mxu1 %v7087_v49  ;;  %v776_v38 = vld [vmem:[#allocation2 + $0x93] sm:$0xff]  ;;  %3444 = vmatpush1.msra.mxu0 %v3045_v18  ;;  %v3043_v18 = vld [vmem:[%s9292_s4 + $0x128] sm:$0xff] }
 0x188   : > { %v1316_v63 = vpop.f32.mrf.mxu1  ;;  %v1581_v50 = vpop.f32.mrf.mxu0  ;;  %1890 = vmatmul.mubr.f32.gmra.mxu1 %v6213_v58  ;;  %5701 = vmatmul.mubr.f32.gmra.mxu0 %v774_v15  ;;  %v6215_v58 = vld [vmem:[#allocation2 + $0x99] sm:$0xff] }
 0x189   : > { %v1317_v1 = vadd.f32 %v1316_v63, %v1047_v43  ;;  %v7328_v62 = vadd.f32 %v1581_v50, %v1312_v34  ;;  %1894 = vmatprep.mubr.f32.mxu1 %v735_v57  ;;  %5703 = vmatprep.mubr.msk.f32.mxu0 %vm6258_vm0, %v7087_v49  ;;  %v737_v57 = vld [vmem:[#allocation2 + $0xa2] sm:$0xff]  ;;  %v1057_v43 = vadd.f32 %v7244_v60, %v7093_v53 }
 0x18a   : > { %v1318_v3 = vpop.f32.mrf.mxu1  ;;  %v1583_v4 = vpop.f32.mrf.mxu0  ;;  %3182 = vmatpush1.msra.mxu1 %v3009_v59  ;;  %v3007_v59 = vld [vmem:[%s9292_s4 + $0x8] sm:$0xff]  ;;  %3445 = vmatprep.subr.mxu0 %v7087_v49  ;;  %v777_v53 = vld [vmem:[#allocation2 + $0x9b] sm:$0xff] }
 0x18b   : > { %3183 = vmatprep.subr.mxu1 %v7087_v49  ;;  %3446 = vmatpush1.msra.mxu0 %v3044_v44  ;;  %v3042_v44 = vld [vmem:[%s9292_s4 + $0x120] sm:$0xff] }
 0x18c   : > { %v1321_v21 = vpop.f32.mrf.mxu1  ;;  %v1586_v22 = vpop.f32.mrf.mxu0  ;;  %1895 = vmatmul.mubr.f32.gmra.mxu1 %v6214_v23  ;;  %5704 = vmatmul.mubr.f32.gmra.mxu0 %v775_v24  ;;  %v6216_v23 = vld [vmem:[#allocation2 + $0xa1] sm:$0xff] }
 0x18d   : > { %v1322_v34 = vadd.f32 %v1321_v21, %v1052_v10  ;;  %v7342_v15 = vadd.f32 %v1586_v22, %v1317_v1  ;;  %1899 = vmatprep.mubr.f32.mxu1 %v736_v9  ;;  %5706 = vmatprep.mubr.msk.f32.mxu0 %vm6258_vm0, %v7087_v49  ;;  %v738_v9 = vld [vmem:[#allocation2 + $0xaa] sm:$0xff]  ;;  %v1062_v10 = vadd.f32 %v7244_v60, %v7110_v6 }
 0x18e   : > { %v1323_v35 = vpop.f32.mrf.mxu1  ;;  %v1588_v36 = vpop.f32.mrf.mxu0  ;;  %3184 = vmatpush1.msra.mxu1 %v3008_v13  ;;  %v3006_v13 = vld [vmem:[%s9292_s4] sm:$0xff]  ;;  %3447 = vmatprep.subr.mxu0 %v7087_v49 }
 0x18f   : > { %3185 = vmatprep.subr.mxu1 %v7087_v49  ;;  %v778_v6 = vld [vmem:[#allocation2 + $0xa3] sm:$0xff]  ;;  %3448 = vmatpush1.msra.mxu0 %v3043_v18  ;;  %v3041_v18 = vld [vmem:[%s9292_s4 + $0x118] sm:$0xff] }
 0x190   : > { %v1326_v63 = vpop.f32.mrf.mxu1  ;;  %v1591_v50 = vpop.f32.mrf.mxu0  ;;  %1900 = vmatmul.mubr.f32.gmra.mxu1 %v6215_v58  ;;  %5707 = vmatmul.mubr.f32.gmra.mxu0 %v776_v38  ;;  %v6217_v58 = vld [vmem:[#allocation2 + $0xa9] sm:$0xff] }
 0x191   : > { %v1327_v1 = vadd.f32 %v1326_v63, %v1057_v43  ;;  %v7356_v24 = vadd.f32 %v1591_v50, %v1322_v34  ;;  %1904 = vmatprep.mubr.f32.mxu1 %v737_v57  ;;  %5709 = vmatprep.mubr.msk.f32.mxu0 %vm6258_vm0, %v7087_v49  ;;  %v739_v57 = vld [vmem:[#allocation2 + $0xb2] sm:$0xff]  ;;  %v1067_v43 = vadd.f32 %v7244_v60, %v7122_v19 }
 0x192   : > { %v1328_v3 = vpop.f32.mrf.mxu1  ;;  %v1593_v4 = vpop.f32.mrf.mxu0  ;;  %3186 = vmatpush1.msra.mxu1 %v3007_v59  ;;  %v3037_v59 = vld [vmem:[%s9292_s4 + $0xf8] sm:$0xff]  ;;  %3449 = vmatprep.subr.mxu0 %v7087_v49  ;;  %v779_v19 = vld [vmem:[#allocation2 + $0xab] sm:$0xff] }
 0x193   : > { %3187 = vmatprep.subr.mxu1 %v7087_v49  ;;  %3450 = vmatpush1.msra.mxu0 %v3042_v44  ;;  %v3040_v44 = vld [vmem:[%s9292_s4 + $0x110] sm:$0xff] }
 0x194   : > { %v1331_v21 = vpop.f32.mrf.mxu1  ;;  %v1596_v22 = vpop.f32.mrf.mxu0  ;;  %1905 = vmatmul.mubr.f32.gmra.mxu1 %v6216_v23  ;;  %5710 = vmatmul.mubr.f32.gmra.mxu0 %v777_v53  ;;  %v6218_v23 = vld [vmem:[#allocation2 + $0xb1] sm:$0xff] }
 0x195   : > { %v1332_v34 = vadd.f32 %v1331_v21, %v1062_v10  ;;  %v7370_v38 = vadd.f32 %v1596_v22, %v1327_v1  ;;  %1909 = vmatprep.mubr.f32.mxu1 %v738_v9  ;;  %5712 = vmatprep.mubr.msk.f32.mxu0 %vm6258_vm0, %v7087_v49  ;;  %v740_v9 = vld [vmem:[#allocation2 + $0xba] sm:$0xff]  ;;  %v1072_v10 = vadd.f32 %v7244_v60, %v7132_v32 }
 0x196   : > { %v1333_v35 = vpop.f32.mrf.mxu1  ;;  %v1598_v36 = vpop.f32.mrf.mxu0  ;;  %3188 = vmatpush1.msra.mxu1 %v3006_v13  ;;  %v3036_v13 = vld [vmem:[%s9292_s4 + $0xf0] sm:$0xff]  ;;  %3451 = vmatprep.subr.mxu0 %v7087_v49 }
 0x197   : > { %3189 = vmatprep.subr.mxu1 %v7087_v49  ;;  %v780_v32 = vld [vmem:[#allocation2 + $0xb3] sm:$0xff]  ;;  %3452 = vmatpush1.msra.mxu0 %v3041_v18  ;;  %v3039_v18 = vld [vmem:[%s9292_s4 + $0x108] sm:$0xff] }
 0x198   : > { %v1336_v63 = vpop.f32.mrf.mxu1  ;;  %v1601_v50 = vpop.f32.mrf.mxu0  ;;  %1910 = vmatmul.mubr.f32.gmra.mxu1 %v6217_v58  ;;  %5713 = vmatmul.mubr.f32.gmra.mxu0 %v778_v6  ;;  %v6219_v58 = vld [vmem:[#allocation2 + $0xb9] sm:$0xff] }
 0x199   : > { %v1337_v1 = vadd.f32 %v1336_v63, %v1067_v43  ;;  %v7384_v53 = vadd.f32 %v1601_v50, %v1332_v34  ;;  %1914 = vmatprep.mubr.f32.mxu1 %v739_v57  ;;  %5715 = vmatprep.mubr.msk.f32.mxu0 %vm6258_vm0, %v7087_v49  ;;  %v741_v57 = vld [vmem:[#allocation2 + $0xc2] sm:$0xff]  ;;  %v1077_v43 = vadd.f32 %v7244_v60, %v7148_v47 }
 0x19a   : > { %v1338_v3 = vpop.f32.mrf.mxu1  ;;  %v1603_v4 = vpop.f32.mrf.mxu0  ;;  %3190 = vmatpush2.msra.mxu1 %v3037_v59  ;;  %v3035_v59 = vld [vmem:[%s9292_s4 + $0xe8] sm:$0xff]  ;;  %3453 = vmatprep.subr.mxu0 %v7087_v49  ;;  %v781_v47 = vld [vmem:[#allocation2 + $0xbb] sm:$0xff] }
 0x19b   : > { %3191 = vmatprep.subr.mxu1 %v7087_v49  ;;  %3454 = vmatpush1.msra.mxu0 %v3040_v44  ;;  %v3038_v44 = vld [vmem:[%s9292_s4 + $0x100] sm:$0xff] }
 0x19c   : > { %v1341_v21 = vpop.f32.mrf.mxu1  ;;  %v1606_v22 = vpop.f32.mrf.mxu0  ;;  %1915 = vmatmul.mubr.f32.gmra.mxu1 %v6218_v23  ;;  %5716 = vmatmul.mubr.f32.gmra.mxu0 %v779_v19  ;;  %v6220_v23 = vld [vmem:[#allocation2 + $0xc1] sm:$0xff] }
 0x19d   : > { %v1342_v34 = vadd.f32 %v1341_v21, %v1072_v10  ;;  %v7398_v6 = vadd.f32 %v1606_v22, %v1337_v1  ;;  %1919 = vmatprep.mubr.f32.mxu1 %v740_v9  ;;  %5718 = vmatprep.mubr.msk.f32.mxu0 %vm6258_vm0, %v7087_v49  ;;  %v742_v9 = vld [vmem:[#allocation2 + $0xca] sm:$0xff]  ;;  %v1082_v10 = vadd.f32 %v7244_v60, %v7158_v0 }
 0x19e   : > { %v1343_v35 = vpop.f32.mrf.mxu1  ;;  %v1608_v36 = vpop.f32.mrf.mxu0  ;;  %3192 = vmatpush2.msra.mxu1 %v3036_v13  ;;  %v3034_v13 = vld [vmem:[%s9292_s4 + $0xe0] sm:$0xff]  ;;  %3455 = vmatprep.subr.mxu0 %v7087_v49 }
 0x19f   : > { %3193 = vmatprep.subr.mxu1 %v7087_v49  ;;  %v782_v0 = vld [vmem:[#allocation2 + $0xc3] sm:$0xff]  ;;  %3456 = vmatpush1.msra.mxu0 %v3039_v18  ;;  %v3069_v18 = vld [vmem:[%s9292_s4 + $0x1f8] sm:$0xff] }
 0x1a0   : > { %v1346_v63 = vpop.f32.mrf.mxu1  ;;  %v1611_v50 = vpop.f32.mrf.mxu0  ;;  %1920 = vmatmul.mubr.f32.gmra.mxu1 %v6219_v58  ;;  %5719 = vmatmul.mubr.f32.gmra.mxu0 %v780_v32  ;;  %v6221_v58 = vld [vmem:[#allocation2 + $0xc9] sm:$0xff] }
 0x1a1   : > { %v1347_v1 = vadd.f32 %v1346_v63, %v1077_v43  ;;  %v7412_v19 = vadd.f32 %v1611_v50, %v1342_v34  ;;  %1924 = vmatprep.mubr.f32.mxu1 %v741_v57  ;;  %5721 = vmatprep.mubr.msk.f32.mxu0 %vm6258_vm0, %v7087_v49  ;;  %v743_v57 = vld [vmem:[#allocation2 + $0xd2] sm:$0xff]  ;;  %v1087_v43 = vadd.f32 %v7244_v60, %v7165_v16 }
 0x1a2   : > { %v1348_v3 = vpop.f32.mrf.mxu1  ;;  %v1613_v4 = vpop.f32.mrf.mxu0  ;;  %3194 = vmatpush2.msra.mxu1 %v3035_v59  ;;  %v3033_v59 = vld [vmem:[%s9292_s4 + $0xd8] sm:$0xff]  ;;  %3457 = vmatprep.subr.mxu0 %v7087_v49  ;;  %v783_v16 = vld [vmem:[#allocation2 + $0xcb] sm:$0xff] }
 0x1a3   : > { %3195 = vmatprep.subr.mxu1 %v7087_v49  ;;  %3458 = vmatpush1.msra.mxu0 %v3038_v44  ;;  %v3031_v44 = vld [vmem:[%s9292_s4 + $0xc8] sm:$0xff] }
 0x1a4   : > { %v1351_v21 = vpop.f32.mrf.mxu1  ;;  %v1616_v22 = vpop.f32.mrf.mxu0  ;;  %1925 = vmatmul.mubr.f32.gmra.mxu1 %v6220_v23  ;;  %5722 = vmatmul.mubr.f32.gmra.mxu0 %v781_v47  ;;  %v6222_v23 = vld [vmem:[#allocation2 + $0xd1] sm:$0xff] }
 0x1a5   : > { %v1352_v34 = vadd.f32 %v1351_v21, %v1082_v10  ;;  %v7426_v32 = vadd.f32 %v1616_v22, %v1347_v1  ;;  %1929 = vmatprep.mubr.f32.mxu1 %v742_v9  ;;  %5724 = vmatprep.mubr.msk.f32.mxu0 %vm6258_vm0, %v7087_v49  ;;  %v744_v9 = vld [vmem:[#allocation2 + $0xda] sm:$0xff]  ;;  %v1092_v10 = vadd.f32 %v7244_v60, %v7169_v25 }
 0x1a6   : > { %v1353_v35 = vpop.f32.mrf.mxu1  ;;  %v1618_v36 = vpop.f32.mrf.mxu0  ;;  %3196 = vmatpush2.msra.mxu1 %v3034_v13  ;;  %v3032_v13 = vld [vmem:[%s9292_s4 + $0xd0] sm:$0xff]  ;;  %3459 = vmatprep.subr.mxu0 %v7087_v49 }
 0x1a7   : > { %3197 = vmatprep.subr.mxu1 %v7087_v49  ;;  %v784_v25 = vld [vmem:[#allocation2 + $0xd3] sm:$0xff]  ;;  %3460 = vmatpush2.msra.mxu0 %v3069_v18  ;;  %v3067_v18 = vld [vmem:[%s9292_s4 + $0x1e8] sm:$0xff] }
 0x1a8   : > { %v1356_v63 = vpop.f32.mrf.mxu1  ;;  %v1621_v50 = vpop.f32.mrf.mxu0  ;;  %1930 = vmatmul.mubr.f32.gmra.mxu1 %v6221_v58  ;;  %5725 = vmatmul.mubr.f32.gmra.mxu0 %v782_v0  ;;  %v6224_v58 = vld [vmem:[#allocation2 + $0xd9] sm:$0xff] }
 0x1a9   : > { %v1357_v1 = vadd.f32 %v1356_v63, %v1087_v43  ;;  %v7440_v47 = vadd.f32 %v1621_v50, %v1352_v34  ;;  %1934 = vmatprep.mubr.f32.mxu1 %v743_v57  ;;  %5727 = vmatprep.mubr.msk.f32.mxu0 %vm6258_vm0, %v7087_v49  ;;  %v745_v57 = vld [vmem:[#allocation2 + $0xe2] sm:$0xff]  ;;  %v1097_v43 = vadd.f32 %v7244_v60, %v7180_v37 }
 0x1aa   : > { %v1358_v3 = vpop.f32.mrf.mxu1  ;;  %v1623_v4 = vpop.f32.mrf.mxu0  ;;  %3198 = vmatpush2.msra.mxu1 %v3033_v59  ;;  %v7460_v59 = vld [vmem:[#allocation2] sm:$0xff] }
 0x1ab   : > { %3199 = vmatprep.subr.mxu1 %v7087_v49  ;;  %3461 = vmatprep.subr.mxu0 %v7460_v59 }
 0x1ac   : > { %v1361_v21 = vpop.f32.mrf.mxu1  ;;  %v1626_v22 = vpop.f32.mrf.mxu0  ;;  %1935 = vmatmul.mubr.f32.gmra.mxu1 %v6222_v23  ;;  %5728 = vmatmul.mubr.f32.gmra.mxu0 %v783_v16  ;;  %v785_v16 = vld [vmem:[#allocation2 + $0xdb] sm:$0xff] }
 0x1ad   : > { %v1362_v34 = vadd.f32 %v1361_v21, %v1092_v10  ;;  %v7454_v0 = vadd.f32 %v1626_v22, %v1357_v1  ;;  %1939 = vmatprep.mubr.f32.mxu1 %v744_v9  ;;  %5730 = vmatprep.mubr.msk.f32.mxu0 %vm6258_vm0, %v7087_v49  ;;  %v3068_v49 = vld [vmem:[%s9292_s4 + $0x1f0] sm:$0xff]  ;;  %v1102_v10 = vadd.f32 %v7244_v60, %v7190_v55  ;;  %v6225_v23 = vld [vmem:[#allocation2 + $0xe1] sm:$0xff] }
 0x1ae   : > { %v1363_v35 = vpop.f32.mrf.mxu1  ;;  %v1628_v36 = vpop.f32.mrf.mxu0  ;;  %3200 = vmatpush2.msra.mxu1 %v3032_v13  ;;  %v746_v9 = vld [vmem:[#allocation2 + $0xea] sm:$0xff]  ;;  %3462 = vmatpush2.msra.mxu0 %v3068_v49  ;;  %v3030_v13 = vld [vmem:[%s9292_s4 + $0xc0] sm:$0xff] }
 0x1af   : > { %3201 = vmatprep.subr.mxu1 %v7460_v59  ;;  %3463 = vmatprep.subr.mxu0 %v7460_v59  ;;  %v786_v55 = vld [vmem:[#allocation2 + $0xe3] sm:$0xff] }
 0x1b0   : > { %v1366_v63 = vpop.f32.mrf.mxu1  ;;  %v1631_v50 = vpop.f32.mrf.mxu0  ;;  %1940 = vmatmul.mubr.f32.gmra.mxu1 %v6224_v58  ;;  %5731 = vmatmul.mubr.f32.gmra.mxu0 %v784_v25  ;;  %v3066_v49 = vld [vmem:[%s9292_s4 + $0x1e0] sm:$0xff]  ;;  %v6226_v58 = vld [vmem:[#allocation2 + $0xe9] sm:$0xff] }
 0x1b1   : > { %v1367_v37 = vadd.f32 %v1366_v63, %v1097_v43  ;;  %v7470_v1 = vadd.f32 %v1631_v50, %v1362_v34  ;;  %1944 = vmatprep.mubr.f32.mxu1 %v745_v57  ;;  %5733 = vmatprep.mubr.msk.f32.mxu0 %vm6258_vm0, %v7460_v59  ;;  %v747_v57 = vld [vmem:[#allocation2 + $0xf2] sm:$0xff]  ;;  %v1107_v43 = vadd.f32 %v7244_v60, %v7206_v12 }
 0x1b2   : > { %v1368_v3 = vpop.f32.mrf.mxu1  ;;  %v1633_v4 = vpop.f32.mrf.mxu0  ;;  %3202 = vmatpush2.msra.mxu1 %v3031_v44  ;;  %3464 = vmatpush2.msra.mxu0 %v3067_v18  ;;  %v3029_v44 = vld [vmem:[%s9292_s4 + $0xb8] sm:$0xff]  ;;  %v787_v12 = vld [vmem:[#allocation2 + $0xeb] sm:$0xff] }
 0x1b3   : > { %3203 = vmatprep.subr.mxu1 %v7460_v59  ;;  %3465 = vmatprep.subr.mxu0 %v7460_v59  ;;  %v3065_v18 = vld [vmem:[%s9292_s4 + $0x1d8] sm:$0xff] }
 0x1b4   : > { %v1371_v21 = vpop.f32.mrf.mxu1  ;;  %v1636_v22 = vpop.f32.mrf.mxu0  ;;  %1945 = vmatmul.mubr.f32.gmra.mxu1 %v6225_v23  ;;  %5734 = vmatmul.mubr.f32.gmra.mxu0 %v785_v16  ;;  %v6227_v23 = vld [vmem:[#allocation2 + $0xf1] sm:$0xff] }
 0x1b5   : > { %v1372_v34 = vadd.f32 %v1371_v21, %v1102_v10  ;;  %v7484_v25 = vadd.f32 %v1636_v22, %v1367_v37  ;;  %1949 = vmatprep.mubr.f32.mxu1 %v746_v9  ;;  %5736 = vmatprep.mubr.msk.f32.mxu0 %vm6258_vm0, %v7460_v59  ;;  %v748_v9 = vld [vmem:[#allocation2 + $0xfa] sm:$0xff]  ;;  %v1112_v10 = vadd.f32 %v7244_v60, %v7214_v28 }
 0x1b6   : > { %v1373_v35 = vpop.f32.mrf.mxu1  ;;  %v1638_v36 = vpop.f32.mrf.mxu0  ;;  %3204 = vmatpush2.msra.mxu1 %v3030_v13  ;;  %3466 = vmatpush2.msra.mxu0 %v3066_v49  ;;  %v3028_v13 = vld [vmem:[%s9292_s4 + $0xb0] sm:$0xff] }
 0x1b7   : > { %3205 = vmatprep.subr.mxu1 %v7460_v59  ;;  %3467 = vmatprep.subr.mxu0 %v7460_v59  ;;  %v788_v28 = vld [vmem:[#allocation2 + $0xf3] sm:$0xff] }
 0x1b8   : > { %v1376_v63 = vpop.f32.mrf.mxu1  ;;  %v1641_v50 = vpop.f32.mrf.mxu0  ;;  %1950 = vmatmul.mubr.f32.gmra.mxu1 %v6226_v58  ;;  %5737 = vmatmul.mubr.f32.gmra.mxu0 %v786_v55  ;;  %v3064_v49 = vld [vmem:[%s9292_s4 + $0x1d0] sm:$0xff]  ;;  %v6228_v58 = vld [vmem:[#allocation2 + $0xf9] sm:$0xff] }
 0x1b9   : > { %v1377_v37 = vadd.f32 %v1376_v63, %v1107_v43  ;;  %v7498_v16 = vadd.f32 %v1641_v50, %v1372_v34  ;;  %1954 = vmatprep.mubr.f32.mxu1 %v747_v57  ;;  %5739 = vmatprep.mubr.msk.f32.mxu0 %vm6258_vm0, %v7460_v59  ;;  %v749_v57 = vld [vmem:[#allocation2 + $0x102] sm:$0xff]  ;;  %v1117_v43 = vadd.f32 %v7244_v60, %v7229_v45 }
 0x1ba   : > { %v1378_v3 = vpop.f32.mrf.mxu1  ;;  %v1643_v4 = vpop.f32.mrf.mxu0  ;;  %3206 = vmatpush2.msra.mxu1 %v3029_v44  ;;  %3468 = vmatpush2.msra.mxu0 %v3065_v18  ;;  %v3027_v44 = vld [vmem:[%s9292_s4 + $0xa8] sm:$0xff]  ;;  %v789_v45 = vld [vmem:[#allocation2 + $0xfb] sm:$0xff] }
 0x1bb   : > { %3207 = vmatprep.subr.mxu1 %v7460_v59  ;;  %3469 = vmatprep.subr.mxu0 %v7460_v59  ;;  %v3063_v18 = vld [vmem:[%s9292_s4 + $0x1c8] sm:$0xff] }
 0x1bc   : > { %v1381_v21 = vpop.f32.mrf.mxu1  ;;  %v1646_v22 = vpop.f32.mrf.mxu0  ;;  %1955 = vmatmul.mubr.f32.gmra.mxu1 %v6227_v23  ;;  %5740 = vmatmul.mubr.f32.gmra.mxu0 %v787_v12  ;;  %v6229_v23 = vld [vmem:[#allocation2 + $0x101] sm:$0xff] }
 0x1bd   : > { %v1382_v34 = vadd.f32 %v1381_v21, %v1112_v10  ;;  %v7512_v55 = vadd.f32 %v1646_v22, %v1377_v37  ;;  %1959 = vmatprep.mubr.f32.mxu1 %v748_v9  ;;  %5742 = vmatprep.mubr.msk.f32.mxu0 %vm6258_vm0, %v7460_v59  ;;  %v750_v9 = vld [vmem:[#allocation2 + $0x10a] sm:$0xff]  ;;  %v1122_v10 = vadd.f32 %v7244_v60, %v7250_v14 }
 0x1be   : > { %v1383_v35 = vpop.f32.mrf.mxu1  ;;  %v1648_v36 = vpop.f32.mrf.mxu0  ;;  %3208 = vmatpush2.msra.mxu1 %v3028_v13  ;;  %3470 = vmatpush2.msra.mxu0 %v3064_v49  ;;  %v3026_v13 = vld [vmem:[%s9292_s4 + $0xa0] sm:$0xff] }
 0x1bf   : > { %3209 = vmatprep.subr.mxu1 %v7460_v59  ;;  %3471 = vmatprep.subr.mxu0 %v7460_v59  ;;  %v790_v14 = vld [vmem:[#allocation2 + $0x103] sm:$0xff] }
 0x1c0   : > { %v1386_v63 = vpop.f32.mrf.mxu1  ;;  %v1651_v50 = vpop.f32.mrf.mxu0  ;;  %1960 = vmatmul.mubr.f32.gmra.mxu1 %v6228_v58  ;;  %5743 = vmatmul.mubr.f32.gmra.mxu0 %v788_v28  ;;  %v3062_v49 = vld [vmem:[%s9292_s4 + $0x1c0] sm:$0xff]  ;;  %v6230_v58 = vld [vmem:[#allocation2 + $0x109] sm:$0xff] }
 0x1c1   : > { %v1387_v37 = vadd.f32 %v1386_v63, %v1117_v43  ;;  %v7526_v12 = vadd.f32 %v1651_v50, %v1382_v34  ;;  %1964 = vmatprep.mubr.f32.mxu1 %v749_v57  ;;  %5745 = vmatprep.mubr.msk.f32.mxu0 %vm6258_vm0, %v7460_v59  ;;  %v751_v57 = vld [vmem:[#allocation2 + $0x112] sm:$0xff]  ;;  %v1127_v43 = vadd.f32 %v7244_v60, %v6981_v30 }
 0x1c2   : > { %v1388_v3 = vpop.f32.mrf.mxu1  ;;  %v1653_v4 = vpop.f32.mrf.mxu0  ;;  %3210 = vmatpush2.msra.mxu1 %v3027_v44  ;;  %3472 = vmatpush2.msra.mxu0 %v3063_v18  ;;  %v3025_v44 = vld [vmem:[%s9292_s4 + $0x98] sm:$0xff]  ;;  %v791_v30 = vld [vmem:[#allocation2 + $0x10b] sm:$0xff] }
 0x1c3   : > { %3211 = vmatprep.subr.mxu1 %v7460_v59  ;;  %3473 = vmatprep.subr.mxu0 %v7460_v59  ;;  %v3061_v18 = vld [vmem:[%s9292_s4 + $0x1b8] sm:$0xff] }
 0x1c4   : > { %v1391_v21 = vpop.f32.mrf.mxu1  ;;  %v1656_v22 = vpop.f32.mrf.mxu0  ;;  %1965 = vmatmul.mubr.f32.gmra.mxu1 %v6229_v23  ;;  %5746 = vmatmul.mubr.f32.gmra.mxu0 %v789_v45  ;;  %v6231_v23 = vld [vmem:[#allocation2 + $0x111] sm:$0xff] }
 0x1c5   : > { %v1392_v34 = vadd.f32 %v1391_v21, %v1122_v10  ;;  %v7540_v28 = vadd.f32 %v1656_v22, %v1387_v37  ;;  %1969 = vmatprep.mubr.f32.mxu1 %v750_v9  ;;  %5748 = vmatprep.mubr.msk.f32.mxu0 %vm6258_vm0, %v7460_v59  ;;  %v752_v9 = vld [vmem:[#allocation2 + $0x11a] sm:$0xff]  ;;  %v1132_v10 = vadd.f32 %v7244_v60, %v6995_v42 }
 0x1c6   : > { %v1393_v35 = vpop.f32.mrf.mxu1  ;;  %v1658_v36 = vpop.f32.mrf.mxu0  ;;  %3212 = vmatpush2.msra.mxu1 %v3026_v13  ;;  %3474 = vmatpush2.msra.mxu0 %v3062_v49  ;;  %v3024_v13 = vld [vmem:[%s9292_s4 + $0x90] sm:$0xff] }
 0x1c7   : > { %3213 = vmatprep.subr.mxu1 %v7460_v59  ;;  %3475 = vmatprep.subr.mxu0 %v7460_v59  ;;  %v792_v42 = vld [vmem:[#allocation2 + $0x113] sm:$0xff] }
 0x1c8   : > { %v1396_v63 = vpop.f32.mrf.mxu1  ;;  %v1661_v50 = vpop.f32.mrf.mxu0  ;;  %1970 = vmatmul.mubr.f32.gmra.mxu1 %v6230_v58  ;;  %5749 = vmatmul.mubr.f32.gmra.mxu0 %v790_v14  ;;  %v3060_v49 = vld [vmem:[%s9292_s4 + $0x1b0] sm:$0xff]  ;;  %v6232_v58 = vld [vmem:[#allocation2 + $0x119] sm:$0xff] }
 0x1c9   : > { %v1397_v37 = vadd.f32 %v1396_v63, %v1127_v43  ;;  %v7554_v45 = vadd.f32 %v1661_v50, %v1392_v34  ;;  %1974 = vmatprep.mubr.f32.mxu1 %v751_v57  ;;  %5751 = vmatprep.mubr.msk.f32.mxu0 %vm6258_vm0, %v7460_v59  ;;  %v753_v57 = vld [vmem:[#allocation2 + $0x122] sm:$0xff]  ;;  %v1137_v43 = vadd.f32 %v7244_v60, %v7007_v51 }
 0x1ca   : > { %v1398_v3 = vpop.f32.mrf.mxu1  ;;  %v1663_v4 = vpop.f32.mrf.mxu0  ;;  %3214 = vmatpush2.msra.mxu1 %v3025_v44  ;;  %3476 = vmatpush2.msra.mxu0 %v3061_v18  ;;  %v3023_v44 = vld [vmem:[%s9292_s4 + $0x88] sm:$0xff]  ;;  %v793_v51 = vld [vmem:[#allocation2 + $0x11b] sm:$0xff] }
 0x1cb   : > { %3215 = vmatprep.subr.mxu1 %v7460_v59  ;;  %3477 = vmatprep.subr.mxu0 %v7460_v59  ;;  %v3059_v18 = vld [vmem:[%s9292_s4 + $0x1a8] sm:$0xff] }
 0x1cc   : > { %v1401_v21 = vpop.f32.mrf.mxu1  ;;  %v1666_v22 = vpop.f32.mrf.mxu0  ;;  %1975 = vmatmul.mubr.f32.gmra.mxu1 %v6231_v23  ;;  %5752 = vmatmul.mubr.f32.gmra.mxu0 %v791_v30  ;;  %v6233_v23 = vld [vmem:[#allocation2 + $0x121] sm:$0xff] }
 0x1cd   : > { %v1402_v34 = vadd.f32 %v1401_v21, %v1132_v10  ;;  %v7568_v14 = vadd.f32 %v1666_v22, %v1397_v37  ;;  %1979 = vmatprep.mubr.f32.mxu1 %v752_v9  ;;  %5754 = vmatprep.mubr.msk.f32.mxu0 %vm6258_vm0, %v7460_v59  ;;  %v754_v9 = vld [vmem:[#allocation2 + $0x12a] sm:$0xff]  ;;  %v1142_v10 = vadd.f32 %v7244_v60, %v7027_v2 }
 0x1ce   : > { %v1403_v35 = vpop.f32.mrf.mxu1  ;;  %v1668_v36 = vpop.f32.mrf.mxu0  ;;  %3216 = vmatpush2.msra.mxu1 %v3024_v13  ;;  %3478 = vmatpush2.msra.mxu0 %v3060_v49  ;;  %v3022_v13 = vld [vmem:[%s9292_s4 + $0x80] sm:$0xff] }
 0x1cf   : > { %3217 = vmatprep.subr.mxu1 %v7460_v59  ;;  %3479 = vmatprep.subr.mxu0 %v7460_v59  ;;  %v794_v2 = vld [vmem:[#allocation2 + $0x123] sm:$0xff] }
 0x1d0   : > { %v1406_v63 = vpop.f32.mrf.mxu1  ;;  %v1671_v50 = vpop.f32.mrf.mxu0  ;;  %1980 = vmatmul.mubr.f32.gmra.mxu1 %v6232_v58  ;;  %5755 = vmatmul.mubr.f32.gmra.mxu0 %v792_v42 }
 0x1d1   : > { %v1407_v37 = vadd.f32 %v1406_v63, %v1137_v43  ;;  %v7582_v30 = vadd.f32 %v1671_v50, %v1402_v34  ;;  %1984 = vmatprep.mubr.f32.mxu1 %v753_v57  ;;  %5757 = vmatprep.mubr.msk.f32.mxu0 %vm6258_vm0, %v7460_v59  ;;  %v755_v57 = vld [vmem:[#allocation2 + $0x132] sm:$0xff]  ;;  %v1147_v43 = vadd.f32 %v7244_v60, %v7039_v11  ;;  %v6234_v50 = vld [vmem:[#allocation2 + $0x129] sm:$0xff] }
 0x1d2   : > { %v1408_v3 = vpop.f32.mrf.mxu1  ;;  %v1673_v4 = vpop.f32.mrf.mxu0  ;;  %3218 = vmatpush2.msra.mxu1 %v3023_v44  ;;  %3480 = vmatpush2.msra.mxu0 %v3059_v18  ;;  %v3058_v44 = vld [vmem:[%s9292_s4 + $0x1a0] sm:$0xff]  ;;  %v795_v11 = vld [vmem:[#allocation2 + $0x12b] sm:$0xff] }
 0x1d3   : > { %3219 = vmatprep.subr.mxu1 %v7460_v59  ;;  %3481 = vmatprep.subr.mxu0 %v7460_v59  ;;  %v756_v4 = vld [vmem:[#allocation2 + $0x13a] sm:$0xff] }
 0x1d4   : > { %v1411_v21 = vpop.f32.mrf.mxu1  ;;  %v1676_v22 = vpop.f32.mrf.mxu0  ;;  %1985 = vmatmul.mubr.f32.gmra.mxu1 %v6233_v23  ;;  %5758 = vmatmul.mubr.f32.gmra.mxu0 %v793_v51 }
 0x1d5   : > { %v1412_v34 = vadd.f32 %v1411_v21, %v1142_v10  ;;  %v7596_v42 = vadd.f32 %v1676_v22, %v1407_v37  ;;  %1989 = vmatprep.mubr.f32.mxu1 %v754_v9  ;;  %5760 = vmatprep.mubr.msk.f32.mxu0 %vm6258_vm0, %v7460_v59  ;;  %v1152_v9 = vadd.f32 %v7244_v60, %v7061_v27  ;;  %v3057_v10 = vld [vmem:[%s9292_s4 + $0x198] sm:$0xff] }
 0x1d6   : > { %v1413_v35 = vpop.f32.mrf.mxu1  ;;  %v1678_v36 = vpop.f32.mrf.mxu0  ;;  %3220 = vmatpush2.msra.mxu1 %v3022_v13  ;;  %3482 = vmatpush2.msra.mxu0 %v3058_v44  ;;  %v6235_v21 = vld [vmem:[#allocation2 + $0x131] sm:$0xff] }
 0x1d7   : > { %3697 = vmatprep.subr.mxu1 %v7460_v59  ;;  %3483 = vmatprep.subr.mxu0 %v7460_v59  ;;  %v7624_v35 = vld [vmem:[%s9291_s3] ss:$0 sm:$0xff] }
 0x1d8   : > { %v1416_v49 = vpop.f32.mrf.mxu1  ;;  %v1681_v63 = vpop.f32.mrf.mxu0  ;;  %1990 = vmatmul.mubr.f32.gmra.mxu1 %v6234_v50  ;;  %5761 = vmatmul.mubr.f32.gmra.mxu0 %v794_v2  ;;  %v757_v2 = vld [vmem:[#allocation2 + $0x142] sm:$0xff]  ;;  %v1157_v36 = vadd.f32 %v7624_v35, %v7076_v40 }
 0x1d9   : > { %v1417_v58 = vadd.f32 %v1416_v49, %v1147_v43  ;;  %v7607_v37 = vadd.f32 %v1681_v63, %v1412_v34  ;;  %1994 = vmatprep.mubr.f32.mxu1 %v755_v57  ;;  %5763 = vmatprep.mubr.msk.f32.mxu0 %vm6258_vm0, %v7460_v59  ;;  %v796_v34 = vld [vmem:[#allocation2 + $0x133] sm:$0xff] }
 0x1da   : > { %v1418_v51 = vpop.f32.mrf.mxu1  ;;  %v1683_v3 = vpop.f32.mrf.mxu0  ;;  %3484 = vmatpush2.msra.mxu0 %v3057_v10  ;;  %v3056_v57 = vld [vmem:[%s9292_s4 + $0x190] sm:$0xff]  ;;  %v6237_v49 = vld [vmem:[#allocation2 + $0x139] sm:$0xff] }
 0x1db   : > { %3485 = vmatprep.subr.mxu0 %v7460_v59  ;;  %v758_v51 = vld [vmem:[#allocation2 + $0x14a] sm:$0xff]  ;;  %v1162_v3 = vadd.f32 %v7624_v35, %v7095_v54 }
 0x1dc   : > { %v1421_v13 = vpop.f32.mrf.mxu1  ;;  %v1686_v18 = vpop.f32.mrf.mxu0  ;;  %1995 = vmatmul.mubr.f32.gmra.mxu1 %v6235_v21  ;;  %5764 = vmatmul.mubr.f32.gmra.mxu0 %v795_v11 }
 0x1dd   : > { %v1422_v22 = vadd.f32 %v1421_v13, %v1152_v9  ;;  %v7617_v23 = vadd.f32 %v1686_v18, %v1417_v58  ;;  %1999 = vmatprep.mubr.f32.mxu1 %v756_v4  ;;  %5766 = vmatprep.mubr.msk.f32.mxu0 %vm6258_vm0, %v7460_v59  ;;  %v797_v58 = vld [vmem:[#allocation2 + $0x13b] sm:$0xff]  ;;  %v3055_v4 = vld [vmem:[%s9292_s4 + $0x188] sm:$0xff] }
 0x1de   : > { %v1423_v27 = vpop.f32.mrf.mxu1  ;;  %v1688_v60 = vpop.f32.mrf.mxu0  ;;  %3486 = vmatpush2.msra.mxu0 %v3056_v57  ;;  %v6238_v13 = vld [vmem:[#allocation2 + $0x141] sm:$0xff] }
 0x1df   : > { %3487 = vmatprep.subr.mxu0 %v7460_v59  ;;  %v759_v27 = vld [vmem:[#allocation2 + $0x152] sm:$0xff]  ;;  %v1167_v60 = vadd.f32 %v7624_v35, %v7112_v7 }
 0x1e0   : > { %v1426_v43 = vpop.f32.mrf.mxu1  ;;  %v1691_v44 = vpop.f32.mrf.mxu0  ;;  %2000 = vmatmul.mubr.f32.gmra.mxu1 %v6237_v49  ;;  %5767 = vmatmul.mubr.f32.gmra.mxu0 %v796_v34 }
 0x1e1   : > { %v1427_v63 = vadd.f32 %v1426_v43, %v1157_v36  ;;  %v7632_v50 = vadd.f32 %v1691_v44, %v1422_v22  ;;  %2004 = vmatprep.mubr.f32.mxu1 %v757_v2  ;;  %5769 = vmatprep.mubr.msk.f32.mxu0 %vm6258_vm0, %v7460_v59  ;;  %v798_v22 = vld [vmem:[#allocation2 + $0x143] sm:$0xff] }
 0x1e2   : > { %v1428_v40 = vpop.f32.mrf.mxu1  ;;  %v1693_v11 = vpop.f32.mrf.mxu0  ;;  %3488 = vmatpush2.msra.mxu0 %v3055_v4  ;;  %v3054_v2 = vld [vmem:[%s9292_s4 + $0x180] sm:$0xff]  ;;  %v6239_v43 = vld [vmem:[#allocation2 + $0x149] sm:$0xff]  ;;  %v6240_v4 = vld [vmem:[#allocation2 + $0x151] sm:$0xff] }
 0x1e3   : > { %3489 = vmatprep.subr.mxu0 %v7460_v59  ;;  %v760_v40 = vld [vmem:[#allocation2 + $0x15a] sm:$0xff]  ;;  %v1172_v11 = vadd.f32 %v7624_v35, %v7124_v20  ;;  %v1177_v20 = vadd.f32 %v7624_v35, %v7134_v33  ;;  %v1182_v33 = vadd.f32 %v7624_v35, %v7150_v48 }
 0x1e4   : > { %v1431_v9 = vpop.f32.mrf.mxu1  ;;  %v1696_v10 = vpop.f32.mrf.mxu0  ;;  %2005 = vmatmul.mubr.f32.gmra.mxu1 %v6238_v13  ;;  %5770 = vmatmul.mubr.f32.gmra.mxu0 %v797_v58  ;;  %v800_v13 = vld [vmem:[#allocation2 + $0x153] sm:$0xff] }
 0x1e5   : > { %v1432_v18 = vadd.f32 %v1431_v9, %v1162_v3  ;;  %v7642_v21 = vadd.f32 %v1696_v10, %v1427_v63  ;;  %2009 = vmatprep.mubr.f32.mxu1 %v758_v51  ;;  %5772 = vmatprep.mubr.msk.f32.mxu0 %vm6258_vm0, %v7460_v59  ;;  %v799_v63 = vld [vmem:[#allocation2 + $0x14b] sm:$0xff] }
 0x1e6   : > { %v1433_v54 = vpop.f32.mrf.mxu1  ;;  %v1698_v34 = vpop.f32.mrf.mxu0  ;;  %3490 = vmatpush2.msra.mxu0 %v3054_v2 }
 0x1e7   : > { %3967 = vmatprep.subr.mxu0 %v7460_v59  ;;  %v761_v54 = vld [vmem:[#allocation2 + $0x162] sm:$0xff] }
 0x1e8   : > { %v1436_v36 = vpop.f32.mrf.mxu1  ;;  %v1701_v57 = vpop.f32.mrf.mxu0  ;;  %2010 = vmatmul.mubr.f32.gmra.mxu1 %v6239_v43  ;;  %5773 = vmatmul.mubr.f32.gmra.mxu0 %v798_v22  ;;  %v801_v43 = vld [vmem:[#allocation2 + $0x15b] sm:$0xff] }
 0x1e9   : > { %v1437_v44 = vadd.f32 %v1436_v36, %v1167_v60  ;;  %v7652_v49 = vadd.f32 %v1701_v57, %v1432_v18  ;;  %2014 = vmatprep.mubr.f32.mxu1 %v759_v27  ;;  %5775 = vmatprep.mubr.msk.f32.mxu0 %vm6258_vm0, %v7460_v59  ;;  %v6241_v60 = vld [vmem:[#allocation2 + $0x159] sm:$0xff]  ;;  %v720_v57 = vld [vmem:[#allocation2 + $0x161] sm:$0xff] }
 0x1ea   : > { %v1438_v7 = vpop.f32.mrf.mxu1  ;;  %v1703_v58 = vpop.f32.mrf.mxu0 }
 0x1eb   : > { %v762_v7 = vld [vmem:[#allocation2 + $0x16a] sm:$0xff] }
 0x1ec   : > { %v1441_v51 = vpop.f32.mrf.mxu1  ;;  %v1706_v3 = vpop.f32.mrf.mxu0  ;;  %2015 = vmatmul.mubr.f32.gmra.mxu1 %v6240_v4  ;;  %5776 = vmatmul.mubr.f32.gmra.mxu0 %v799_v63  ;;  %v802_v4 = vld [vmem:[#allocation2 + $0x163] sm:$0xff] }
 0x1ed   : > { %v1442_v9 = vadd.f32 %v1441_v51, %v1172_v11  ;;  %v7659_v10 = vadd.f32 %v1706_v3, %v1437_v44  ;;  %2019 = vmatprep.mubr.f32.mxu1 %v760_v40  ;;  %5778 = vmatprep.mubr.msk.f32.mxu0 %vm6258_vm0, %v7460_v59  ;;  %v721_v3 = vld [vmem:[#allocation2 + $0x169] sm:$0xff] }
 0x1ee   : > { %v1443_v18 = vpop.f32.mrf.mxu1  ;;  %v1708_v22 = vpop.f32.mrf.mxu0 }
 0x1ef   : > { %v2756_v18 = vld [vmem:[#allocation2 + $0x6] sm:$0xff]  ;;  %v1187_v22 = vadd.f32 %v7624_v35, %v7160_v5  ;;  %v2757_v5 = vld [vmem:[#allocation2 + $0xe] sm:$0xff] }
 0x1f0   : > { %v1446_v34 = vpop.f32.mrf.mxu1  ;;  %v1711_v27 = vpop.f32.mrf.mxu0  ;;  %2020 = vmatmul.mubr.f32.gmra.mxu1 %v6241_v60  ;;  %5779 = vmatmul.mubr.f32.gmra.mxu0 %v800_v13  ;;  %v2715_v60 = vld [vmem:[#allocation2 + $0x5] sm:$0xff] }
 0x1f1   : > { %v1447_v2 = vadd.f32 %v1446_v34, %v1177_v20  ;;  %v7665_v36 = vadd.f32 %v1711_v27, %v1442_v9  ;;  %2024 = vmatprep.mubr.f32.mxu1 %v761_v54  ;;  %5781 = vmatprep.mubr.msk.f32.mxu0 %vm6258_vm0, %v7460_v59  ;;  %v803_v27 = vld [vmem:[#allocation2 + $0x16b] sm:$0xff] }
 0x1f2   : > { %v1448_v44 = vpop.f32.mrf.mxu1  ;;  %v1713_v63 = vpop.f32.mrf.mxu0 }
 0x1f3   : > { %v1192_v44 = vadd.f32 %v7624_v35, %v7167_v17  ;;  %v3083_v17 = vld [vmem:[%s9292_s4 + $0x268] sm:$0xff] }
 0x1f4   : > { %v1451_v58 = vpop.f32.mrf.mxu1  ;;  %v1716_v40 = vpop.f32.mrf.mxu0  ;;  %2025 = vmatmul.mubr.f32.gmra.mxu1 %v720_v57  ;;  %5782 = vmatmul.mubr.f32.gmra.mxu0 %v801_v43  ;;  %v3085_v43 = vld [vmem:[%s9292_s4 + $0x278] sm:$0xff] }
 0x1f5   : > { %v1452_v11 = vadd.f32 %v1451_v58, %v1182_v33  ;;  %v7671_v51 = vadd.f32 %v1716_v40, %v1447_v2  ;;  %2029 = vmatprep.mubr.f32.mxu1 %v762_v7  ;;  %5784 = vmatprep.mubr.msk.f32.mxu0 %vm6258_vm0, %v7460_v59  ;;  %v3084_v33 = vld [vmem:[%s9292_s4 + $0x270] sm:$0xff] }
 0x1f6   : > { %v1453_v9 = vpop.f32.mrf.mxu1  ;;  %v1718_v13 = vpop.f32.mrf.mxu0 }
 0x1f7   : > { %v1197_v9 = vadd.f32 %v7624_v35, %v7172_v26  ;;  %v3081_v26 = vld [vmem:[%s9292_s4 + $0x258] sm:$0xff] }
 0x1f8   : > { %v1456_v48 = vpop.f32.mrf.mxu1  ;;  %v1721_v54 = vpop.f32.mrf.mxu0  ;;  %2030 = vmatmul.mubr.f32.gmra.mxu1 %v721_v3  ;;  %5785 = vmatmul.mubr.f32.gmra.mxu0 %v802_v4 }
 0x1f9   : > { %v1457_v20 = vadd.f32 %v1456_v48, %v1187_v22  ;;  %v7677_v34 = vadd.f32 %v1721_v54, %v1452_v11  ;;  %5787 = vmatprep.mubr.msk.f32.mxu0 %vm6258_vm0, %v7460_v59  ;;  %3221 = vmatprep.mubr.f32.mxu1 %v2756_v18  ;;  %v2716_v11 = vld [vmem:[#allocation2 + $0xd] sm:$0xff]  ;;  %v3082_v22 = vld [vmem:[%s9292_s4 + $0x260] sm:$0xff] }
 0x1fa   : > { %v1458_v2 = vpop.f32.mrf.mxu1  ;;  %v1723_v57 = vpop.f32.mrf.mxu0 }
 0x1fc   : > { %v1461_v63 = vpop.f32.mrf.mxu1  ;;  %v1726_v7 = vpop.f32.mrf.mxu0  ;;  %5788 = vmatmul.mubr.f32.gmra.mxu0 %v803_v27  ;;  %3222 = vmatmul.mubr.f32.vlgmr.msra.gmra.mxu1 %v2715_v60  ;;  %v1202_v60 = vadd.f32 %v7624_v35, %v7182_v41  ;;  %v3079_v41 = vld [vmem:[%s9292_s4 + $0x248] sm:$0xff] }
 0x1fd   : > { %v1462_v58 = vadd.f32 %v1461_v63, %v1192_v44  ;;  %v7689_v40 = vadd.f32 %v1726_v7, %v1457_v20  ;;  %3698 = vmatpush1.msra.mxu1 %v3085_v43  ;;  %3226 = vmatprep.mubr.f32.mxu1 %v2757_v5  ;;  %v3080_v43 = vld [vmem:[%s9292_s4 + $0x250] sm:$0xff] }
 0x1fe   : > { %v1463_v3 = vpop.f32.mrf.mxu1  ;;  %v1728_v4 = vpop.f32.mrf.mxu0  ;;  %3699 = vmatprep.subr.mxu1 %v7460_v59 }
 0x1ff   : > { %3700 = vmatpush1.msra.mxu1 %v3084_v33  ;;  %v1207_v33 = vadd.f32 %v7624_v35, %v7192_v56  ;;  %v3078_v3 = vld [vmem:[%s9292_s4 + $0x240] sm:$0xff]  ;;  %v3077_v56 = vld [vmem:[%s9292_s4 + $0x238] sm:$0xff] }
 0x200   : > { %v1466_v13 = vpop.f32.mrf.mxu1  ;;  %v1731_v18 = vpop.f32.mrf.mxu0  ;;  %3227 = vmatmul.mubr.f32.gmra.mxu1 %v2716_v11  ;;  %3701 = vmatprep.subr.mxu1 %v7460_v59 }
 0x201   : > { %v1467_v48 = vadd.f32 %v1466_v13, %v1197_v9  ;;  %v7701_v54 = vadd.f32 %v1731_v18, %v1462_v58  ;;  %3702 = vmatpush1.msra.mxu1 %v3083_v17  ;;  %v1212_v18 = vadd.f32 %v7624_v35, %v7200_v8  ;;  %v3075_v8 = vld [vmem:[%s9292_s4 + $0x228] sm:$0xff] }
 0x202   : > { %v1468_v20 = vpop.f32.mrf.mxu1  ;;  %v1733_v27 = vpop.f32.mrf.mxu0  ;;  %3703 = vmatprep.subr.mxu1 %v7460_v59 }
 0x203   : > { %3704 = vmatpush1.msra.mxu1 %v3082_v22  ;;  %v3076_v20 = vld [vmem:[%s9292_s4 + $0x230] sm:$0xff] }
 0x204   : > { %v1471_v2 = vpop.f32.mrf.mxu1  ;;  %v1736_v57 = vpop.f32.mrf.mxu0  ;;  %3705 = vmatprep.subr.mxu1 %v7460_v59 }
 0x205   : > { %v1472_v5 = vadd.f32 %v1471_v2, %v1202_v60  ;;  %v7713_v44 = vadd.f32 %v1736_v57, %v1467_v48  ;;  %3706 = vmatpush1.msra.mxu1 %v3081_v26  ;;  %v1217_v57 = vadd.f32 %v7624_v35, %v7218_v31  ;;  %v3073_v31 = vld [vmem:[%s9292_s4 + $0x218] sm:$0xff] }
 0x206   : > { %v1473_v63 = vpop.f32.mrf.mxu1  ;;  %v1738_v7 = vpop.f32.mrf.mxu0  ;;  %3707 = vmatprep.subr.mxu1 %v7460_v59 }
 0x207   : > { %3708 = vmatpush1.msra.mxu1 %v3080_v43  ;;  %v3074_v63 = vld [vmem:[%s9292_s4 + $0x220] sm:$0xff] }
 0x208   : > { %v1476_v58 = vpop.f32.mrf.mxu1  ;;  %v1741_v11 = vpop.f32.mrf.mxu0  ;;  %3709 = vmatprep.subr.mxu1 %v7460_v59 }
 0x209   : > { %v1477_v4 = vadd.f32 %v1476_v58, %v1207_v33  ;;  %v7725_v17 = vadd.f32 %v1741_v11, %v1472_v5  ;;  %3710 = vmatpush1.msra.mxu1 %v3079_v41  ;;  %v1222_v11 = vadd.f32 %v7624_v35, %v7231_v46  ;;  %v3071_v46 = vld [vmem:[%s9292_s4 + $0x208] sm:$0xff] }
 0x20a   : > { %v1478_v9 = vpop.f32.mrf.mxu1  ;;  %v1743_v13 = vpop.f32.mrf.mxu0  ;;  %3711 = vmatprep.subr.mxu1 %v7460_v59 }
 0x20b   : > { %3712 = vmatpush1.msra.mxu1 %v3078_v3  ;;  %v3072_v9 = vld [vmem:[%s9292_s4 + $0x210] sm:$0xff] }
 0x20c   : > { %v1481_v22 = vpop.f32.mrf.mxu1  ;;  %v1746_v48 = vpop.f32.mrf.mxu0  ;;  %3713 = vmatprep.subr.mxu1 %v7460_v59 }
 0x20d   : > { %v1482_v27 = vadd.f32 %v1481_v22, %v1212_v18  ;;  %v7737_v26 = vadd.f32 %v1746_v48, %v1477_v4  ;;  %3714 = vmatpush1.msra.mxu1 %v3077_v56 }
 0x20e   : > { %v1483_v60 = vpop.f32.mrf.mxu1  ;;  %v1748_v2 = vpop.f32.mrf.mxu0  ;;  %3715 = vmatprep.subr.mxu1 %v7460_v59 }
 0x20f   : > { %3716 = vmatpush1.msra.mxu1 %v3076_v20  ;;  %v3070_v20 = vld [vmem:[%s9292_s4 + $0x200] sm:$0xff] }
 0x210   : > { %v1486_v43 = vpop.f32.mrf.mxu1  ;;  %v1751_v5 = vpop.f32.mrf.mxu0  ;;  %3717 = vmatprep.subr.mxu1 %v7460_v59 }
 0x211   : > { %v1487_v7 = vadd.f32 %v1486_v43, %v1217_v57  ;;  %v7749_v41 = vadd.f32 %v1751_v5, %v1482_v27  ;;  %3718 = vmatpush1.msra.mxu1 %v3075_v8  ;;  %v3101_v8 = vld [vmem:[%s9292_s4 + $0x2f8] sm:$0xff] }
 0x212   : > { %v1488_v33 = vpop.f32.mrf.mxu1  ;;  %v1753_v58 = vpop.f32.mrf.mxu0  ;;  %3719 = vmatprep.subr.mxu1 %v7460_v59 }
 0x213   : > { %3720 = vmatpush1.msra.mxu1 %v3074_v63  ;;  %v3100_v63 = vld [vmem:[%s9292_s4 + $0x2f0] sm:$0xff] }
 0x214   : > { %v1491_v3 = vpop.f32.mrf.mxu1  ;;  %v1756_v4 = vpop.f32.mrf.mxu0  ;;  %3721 = vmatprep.subr.mxu1 %v7460_v59 }
 0x215   : > { %v1492_v13 = vadd.f32 %v1491_v3, %v1222_v11  ;;  %v7761_v56 = vadd.f32 %v1756_v4, %v1487_v7  ;;  %3722 = vmatpush1.msra.mxu1 %v3073_v31  ;;  %v3099_v31 = vld [vmem:[%s9292_s4 + $0x2e8] sm:$0xff] }
 0x216   : > { %v1493_v18 = vpop.f32.mrf.mxu1  ;;  %v1758_v22 = vpop.f32.mrf.mxu0  ;;  %3723 = vmatprep.subr.mxu1 %v7460_v59 }
 0x217   : > { %3724 = vmatpush1.msra.mxu1 %v3072_v9 }
 0x218   : > { %v1761_v35 = vpop.f32.mrf.mxu0  ;;  %v1831_v48 = vpop.f32.mrf.mxu1  ;;  %3725 = vmatprep.subr.mxu1 %v7460_v59 }
 0x219   : > { %v7771_v27 = vadd.f32 %v1761_v35, %v1492_v13  ;;  %3726 = vmatpush1.msra.mxu1 %v3071_v46  ;;  %v1832_v57 = vadd.f32 %v1831_v48, %v7272_v61  ;;  %v7786_v61 = vpop.permute.xlu0 %2430  ;;  %v3098_v13 = vld [vmem:[%s9292_s4 + $0x2e0] sm:$0xff] }
 0x21a   : > { %v1763_v60 = vpop.f32.mrf.mxu0  ;;  %v1833_v2 = vpop.f32.mrf.mxu1  ;;  %3727 = vmatprep.subr.mxu1 %v7460_v59 }
 0x21b   : > { %3728 = vmatpush1.msra.mxu1 %v3070_v20 }
 0x21c   : > { %v1836_v43 = vpop.f32.mrf.mxu1  ;;  %v2101_v5 = vpop.f32.mrf.mxu0  ;;  %3729 = vmatprep.subr.mxu1 %v7460_v59 }
 0x21d   : > { %v2102_v7 = vadd.f32 %v2101_v5, %v1832_v57  ;;  %3730 = vmatpush2.msra.mxu1 %v3101_v8  ;;  %v1837_v11 = vadd.f32 %v1836_v43, %v7286_v29  ;;  %v3097_v29 = vld [vmem:[%s9292_s4 + $0x2d8] sm:$0xff]  ;;  %v3096_v57 = vld [vmem:[%s9292_s4 + $0x2d0] sm:$0xff]  ;;  %v7803_v43 = vpop.permute.xlu0 %2435 }
 0x21e   : > { %v1838_v33 = vpop.f32.mrf.mxu1  ;;  %v5669_v58 = vpop.f32.mrf.mxu0  ;;  %3731 = vmatprep.subr.mxu1 %v7460_v59 }
 0x21f   : > { %vm2305_vm1 = vcmp.ge.f32.partialorder %v2102_v7, 0.0  ;;  %v2346_v3 = vmul.f32 0.2, %v2102_v7  ;;  %3732 = vmatpush2.msra.mxu1 %v3100_v63  ;;  %v3095_v58 = vld [vmem:[%s9292_s4 + $0x2c8] sm:$0xff] }
 0x220   : > { %v1841_v4 = vpop.f32.mrf.mxu1  ;;  %v2106_v9 = vpop.f32.mrf.mxu0  ;;  %3733 = vmatprep.subr.mxu1 %v7460_v59 }
 0x221   : > { %v2387_v18 = vsel %vm2305_vm1, %v2102_v7, %v2346_v3  ;;  %v2107_v22 = vadd.f32 %v2106_v9, %v1837_v11  ;;  %3734 = vmatpush2.msra.mxu1 %v3099_v31  ;;  %v1842_v20 = vadd.f32 %v1841_v4, %v7300_v39  ;;  %v7810_v31 = vpop.permute.xlu1 %2440 }
 0x222   : > { %v2633_v46 = vmul.f32 %v7786_v61, %v2387_v18  ;;  %v1843_v35 = vpop.f32.mrf.mxu1  ;;  %v5672_v48 = vpop.f32.mrf.mxu0  ;;  %3735 = vmatprep.subr.mxu1 %v7460_v59 }
 0x223   : > { %vm2306_vm2 = vcmp.ge.f32.partialorder %v2107_v22, 0.0  ;;  %v2347_v60 = vmul.f32 0.2, %v2107_v22  ;;  %3736 = vmatpush2.msra.mxu1 %v3098_v13  ;;  %v3094_v13 = vld [vmem:[%s9292_s4 + $0x2c0] sm:$0xff] }
 0x224   : > { %2674 = vst [vmem:[#allocation2 + $0x18] sm:$0xff] %v2633_v46  ;;  %v1846_v2 = vpop.f32.mrf.mxu1  ;;  %v2111_v8 = vpop.f32.mrf.mxu0  ;;  %3737 = vmatprep.subr.mxu1 %v7460_v59 }
 0x225   : > { %v2388_v5 = vsel %vm2306_vm2, %v2107_v22, %v2347_v60  ;;  %v2112_v63 = vadd.f32 %v2111_v8, %v1842_v20  ;;  %3738 = vmatpush2.msra.mxu1 %v3097_v29  ;;  %v1847_v11 = vadd.f32 %v1846_v2, %v7314_v52  ;;  %v2797_v52 = vld [vmem:[#allocation2 + $0x7] sm:$0xff]  ;;  %v3117_v29 = vld [vmem:[%s9292_s4 + $0x378] sm:$0xff] }
 0x226   : > { %v2634_v7 = vmul.f32 %v7803_v43, %v2388_v5  ;;  %v1848_v39 = vpop.f32.mrf.mxu1  ;;  %v5675_v33 = vpop.f32.mrf.mxu0  ;;  %3739 = vmatprep.subr.mxu1 %v7460_v59 }
 0x227   : > { %vm2307_vm3 = vcmp.ge.f32.partialorder %v2112_v63, 0.0  ;;  %v2348_v3 = vmul.f32 0.2, %v2112_v63  ;;  %3740 = vmatpush2.msra.mxu1 %v3096_v57 }
 0x228   : > { %2675 = vst [vmem:[#allocation2 + $0x20] sm:$0xff] %v2634_v7  ;;  %v1851_v4 = vpop.f32.mrf.mxu1  ;;  %v2116_v9 = vpop.f32.mrf.mxu0  ;;  %3741 = vmatprep.subr.mxu1 %v7460_v59  ;;  %v3093_v7 = vld [vmem:[%s9292_s4 + $0x2b8] sm:$0xff] }
 0x229   : > { %v2389_v18 = vsel %vm2307_vm3, %v2112_v63, %v2348_v3  ;;  %v2117_v22 = vadd.f32 %v2116_v9, %v1847_v11  ;;  %3742 = vmatpush2.msra.mxu1 %v3095_v58  ;;  %v1852_v20 = vadd.f32 %v1851_v4, %v7328_v62  ;;  %v2798_v3 = vld [vmem:[#allocation2 + $0xf] sm:$0xff]  ;;  %v7835_v9 = vld [vmem:[#allocation2] sm:$0xff] }
 0x22a   : > { %v2635_v46 = vmul.f32 %v7810_v31, %v2389_v18  ;;  %v1853_v35 = vpop.f32.mrf.mxu1  ;;  %v5678_v48 = vpop.f32.mrf.mxu0  ;;  %3743 = vmatprep.subr.mxu1 %v7460_v59  ;;  %v3116_v4 = vld [vmem:[%s9292_s4 + $0x370] sm:$0xff] }
 0x22b   : > { %vm2308_vm4 = vcmp.ge.f32.partialorder %v2117_v22, 0.0  ;;  %v2349_v60 = vmul.f32 0.2, %v2117_v22  ;;  %v2758_v2 = vld [vmem:[#allocation2 + $0x16] sm:$0xff]  ;;  %3744 = vmatpush2.msra.mxu1 %v3094_v13  ;;  %v7829_v59 = vpop.permute.xlu1 %2445 }
 0x22c   : > { %v7823_v8 = vld [vmem:[#allocation2 + $0x17] sm:$0xff]  ;;  %2676 = vst [vmem:[#allocation2 + $0x28] sm:$0xff] %v2635_v46  ;;  %v1856_v5 = vpop.f32.mrf.mxu1  ;;  %v2121_v63 = vpop.f32.mrf.mxu0  ;;  %3231 = vmatprep.mubr.f32.mxu1 %v2758_v2  ;;  %3745 = vmatprep.subr.mxu1 %v7835_v9 }
 0x22d   : > { %v2717_v57 = vld [vmem:[#allocation2 + $0x15] sm:$0xff]  ;;  %3491 = vmatprep.mubr.f32.mxu0 %v7823_v8  ;;  %v2390_v62 = vsel %vm2308_vm4, %v2117_v22, %v2349_v60  ;;  %v2122_v39 = vadd.f32 %v2121_v63, %v1852_v20  ;;  %v1857_v13 = vadd.f32 %v1856_v5, %v7342_v15  ;;  %3746 = vmatpush2.msra.mxu1 %v3093_v7  ;;  %v7846_v15 = vpop.permute.xlu0 %2450  ;;  %v3115_v63 = vld [vmem:[%s9292_s4 + $0x368] sm:$0xff] }
 0x22e   : > { %3232 = vmatmul.mubr.f32.gmra.mxu1 %v2717_v57  ;;  %3492 = vmatmul.mubr.f32.vlgmr.msra.gmra.mxu0 %v2797_v52  ;;  %v2636_v33 = vmul.f32 %v7829_v59, %v2390_v62  ;;  %v1858_v58 = vpop.f32.mrf.mxu1  ;;  %v5681_v11 = vpop.f32.mrf.mxu0 }
 0x22f   : > { %3968 = vmatpush1.msra.mxu0 %v3117_v29  ;;  %vm2309_vm5 = vcmp.ge.f32.partialorder %v2122_v39, 0.0  ;;  %v2350_v18 = vmul.f32 0.2, %v2122_v39  ;;  %v2759_v22 = vld [vmem:[#allocation2 + $0x1e] sm:$0xff]  ;;  %v3092_v29 = vld [vmem:[%s9292_s4 + $0x2b0] sm:$0xff]  ;;  %3747 = vmatprep.subr.mxu1 %v7835_v9 }
 0x230   : > { %v7839_v46 = vld [vmem:[#allocation2 + $0x1f] sm:$0xff]  ;;  %3969 = vmatprep.subr.mxu0 %v7835_v9  ;;  %2677 = vst [vmem:[#allocation2 + $0x30] sm:$0xff] %v2636_v33  ;;  %v1861_v48 = vpop.f32.mrf.mxu1  ;;  %v2126_v52 = vpop.f32.mrf.mxu0  ;;  %3236 = vmatprep.mubr.f32.mxu1 %v2759_v22 }
 0x231   : > { %v2718_v35 = vld [vmem:[#allocation2 + $0x1d] sm:$0xff]  ;;  %3496 = vmatprep.mubr.f32.mxu0 %v7839_v46  ;;  %v2391_v20 = vsel %vm2309_vm5, %v2122_v39, %v2350_v18  ;;  %v2127_v60 = vadd.f32 %v2126_v52, %v1857_v13  ;;  %3970 = vmatpush1.msra.mxu0 %v3116_v4  ;;  %v1862_v7 = vadd.f32 %v1861_v48, %v7356_v24  ;;  %v3091_v4 = vld [vmem:[%s9292_s4 + $0x2a8] sm:$0xff]  ;;  %v7861_v24 = vpop.permute.xlu1 %2455 }
 0x232   : > { %3237 = vmatmul.mubr.f32.gmra.mxu1 %v2718_v35  ;;  %3497 = vmatmul.mubr.f32.gmra.mxu0 %v2798_v3  ;;  %v2637_v2 = vmul.f32 %v7846_v15, %v2391_v20  ;;  %v1863_v57 = vpop.f32.mrf.mxu1  ;;  %v5684_v5 = vpop.f32.mrf.mxu0  ;;  %v3114_v52 = vld [vmem:[%s9292_s4 + $0x360] sm:$0xff] }
 0x233   : > { %vm2310_vm6 = vcmp.ge.f32.partialorder %v2127_v60, 0.0  ;;  %v2351_v62 = vmul.f32 0.2, %v2127_v60  ;;  %v2760_v33 = vld [vmem:[#allocation2 + $0x26] sm:$0xff]  ;;  %3971 = vmatprep.subr.mxu0 %v7835_v9  ;;  %3748 = vmatpush2.msra.mxu1 %v3092_v29 }
 0x234   : > { %v7854_v39 = vld [vmem:[#allocation2 + $0x27] sm:$0xff]  ;;  %2678 = vst [vmem:[#allocation2 + $0x38] sm:$0xff] %v2637_v2  ;;  %v1866_v11 = vpop.f32.mrf.mxu1  ;;  %v2131_v3 = vpop.f32.mrf.mxu0  ;;  %3241 = vmatprep.mubr.f32.mxu1 %v2760_v33  ;;  %3972 = vmatpush1.msra.mxu0 %v3115_v63 }
 0x235   : > { %v2719_v58 = vld [vmem:[#allocation2 + $0x25] sm:$0xff]  ;;  %3501 = vmatprep.mubr.f32.mxu0 %v7854_v39  ;;  %v2392_v13 = vsel %vm2310_vm6, %v2127_v60, %v2351_v62  ;;  %v2132_v18 = vadd.f32 %v2131_v3, %v1862_v7  ;;  %3749 = vmatprep.subr.mxu1 %v7835_v9  ;;  %v1867_v29 = vadd.f32 %v1866_v11, %v7370_v38  ;;  %v7877_v38 = vpop.permute.xlu0 %2460  ;;  %v3113_v3 = vld [vmem:[%s9292_s4 + $0x358] sm:$0xff] }
 0x236   : > { %3242 = vmatmul.mubr.f32.gmra.mxu1 %v2719_v58  ;;  %3502 = vmatmul.mubr.f32.gmra.mxu0 %v7823_v8  ;;  %v2638_v22 = vmul.f32 %v7861_v24, %v2392_v13  ;;  %v1868_v35 = vpop.f32.mrf.mxu1  ;;  %v5687_v48 = vpop.f32.mrf.mxu0  ;;  %v3090_v63 = vld [vmem:[%s9292_s4 + $0x2a0] sm:$0xff] }
 0x237   : > { %vm2311_vm7 = vcmp.ge.f32.partialorder %v2132_v18, 0.0  ;;  %v2352_v20 = vmul.f32 0.2, %v2132_v18  ;;  %v2761_v60 = vld [vmem:[#allocation2 + $0x2e] sm:$0xff]  ;;  %3973 = vmatprep.subr.mxu0 %v7835_v9  ;;  %3750 = vmatpush2.msra.mxu1 %v3091_v4 }
 0x238   : > { %v7870_v2 = vld [vmem:[#allocation2 + $0x2f] sm:$0xff]  ;;  %2679 = vst [vmem:[#allocation2 + $0x40] sm:$0xff] %v2638_v22  ;;  %v1871_v8 = vpop.f32.mrf.mxu1  ;;  %v2136_v5 = vpop.f32.mrf.mxu0  ;;  %3246 = vmatprep.mubr.f32.mxu1 %v2761_v60  ;;  %3974 = vmatpush1.msra.mxu0 %v3114_v52  ;;  %v3089_v52 = vld [vmem:[%s9292_s4 + $0x298] sm:$0xff] }
 0x239   : > { %v2720_v57 = vld [vmem:[#allocation2 + $0x2d] sm:$0xff]  ;;  %3506 = vmatprep.mubr.f32.mxu0 %v7870_v2  ;;  %v2393_v7 = vsel %vm2311_vm7, %v2132_v18, %v2352_v20  ;;  %v2137_v62 = vadd.f32 %v2136_v5, %v1867_v29  ;;  %3751 = vmatprep.subr.mxu1 %v7835_v9  ;;  %v1872_v4 = vadd.f32 %v1871_v8, %v7384_v53  ;;  %v7893_v53 = vpop.permute.xlu1 %2465 }
 0x23a   : > { %3247 = vmatmul.mubr.f32.gmra.mxu1 %v2720_v57  ;;  %3507 = vmatmul.mubr.f32.gmra.mxu0 %v7839_v46  ;;  %v2639_v33 = vmul.f32 %v7877_v38, %v2393_v7  ;;  %v1873_v58 = vpop.f32.mrf.mxu1  ;;  %v5690_v11 = vpop.f32.mrf.mxu0  ;;  %v3112_v5 = vld [vmem:[%s9292_s4 + $0x350] sm:$0xff] }
 0x23b   : > { %vm2312_vm8 = vcmp.ge.f32.partialorder %v2137_v62, 0.0  ;;  %v2353_v13 = vmul.f32 0.2, %v2137_v62  ;;  %v2762_v18 = vld [vmem:[#allocation2 + $0x36] sm:$0xff]  ;;  %3975 = vmatprep.subr.mxu0 %v7835_v9  ;;  %3752 = vmatpush2.msra.mxu1 %v3090_v63 }
 0x23c   : > { %v7886_v22 = vld [vmem:[#allocation2 + $0x37] sm:$0xff]  ;;  %2680 = vst [vmem:[#allocation2 + $0x48] sm:$0xff] %v2639_v33  ;;  %v1876_v46 = vpop.f32.mrf.mxu1  ;;  %v2141_v48 = vpop.f32.mrf.mxu0  ;;  %3251 = vmatprep.mubr.f32.mxu1 %v2762_v18  ;;  %3976 = vmatpush1.msra.mxu0 %v3113_v3 }
 0x23d   : > { %v2721_v35 = vld [vmem:[#allocation2 + $0x35] sm:$0xff]  ;;  %3511 = vmatprep.mubr.f32.mxu0 %v7886_v22  ;;  %v2394_v29 = vsel %vm2312_vm8, %v2137_v62, %v2353_v13  ;;  %v2142_v20 = vadd.f32 %v2141_v48, %v1872_v4  ;;  %3753 = vmatprep.subr.mxu1 %v7835_v9  ;;  %v1877_v63 = vadd.f32 %v1876_v46, %v7398_v6  ;;  %v7909_v6 = vpop.permute.xlu0 %2470  ;;  %v3111_v48 = vld [vmem:[%s9292_s4 + $0x348] sm:$0xff] }
 0x23e   : > { %3252 = vmatmul.mubr.f32.gmra.mxu1 %v2721_v35  ;;  %3512 = vmatmul.mubr.f32.gmra.mxu0 %v7854_v39  ;;  %v2640_v60 = vmul.f32 %v7893_v53, %v2394_v29  ;;  %v1878_v57 = vpop.f32.mrf.mxu1  ;;  %v5693_v8 = vpop.f32.mrf.mxu0  ;;  %v3088_v3 = vld [vmem:[%s9292_s4 + $0x290] sm:$0xff]  ;;  %9331 = vst [vmem:[#allocation3_spill] sm:$0xff] %v7909_v6 }
 0x23f   : > { %vm2313_vm9 = vcmp.ge.f32.partialorder %v2142_v20, 0.0  ;;  %v2354_v7 = vmul.f32 0.2, %v2142_v20  ;;  %v2763_v62 = vld [vmem:[#allocation2 + $0x3e] sm:$0xff]  ;;  %3977 = vmatprep.subr.mxu0 %v7835_v9  ;;  %3754 = vmatpush2.msra.mxu1 %v3089_v52 }
 0x240   : > { %v7902_v33 = vld [vmem:[#allocation2 + $0x3f] sm:$0xff]  ;;  %2681 = vst [vmem:[#allocation2 + $0x50] sm:$0xff] %v2640_v60  ;;  %v1881_v39 = vpop.f32.mrf.mxu1  ;;  %v2146_v11 = vpop.f32.mrf.mxu0  ;;  %3256 = vmatprep.mubr.f32.mxu1 %v2763_v62  ;;  %3978 = vmatpush1.msra.mxu0 %v3112_v5  ;;  %v3087_v5 = vld [vmem:[%s9292_s4 + $0x288] sm:$0xff] }
 0x241   : > { %v2722_v58 = vld [vmem:[#allocation2 + $0x3d] sm:$0xff]  ;;  %3516 = vmatprep.mubr.f32.mxu0 %v7902_v33  ;;  %v2395_v4 = vsel %vm2313_vm9, %v2142_v20, %v2354_v7  ;;  %v2147_v13 = vadd.f32 %v2146_v11, %v1877_v63  ;;  %3755 = vmatprep.subr.mxu1 %v7835_v9  ;;  %v1882_v52 = vadd.f32 %v1881_v39, %v7412_v19  ;;  %v7922_v63 = vpop.permute.xlu1 %2475 }
 0x242   : > { %3257 = vmatmul.mubr.f32.gmra.mxu1 %v2722_v58  ;;  %3517 = vmatmul.mubr.f32.gmra.mxu0 %v7870_v2  ;;  %v2641_v18 = vmul.f32 %v7909_v6, %v2395_v4  ;;  %v1883_v35 = vpop.f32.mrf.mxu1  ;;  %v5696_v46 = vpop.f32.mrf.mxu0  ;;  %9332 = vst [vmem:[#allocation4_spill] sm:$0xff] %v7922_v63  ;;  %v3110_v11 = vld [vmem:[%s9292_s4 + $0x340] sm:$0xff] }
 0x243   : > { %vm2314_vm10 = vcmp.ge.f32.partialorder %v2147_v13, 0.0  ;;  %v2355_v29 = vmul.f32 0.2, %v2147_v13  ;;  %v2764_v20 = vld [vmem:[#allocation2 + $0x46] sm:$0xff]  ;;  %3979 = vmatprep.subr.mxu0 %v7835_v9  ;;  %3756 = vmatpush2.msra.mxu1 %v3088_v3 }
 0x244   : > { %v2805_v60 = vld [vmem:[#allocation2 + $0x47] sm:$0xff]  ;;  %2682 = vst [vmem:[#allocation2 + $0x58] sm:$0xff] %v2641_v18  ;;  %v1886_v2 = vpop.f32.mrf.mxu1  ;;  %v2151_v8 = vpop.f32.mrf.mxu0  ;;  %3261 = vmatprep.mubr.f32.mxu1 %v2764_v20  ;;  %3980 = vmatpush1.msra.mxu0 %v3111_v48 }
 0x245   : > { %v2723_v57 = vld [vmem:[#allocation2 + $0x45] sm:$0xff]  ;;  %3521 = vmatprep.mubr.f32.mxu0 %v2805_v60  ;;  %v2396_v19 = vsel %vm2314_vm10, %v2147_v13, %v2355_v29  ;;  %v2152_v7 = vadd.f32 %v2151_v8, %v1882_v52  ;;  %3757 = vmatprep.subr.mxu1 %v7835_v9  ;;  %v1887_v3 = vadd.f32 %v1886_v2, %v7426_v32  ;;  %v7935_v52 = vpop.permute.xlu0 %2480  ;;  %v3109_v8 = vld [vmem:[%s9292_s4 + $0x338] sm:$0xff] }
 0x246   : > { %3262 = vmatmul.mubr.f32.gmra.mxu1 %v2723_v57  ;;  %3522 = vmatmul.mubr.f32.gmra.mxu0 %v7886_v22  ;;  %v2642_v62 = vmul.f32 %v7922_v63, %v2396_v19  ;;  %v1888_v58 = vpop.f32.mrf.mxu1  ;;  %v5699_v39 = vpop.f32.mrf.mxu0  ;;  %v3086_v48 = vld [vmem:[%s9292_s4 + $0x280] sm:$0xff]  ;;  %9333 = vst [vmem:[#allocation5_spill] sm:$0xff] %v7935_v52 }
 0x247   : > { %vm2315_vm11 = vcmp.ge.f32.partialorder %v2152_v7, 0.0  ;;  %v2356_v4 = vmul.f32 0.2, %v2152_v7  ;;  %v2765_v13 = vld [vmem:[#allocation2 + $0x4e] sm:$0xff]  ;;  %3981 = vmatprep.subr.mxu0 %v7835_v9  ;;  %3758 = vmatpush2.msra.mxu1 %v3087_v5 }
 0x248   : > { %v2806_v18 = vld [vmem:[#allocation2 + $0x4f] sm:$0xff]  ;;  %2683 = vst [vmem:[#allocation2 + $0x60] sm:$0xff] %v2642_v62  ;;  %v1891_v22 = vpop.f32.mrf.mxu1  ;;  %v2156_v46 = vpop.f32.mrf.mxu0  ;;  %3266 = vmatprep.mubr.f32.mxu1 %v2765_v13  ;;  %3982 = vmatpush1.msra.mxu0 %v3110_v11 }
 0x249   : > { %v2724_v35 = vld [vmem:[#allocation2 + $0x4d] sm:$0xff]  ;;  %3526 = vmatprep.mubr.f32.mxu0 %v2806_v18  ;;  %v2397_v32 = vsel %vm2315_vm11, %v2152_v7, %v2356_v4  ;;  %v2157_v29 = vadd.f32 %v2156_v46, %v1887_v3  ;;  %3759 = vmatprep.subr.mxu1 %v7835_v9  ;;  %v1892_v5 = vadd.f32 %v1891_v22, %v7440_v47  ;;  %v7945_v11 = vpop.permute.xlu1 %2485 }
 0x24a   : > { %3267 = vmatmul.mubr.f32.gmra.mxu1 %v2724_v35  ;;  %3527 = vmatmul.mubr.f32.gmra.mxu0 %v7902_v33  ;;  %v2643_v20 = vmul.f32 %v7935_v52, %v2397_v32  ;;  %v1893_v57 = vpop.f32.mrf.mxu1  ;;  %v5702_v2 = vpop.f32.mrf.mxu0  ;;  %9334 = vst [vmem:[#allocation6_spill] sm:$0xff] %v7945_v11  ;;  %v3108_v22 = vld [vmem:[%s9292_s4 + $0x330] sm:$0xff] }
 0x24b   : > { %vm2316_vm12 = vcmp.ge.f32.partialorder %v2157_v29, 0.0  ;;  %v2357_v19 = vmul.f32 0.2, %v2157_v29  ;;  %v2766_v7 = vld [vmem:[#allocation2 + $0x56] sm:$0xff]  ;;  %3983 = vmatprep.subr.mxu0 %v7835_v9  ;;  %3760 = vmatpush2.msra.mxu1 %v3086_v48  ;;  %v7954_v2 = vpop.permute.xlu0 %2490 }
 0x24c   : > { %v2807_v62 = vld [vmem:[#allocation2 + $0x57] sm:$0xff]  ;;  %2684 = vst [vmem:[#allocation2 + $0x68] sm:$0xff] %v2643_v20  ;;  %v1896_v33 = vpop.f32.mrf.mxu1  ;;  %v2161_v39 = vpop.f32.mrf.mxu0  ;;  %3271 = vmatprep.mubr.f32.mxu1 %v2766_v7  ;;  %3984 = vmatpush1.msra.mxu0 %v3109_v8  ;;  %9335 = vst [vmem:[#allocation7_spill] sm:$0xff] %v7954_v2 }
 0x24d   : > { %v2725_v58 = vld [vmem:[#allocation2 + $0x55] sm:$0xff]  ;;  %3531 = vmatprep.mubr.f32.mxu0 %v2807_v62  ;;  %v2398_v3 = vsel %vm2316_vm12, %v2157_v29, %v2357_v19  ;;  %v2162_v4 = vadd.f32 %v2161_v39, %v1892_v5  ;;  %5790 = vmatprep.subr.mxu1 %v7835_v9  ;;  %v1897_v46 = vadd.f32 %v1896_v33, %v7454_v0 }
 0x24e   : > { %3272 = vmatmul.mubr.f32.gmra.mxu1 %v2725_v58  ;;  %3532 = vmatmul.mubr.f32.gmra.mxu0 %v2805_v60  ;;  %v2644_v47 = vmul.f32 %v7945_v11, %v2398_v3  ;;  %v1898_v13 = vpop.f32.mrf.mxu1  ;;  %v5705_v35 = vpop.f32.mrf.mxu0  ;;  %v3107_v58 = vld [vmem:[%s9292_s4 + $0x328] sm:$0xff] }
 0x24f   : > { %vm2317_vm13 = vcmp.ge.f32.partialorder %v2162_v4, 0.0  ;;  %v2358_v48 = vmul.f32 0.2, %v2162_v4  ;;  %v2767_v32 = vld [vmem:[#allocation2 + $0x5e] sm:$0xff]  ;;  %3985 = vmatprep.subr.mxu0 %v7835_v9  ;;  %v7962_v35 = vpop.permute.xlu1 %2495 }
 0x250   : > { %v2808_v29 = vld [vmem:[#allocation2 + $0x5f] sm:$0xff]  ;;  %2685 = vst [vmem:[#allocation2 + $0x70] sm:$0xff] %v2644_v47  ;;  %v1901_v60 = vpop.f32.mrf.mxu1  ;;  %v2166_v57 = vpop.f32.mrf.mxu0  ;;  %3276 = vmatprep.mubr.f32.mxu1 %v2767_v32  ;;  %3986 = vmatpush1.msra.mxu0 %v3108_v22  ;;  %9336 = vst [vmem:[#allocation8_spill] sm:$0xff] %v7962_v35 }
 0x251   : > { %v2726_v20 = vld [vmem:[#allocation2 + $0x5d] sm:$0xff]  ;;  %3536 = vmatprep.mubr.f32.mxu0 %v2808_v29  ;;  %v2399_v8 = vsel %vm2317_vm13, %v2162_v4, %v2358_v48  ;;  %v2167_v5 = vadd.f32 %v2166_v57, %v1897_v46  ;;  %v1902_v33 = vadd.f32 %v1901_v60, %v7470_v1  ;;  %3987 = vmatprep.subr.mxu0 %v7835_v9 }
 0x252   : > { %3277 = vmatmul.mubr.f32.gmra.mxu1 %v2726_v20  ;;  %3537 = vmatmul.mubr.f32.gmra.mxu0 %v2806_v18  ;;  %v2645_v0 = vmul.f32 %v7954_v2, %v2399_v8  ;;  %v1903_v19 = vpop.f32.mrf.mxu1  ;;  %v5708_v7 = vpop.f32.mrf.mxu0  ;;  %v3106_v20 = vld [vmem:[%s9292_s4 + $0x320] sm:$0xff] }
 0x253   : > { %vm2318_vm14 = vcmp.ge.f32.partialorder %v2167_v5, 0.0  ;;  %v2359_v39 = vmul.f32 0.2, %v2167_v5  ;;  %v2768_v3 = vld [vmem:[#allocation2 + $0x66] sm:$0xff]  ;;  %3988 = vmatpush1.msra.mxu0 %v3107_v58  ;;  %v7970_v7 = vpop.permute.xlu0 %2500 }
 0x254   : > { %v2809_v47 = vld [vmem:[#allocation2 + $0x67] sm:$0xff]  ;;  %2686 = vst [vmem:[#allocation2 + $0x78] sm:$0xff] %v2645_v0  ;;  %v1906_v18 = vpop.f32.mrf.mxu1  ;;  %v2171_v4 = vpop.f32.mrf.mxu0  ;;  %3281 = vmatprep.mubr.f32.mxu1 %v2768_v3  ;;  %3989 = vmatprep.subr.mxu0 %v7835_v9  ;;  %9337 = vst [vmem:[#allocation9_spill] sm:$0xff] %v7970_v7 }
 0x255   : > { %v2727_v13 = vld [vmem:[#allocation2 + $0x65] sm:$0xff]  ;;  %3541 = vmatprep.mubr.f32.mxu0 %v2809_v47  ;;  %v2400_v22 = vsel %vm2318_vm14, %v2167_v5, %v2359_v39  ;;  %v2172_v46 = vadd.f32 %v2171_v4, %v1902_v33  ;;  %v1907_v60 = vadd.f32 %v1906_v18, %v7484_v25  ;;  %3990 = vmatpush1.msra.mxu0 %v3106_v20 }
 0x256   : > { %3282 = vmatmul.mubr.f32.gmra.mxu1 %v2727_v13  ;;  %3542 = vmatmul.mubr.f32.gmra.mxu0 %v2807_v62  ;;  %v2646_v1 = vmul.f32 %v7962_v35, %v2400_v22  ;;  %v1908_v48 = vpop.f32.mrf.mxu1  ;;  %v5711_v32 = vpop.f32.mrf.mxu0  ;;  %v3105_v13 = vld [vmem:[%s9292_s4 + $0x318] sm:$0xff] }
 0x257   : > { %vm2319_vm15 = vcmp.ge.f32.partialorder %v2172_v46, 0.0  ;;  %v2360_v57 = vmul.f32 0.2, %v2172_v46  ;;  %v2769_v8 = vld [vmem:[#allocation2 + $0x6e] sm:$0xff]  ;;  %3991 = vmatprep.subr.mxu0 %v7835_v9  ;;  %v7978_v32 = vpop.permute.xlu1 %2505 }
 0x258   : > { %v2810_v0 = vld [vmem:[#allocation2 + $0x6f] sm:$0xff]  ;;  %2687 = vst [vmem:[#allocation2 + $0x80] sm:$0xff] %v2646_v1  ;;  %v1911_v62 = vpop.f32.mrf.mxu1  ;;  %v2176_v5 = vpop.f32.mrf.mxu0  ;;  %3286 = vmatprep.mubr.f32.mxu1 %v2769_v8  ;;  %9338 = vst [vmem:[#allocation10_spill] sm:$0xff] %v7978_v32  ;;  %3992 = vmatpush1.msra.mxu0 %v3105_v13 }
 0x259   : > { %v2728_v19 = vld [vmem:[#allocation2 + $0x6d] sm:$0xff]  ;;  %3546 = vmatprep.mubr.f32.mxu0 %v2810_v0  ;;  %v2401_v58 = vsel %vm2319_vm15, %v2172_v46, %v2360_v57  ;;  %v2177_v33 = vadd.f32 %v2176_v5, %v1907_v60  ;;  %v1912_v18 = vadd.f32 %v1911_v62, %v7498_v16  ;;  %3993 = vmatprep.subr.mxu0 %v7835_v9 }
 0x25a   : > { %3287 = vmatmul.mubr.f32.gmra.mxu1 %v2728_v19  ;;  %3547 = vmatmul.mubr.f32.gmra.mxu0 %v2808_v29  ;;  %v2647_v25 = vmul.f32 %v7970_v7, %v2401_v58  ;;  %v1913_v39 = vpop.f32.mrf.mxu1  ;;  %v5714_v3 = vpop.f32.mrf.mxu0  ;;  %v3104_v19 = vld [vmem:[%s9292_s4 + $0x310] sm:$0xff] }
 0x25b   : > { %vm2320_vm1 = vcmp.ge.f32.partialorder %v2177_v33, 0.0  ;;  %v2361_v4 = vmul.f32 0.2, %v2177_v33  ;;  %v2770_v22 = vld [vmem:[#allocation2 + $0x76] sm:$0xff]  ;;  %v7986_v3 = vpop.permute.xlu0 %2510  ;;  %3994 = vmatpush1.msra.mxu0 %v3104_v19 }
 0x25c   : > { %v2811_v1 = vld [vmem:[#allocation2 + $0x77] sm:$0xff]  ;;  %2688 = vst [vmem:[#allocation2 + $0x88] sm:$0xff] %v2647_v25  ;;  %v1916_v29 = vpop.f32.mrf.mxu1  ;;  %v2181_v46 = vpop.f32.mrf.mxu0  ;;  %3291 = vmatprep.mubr.f32.mxu1 %v2770_v22  ;;  %9339 = vst [vmem:[#allocation11_spill] sm:$0xff] %v7986_v3  ;;  %3995 = vmatprep.subr.mxu0 %v7835_v9 }
 0x25d   : > { %v2729_v48 = vld [vmem:[#allocation2 + $0x75] sm:$0xff]  ;;  %3551 = vmatprep.mubr.f32.mxu0 %v2811_v1  ;;  %v2402_v20 = vsel %vm2320_vm1, %v2177_v33, %v2361_v4  ;;  %v2182_v60 = vadd.f32 %v2181_v46, %v1912_v18  ;;  %v1917_v62 = vadd.f32 %v1916_v29, %v7512_v55 }
 0x25e   : > { %3292 = vmatmul.mubr.f32.gmra.mxu1 %v2729_v48  ;;  %3552 = vmatmul.mubr.f32.gmra.mxu0 %v2809_v47  ;;  %v2648_v16 = vmul.f32 %v7978_v32, %v2402_v20  ;;  %v1918_v57 = vpop.f32.mrf.mxu1  ;;  %v5717_v8 = vpop.f32.mrf.mxu0  ;;  %v3103_v48 = vld [vmem:[%s9292_s4 + $0x308] sm:$0xff] }
 0x25f   : > { %vm2321_vm2 = vcmp.ge.f32.partialorder %v2182_v60, 0.0  ;;  %v2362_v5 = vmul.f32 0.2, %v2182_v60  ;;  %v2771_v58 = vld [vmem:[#allocation2 + $0x7e] sm:$0xff]  ;;  %v7994_v8 = vpop.permute.xlu1 %2515  ;;  %3996 = vmatpush1.msra.mxu0 %v3103_v48 }
 0x260   : > { %v2812_v25 = vld [vmem:[#allocation2 + $0x7f] sm:$0xff]  ;;  %2689 = vst [vmem:[#allocation2 + $0x90] sm:$0xff] %v2648_v16  ;;  %v1921_v47 = vpop.f32.mrf.mxu1  ;;  %v2186_v33 = vpop.f32.mrf.mxu0  ;;  %3296 = vmatprep.mubr.f32.mxu1 %v2771_v58  ;;  %9340 = vst [vmem:[#allocation12_spill] sm:$0xff] %v7994_v8  ;;  %3997 = vmatprep.subr.mxu0 %v7835_v9 }
 0x261   : > { %v2730_v39 = vld [vmem:[#allocation2 + $0x7d] sm:$0xff]  ;;  %3556 = vmatprep.mubr.f32.mxu0 %v2812_v25  ;;  %v2403_v13 = vsel %vm2321_vm2, %v2182_v60, %v2362_v5  ;;  %v2187_v18 = vadd.f32 %v2186_v33, %v1917_v62  ;;  %v1922_v29 = vadd.f32 %v1921_v47, %v7526_v12 }
 0x262   : > { %3297 = vmatmul.mubr.f32.gmra.mxu1 %v2730_v39  ;;  %3557 = vmatmul.mubr.f32.gmra.mxu0 %v2810_v0  ;;  %v2649_v55 = vmul.f32 %v7986_v3, %v2403_v13  ;;  %v1923_v4 = vpop.f32.mrf.mxu1  ;;  %v5720_v22 = vpop.f32.mrf.mxu0  ;;  %v3102_v39 = vld [vmem:[%s9292_s4 + $0x300] sm:$0xff] }
 0x263   : > { %vm2322_vm3 = vcmp.ge.f32.partialorder %v2187_v18, 0.0  ;;  %v2363_v46 = vmul.f32 0.2, %v2187_v18  ;;  %v2772_v20 = vld [vmem:[#allocation2 + $0x86] sm:$0xff]  ;;  %v8002_v22 = vpop.permute.xlu0 %2520  ;;  %3998 = vmatpush1.msra.mxu0 %v3102_v39 }
 0x264   : > { %v2813_v16 = vld [vmem:[#allocation2 + $0x87] sm:$0xff]  ;;  %2690 = vst [vmem:[#allocation2 + $0x98] sm:$0xff] %v2649_v55  ;;  %v1926_v0 = vpop.f32.mrf.mxu1  ;;  %v2191_v60 = vpop.f32.mrf.mxu0  ;;  %3301 = vmatprep.mubr.f32.mxu1 %v2772_v20  ;;  %9341 = vst [vmem:[#allocation13_spill] sm:$0xff] %v8002_v22  ;;  %3999 = vmatprep.subr.mxu0 %v7835_v9 }
 0x265   : > { %v2731_v57 = vld [vmem:[#allocation2 + $0x85] sm:$0xff]  ;;  %3561 = vmatprep.mubr.f32.mxu0 %v2813_v16  ;;  %v2404_v19 = vsel %vm2322_vm3, %v2187_v18, %v2363_v46  ;;  %v2192_v62 = vadd.f32 %v2191_v60, %v1922_v29  ;;  %v1927_v47 = vadd.f32 %v1926_v0, %v7540_v28 }
 0x266   : > { %3302 = vmatmul.mubr.f32.gmra.mxu1 %v2731_v57  ;;  %3562 = vmatmul.mubr.f32.gmra.mxu0 %v2811_v1  ;;  %v2650_v12 = vmul.f32 %v7994_v8, %v2404_v19  ;;  %v1928_v5 = vpop.f32.mrf.mxu1  ;;  %v5723_v58 = vpop.f32.mrf.mxu0  ;;  %v3133_v57 = vld [vmem:[%s9292_s4 + $0x3f8] sm:$0xff] }
 0x267   : > { %vm2323_vm4 = vcmp.ge.f32.partialorder %v2192_v62, 0.0  ;;  %v2364_v33 = vmul.f32 0.2, %v2192_v62  ;;  %v2773_v13 = vld [vmem:[#allocation2 + $0x8e] sm:$0xff]  ;;  %v8010_v58 = vpop.permute.xlu1 %2525  ;;  %4000 = vmatpush2.msra.mxu0 %v3133_v57 }
 0x268   : > { %v2814_v55 = vld [vmem:[#allocation2 + $0x8f] sm:$0xff]  ;;  %2691 = vst [vmem:[#allocation2 + $0xa0] sm:$0xff] %v2650_v12  ;;  %v1931_v1 = vpop.f32.mrf.mxu1  ;;  %v2196_v18 = vpop.f32.mrf.mxu0  ;;  %3306 = vmatprep.mubr.f32.mxu1 %v2773_v13  ;;  %9342 = vst [vmem:[#allocation14_spill] sm:$0xff] %v8010_v58  ;;  %4001 = vmatprep.subr.mxu0 %v7835_v9 }
 0x269   : > { %v2732_v4 = vld [vmem:[#allocation2 + $0x8d] sm:$0xff]  ;;  %3566 = vmatprep.mubr.f32.mxu0 %v2814_v55  ;;  %v2405_v48 = vsel %vm2323_vm4, %v2192_v62, %v2364_v33  ;;  %v2197_v29 = vadd.f32 %v2196_v18, %v1927_v47  ;;  %v1932_v0 = vadd.f32 %v1931_v1, %v7554_v45 }
 0x26a   : > { %3307 = vmatmul.mubr.f32.gmra.mxu1 %v2732_v4  ;;  %3567 = vmatmul.mubr.f32.gmra.mxu0 %v2812_v25  ;;  %v2651_v28 = vmul.f32 %v8002_v22, %v2405_v48  ;;  %v1933_v46 = vpop.f32.mrf.mxu1  ;;  %v5726_v20 = vpop.f32.mrf.mxu0  ;;  %v3132_v4 = vld [vmem:[%s9292_s4 + $0x3f0] sm:$0xff] }
 0x26b   : > { %vm2324_vm5 = vcmp.ge.f32.partialorder %v2197_v29, 0.0  ;;  %v2365_v60 = vmul.f32 0.2, %v2197_v29  ;;  %v2774_v19 = vld [vmem:[#allocation2 + $0x96] sm:$0xff]  ;;  %v8018_v20 = vpop.permute.xlu0 %2530  ;;  %4002 = vmatpush2.msra.mxu0 %v3132_v4 }
 0x26c   : > { %v2815_v12 = vld [vmem:[#allocation2 + $0x97] sm:$0xff]  ;;  %2692 = vst [vmem:[#allocation2 + $0xa8] sm:$0xff] %v2651_v28  ;;  %v1936_v25 = vpop.f32.mrf.mxu1  ;;  %v2201_v62 = vpop.f32.mrf.mxu0  ;;  %3311 = vmatprep.mubr.f32.mxu1 %v2774_v19  ;;  %9343 = vst [vmem:[#allocation15_spill] sm:$0xff] %v8018_v20  ;;  %4003 = vmatprep.subr.mxu0 %v7835_v9 }
 0x26d   : > { %v2733_v5 = vld [vmem:[#allocation2 + $0x95] sm:$0xff]  ;;  %3571 = vmatprep.mubr.f32.mxu0 %v2815_v12  ;;  %v2406_v39 = vsel %vm2324_vm5, %v2197_v29, %v2365_v60  ;;  %v2202_v47 = vadd.f32 %v2201_v62, %v1932_v0  ;;  %v1937_v1 = vadd.f32 %v1936_v25, %v7568_v14 }
 0x26e   : > { %3312 = vmatmul.mubr.f32.gmra.mxu1 %v2733_v5  ;;  %3572 = vmatmul.mubr.f32.gmra.mxu0 %v2813_v16  ;;  %v2652_v45 = vmul.f32 %v8010_v58, %v2406_v39  ;;  %v1938_v33 = vpop.f32.mrf.mxu1  ;;  %v5729_v13 = vpop.f32.mrf.mxu0  ;;  %v3131_v5 = vld [vmem:[%s9292_s4 + $0x3e8] sm:$0xff] }
 0x26f   : > { %vm2325_vm6 = vcmp.ge.f32.partialorder %v2202_v47, 0.0  ;;  %v2366_v18 = vmul.f32 0.2, %v2202_v47  ;;  %v2775_v48 = vld [vmem:[#allocation2 + $0x9e] sm:$0xff]  ;;  %v8026_v13 = vpop.permute.xlu1 %2535  ;;  %4004 = vmatpush2.msra.mxu0 %v3131_v5 }
 0x270   : > { %v2816_v28 = vld [vmem:[#allocation2 + $0x9f] sm:$0xff]  ;;  %2693 = vst [vmem:[#allocation2 + $0xb0] sm:$0xff] %v2652_v45  ;;  %v1941_v16 = vpop.f32.mrf.mxu1  ;;  %v2206_v29 = vpop.f32.mrf.mxu0  ;;  %3316 = vmatprep.mubr.f32.mxu1 %v2775_v48  ;;  %9344 = vst [vmem:[#allocation16_spill] sm:$0xff] %v8026_v13  ;;  %4005 = vmatprep.subr.mxu0 %v7835_v9 }
 0x271   : > { %v2734_v46 = vld [vmem:[#allocation2 + $0x9d] sm:$0xff]  ;;  %3576 = vmatprep.mubr.f32.mxu0 %v2816_v28  ;;  %v2407_v57 = vsel %vm2325_vm6, %v2202_v47, %v2366_v18  ;;  %v2207_v0 = vadd.f32 %v2206_v29, %v1937_v1  ;;  %v1942_v25 = vadd.f32 %v1941_v16, %v7582_v30 }
 0x272   : > { %3317 = vmatmul.mubr.f32.gmra.mxu1 %v2734_v46  ;;  %3577 = vmatmul.mubr.f32.gmra.mxu0 %v2814_v55  ;;  %v2653_v14 = vmul.f32 %v8018_v20, %v2407_v57  ;;  %v1943_v60 = vpop.f32.mrf.mxu1  ;;  %v5732_v19 = vpop.f32.mrf.mxu0  ;;  %v3130_v46 = vld [vmem:[%s9292_s4 + $0x3e0] sm:$0xff] }
 0x273   : > { %vm2326_vm7 = vcmp.ge.f32.partialorder %v2207_v0, 0.0  ;;  %v2367_v62 = vmul.f32 0.2, %v2207_v0  ;;  %v2776_v39 = vld [vmem:[#allocation2 + $0xa6] sm:$0xff]  ;;  %v8034_v19 = vpop.permute.xlu0 %2540  ;;  %4006 = vmatpush2.msra.mxu0 %v3130_v46 }
 0x274   : > { %v2817_v45 = vld [vmem:[#allocation2 + $0xa7] sm:$0xff]  ;;  %2694 = vst [vmem:[#allocation2 + $0xb8] sm:$0xff] %v2653_v14  ;;  %v1946_v55 = vpop.f32.mrf.mxu1  ;;  %v2211_v47 = vpop.f32.mrf.mxu0  ;;  %3321 = vmatprep.mubr.f32.mxu1 %v2776_v39  ;;  %9345 = vst [vmem:[#allocation17_spill] sm:$0xff] %v8034_v19  ;;  %4007 = vmatprep.subr.mxu0 %v7835_v9 }
 0x275   : > { %v2735_v33 = vld [vmem:[#allocation2 + $0xa5] sm:$0xff]  ;;  %3581 = vmatprep.mubr.f32.mxu0 %v2817_v45  ;;  %v2408_v4 = vsel %vm2326_vm7, %v2207_v0, %v2367_v62  ;;  %v2212_v1 = vadd.f32 %v2211_v47, %v1942_v25  ;;  %v1947_v16 = vadd.f32 %v1946_v55, %v7596_v42 }
 0x276   : > { %3322 = vmatmul.mubr.f32.gmra.mxu1 %v2735_v33  ;;  %3582 = vmatmul.mubr.f32.gmra.mxu0 %v2815_v12  ;;  %v2654_v30 = vmul.f32 %v8026_v13, %v2408_v4  ;;  %v1948_v18 = vpop.f32.mrf.mxu1  ;;  %v5735_v48 = vpop.f32.mrf.mxu0  ;;  %v3129_v33 = vld [vmem:[%s9292_s4 + $0x3d8] sm:$0xff] }
 0x277   : > { %vm2327_vm8 = vcmp.ge.f32.partialorder %v2212_v1, 0.0  ;;  %v2368_v29 = vmul.f32 0.2, %v2212_v1  ;;  %v2777_v57 = vld [vmem:[#allocation2 + $0xae] sm:$0xff]  ;;  %v8042_v48 = vpop.permute.xlu1 %2545  ;;  %4008 = vmatpush2.msra.mxu0 %v3129_v33 }
 0x278   : > { %v2818_v14 = vld [vmem:[#allocation2 + $0xaf] sm:$0xff]  ;;  %2695 = vst [vmem:[#allocation2 + $0xc0] sm:$0xff] %v2654_v30  ;;  %v1951_v12 = vpop.f32.mrf.mxu1  ;;  %v2216_v0 = vpop.f32.mrf.mxu0  ;;  %3326 = vmatprep.mubr.f32.mxu1 %v2777_v57  ;;  %9346 = vst [vmem:[#allocation18_spill] sm:$0xff] %v8042_v48  ;;  %4009 = vmatprep.subr.mxu0 %v7835_v9 }
 0x279   : > { %v2736_v60 = vld [vmem:[#allocation2 + $0xad] sm:$0xff]  ;;  %3586 = vmatprep.mubr.f32.mxu0 %v2818_v14  ;;  %v2409_v5 = vsel %vm2327_vm8, %v2212_v1, %v2368_v29  ;;  %v2217_v25 = vadd.f32 %v2216_v0, %v1947_v16  ;;  %v1952_v55 = vadd.f32 %v1951_v12, %v7607_v37 }
 0x27a   : > { %3327 = vmatmul.mubr.f32.gmra.mxu1 %v2736_v60  ;;  %3587 = vmatmul.mubr.f32.gmra.mxu0 %v2816_v28  ;;  %v2655_v42 = vmul.f32 %v8034_v19, %v2409_v5  ;;  %v1953_v62 = vpop.f32.mrf.mxu1  ;;  %v5738_v39 = vpop.f32.mrf.mxu0  ;;  %v3128_v60 = vld [vmem:[%s9292_s4 + $0x3d0] sm:$0xff] }
 0x27b   : > { %vm2328_vm9 = vcmp.ge.f32.partialorder %v2217_v25, 0.0  ;;  %v2369_v47 = vmul.f32 0.2, %v2217_v25  ;;  %v2778_v4 = vld [vmem:[#allocation2 + $0xb6] sm:$0xff]  ;;  %v8050_v39 = vpop.permute.xlu0 %2550  ;;  %4010 = vmatpush2.msra.mxu0 %v3128_v60 }
 0x27c   : > { %v2819_v30 = vld [vmem:[#allocation2 + $0xb7] sm:$0xff]  ;;  %2696 = vst [vmem:[#allocation2 + $0xc8] sm:$0xff] %v2655_v42  ;;  %v1956_v28 = vpop.f32.mrf.mxu1  ;;  %v2221_v1 = vpop.f32.mrf.mxu0  ;;  %3331 = vmatprep.mubr.f32.mxu1 %v2778_v4  ;;  %9347 = vst [vmem:[#allocation19_spill] sm:$0xff] %v8050_v39  ;;  %4011 = vmatprep.subr.mxu0 %v7835_v9  ;;  %v3126_v9 = vld [vmem:[%s9292_s4 + $0x3c0] sm:$0xff] }
 0x27d   : > { %v2737_v18 = vld [vmem:[#allocation2 + $0xb5] sm:$0xff]  ;;  %3591 = vmatprep.mubr.f32.mxu0 %v2819_v30  ;;  %v2410_v46 = vsel %vm2328_vm9, %v2217_v25, %v2369_v47  ;;  %v2222_v16 = vadd.f32 %v2221_v1, %v1952_v55  ;;  %v1957_v12 = vadd.f32 %v1956_v28, %v7617_v23 }
 0x27e   : > { %3332 = vmatmul.mubr.f32.gmra.mxu1 %v2737_v18  ;;  %3592 = vmatmul.mubr.f32.gmra.mxu0 %v2817_v45  ;;  %v2656_v37 = vmul.f32 %v8042_v48, %v2410_v46  ;;  %v1958_v29 = vpop.f32.mrf.mxu1  ;;  %v5741_v57 = vpop.f32.mrf.mxu0  ;;  %v3127_v18 = vld [vmem:[%s9292_s4 + $0x3c8] sm:$0xff] }
 0x27f   : > { %vm2329_vm10 = vcmp.ge.f32.partialorder %v2222_v16, 0.0  ;;  %v2370_v0 = vmul.f32 0.2, %v2222_v16  ;;  %v2779_v5 = vld [vmem:[#allocation2 + $0xbe] sm:$0xff]  ;;  %v8058_v57 = vpop.permute.xlu1 %2555  ;;  %4012 = vmatpush2.msra.mxu0 %v3127_v18 }
 0x280   : > { %v2820_v42 = vld [vmem:[#allocation2 + $0xbf] sm:$0xff]  ;;  %2697 = vst [vmem:[#allocation2 + $0xd0] sm:$0xff] %v2656_v37  ;;  %v1961_v45 = vpop.f32.mrf.mxu1  ;;  %v2226_v25 = vpop.f32.mrf.mxu0  ;;  %3336 = vmatprep.mubr.f32.mxu1 %v2779_v5  ;;  %9348 = vst [vmem:[#allocation20_spill] sm:$0xff] %v8058_v57 }
 0x281   : > { %v2738_v62 = vld [vmem:[#allocation2 + $0xbd] sm:$0xff]  ;;  %3596 = vmatprep.mubr.f32.mxu0 %v2820_v42  ;;  %v2411_v33 = vsel %vm2329_vm10, %v2222_v16, %v2370_v0  ;;  %v2227_v55 = vadd.f32 %v2226_v25, %v1957_v12  ;;  %v1962_v28 = vadd.f32 %v1961_v45, %v7632_v50 }
 0x282   : > { %3337 = vmatmul.mubr.f32.gmra.mxu1 %v2738_v62  ;;  %3597 = vmatmul.mubr.f32.gmra.mxu0 %v2818_v14  ;;  %v2657_v23 = vmul.f32 %v8050_v39, %v2411_v33  ;;  %v1963_v47 = vpop.f32.mrf.mxu1  ;;  %v5744_v4 = vpop.f32.mrf.mxu0 }
 0x283   : > { %vm2330_vm11 = vcmp.ge.f32.partialorder %v2227_v55, 0.0  ;;  %v2371_v1 = vmul.f32 0.2, %v2227_v55  ;;  %v2780_v46 = vld [vmem:[#allocation2 + $0xc6] sm:$0xff]  ;;  %v8068_v4 = vpop.permute.xlu0 %2560 }
 0x284   : > { %v2821_v37 = vld [vmem:[#allocation2 + $0xc7] sm:$0xff]  ;;  %2698 = vst [vmem:[#allocation2 + $0xd8] sm:$0xff] %v2657_v23  ;;  %v1966_v14 = vpop.f32.mrf.mxu1  ;;  %v2231_v16 = vpop.f32.mrf.mxu0  ;;  %3341 = vmatprep.mubr.f32.mxu1 %v2780_v46  ;;  %9349 = vst [vmem:[#allocation21_spill] sm:$0xff] %v8068_v4 }
 0x285   : > { %v2739_v29 = vld [vmem:[#allocation2 + $0xc5] sm:$0xff]  ;;  %3601 = vmatprep.mubr.f32.mxu0 %v2821_v37  ;;  %v2412_v60 = vsel %vm2330_vm11, %v2227_v55, %v2371_v1  ;;  %v2232_v12 = vadd.f32 %v2231_v16, %v1962_v28  ;;  %v1967_v62 = vadd.f32 %v1966_v14, %v7642_v21 }
 0x286   : > { %3342 = vmatmul.mubr.f32.gmra.mxu1 %v2739_v29  ;;  %3602 = vmatmul.mubr.f32.gmra.mxu0 %v2819_v30  ;;  %v2658_v50 = vmul.f32 %v8058_v57, %v2412_v60  ;;  %v1968_v0 = vpop.f32.mrf.mxu1  ;;  %v5747_v5 = vpop.f32.mrf.mxu0  ;;  %v8065_v55 = vld [vmem:[#allocation2] sm:$0xff]  ;;  %v3125_v29 = vld [vmem:[%s9292_s4 + $0x3b8] sm:$0xff] }
 0x287   : > { %vm2331_vm12 = vcmp.ge.f32.partialorder %v2232_v12, 0.0  ;;  %v2372_v45 = vmul.f32 0.2, %v2232_v12  ;;  %v2781_v25 = vld [vmem:[#allocation2 + $0xce] sm:$0xff]  ;;  %4013 = vmatprep.subr.mxu0 %v8065_v55  ;;  %v8076_v5 = vpop.permute.xlu1 %2565 }
 0x288   : > { %v2822_v33 = vld [vmem:[#allocation2 + $0xcf] sm:$0xff]  ;;  %2699 = vst [vmem:[#allocation2 + $0xe0] sm:$0xff] %v2658_v50  ;;  %v1971_v30 = vpop.f32.mrf.mxu1  ;;  %v2236_v47 = vpop.f32.mrf.mxu0  ;;  %3346 = vmatprep.mubr.f32.mxu1 %v2781_v25  ;;  %4014 = vmatpush2.msra.mxu0 %v3126_v9  ;;  %9350 = vst [vmem:[#allocation22_spill] sm:$0xff] %v8076_v5 }
 0x289   : > { %v2740_v23 = vld [vmem:[#allocation2 + $0xcd] sm:$0xff]  ;;  %3606 = vmatprep.mubr.f32.mxu0 %v2822_v33  ;;  %v2413_v18 = vsel %vm2331_vm12, %v2232_v12, %v2372_v45  ;;  %v2237_v28 = vadd.f32 %v2236_v47, %v1967_v62  ;;  %v1972_v14 = vadd.f32 %v1971_v30, %v7652_v49  ;;  %4015 = vmatprep.subr.mxu0 %v8065_v55 }
 0x28a   : > { %3347 = vmatmul.mubr.f32.gmra.mxu1 %v2740_v23  ;;  %3607 = vmatmul.mubr.f32.gmra.mxu0 %v2820_v42  ;;  %v2659_v21 = vmul.f32 %v8068_v4, %v2413_v18  ;;  %v1973_v1 = vpop.f32.mrf.mxu1  ;;  %v5750_v46 = vpop.f32.mrf.mxu0  ;;  %v3124_v23 = vld [vmem:[%s9292_s4 + $0x3b0] sm:$0xff] }
 0x28b   : > { %vm2332_vm13 = vcmp.ge.f32.partialorder %v2237_v28, 0.0  ;;  %v2373_v16 = vmul.f32 0.2, %v2237_v28  ;;  %v2782_v60 = vld [vmem:[#allocation2 + $0xd6] sm:$0xff]  ;;  %4016 = vmatpush2.msra.mxu0 %v3125_v29  ;;  %v8084_v46 = vpop.permute.xlu0 %2570 }
 0x28c   : > { %v2823_v50 = vld [vmem:[#allocation2 + $0xd7] sm:$0xff]  ;;  %2700 = vst [vmem:[#allocation2 + $0xe8] sm:$0xff] %v2659_v21  ;;  %v1976_v42 = vpop.f32.mrf.mxu1  ;;  %v2241_v12 = vpop.f32.mrf.mxu0  ;;  %3351 = vmatprep.mubr.f32.mxu1 %v2782_v60  ;;  %4017 = vmatprep.subr.mxu0 %v8065_v55  ;;  %9351 = vst [vmem:[#allocation23_spill] sm:$0xff] %v8084_v46 }
 0x28d   : > { %v2741_v0 = vld [vmem:[#allocation2 + $0xd5] sm:$0xff]  ;;  %3611 = vmatprep.mubr.f32.mxu0 %v2823_v50  ;;  %v2414_v9 = vsel %vm2332_vm13, %v2237_v28, %v2373_v16  ;;  %v2242_v62 = vadd.f32 %v2241_v12, %v1972_v14  ;;  %v1977_v30 = vadd.f32 %v1976_v42, %v7659_v10  ;;  %4018 = vmatpush2.msra.mxu0 %v3124_v23 }
 0x28e   : > { %3352 = vmatmul.mubr.f32.gmra.mxu1 %v2741_v0  ;;  %3612 = vmatmul.mubr.f32.gmra.mxu0 %v2821_v37  ;;  %v2660_v49 = vmul.f32 %v8076_v5, %v2414_v9  ;;  %v1978_v45 = vpop.f32.mrf.mxu1  ;;  %v5753_v25 = vpop.f32.mrf.mxu0  ;;  %v3123_v0 = vld [vmem:[%s9292_s4 + $0x3a8] sm:$0xff] }
 0x28f   : > { %vm2333_vm14 = vcmp.ge.f32.partialorder %v2242_v62, 0.0  ;;  %v2374_v47 = vmul.f32 0.2, %v2242_v62  ;;  %v2783_v18 = vld [vmem:[#allocation2 + $0xde] sm:$0xff]  ;;  %4019 = vmatprep.subr.mxu0 %v8065_v55  ;;  %v8092_v25 = vpop.permute.xlu1 %2575 }
 0x290   : > { %v2824_v21 = vld [vmem:[#allocation2 + $0xdf] sm:$0xff]  ;;  %2701 = vst [vmem:[#allocation2 + $0xf0] sm:$0xff] %v2660_v49  ;;  %v1981_v37 = vpop.f32.mrf.mxu1  ;;  %v2246_v28 = vpop.f32.mrf.mxu0  ;;  %3356 = vmatprep.mubr.f32.mxu1 %v2783_v18  ;;  %9352 = vst [vmem:[#allocation24_spill] sm:$0xff] %v8092_v25  ;;  %4020 = vmatpush2.msra.mxu0 %v3123_v0 }
 0x291   : > { %v2742_v1 = vld [vmem:[#allocation2 + $0xdd] sm:$0xff]  ;;  %3616 = vmatprep.mubr.f32.mxu0 %v2824_v21  ;;  %v2415_v29 = vsel %vm2333_vm14, %v2242_v62, %v2374_v47  ;;  %v2247_v14 = vadd.f32 %v2246_v28, %v1977_v30  ;;  %v1982_v42 = vadd.f32 %v1981_v37, %v7665_v36  ;;  %4021 = vmatprep.subr.mxu0 %v8065_v55 }
 0x292   : > { %3357 = vmatmul.mubr.f32.gmra.mxu1 %v2742_v1  ;;  %3617 = vmatmul.mubr.f32.gmra.mxu0 %v2822_v33  ;;  %v2661_v10 = vmul.f32 %v8084_v46, %v2415_v29  ;;  %v1983_v16 = vpop.f32.mrf.mxu1  ;;  %v5756_v60 = vpop.f32.mrf.mxu0  ;;  %v3122_v1 = vld [vmem:[%s9292_s4 + $0x3a0] sm:$0xff] }
 0x293   : > { %vm2334_vm15 = vcmp.ge.f32.partialorder %v2247_v14, 0.0  ;;  %v2375_v12 = vmul.f32 0.2, %v2247_v14  ;;  %v2784_v9 = vld [vmem:[#allocation2 + $0xe6] sm:$0xff]  ;;  %v8100_v60 = vpop.permute.xlu0 %2580  ;;  %4022 = vmatpush2.msra.mxu0 %v3122_v1 }
 0x294   : > { %v2825_v49 = vld [vmem:[#allocation2 + $0xe7] sm:$0xff]  ;;  %2702 = vst [vmem:[#allocation2 + $0xf8] sm:$0xff] %v2661_v10  ;;  %v1986_v33 = vpop.f32.mrf.mxu1  ;;  %v2251_v62 = vpop.f32.mrf.mxu0  ;;  %3361 = vmatprep.mubr.f32.mxu1 %v2784_v9  ;;  %9353 = vst [vmem:[#allocation25_spill] sm:$0xff] %v8100_v60  ;;  %4023 = vmatprep.subr.mxu0 %v8065_v55 }
 0x295   : > { %v2743_v45 = vld [vmem:[#allocation2 + $0xe5] sm:$0xff]  ;;  %3621 = vmatprep.mubr.f32.mxu0 %v2825_v49  ;;  %v2416_v23 = vsel %vm2334_vm15, %v2247_v14, %v2375_v12  ;;  %v2252_v30 = vadd.f32 %v2251_v62, %v1982_v42  ;;  %v1987_v37 = vadd.f32 %v1986_v33, %v7671_v51 }
 0x296   : > { %3362 = vmatmul.mubr.f32.gmra.mxu1 %v2743_v45  ;;  %3622 = vmatmul.mubr.f32.gmra.mxu0 %v2823_v50  ;;  %v2662_v36 = vmul.f32 %v8092_v25, %v2416_v23  ;;  %v1988_v47 = vpop.f32.mrf.mxu1  ;;  %v5759_v18 = vpop.f32.mrf.mxu0  ;;  %v3121_v45 = vld [vmem:[%s9292_s4 + $0x398] sm:$0xff] }
 0x297   : > { %vm2335_vm1 = vcmp.ge.f32.partialorder %v2252_v30, 0.0  ;;  %v2376_v28 = vmul.f32 0.2, %v2252_v30  ;;  %v2785_v29 = vld [vmem:[#allocation2 + $0xee] sm:$0xff]  ;;  %v8108_v18 = vpop.permute.xlu1 %2585  ;;  %4024 = vmatpush2.msra.mxu0 %v3121_v45 }
 0x298   : > { %v2826_v10 = vld [vmem:[#allocation2 + $0xef] sm:$0xff]  ;;  %2703 = vst [vmem:[#allocation2 + $0x100] sm:$0xff] %v2662_v36  ;;  %v1991_v50 = vpop.f32.mrf.mxu1  ;;  %v2256_v14 = vpop.f32.mrf.mxu0  ;;  %3366 = vmatprep.mubr.f32.mxu1 %v2785_v29  ;;  %9354 = vst [vmem:[#allocation26_spill] sm:$0xff] %v8108_v18  ;;  %4025 = vmatprep.subr.mxu0 %v8065_v55 }
 0x299   : > { %v2744_v16 = vld [vmem:[#allocation2 + $0xed] sm:$0xff]  ;;  %3626 = vmatprep.mubr.f32.mxu0 %v2826_v10  ;;  %v2417_v0 = vsel %vm2335_vm1, %v2252_v30, %v2376_v28  ;;  %v2257_v42 = vadd.f32 %v2256_v14, %v1987_v37  ;;  %v1992_v33 = vadd.f32 %v1991_v50, %v7677_v34 }
 0x29a   : > { %3367 = vmatmul.mubr.f32.gmra.mxu1 %v2744_v16  ;;  %3627 = vmatmul.mubr.f32.gmra.mxu0 %v2824_v21  ;;  %v2663_v51 = vmul.f32 %v8100_v60, %v2417_v0  ;;  %v1993_v12 = vpop.f32.mrf.mxu1  ;;  %v5762_v9 = vpop.f32.mrf.mxu0  ;;  %v3120_v16 = vld [vmem:[%s9292_s4 + $0x390] sm:$0xff] }
 0x29b   : > { %vm2336_vm2 = vcmp.ge.f32.partialorder %v2257_v42, 0.0  ;;  %v2377_v62 = vmul.f32 0.2, %v2257_v42  ;;  %v2786_v23 = vld [vmem:[#allocation2 + $0xf6] sm:$0xff]  ;;  %v8116_v9 = vpop.permute.xlu0 %2590  ;;  %4026 = vmatpush2.msra.mxu0 %v3120_v16 }
 0x29c   : > { %v2827_v36 = vld [vmem:[#allocation2 + $0xf7] sm:$0xff]  ;;  %2704 = vst [vmem:[#allocation2 + $0x108] sm:$0xff] %v2663_v51  ;;  %v1996_v21 = vpop.f32.mrf.mxu1  ;;  %v2261_v30 = vpop.f32.mrf.mxu0  ;;  %3371 = vmatprep.mubr.f32.mxu1 %v2786_v23  ;;  %9355 = vst [vmem:[#allocation27_spill] sm:$0xff] %v8116_v9  ;;  %4027 = vmatprep.subr.mxu0 %v8065_v55 }
 0x29d   : > { %v2745_v47 = vld [vmem:[#allocation2 + $0xf5] sm:$0xff]  ;;  %3631 = vmatprep.mubr.f32.mxu0 %v2827_v36  ;;  %v2418_v1 = vsel %vm2336_vm2, %v2257_v42, %v2377_v62  ;;  %v2262_v37 = vadd.f32 %v2261_v30, %v1992_v33  ;;  %v1997_v50 = vadd.f32 %v1996_v21, %v7689_v40 }
 0x29e   : > { %3372 = vmatmul.mubr.f32.gmra.mxu1 %v2745_v47  ;;  %3632 = vmatmul.mubr.f32.gmra.mxu0 %v2825_v49  ;;  %v2664_v34 = vmul.f32 %v8108_v18, %v2418_v1  ;;  %v1998_v28 = vpop.f32.mrf.mxu1  ;;  %v5765_v29 = vpop.f32.mrf.mxu0  ;;  %v3119_v47 = vld [vmem:[%s9292_s4 + $0x388] sm:$0xff] }
 0x29f   : > { %vm2337_vm3 = vcmp.ge.f32.partialorder %v2262_v37, 0.0  ;;  %v2378_v14 = vmul.f32 0.2, %v2262_v37  ;;  %v2787_v0 = vld [vmem:[#allocation2 + $0xfe] sm:$0xff]  ;;  %v8124_v29 = vpop.permute.xlu1 %2595  ;;  %4028 = vmatpush2.msra.mxu0 %v3119_v47 }
 0x2a0   : > { %v2828_v51 = vld [vmem:[#allocation2 + $0xff] sm:$0xff]  ;;  %2705 = vst [vmem:[#allocation2 + $0x110] sm:$0xff] %v2664_v34  ;;  %v2001_v49 = vpop.f32.mrf.mxu1  ;;  %v2266_v42 = vpop.f32.mrf.mxu0  ;;  %3376 = vmatprep.mubr.f32.mxu1 %v2787_v0  ;;  %9356 = vst [vmem:[#allocation28_spill] sm:$0xff] %v8124_v29  ;;  %4029 = vmatprep.subr.mxu0 %v8065_v55 }
 0x2a1   : > { %v2746_v12 = vld [vmem:[#allocation2 + $0xfd] sm:$0xff]  ;;  %3636 = vmatprep.mubr.f32.mxu0 %v2828_v51  ;;  %v2419_v45 = vsel %vm2337_vm3, %v2262_v37, %v2378_v14  ;;  %v2267_v33 = vadd.f32 %v2266_v42, %v1997_v50  ;;  %v2002_v21 = vadd.f32 %v2001_v49, %v7701_v54 }
 0x2a2   : > { %3377 = vmatmul.mubr.f32.gmra.mxu1 %v2746_v12  ;;  %3637 = vmatmul.mubr.f32.gmra.mxu0 %v2826_v10  ;;  %v2665_v40 = vmul.f32 %v8116_v9, %v2419_v45  ;;  %v2003_v62 = vpop.f32.mrf.mxu1  ;;  %v5768_v23 = vpop.f32.mrf.mxu0  ;;  %v3118_v12 = vld [vmem:[%s9292_s4 + $0x380] sm:$0xff] }
 0x2a3   : > { %vm2338_vm4 = vcmp.ge.f32.partialorder %v2267_v33, 0.0  ;;  %v2379_v30 = vmul.f32 0.2, %v2267_v33  ;;  %v2788_v1 = vld [vmem:[#allocation2 + $0x106] sm:$0xff]  ;;  %v8132_v23 = vpop.permute.xlu0 %2600  ;;  %4030 = vmatpush2.msra.mxu0 %v3118_v12 }
 0x2a4   : > { %v2829_v34 = vld [vmem:[#allocation2 + $0x107] sm:$0xff]  ;;  %2706 = vst [vmem:[#allocation2 + $0x118] sm:$0xff] %v2665_v40  ;;  %v2006_v10 = vpop.f32.mrf.mxu1  ;;  %v2271_v37 = vpop.f32.mrf.mxu0  ;;  %3381 = vmatprep.mubr.f32.mxu1 %v2788_v1  ;;  %9357 = vst [vmem:[#allocation29_spill] sm:$0xff] %v8132_v23  ;;  %5945 = vmatprep.subr.mxu0 %v8065_v55 }
 0x2a5   : > { %v2747_v28 = vld [vmem:[#allocation2 + $0x105] sm:$0xff]  ;;  %3641 = vmatprep.mubr.f32.mxu0 %v2829_v34  ;;  %v2420_v16 = vsel %vm2338_vm4, %v2267_v33, %v2379_v30  ;;  %v2272_v50 = vadd.f32 %v2271_v37, %v2002_v21  ;;  %v2007_v49 = vadd.f32 %v2006_v10, %v7713_v44 }
 0x2a6   : > { %3382 = vmatmul.mubr.f32.gmra.mxu1 %v2747_v28  ;;  %3642 = vmatmul.mubr.f32.gmra.mxu0 %v2827_v36  ;;  %v2666_v54 = vmul.f32 %v8124_v29, %v2420_v16  ;;  %v2008_v14 = vpop.f32.mrf.mxu1  ;;  %v5771_v0 = vpop.f32.mrf.mxu0 }
 0x2a7   : > { %vm2339_vm5 = vcmp.ge.f32.partialorder %v2272_v50, 0.0  ;;  %v2380_v42 = vmul.f32 0.2, %v2272_v50  ;;  %v2789_v45 = vld [vmem:[#allocation2 + $0x10e] sm:$0xff] }
 0x2a8   : > { %v2830_v40 = vld [vmem:[#allocation2 + $0x10f] sm:$0xff]  ;;  %2707 = vst [vmem:[#allocation2 + $0x120] sm:$0xff] %v2666_v54  ;;  %v2011_v36 = vpop.f32.mrf.mxu1  ;;  %v2276_v33 = vpop.f32.mrf.mxu0  ;;  %3386 = vmatprep.mubr.f32.mxu1 %v2789_v45 }
 0x2a9   : > { %v2748_v62 = vld [vmem:[#allocation2 + $0x10d] sm:$0xff]  ;;  %3646 = vmatprep.mubr.f32.mxu0 %v2830_v40  ;;  %v2421_v47 = vsel %vm2339_vm5, %v2272_v50, %v2380_v42  ;;  %v2277_v21 = vadd.f32 %v2276_v33, %v2007_v49  ;;  %v2012_v28 = vadd.f32 %v2011_v36, %v7725_v17 }
 0x2aa   : > { %3387 = vmatmul.mubr.f32.gmra.mxu1 %v2748_v62  ;;  %3647 = vmatmul.mubr.f32.gmra.mxu0 %v2828_v51  ;;  %v2667_v44 = vmul.f32 %v8132_v23, %v2421_v47  ;;  %v2013_v30 = vpop.f32.mrf.mxu1  ;;  %v5774_v1 = vpop.f32.mrf.mxu0 }
 0x2ab   : > { %vm2340_vm6 = vcmp.ge.f32.partialorder %v2277_v21, 0.0  ;;  %v2381_v10 = vmul.f32 0.2, %v2277_v21  ;;  %v2790_v37 = vld [vmem:[#allocation2 + $0x116] sm:$0xff]  ;;  %v8137_v51 = vpop.permute.xlu1 %2605 }
 0x2ac   : > { %v2831_v16 = vld [vmem:[#allocation2 + $0x117] sm:$0xff]  ;;  %2708 = vst [vmem:[#allocation2 + $0x128] sm:$0xff] %v2667_v44  ;;  %v2016_v14 = vpop.f32.mrf.mxu1  ;;  %v2281_v50 = vpop.f32.mrf.mxu0  ;;  %3391 = vmatprep.mubr.f32.mxu1 %v2790_v37  ;;  %9358 = vst [vmem:[#allocation30_spill] sm:$0xff] %v8137_v51 }
 0x2ad   : > { %v2749_v54 = vld [vmem:[#allocation2 + $0x115] sm:$0xff]  ;;  %3651 = vmatprep.mubr.f32.mxu0 %v2831_v16  ;;  %v2422_v0 = vsel %vm2340_vm6, %v2277_v21, %v2381_v10  ;;  %v2282_v49 = vadd.f32 %v2281_v50, %v2012_v28  ;;  %v2017_v45 = vadd.f32 %v2016_v14, %v7737_v26  ;;  %v8141_v21 = vpop.permute.xlu0 %2610 }
 0x2ae   : > { %3392 = vmatmul.mubr.f32.gmra.mxu1 %v2749_v54  ;;  %3652 = vmatmul.mubr.f32.gmra.mxu0 %v2829_v34  ;;  %v2668_v17 = vmul.f32 %v8137_v51, %v2422_v0  ;;  %v2018_v12 = vpop.f32.mrf.mxu1  ;;  %v5777_v42 = vpop.f32.mrf.mxu0  ;;  %9359 = vst [vmem:[#allocation31_spill] sm:$0xff] %v8141_v21 }
 0x2af   : > { %vm2341_vm7 = vcmp.ge.f32.partialorder %v2282_v49, 0.0  ;;  %v2382_v62 = vmul.f32 0.2, %v2282_v49  ;;  %v2791_v36 = vld [vmem:[#allocation2 + $0x11e] sm:$0xff] }
 0x2b0   : > { %v2832_v33 = vld [vmem:[#allocation2 + $0x11f] sm:$0xff]  ;;  %2709 = vst [vmem:[#allocation2 + $0x130] sm:$0xff] %v2668_v17  ;;  %v2021_v44 = vpop.f32.mrf.mxu1  ;;  %v2286_v30 = vpop.f32.mrf.mxu0  ;;  %3396 = vmatprep.mubr.f32.mxu1 %v2791_v36 }
 0x2b1   : > { %v2750_v47 = vld [vmem:[#allocation2 + $0x11d] sm:$0xff]  ;;  %3656 = vmatprep.mubr.f32.mxu0 %v2832_v33  ;;  %v2423_v1 = vsel %vm2341_vm7, %v2282_v49, %v2382_v62  ;;  %v2287_v34 = vadd.f32 %v2286_v30, %v2017_v45  ;;  %v2022_v37 = vadd.f32 %v2021_v44, %v7749_v41  ;;  %v8145_v49 = vpop.permute.xlu1 %2615 }
 0x2b2   : > { %3397 = vmatmul.mubr.f32.gmra.mxu1 %v2750_v47  ;;  %3657 = vmatmul.mubr.f32.gmra.mxu0 %v2830_v40  ;;  %v2669_v28 = vmul.f32 %v8141_v21, %v2423_v1  ;;  %v2023_v10 = vpop.f32.mrf.mxu1  ;;  %v5780_v26 = vpop.f32.mrf.mxu0  ;;  %9360 = vst [vmem:[#allocation32_spill] sm:$0xff] %v8145_v49 }
 0x2b3   : > { %vm2342_vm8 = vcmp.ge.f32.partialorder %v2287_v34, 0.0  ;;  %v2383_v54 = vmul.f32 0.2, %v2287_v34  ;;  %v2792_v14 = vld [vmem:[#allocation2 + $0x126] sm:$0xff] }
 0x2b4   : > { %v2833_v50 = vld [vmem:[#allocation2 + $0x127] sm:$0xff]  ;;  %2710 = vst [vmem:[#allocation2 + $0x138] sm:$0xff] %v2669_v28  ;;  %v2026_v17 = vpop.f32.mrf.mxu1  ;;  %v2291_v12 = vpop.f32.mrf.mxu0  ;;  %3401 = vmatprep.mubr.f32.mxu1 %v2792_v14 }
 0x2b5   : > { %v2751_v0 = vld [vmem:[#allocation2 + $0x125] sm:$0xff]  ;;  %3661 = vmatprep.mubr.f32.mxu0 %v2833_v50  ;;  %v2424_v42 = vsel %vm2342_vm8, %v2287_v34, %v2383_v54  ;;  %v2292_v40 = vadd.f32 %v2291_v12, %v2022_v37  ;;  %v2027_v36 = vadd.f32 %v2026_v17, %v7761_v56  ;;  %v8149_v34 = vpop.permute.xlu0 %2620 }
 0x2b6   : > { %3402 = vmatmul.mubr.f32.gmra.mxu1 %v2751_v0  ;;  %3662 = vmatmul.mubr.f32.gmra.mxu0 %v2831_v16  ;;  %v2670_v45 = vmul.f32 %v8145_v49, %v2424_v42  ;;  %v2028_v62 = vpop.f32.mrf.mxu1  ;;  %v5783_v41 = vpop.f32.mrf.mxu0  ;;  %9361 = vst [vmem:[#allocation33_spill] sm:$0xff] %v8149_v34 }
 0x2b7   : > { %vm2343_vm9 = vcmp.ge.f32.partialorder %v2292_v40, 0.0  ;;  %v2384_v47 = vmul.f32 0.2, %v2292_v40  ;;  %v2793_v44 = vld [vmem:[#allocation2 + $0x12e] sm:$0xff] }
 0x2b8   : > { %v2834_v30 = vld [vmem:[#allocation2 + $0x12f] sm:$0xff]  ;;  %2711 = vst [vmem:[#allocation2 + $0x140] sm:$0xff] %v2670_v45  ;;  %v2031_v28 = vpop.f32.mrf.mxu1  ;;  %v2296_v10 = vpop.f32.mrf.mxu0  ;;  %3406 = vmatprep.mubr.f32.mxu1 %v2793_v44 }
 0x2b9   : > { %v2752_v1 = vld [vmem:[#allocation2 + $0x12d] sm:$0xff]  ;;  %3666 = vmatprep.mubr.f32.mxu0 %v2834_v30  ;;  %v2425_v26 = vsel %vm2343_vm9, %v2292_v40, %v2384_v47  ;;  %v2297_v16 = vadd.f32 %v2296_v10, %v2027_v36  ;;  %v2032_v14 = vadd.f32 %v2031_v28, %v7771_v27  ;;  %v8155_v40 = vpop.permute.xlu1 %2625 }
 0x2ba   : > { %3407 = vmatmul.mubr.f32.gmra.mxu1 %v2752_v1  ;;  %3667 = vmatmul.mubr.f32.gmra.mxu0 %v2832_v33  ;;  %v2671_v37 = vmul.f32 %v8149_v34, %v2425_v26  ;;  %v5786_v54 = vpop.f32.mrf.mxu0  ;;  %v2033_v56 = vpop.f32.mrf.mxu1  ;;  %9362 = vst [vmem:[#allocation34_spill] sm:$0xff] %v8155_v40 }
 0x2bb   : > { %vm2344_vm10 = vcmp.ge.f32.partialorder %v2297_v16, 0.0  ;;  %v2385_v0 = vmul.f32 0.2, %v2297_v16  ;;  %v2794_v17 = vld [vmem:[#allocation2 + $0x136] sm:$0xff] }
 0x2bc   : > { %v2835_v12 = vld [vmem:[#allocation2 + $0x137] sm:$0xff]  ;;  %2712 = vst [vmem:[#allocation2 + $0x148] sm:$0xff] %v2671_v37  ;;  %v2301_v45 = vpop.f32.mrf.mxu0  ;;  %3411 = vmatprep.mubr.f32.mxu1 %v2794_v17  ;;  %v8153_v62 = vpop.f32.mrf.mxu1 }
 0x2bd   : > { %v2753_v42 = vld [vmem:[#allocation2 + $0x135] sm:$0xff]  ;;  %3671 = vmatprep.mubr.f32.mxu0 %v2835_v12  ;;  %v2426_v33 = vsel %vm2344_vm10, %v2297_v16, %v2385_v0  ;;  %v2302_v41 = vadd.f32 %v2301_v45, %v2032_v14  ;;  %v8160_v37 = vpop.permute.xlu0 %2630 }
 0x2be   : > { %3412 = vmatmul.mubr.f32.gmra.mxu1 %v2753_v42  ;;  %3672 = vmatmul.mubr.f32.gmra.mxu0 %v2833_v50  ;;  %v2672_v36 = vmul.f32 %v8155_v40, %v2426_v33  ;;  %v3225_v27 = vpop.f32.mrf.mxu1  ;;  %v5789_v47 = vpop.f32.mrf.mxu0  ;;  %9363 = vst [vmem:[#allocation35_spill] sm:$0xff] %v8160_v37  ;;  %v2881_v17 = vld [vmem:[#allocation2 + $0x19] sm:$0xff]  ;;  %v2882_v33 = vld [vmem:[#allocation2 + $0x21] sm:$0xff] }
 0x2bf   : > { %vm2345_vm11 = vcmp.ge.f32.partialorder %v2302_v41, 0.0  ;;  %v2386_v44 = vmul.f32 0.2, %v2302_v41  ;;  %v2795_v1 = vld [vmem:[#allocation2 + $0x13e] sm:$0xff]  ;;  %v2883_v27 = vld [vmem:[#allocation2 + $0x29] sm:$0xff] }
 0x2c0   : > { %v2836_v28 = vld [vmem:[#allocation2 + $0x13f] sm:$0xff]  ;;  %2713 = vst [vmem:[#allocation2 + $0x150] sm:$0xff] %v2672_v36  ;;  %3416 = vmatprep.mubr.f32.mxu1 %v2795_v1  ;;  %v8158_v26 = vpop.f32.mrf.mxu1  ;;  %v2924_v47 = vld [vmem:[#allocation2 + $0x2a] sm:$0xff] }
 0x2c1   : > { %v2754_v10 = vld [vmem:[#allocation2 + $0x13d] sm:$0xff]  ;;  %3676 = vmatprep.mubr.f32.mxu0 %v2836_v28  ;;  %v2427_v16 = vsel %vm2345_vm11, %v2302_v41, %v2386_v44  ;;  %v3148_v41 = vld [vmem:[%s9292_s4 + $0x470] sm:$0xff]  ;;  %v3147_v44 = vld [vmem:[%s9292_s4 + $0x468] sm:$0xff] }
 0x2c2   : > { %3417 = vmatmul.mubr.f32.gmra.mxu1 %v2754_v10  ;;  %3677 = vmatmul.mubr.f32.gmra.mxu0 %v2834_v30  ;;  %v2673_v50 = vmul.f32 %v8160_v37, %v2427_v16  ;;  %v3230_v54 = vpop.f32.mrf.mxu1  ;;  %v3149_v45 = vld [vmem:[%s9292_s4 + $0x478] sm:$0xff]  ;;  %v2842_v1 = vld [vmem:[#allocation2 + $0x28] sm:$0xff]  ;;  %v3146_v16 = vld [vmem:[%s9292_s4 + $0x460] sm:$0xff] }
 0x2c3   : > { %v2796_v56 = vld [vmem:[#allocation2 + $0x146] sm:$0xff]  ;;  %v2840_v30 = vld [vmem:[#allocation2 + $0x18] sm:$0xff] }
 0x2c4   : > { %v2837_v14 = vld [vmem:[#allocation2 + $0x147] sm:$0xff]  ;;  %2714 = vst [vmem:[#allocation2 + $0x158] sm:$0xff] %v2673_v50  ;;  %3421 = vmatprep.mubr.f32.mxu1 %v2796_v56  ;;  %v2925_v10 = vld [vmem:[#allocation2 + $0x32] sm:$0xff]  ;;  %v2926_v56 = vld [vmem:[#allocation2 + $0x3a] sm:$0xff] }
 0x2c5   : > { %v2755_v0 = vld [vmem:[#allocation2 + $0x145] sm:$0xff]  ;;  %3681 = vmatprep.mubr.f32.mxu0 %v2837_v14  ;;  %v2843_v50 = vld [vmem:[#allocation2 + $0x30] sm:$0xff]  ;;  %v2885_v54 = vld [vmem:[#allocation2 + $0x39] sm:$0xff] }
 0x2c6   : > { %3422 = vmatmul.mubr.f32.gmra.mxu1 %v2755_v0  ;;  %3682 = vmatmul.mubr.f32.gmra.mxu0 %v2835_v12  ;;  %v2841_v12 = vld [vmem:[#allocation2 + $0x20] sm:$0xff]  ;;  %v2844_v0 = vld [vmem:[#allocation2 + $0x38] sm:$0xff] }
 0x2c7   : > { %3761 = vmatprep.mubr.f32.mxu1 %v2881_v17  ;;  %v2838_v42 = vld [vmem:[#allocation2 + $0x14f] sm:$0xff]  ;;  %v2886_v17 = vld [vmem:[#allocation2 + $0x41] sm:$0xff] }
 0x2c8   : > { %3686 = vmatprep.mubr.f32.mxu0 %v2838_v42  ;;  %v2927_v42 = vld [vmem:[#allocation2 + $0x42] sm:$0xff] }
 0x2ca   : > { %3687 = vmatmul.mubr.f32.gmra.mxu0 %v2836_v28  ;;  %3762 = vmatmul.mubr.f32.vlgmr.msra.gmra.mxu1 %v2840_v30  ;;  %v2884_v28 = vld [vmem:[#allocation2 + $0x31] sm:$0xff]  ;;  %v2845_v30 = vld [vmem:[#allocation2 + $0x40] sm:$0xff] }
 0x2cb   : > { %3766 = vmatprep.mubr.f32.mxu1 %v2882_v33  ;;  %5791 = vmatpush3.msra.mxu1 %v3149_v45  ;;  %v2839_v36 = vld [vmem:[#allocation2 + $0x157] sm:$0xff]  ;;  %v2887_v33 = vld [vmem:[#allocation2 + $0x49] sm:$0xff] }
 0x2cc   : > { %5792 = vmatprep.subr.mxu1 %v8065_v55  ;;  %3691 = vmatprep.mubr.f32.mxu0 %v2839_v36  ;;  %v3144_v45 = vld [vmem:[%s9292_s4 + $0x450] sm:$0xff]  ;;  %v3143_v36 = vld [vmem:[%s9292_s4 + $0x448] sm:$0xff] }
 0x2cd   : > { %5793 = vmatpush3.msra.mxu1 %v3148_v41  ;;  %v2928_v41 = vld [vmem:[#allocation2 + $0x4a] sm:$0xff] }
 0x2ce   : > { %3692 = vmatmul.mubr.f32.gmra.mxu0 %v2837_v14  ;;  %3767 = vmatmul.mubr.f32.gmra.mxu1 %v2841_v12  ;;  %v3145_v14 = vld [vmem:[%s9292_s4 + $0x458] sm:$0xff]  ;;  %v2846_v12 = vld [vmem:[#allocation2 + $0x48] sm:$0xff] }
 0x2cf   : > { %3771 = vmatprep.mubr.f32.mxu1 %v2883_v27  ;;  %4031 = vmatprep.mubr.f32.mxu0 %v2924_v47  ;;  %v2929_v47 = vld [vmem:[#allocation2 + $0x52] sm:$0xff] }
 0x2d0   : > { %5794 = vmatprep.subr.mxu1 %v8065_v55 }
 0x2d1   : > { %5795 = vmatpush3.msra.mxu1 %v3147_v44  ;;  %v3142_v44 = vld [vmem:[%s9292_s4 + $0x440] sm:$0xff] }
 0x2d2   : > { %3772 = vmatmul.mubr.f32.gmra.mxu1 %v2842_v1  ;;  %4032 = vmatmul.mubr.f32.vlgmr.msra.gmra.mxu0 %v2883_v27  ;;  %v2888_v27 = vld [vmem:[#allocation2 + $0x51] sm:$0xff] }
 0x2d3   : > { %3776 = vmatprep.mubr.f32.mxu1 %v2884_v28  ;;  %4036 = vmatprep.mubr.f32.mxu0 %v2925_v10  ;;  %v2847_v1 = vld [vmem:[#allocation2 + $0x50] sm:$0xff]  ;;  %v2930_v10 = vld [vmem:[#allocation2 + $0x5a] sm:$0xff] }
 0x2d4   : > { %5796 = vmatprep.subr.mxu1 %v8065_v55 }
 0x2d5   : > { %5797 = vmatpush3.msra.mxu1 %v3146_v16  ;;  %v3141_v16 = vld [vmem:[%s9292_s4 + $0x438] sm:$0xff] }
 0x2d6   : > { %3777 = vmatmul.mubr.f32.gmra.mxu1 %v2843_v50  ;;  %4037 = vmatmul.mubr.f32.gmra.mxu0 %v2884_v28  ;;  %v2889_v28 = vld [vmem:[#allocation2 + $0x59] sm:$0xff] }
 0x2d7   : > { %3781 = vmatprep.mubr.f32.mxu1 %v2885_v54  ;;  %4041 = vmatprep.mubr.f32.mxu0 %v2926_v56  ;;  %v2848_v50 = vld [vmem:[#allocation2 + $0x58] sm:$0xff]  ;;  %v8201_v56 = vld [vmem:[%s9293_s5] ss:$0 sm:$0xff] }
 0x2d8   : > { %5798 = vmatprep.subr.mxu1 %v8065_v55 }
 0x2d9   : > { %5799 = vmatpush3.msra.mxu1 %v3145_v14  ;;  %v2931_v14 = vld [vmem:[#allocation2 + $0x62] sm:$0xff] }
 0x2da   : > { %3782 = vmatmul.mubr.f32.gmra.mxu1 %v2844_v0  ;;  %4042 = vmatmul.mubr.f32.gmra.mxu0 %v2885_v54  ;;  %v2890_v54 = vld [vmem:[#allocation2 + $0x61] sm:$0xff]  ;;  %v3140_v0 = vld [vmem:[%s9292_s4 + $0x430] sm:$0xff] }
 0x2db   : > { %3786 = vmatprep.mubr.f32.mxu1 %v2886_v17  ;;  %4046 = vmatprep.mubr.f32.mxu0 %v2927_v42  ;;  %v2849_v42 = vld [vmem:[#allocation2 + $0x60] sm:$0xff] }
 0x2dc   : > { %5800 = vmatprep.subr.mxu1 %v8065_v55 }
 0x2dd   : > { %5801 = vmatpush3.msra.mxu1 %v3144_v45 }
 0x2de   : > { %3787 = vmatmul.mubr.f32.gmra.mxu1 %v2845_v30  ;;  %4047 = vmatmul.mubr.f32.gmra.mxu0 %v2886_v17  ;;  %v3224_v17 = vadd.f32 %v8201_v56, %v8153_v62  ;;  %v3229_v62 = vadd.f32 %v8201_v56, %v8158_v26 }
 0x2df   : > { %3791 = vmatprep.mubr.f32.mxu1 %v2887_v33  ;;  %4051 = vmatprep.mubr.f32.mxu0 %v2928_v41  ;;  %v2932_v41 = vld [vmem:[#allocation2 + $0x6a] sm:$0xff] }
 0x2e0   : > { %5802 = vmatprep.subr.mxu1 %v8065_v55 }
 0x2e1   : > { %5803 = vmatpush3.msra.mxu1 %v3143_v36  ;;  %v3139_v36 = vld [vmem:[%s9292_s4 + $0x428] sm:$0xff] }
 0x2e2   : > { %3792 = vmatmul.mubr.f32.gmra.mxu1 %v2846_v12  ;;  %4052 = vmatmul.mubr.f32.gmra.mxu0 %v2887_v33  ;;  %v2891_v33 = vld [vmem:[#allocation2 + $0x69] sm:$0xff] }
 0x2e3   : > { %3796 = vmatprep.mubr.f32.mxu1 %v2888_v27  ;;  %4056 = vmatprep.mubr.f32.mxu0 %v2929_v47 }
 0x2e4   : > { %5804 = vmatprep.subr.mxu1 %v8065_v55 }
 0x2e5   : > { %5805 = vmatpush3.msra.mxu1 %v3142_v44  ;;  %v2850_v44 = vld [vmem:[#allocation2 + $0x68] sm:$0xff] }
 0x2e6   : > { %3797 = vmatmul.mubr.f32.gmra.mxu1 %v2847_v1  ;;  %4057 = vmatmul.mubr.f32.gmra.mxu0 %v2888_v27 }
 0x2e7   : > { %3801 = vmatprep.mubr.f32.mxu1 %v2889_v28  ;;  %4061 = vmatprep.mubr.f32.mxu0 %v2930_v10  ;;  %v2892_v10 = vld [vmem:[#allocation2 + $0x71] sm:$0xff] }
 0x2e8   : > { %5806 = vmatprep.subr.mxu1 %v8065_v55 }
 0x2e9   : > { %5807 = vmatpush3.msra.mxu1 %v3141_v16  ;;  %v2933_v16 = vld [vmem:[#allocation2 + $0x72] sm:$0xff] }
 0x2ea   : > { %3802 = vmatmul.mubr.f32.gmra.mxu1 %v2848_v50  ;;  %4062 = vmatmul.mubr.f32.gmra.mxu0 %v2889_v28  ;;  %v3138_v50 = vld [vmem:[%s9292_s4 + $0x420] sm:$0xff] }
 0x2eb   : > { %3806 = vmatprep.mubr.f32.mxu1 %v2890_v54  ;;  %4066 = vmatprep.mubr.f32.mxu0 %v2931_v14 }
 0x2ec   : > { %5808 = vmatprep.subr.mxu1 %v8065_v55 }
 0x2ed   : > { %5809 = vmatpush3.msra.mxu1 %v3140_v0 }
 0x2ee   : > { %v3233_v45 = vpop.f32.mrf.mxu1  ;;  %v3493_v30 = vpop.f32.mrf.mxu0  ;;  %3807 = vmatmul.mubr.f32.gmra.mxu1 %v2849_v42  ;;  %4067 = vmatmul.mubr.f32.gmra.mxu0 %v2890_v54 }
 0x2ef   : > { %v8212_v12 = vadd.f32 %v3493_v30, %v3224_v17  ;;  %3811 = vmatprep.mubr.f32.mxu1 %v2891_v33  ;;  %4071 = vmatprep.mubr.f32.mxu0 %v2932_v41  ;;  %v3234_v26 = vadd.f32 %v8201_v56, %v3233_v45  ;;  %v2851_v17 = vld [vmem:[#allocation2 + $0x70] sm:$0xff]  ;;  %v2934_v41 = vld [vmem:[#allocation2 + $0x7a] sm:$0xff] }
 0x2f0   : > { %v3235_v27 = vpop.f32.mrf.mxu1  ;;  %v3495_v47 = vpop.f32.mrf.mxu0  ;;  %5810 = vmatprep.subr.mxu1 %v8065_v55 }
 0x2f1   : > { %5811 = vmatpush3.msra.mxu1 %v3139_v36  ;;  %v3137_v36 = vld [vmem:[%s9292_s4 + $0x418] sm:$0xff] }
 0x2f2   : > { %v3238_v1 = vpop.f32.mrf.mxu1  ;;  %v3498_v28 = vpop.f32.mrf.mxu0  ;;  %3812 = vmatmul.mubr.f32.gmra.mxu1 %v2850_v44  ;;  %4072 = vmatmul.mubr.f32.gmra.mxu0 %v2891_v33  ;;  %v2893_v33 = vld [vmem:[#allocation2 + $0x79] sm:$0xff] }
 0x2f3   : > { %v8220_v54 = vadd.f32 %v3498_v28, %v3229_v62  ;;  %3816 = vmatprep.mubr.f32.mxu1 %v2892_v10  ;;  %4076 = vmatprep.mubr.f32.mxu0 %v2933_v16  ;;  %v3239_v45 = vadd.f32 %v8201_v56, %v3238_v1  ;;  %v2852_v44 = vld [vmem:[#allocation2 + $0x78] sm:$0xff]  ;;  %v2894_v16 = vld [vmem:[#allocation2 + $0x81] sm:$0xff] }
 0x2f4   : > { %v3240_v14 = vpop.f32.mrf.mxu1  ;;  %v3500_v0 = vpop.f32.mrf.mxu0  ;;  %5812 = vmatprep.subr.mxu1 %v8065_v55 }
 0x2f5   : > { %5813 = vmatpush3.msra.mxu1 %v3138_v50  ;;  %v2935_v50 = vld [vmem:[#allocation2 + $0x82] sm:$0xff]  ;;  %v3136_v14 = vld [vmem:[%s9292_s4 + $0x410] sm:$0xff] }
 0x2f6   : > { %v3243_v42 = vpop.f32.mrf.mxu1  ;;  %v3503_v30 = vpop.f32.mrf.mxu0  ;;  %3817 = vmatmul.mubr.f32.gmra.mxu1 %v2851_v17  ;;  %4077 = vmatmul.mubr.f32.gmra.mxu0 %v2892_v10 }
 0x2f7   : > { %v8227_v27 = vadd.f32 %v3503_v30, %v3234_v26  ;;  %3821 = vmatprep.mubr.f32.mxu1 %v2893_v33  ;;  %4081 = vmatprep.mubr.f32.mxu0 %v2934_v41  ;;  %v3244_v1 = vadd.f32 %v8201_v56, %v3243_v42  ;;  %v2853_v30 = vld [vmem:[#allocation2 + $0x80] sm:$0xff] }
 0x2f8   : > { %v3245_v47 = vpop.f32.mrf.mxu1  ;;  %v3505_v62 = vpop.f32.mrf.mxu0  ;;  %5814 = vmatprep.subr.mxu1 %v8065_v55 }
 0x2f9   : > { %5815 = vmatpush3.msra.mxu1 %v3137_v36  ;;  %v2895_v36 = vld [vmem:[#allocation2 + $0x89] sm:$0xff] }
 0x2fa   : > { %v3248_v28 = vpop.f32.mrf.mxu1  ;;  %v3508_v10 = vpop.f32.mrf.mxu0  ;;  %3822 = vmatmul.mubr.f32.gmra.mxu1 %v2852_v44  ;;  %4082 = vmatmul.mubr.f32.gmra.mxu0 %v2893_v33  ;;  %v2936_v47 = vld [vmem:[#allocation2 + $0x8a] sm:$0xff] }
 0x2fb   : > { %v8234_v0 = vadd.f32 %v3508_v10, %v3239_v45  ;;  %3826 = vmatprep.mubr.f32.mxu1 %v2894_v16  ;;  %4086 = vmatprep.mubr.f32.mxu0 %v2935_v50  ;;  %v3135_v62 = vld [vmem:[%s9292_s4 + $0x408] sm:$0xff]  ;;  %v3249_v42 = vadd.f32 %v8201_v56, %v3248_v28 }
 0x2fc   : > { %v3250_v26 = vpop.f32.mrf.mxu1  ;;  %v3510_v17 = vpop.f32.mrf.mxu0  ;;  %5816 = vmatprep.subr.mxu1 %v8065_v55  ;;  %v2854_v50 = vld [vmem:[#allocation2 + $0x88] sm:$0xff] }
 0x2fd   : > { %5817 = vmatpush3.msra.mxu1 %v3136_v14  ;;  %v2896_v26 = vld [vmem:[#allocation2 + $0x91] sm:$0xff] }
 0x2fe   : > { %v3253_v41 = vpop.f32.mrf.mxu1  ;;  %v3513_v33 = vpop.f32.mrf.mxu0  ;;  %3827 = vmatmul.mubr.f32.gmra.mxu1 %v2853_v30  ;;  %4087 = vmatmul.mubr.f32.gmra.mxu0 %v2894_v16  ;;  %v2937_v17 = vld [vmem:[#allocation2 + $0x92] sm:$0xff] }
 0x2ff   : > { %v8241_v45 = vadd.f32 %v3513_v33, %v3244_v1  ;;  %3831 = vmatprep.mubr.f32.mxu1 %v2895_v36  ;;  %4091 = vmatprep.mubr.f32.mxu0 %v2936_v47  ;;  %v3134_v1 = vld [vmem:[%s9292_s4 + $0x400] sm:$0xff]  ;;  %v3254_v28 = vadd.f32 %v8201_v56, %v3253_v41 }
 0x300   : > { %v3255_v44 = vpop.f32.mrf.mxu1  ;;  %v3515_v10 = vpop.f32.mrf.mxu0  ;;  %5818 = vmatprep.subr.mxu1 %v8065_v55  ;;  %v2898_v41 = vld [vmem:[#allocation2 + $0xa1] sm:$0xff] }
 0x301   : > { %5819 = vmatpush3.msra.mxu1 %v3135_v62  ;;  %v2855_v62 = vld [vmem:[#allocation2 + $0x90] sm:$0xff]  ;;  %v2897_v10 = vld [vmem:[#allocation2 + $0x99] sm:$0xff] }
 0x302   : > { %v3258_v14 = vpop.f32.mrf.mxu1  ;;  %v3518_v16 = vpop.f32.mrf.mxu0  ;;  %3832 = vmatmul.mubr.f32.gmra.mxu1 %v2854_v50  ;;  %4092 = vmatmul.mubr.f32.gmra.mxu0 %v2895_v36  ;;  %v2938_v50 = vld [vmem:[#allocation2 + $0x9a] sm:$0xff] }
 0x303   : > { %v8248_v30 = vadd.f32 %v3518_v16, %v3249_v42  ;;  %3836 = vmatprep.mubr.f32.mxu1 %v2896_v26  ;;  %4096 = vmatprep.mubr.f32.mxu0 %v2937_v17  ;;  %v3259_v17 = vadd.f32 %v8201_v56, %v3258_v14  ;;  %v2899_v14 = vld [vmem:[#allocation2 + $0xa9] sm:$0xff] }
 0x304   : > { %v3260_v33 = vpop.f32.mrf.mxu1  ;;  %v3520_v47 = vpop.f32.mrf.mxu0  ;;  %5820 = vmatprep.subr.mxu1 %v8065_v55 }
 0x305   : > { %5821 = vmatpush3.msra.mxu1 %v3134_v1  ;;  %v2856_v33 = vld [vmem:[#allocation2 + $0x98] sm:$0xff]  ;;  %v2939_v1 = vld [vmem:[#allocation2 + $0xa2] sm:$0xff] }
 0x306   : > { %v3263_v44 = vpop.f32.mrf.mxu1  ;;  %v3523_v36 = vpop.f32.mrf.mxu0  ;;  %3837 = vmatmul.mubr.f32.gmra.mxu1 %v2855_v62  ;;  %4097 = vmatmul.mubr.f32.gmra.mxu0 %v2896_v26 }
 0x307   : > { %v8252_v37 = vadd.f32 %v3523_v36, %v3254_v28  ;;  %3841 = vmatprep.mubr.f32.mxu1 %v2897_v10  ;;  %4101 = vmatprep.mubr.f32.mxu0 %v2938_v50  ;;  %v3264_v62 = vadd.f32 %v8201_v56, %v3263_v44  ;;  %v2857_v36 = vld [vmem:[#allocation2 + $0xa0] sm:$0xff]  ;;  %v2900_v44 = vld [vmem:[#allocation2 + $0xb1] sm:$0xff] }
 0x308   : > { %v3265_v42 = vpop.f32.mrf.mxu1  ;;  %v3525_v16 = vpop.f32.mrf.mxu0 }
 0x309   : > { %v2940_v16 = vld [vmem:[#allocation2 + $0xaa] sm:$0xff] }
 0x30a   : > { %v3268_v55 = vpop.f32.mrf.mxu1  ;;  %v3528_v47 = vpop.f32.mrf.mxu0  ;;  %3842 = vmatmul.mubr.f32.gmra.mxu1 %v2856_v33  ;;  %4102 = vmatmul.mubr.f32.gmra.mxu0 %v2897_v10 }
 0x30b   : > { %v8255_v40 = vadd.f32 %v3528_v47, %v3259_v17  ;;  %3846 = vmatprep.mubr.f32.mxu1 %v2898_v41  ;;  %4106 = vmatprep.mubr.f32.mxu0 %v2939_v1  ;;  %v3269_v33 = vadd.f32 %v8201_v56, %v3268_v55  ;;  %v2858_v47 = vld [vmem:[#allocation2 + $0xa8] sm:$0xff]  ;;  %v2901_v55 = vld [vmem:[#allocation2 + $0xb9] sm:$0xff] }
 0x30c   : > { %v3270_v26 = vpop.f32.mrf.mxu1  ;;  %v3530_v28 = vpop.f32.mrf.mxu0 }
 0x30d   : > { %v2941_v28 = vld [vmem:[#allocation2 + $0xb2] sm:$0xff] }
 0x30e   : > { %v3273_v50 = vpop.f32.mrf.mxu1  ;;  %v3533_v42 = vpop.f32.mrf.mxu0  ;;  %3847 = vmatmul.mubr.f32.gmra.mxu1 %v2857_v36  ;;  %4107 = vmatmul.mubr.f32.gmra.mxu0 %v2898_v41 }
 0x30f   : > { %v8258_v34 = vadd.f32 %v3533_v42, %v3264_v62  ;;  %3851 = vmatprep.mubr.f32.mxu1 %v2899_v14  ;;  %4111 = vmatprep.mubr.f32.mxu0 %v2940_v16  ;;  %v3274_v36 = vadd.f32 %v8201_v56, %v3273_v50  ;;  %v2859_v42 = vld [vmem:[#allocation2 + $0xb0] sm:$0xff]  ;;  %v2902_v50 = vld [vmem:[#allocation2 + $0xc1] sm:$0xff] }
 0x310   : > { %v3275_v10 = vpop.f32.mrf.mxu1  ;;  %v3535_v17 = vpop.f32.mrf.mxu0 }
 0x311   : > { %v2942_v17 = vld [vmem:[#allocation2 + $0xba] sm:$0xff] }
 0x312   : > { %v3278_v1 = vpop.f32.mrf.mxu1  ;;  %v3538_v26 = vpop.f32.mrf.mxu0  ;;  %3852 = vmatmul.mubr.f32.gmra.mxu1 %v2858_v47  ;;  %4112 = vmatmul.mubr.f32.gmra.mxu0 %v2899_v14 }
 0x313   : > { %v8261_v49 = vadd.f32 %v3538_v26, %v3269_v33  ;;  %3856 = vmatprep.mubr.f32.mxu1 %v2900_v44  ;;  %4116 = vmatprep.mubr.f32.mxu0 %v2941_v28  ;;  %v3279_v47 = vadd.f32 %v8201_v56, %v3278_v1  ;;  %v2860_v26 = vld [vmem:[#allocation2 + $0xb8] sm:$0xff]  ;;  %v2903_v1 = vld [vmem:[#allocation2 + $0xc9] sm:$0xff] }
 0x314   : > { %v3280_v41 = vpop.f32.mrf.mxu1  ;;  %v3540_v62 = vpop.f32.mrf.mxu0 }
 0x315   : > { %v2943_v62 = vld [vmem:[#allocation2 + $0xc2] sm:$0xff] }
 0x316   : > { %v3283_v16 = vpop.f32.mrf.mxu1  ;;  %v3543_v10 = vpop.f32.mrf.mxu0  ;;  %3857 = vmatmul.mubr.f32.gmra.mxu1 %v2859_v42  ;;  %4117 = vmatmul.mubr.f32.gmra.mxu0 %v2900_v44 }
 0x317   : > { %v8264_v21 = vadd.f32 %v3543_v10, %v3274_v36  ;;  %3861 = vmatprep.mubr.f32.mxu1 %v2901_v55  ;;  %4121 = vmatprep.mubr.f32.mxu0 %v2942_v17  ;;  %v3284_v42 = vadd.f32 %v8201_v56, %v3283_v16  ;;  %v2861_v10 = vld [vmem:[#allocation2 + $0xc0] sm:$0xff]  ;;  %v2904_v16 = vld [vmem:[#allocation2 + $0xd1] sm:$0xff] }
 0x318   : > { %v3285_v14 = vpop.f32.mrf.mxu1  ;;  %v3545_v33 = vpop.f32.mrf.mxu0 }
 0x319   : > { %v2944_v33 = vld [vmem:[#allocation2 + $0xca] sm:$0xff] }
 0x31a   : > { %v3288_v28 = vpop.f32.mrf.mxu1  ;;  %v3548_v41 = vpop.f32.mrf.mxu0  ;;  %3862 = vmatmul.mubr.f32.gmra.mxu1 %v2860_v26  ;;  %4122 = vmatmul.mubr.f32.gmra.mxu0 %v2901_v55 }
 0x31b   : > { %v8267_v51 = vadd.f32 %v3548_v41, %v3279_v47  ;;  %3866 = vmatprep.mubr.f32.mxu1 %v2902_v50  ;;  %4126 = vmatprep.mubr.f32.mxu0 %v2943_v62  ;;  %v3289_v26 = vadd.f32 %v8201_v56, %v3288_v28  ;;  %v2862_v41 = vld [vmem:[#allocation2 + $0xc8] sm:$0xff]  ;;  %v2905_v28 = vld [vmem:[#allocation2 + $0xd9] sm:$0xff] }
 0x31c   : > { %v3290_v44 = vpop.f32.mrf.mxu1  ;;  %v3550_v36 = vpop.f32.mrf.mxu0 }
 0x31d   : > { %v2945_v36 = vld [vmem:[#allocation2 + $0xd2] sm:$0xff] }
 0x31e   : > { %v3293_v17 = vpop.f32.mrf.mxu1  ;;  %v3553_v14 = vpop.f32.mrf.mxu0  ;;  %3867 = vmatmul.mubr.f32.gmra.mxu1 %v2861_v10  ;;  %4127 = vmatmul.mubr.f32.gmra.mxu0 %v2902_v50 }
 0x31f   : > { %v8270_v23 = vadd.f32 %v3553_v14, %v3284_v42  ;;  %3871 = vmatprep.mubr.f32.mxu1 %v2903_v1  ;;  %4131 = vmatprep.mubr.f32.mxu0 %v2944_v33  ;;  %v3294_v10 = vadd.f32 %v8201_v56, %v3293_v17  ;;  %v2863_v14 = vld [vmem:[#allocation2 + $0xd0] sm:$0xff]  ;;  %v2906_v17 = vld [vmem:[#allocation2 + $0xe1] sm:$0xff] }
 0x320   : > { %v3295_v55 = vpop.f32.mrf.mxu1  ;;  %v3555_v47 = vpop.f32.mrf.mxu0 }
 0x321   : > { %v2946_v47 = vld [vmem:[#allocation2 + $0xda] sm:$0xff] }
 0x322   : > { %v3298_v62 = vpop.f32.mrf.mxu1  ;;  %v3558_v44 = vpop.f32.mrf.mxu0  ;;  %3872 = vmatmul.mubr.f32.gmra.mxu1 %v2862_v41  ;;  %4132 = vmatmul.mubr.f32.gmra.mxu0 %v2903_v1 }
 0x323   : > { %v8273_v29 = vadd.f32 %v3558_v44, %v3289_v26  ;;  %3876 = vmatprep.mubr.f32.mxu1 %v2904_v16  ;;  %4136 = vmatprep.mubr.f32.mxu0 %v2945_v36  ;;  %v3299_v41 = vadd.f32 %v8201_v56, %v3298_v62  ;;  %v2864_v44 = vld [vmem:[#allocation2 + $0xd8] sm:$0xff]  ;;  %v2907_v62 = vld [vmem:[#allocation2 + $0xe9] sm:$0xff] }
 0x324   : > { %v3300_v50 = vpop.f32.mrf.mxu1  ;;  %v3560_v42 = vpop.f32.mrf.mxu0 }
 0x325   : > { %v2947_v42 = vld [vmem:[#allocation2 + $0xe2] sm:$0xff] }
 0x326   : > { %v3303_v33 = vpop.f32.mrf.mxu1  ;;  %v3563_v55 = vpop.f32.mrf.mxu0  ;;  %3877 = vmatmul.mubr.f32.gmra.mxu1 %v2863_v14  ;;  %4137 = vmatmul.mubr.f32.gmra.mxu0 %v2904_v16 }
 0x327   : > { %v8276_v9 = vadd.f32 %v3563_v55, %v3294_v10  ;;  %3881 = vmatprep.mubr.f32.mxu1 %v2905_v28  ;;  %4141 = vmatprep.mubr.f32.mxu0 %v2946_v47  ;;  %v3304_v14 = vadd.f32 %v8201_v56, %v3303_v33  ;;  %v2865_v55 = vld [vmem:[#allocation2 + $0xe0] sm:$0xff]  ;;  %v2908_v33 = vld [vmem:[#allocation2 + $0xf1] sm:$0xff] }
 0x328   : > { %v3305_v1 = vpop.f32.mrf.mxu1  ;;  %v3565_v26 = vpop.f32.mrf.mxu0 }
 0x329   : > { %v2948_v26 = vld [vmem:[#allocation2 + $0xea] sm:$0xff] }
 0x32a   : > { %v3308_v36 = vpop.f32.mrf.mxu1  ;;  %v3568_v50 = vpop.f32.mrf.mxu0  ;;  %3882 = vmatmul.mubr.f32.gmra.mxu1 %v2864_v44  ;;  %4142 = vmatmul.mubr.f32.gmra.mxu0 %v2905_v28 }
 0x32b   : > { %v8279_v18 = vadd.f32 %v3568_v50, %v3299_v41  ;;  %3886 = vmatprep.mubr.f32.mxu1 %v2906_v17  ;;  %4146 = vmatprep.mubr.f32.mxu0 %v2947_v42  ;;  %v3309_v44 = vadd.f32 %v8201_v56, %v3308_v36  ;;  %v2866_v50 = vld [vmem:[#allocation2 + $0xe8] sm:$0xff]  ;;  %v2909_v36 = vld [vmem:[#allocation2 + $0xf9] sm:$0xff] }
 0x32c   : > { %v3310_v16 = vpop.f32.mrf.mxu1  ;;  %v3570_v10 = vpop.f32.mrf.mxu0 }
 0x32d   : > { %v2949_v10 = vld [vmem:[#allocation2 + $0xf2] sm:$0xff] }
 0x32e   : > { %v3313_v47 = vpop.f32.mrf.mxu1  ;;  %v3573_v1 = vpop.f32.mrf.mxu0  ;;  %3887 = vmatmul.mubr.f32.gmra.mxu1 %v2865_v55  ;;  %4147 = vmatmul.mubr.f32.gmra.mxu0 %v2906_v17 }
 0x32f   : > { %v8282_v60 = vadd.f32 %v3573_v1, %v3304_v14  ;;  %3891 = vmatprep.mubr.f32.mxu1 %v2907_v62  ;;  %4151 = vmatprep.mubr.f32.mxu0 %v2948_v26  ;;  %v3314_v55 = vadd.f32 %v8201_v56, %v3313_v47  ;;  %v2867_v1 = vld [vmem:[#allocation2 + $0xf0] sm:$0xff]  ;;  %v2910_v47 = vld [vmem:[#allocation2 + $0x101] sm:$0xff] }
 0x330   : > { %v3315_v28 = vpop.f32.mrf.mxu1  ;;  %v3575_v41 = vpop.f32.mrf.mxu0 }
 0x331   : > { %v2950_v41 = vld [vmem:[#allocation2 + $0xfa] sm:$0xff] }
 0x332   : > { %v3318_v42 = vpop.f32.mrf.mxu1  ;;  %v3578_v16 = vpop.f32.mrf.mxu0  ;;  %3892 = vmatmul.mubr.f32.gmra.mxu1 %v2866_v50  ;;  %4152 = vmatmul.mubr.f32.gmra.mxu0 %v2907_v62 }
 0x333   : > { %v8285_v25 = vadd.f32 %v3578_v16, %v3309_v44  ;;  %3896 = vmatprep.mubr.f32.mxu1 %v2908_v33  ;;  %4156 = vmatprep.mubr.f32.mxu0 %v2949_v10  ;;  %v3319_v50 = vadd.f32 %v8201_v56, %v3318_v42  ;;  %v2868_v16 = vld [vmem:[#allocation2 + $0xf8] sm:$0xff]  ;;  %v2911_v42 = vld [vmem:[#allocation2 + $0x109] sm:$0xff] }
 0x334   : > { %v3320_v17 = vpop.f32.mrf.mxu1  ;;  %v3580_v14 = vpop.f32.mrf.mxu0 }
 0x335   : > { %v2951_v14 = vld [vmem:[#allocation2 + $0x102] sm:$0xff] }
 0x336   : > { %v3323_v26 = vpop.f32.mrf.mxu1  ;;  %v3583_v28 = vpop.f32.mrf.mxu0  ;;  %3897 = vmatmul.mubr.f32.gmra.mxu1 %v2867_v1  ;;  %4157 = vmatmul.mubr.f32.gmra.mxu0 %v2908_v33 }
 0x337   : > { %v8288_v46 = vadd.f32 %v3583_v28, %v3314_v55  ;;  %3901 = vmatprep.mubr.f32.mxu1 %v2909_v36  ;;  %4161 = vmatprep.mubr.f32.mxu0 %v2950_v41  ;;  %v3324_v1 = vadd.f32 %v8201_v56, %v3323_v26  ;;  %v2869_v28 = vld [vmem:[#allocation2 + $0x100] sm:$0xff]  ;;  %v2912_v26 = vld [vmem:[#allocation2 + $0x111] sm:$0xff] }
 0x338   : > { %v3325_v62 = vpop.f32.mrf.mxu1  ;;  %v3585_v44 = vpop.f32.mrf.mxu0 }
 0x339   : > { %v2952_v44 = vld [vmem:[#allocation2 + $0x10a] sm:$0xff] }
 0x33a   : > { %v3328_v10 = vpop.f32.mrf.mxu1  ;;  %v3588_v17 = vpop.f32.mrf.mxu0  ;;  %3902 = vmatmul.mubr.f32.gmra.mxu1 %v2868_v16  ;;  %4162 = vmatmul.mubr.f32.gmra.mxu0 %v2909_v36 }
 0x33b   : > { %v8291_v5 = vadd.f32 %v3588_v17, %v3319_v50  ;;  %3906 = vmatprep.mubr.f32.mxu1 %v2910_v47  ;;  %4166 = vmatprep.mubr.f32.mxu0 %v2951_v14  ;;  %v3329_v16 = vadd.f32 %v8201_v56, %v3328_v10  ;;  %v2870_v17 = vld [vmem:[#allocation2 + $0x108] sm:$0xff]  ;;  %v2913_v10 = vld [vmem:[#allocation2 + $0x119] sm:$0xff] }
 0x33c   : > { %v3330_v33 = vpop.f32.mrf.mxu1  ;;  %v3590_v55 = vpop.f32.mrf.mxu0 }
 0x33d   : > { %v2953_v55 = vld [vmem:[#allocation2 + $0x112] sm:$0xff] }
 0x33e   : > { %v3333_v41 = vpop.f32.mrf.mxu1  ;;  %v3593_v62 = vpop.f32.mrf.mxu0  ;;  %3907 = vmatmul.mubr.f32.gmra.mxu1 %v2869_v28  ;;  %4167 = vmatmul.mubr.f32.gmra.mxu0 %v2910_v47 }
 0x33f   : > { %v8294_v4 = vadd.f32 %v3593_v62, %v3324_v1  ;;  %3911 = vmatprep.mubr.f32.mxu1 %v2911_v42  ;;  %4171 = vmatprep.mubr.f32.mxu0 %v2952_v44  ;;  %v3334_v28 = vadd.f32 %v8201_v56, %v3333_v41  ;;  %v2871_v62 = vld [vmem:[#allocation2 + $0x110] sm:$0xff]  ;;  %v2914_v41 = vld [vmem:[#allocation2 + $0x121] sm:$0xff] }
 0x340   : > { %v3335_v36 = vpop.f32.mrf.mxu1  ;;  %v3595_v50 = vpop.f32.mrf.mxu0 }
 0x341   : > { %v2954_v50 = vld [vmem:[#allocation2 + $0x11a] sm:$0xff] }
 0x342   : > { %v3338_v14 = vpop.f32.mrf.mxu1  ;;  %v3598_v33 = vpop.f32.mrf.mxu0  ;;  %3912 = vmatmul.mubr.f32.gmra.mxu1 %v2870_v17  ;;  %4172 = vmatmul.mubr.f32.gmra.mxu0 %v2911_v42 }
 0x343   : > { %v8297_v57 = vadd.f32 %v3598_v33, %v3329_v16  ;;  %3916 = vmatprep.mubr.f32.mxu1 %v2912_v26  ;;  %4176 = vmatprep.mubr.f32.mxu0 %v2953_v55  ;;  %v3339_v17 = vadd.f32 %v8201_v56, %v3338_v14  ;;  %v2872_v33 = vld [vmem:[#allocation2 + $0x118] sm:$0xff]  ;;  %v2915_v14 = vld [vmem:[#allocation2 + $0x129] sm:$0xff] }
 0x344   : > { %v3340_v47 = vpop.f32.mrf.mxu1  ;;  %v3600_v1 = vpop.f32.mrf.mxu0 }
 0x345   : > { %v2955_v1 = vld [vmem:[#allocation2 + $0x122] sm:$0xff] }
 0x346   : > { %v3343_v44 = vpop.f32.mrf.mxu1  ;;  %v3603_v36 = vpop.f32.mrf.mxu0  ;;  %3917 = vmatmul.mubr.f32.gmra.mxu1 %v2871_v62  ;;  %4177 = vmatmul.mubr.f32.gmra.mxu0 %v2912_v26 }
 0x347   : > { %v8300_v39 = vadd.f32 %v3603_v36, %v3334_v28  ;;  %3921 = vmatprep.mubr.f32.mxu1 %v2913_v10  ;;  %4181 = vmatprep.mubr.f32.mxu0 %v2954_v50  ;;  %v3344_v62 = vadd.f32 %v8201_v56, %v3343_v44  ;;  %v2873_v36 = vld [vmem:[#allocation2 + $0x120] sm:$0xff]  ;;  %v2916_v44 = vld [vmem:[#allocation2 + $0x131] sm:$0xff] }
 0x348   : > { %v3345_v42 = vpop.f32.mrf.mxu1  ;;  %v3605_v16 = vpop.f32.mrf.mxu0 }
 0x349   : > { %v2956_v16 = vld [vmem:[#allocation2 + $0x12a] sm:$0xff] }
 0x34a   : > { %v3348_v55 = vpop.f32.mrf.mxu1  ;;  %v3608_v47 = vpop.f32.mrf.mxu0  ;;  %3922 = vmatmul.mubr.f32.gmra.mxu1 %v2872_v33  ;;  %4182 = vmatmul.mubr.f32.gmra.mxu0 %v2913_v10 }
 0x34b   : > { %v8303_v48 = vadd.f32 %v3608_v47, %v3339_v17  ;;  %3926 = vmatprep.mubr.f32.mxu1 %v2914_v41  ;;  %4186 = vmatprep.mubr.f32.mxu0 %v2955_v1  ;;  %v3349_v33 = vadd.f32 %v8201_v56, %v3348_v55  ;;  %v2874_v47 = vld [vmem:[#allocation2 + $0x128] sm:$0xff]  ;;  %v2917_v55 = vld [vmem:[#allocation2 + $0x139] sm:$0xff] }
 0x34c   : > { %v3350_v26 = vpop.f32.mrf.mxu1  ;;  %v3610_v28 = vpop.f32.mrf.mxu0 }
 0x34d   : > { %v2957_v28 = vld [vmem:[#allocation2 + $0x132] sm:$0xff] }
 0x34e   : > { %v3353_v50 = vpop.f32.mrf.mxu1  ;;  %v3613_v42 = vpop.f32.mrf.mxu0  ;;  %3927 = vmatmul.mubr.f32.gmra.mxu1 %v2873_v36  ;;  %4187 = vmatmul.mubr.f32.gmra.mxu0 %v2914_v41 }
 0x34f   : > { %v8306_v19 = vadd.f32 %v3613_v42, %v3344_v62  ;;  %3931 = vmatprep.mubr.f32.mxu1 %v2915_v14  ;;  %4191 = vmatprep.mubr.f32.mxu0 %v2956_v16  ;;  %v3354_v36 = vadd.f32 %v8201_v56, %v3353_v50  ;;  %v2875_v42 = vld [vmem:[#allocation2 + $0x130] sm:$0xff]  ;;  %v2918_v50 = vld [vmem:[#allocation2 + $0x141] sm:$0xff] }
 0x350   : > { %v3355_v10 = vpop.f32.mrf.mxu1  ;;  %v3615_v17 = vpop.f32.mrf.mxu0 }
 0x351   : > { %v2958_v17 = vld [vmem:[#allocation2 + $0x13a] sm:$0xff] }
 0x352   : > { %v3358_v1 = vpop.f32.mrf.mxu1  ;;  %v3618_v26 = vpop.f32.mrf.mxu0  ;;  %3932 = vmatmul.mubr.f32.gmra.mxu1 %v2874_v47  ;;  %4192 = vmatmul.mubr.f32.gmra.mxu0 %v2915_v14 }
 0x353   : > { %v8309_v13 = vadd.f32 %v3618_v26, %v3349_v33  ;;  %3936 = vmatprep.mubr.f32.mxu1 %v2916_v44  ;;  %4196 = vmatprep.mubr.f32.mxu0 %v2957_v28  ;;  %v3359_v47 = vadd.f32 %v8201_v56, %v3358_v1  ;;  %v2876_v26 = vld [vmem:[#allocation2 + $0x138] sm:$0xff]  ;;  %v2919_v1 = vld [vmem:[#allocation2 + $0x149] sm:$0xff] }
 0x354   : > { %v3360_v41 = vpop.f32.mrf.mxu1  ;;  %v3620_v62 = vpop.f32.mrf.mxu0 }
 0x355   : > { %v2959_v62 = vld [vmem:[#allocation2 + $0x142] sm:$0xff] }
 0x356   : > { %v3363_v16 = vpop.f32.mrf.mxu1  ;;  %v3623_v10 = vpop.f32.mrf.mxu0  ;;  %3937 = vmatmul.mubr.f32.gmra.mxu1 %v2875_v42  ;;  %4197 = vmatmul.mubr.f32.gmra.mxu0 %v2916_v44 }
 0x357   : > { %v8312_v20 = vadd.f32 %v3623_v10, %v3354_v36  ;;  %3941 = vmatprep.mubr.f32.mxu1 %v2917_v55  ;;  %4201 = vmatprep.mubr.f32.mxu0 %v2958_v17  ;;  %v3364_v42 = vadd.f32 %v8201_v56, %v3363_v16  ;;  %v2877_v10 = vld [vmem:[#allocation2 + $0x140] sm:$0xff]  ;;  %v2920_v16 = vld [vmem:[#allocation2 + $0x151] sm:$0xff] }
 0x358   : > { %v3365_v14 = vpop.f32.mrf.mxu1  ;;  %v3625_v33 = vpop.f32.mrf.mxu0 }
 0x359   : > { %v2960_v33 = vld [vmem:[#allocation2 + $0x14a] sm:$0xff] }
 0x35a   : > { %v3368_v28 = vpop.f32.mrf.mxu1  ;;  %v3628_v41 = vpop.f32.mrf.mxu0  ;;  %3942 = vmatmul.mubr.f32.gmra.mxu1 %v2876_v26  ;;  %4202 = vmatmul.mubr.f32.gmra.mxu0 %v2917_v55 }
 0x35b   : > { %v8315_v58 = vadd.f32 %v3628_v41, %v3359_v47  ;;  %3946 = vmatprep.mubr.f32.mxu1 %v2918_v50  ;;  %4206 = vmatprep.mubr.f32.mxu0 %v2959_v62  ;;  %v3369_v26 = vadd.f32 %v8201_v56, %v3368_v28  ;;  %v2878_v41 = vld [vmem:[#allocation2 + $0x148] sm:$0xff]  ;;  %v2921_v28 = vld [vmem:[#allocation2 + $0x159] sm:$0xff] }
 0x35c   : > { %v3370_v44 = vpop.f32.mrf.mxu1  ;;  %v3630_v36 = vpop.f32.mrf.mxu0 }
 0x35d   : > { %v2961_v36 = vld [vmem:[#allocation2 + $0x152] sm:$0xff] }
 0x35e   : > { %v3373_v17 = vpop.f32.mrf.mxu1  ;;  %v3633_v14 = vpop.f32.mrf.mxu0  ;;  %3947 = vmatmul.mubr.f32.gmra.mxu1 %v2877_v10  ;;  %4207 = vmatmul.mubr.f32.gmra.mxu0 %v2918_v50 }
 0x35f   : > { %v8318_v22 = vadd.f32 %v3633_v14, %v3364_v42  ;;  %3951 = vmatprep.mubr.f32.mxu1 %v2919_v1  ;;  %4211 = vmatprep.mubr.f32.mxu0 %v2960_v33  ;;  %v3374_v10 = vadd.f32 %v8201_v56, %v3373_v17  ;;  %v2879_v14 = vld [vmem:[#allocation2 + $0x150] sm:$0xff] }
 0x360   : > { %v3375_v55 = vpop.f32.mrf.mxu1  ;;  %v3635_v47 = vpop.f32.mrf.mxu0 }
 0x361   : > { %v2962_v47 = vld [vmem:[#allocation2 + $0x15a] sm:$0xff] }
 0x362   : > { %v3378_v62 = vpop.f32.mrf.mxu1  ;;  %v3638_v44 = vpop.f32.mrf.mxu0  ;;  %3952 = vmatmul.mubr.f32.gmra.mxu1 %v2878_v41  ;;  %4212 = vmatmul.mubr.f32.gmra.mxu0 %v2919_v1  ;;  %v2963_v41 = vld [vmem:[#allocation2 + $0x162] sm:$0xff] }
 0x363   : > { %v8321_v8 = vadd.f32 %v3638_v44, %v3369_v26  ;;  %3956 = vmatprep.mubr.f32.mxu1 %v2920_v16  ;;  %4216 = vmatprep.mubr.f32.mxu0 %v2961_v36  ;;  %v3379_v44 = vadd.f32 %v8201_v56, %v3378_v62  ;;  %v2880_v36 = vld [vmem:[#allocation2 + $0x158] sm:$0xff]  ;;  %v2965_v62 = vld [vmem:[#allocation2 + $0x2b] sm:$0xff] }
 0x364   : > { %v3380_v50 = vpop.f32.mrf.mxu1  ;;  %v3640_v42 = vpop.f32.mrf.mxu0 }
 0x366   : > { %v3383_v33 = vpop.f32.mrf.mxu1  ;;  %v3643_v55 = vpop.f32.mrf.mxu0  ;;  %3957 = vmatmul.mubr.f32.gmra.mxu1 %v2879_v14  ;;  %4217 = vmatmul.mubr.f32.gmra.mxu0 %v2920_v16  ;;  %v8329_v16 = vld [vmem:[#allocation2] sm:$0xff] }
 0x367   : > { %v8324_v3 = vadd.f32 %v3643_v55, %v3374_v10  ;;  %3961 = vmatprep.mubr.f32.mxu1 %v2921_v28  ;;  %4221 = vmatprep.mubr.f32.mxu0 %v2962_v47  ;;  %v2922_v10 = vld [vmem:[#allocation2 + $0x161] sm:$0xff]  ;;  %v2964_v47 = vld [vmem:[#allocation2 + $0x16a] sm:$0xff] }
 0x368   : > { %v3385_v1 = vpop.f32.mrf.mxu1  ;;  %v3645_v26 = vpop.f32.mrf.mxu0 }
 0x369   : > { %v3384_v1 = vadd.f32 %v8201_v56, %v3383_v33 }
 0x36a   : > { %v3388_v50 = vpop.f32.mrf.mxu1  ;;  %v3648_v42 = vpop.f32.mrf.mxu0  ;;  %3962 = vmatmul.mubr.f32.gmra.mxu1 %v2880_v36  ;;  %4222 = vmatmul.mubr.f32.gmra.mxu0 %v2921_v28 }
 0x36b   : > { %v8327_v17 = vadd.f32 %v3648_v42, %v3379_v44  ;;  %4226 = vmatprep.mubr.f32.mxu0 %v2963_v41  ;;  %5822 = vmatprep.mubr.msk.f32.mxu1 %vm6258_vm0, %v8329_v16  ;;  %v2923_v41 = vld [vmem:[#allocation2 + $0x169] sm:$0xff]  ;;  %v3389_v42 = vadd.f32 %v8201_v56, %v3388_v50 }
 0x36c   : > { %v3390_v14 = vpop.f32.mrf.mxu1  ;;  %v3650_v55 = vpop.f32.mrf.mxu0 }
 0x36d   : > { %v2966_v14 = vld [vmem:[#allocation2 + $0x33] sm:$0xff] }
 0x36e   : > { %v3393_v26 = vpop.f32.mrf.mxu1  ;;  %v3653_v32 = vpop.f32.mrf.mxu0  ;;  %4227 = vmatmul.mubr.f32.gmra.mxu0 %v2922_v10  ;;  %5823 = vmatmul.mubr.f32.vlgmr.msra.gmra.mxu1 %v2965_v62 }
 0x36f   : > { %v8334_v28 = vadd.f32 %v3653_v32, %v3384_v1  ;;  %4231 = vmatprep.mubr.f32.mxu0 %v2964_v47  ;;  %5825 = vmatprep.mubr.msk.f32.mxu1 %vm6258_vm0, %v8329_v16  ;;  %v3394_v47 = vadd.f32 %v8201_v56, %v3393_v26  ;;  %v2967_v1 = vld [vmem:[#allocation2 + $0x3b] sm:$0xff] }
 0x370   : > { %v3395_v44 = vpop.f32.mrf.mxu1  ;;  %v3655_v36 = vpop.f32.mrf.mxu0 }
 0x372   : > { %v3398_v55 = vpop.f32.mrf.mxu1  ;;  %v3658_v7 = vpop.f32.mrf.mxu0  ;;  %4232 = vmatmul.mubr.f32.gmra.mxu0 %v2923_v41  ;;  %5826 = vmatmul.mubr.f32.gmra.mxu1 %v2966_v14 }
 0x373   : > { %v8339_v33 = vadd.f32 %v3658_v7, %v3389_v42  ;;  %5828 = vmatprep.mubr.msk.f32.mxu1 %vm6258_vm0, %v8329_v16  ;;  %5977 = vmatprep.mubr.msk.f32.mxu0 %vm6258_vm0, %v8329_v16  ;;  %v3399_v36 = vadd.f32 %v8201_v56, %v3398_v55  ;;  %v2968_v42 = vld [vmem:[#allocation2 + $0x43] sm:$0xff] }
 0x374   : > { %v3400_v32 = vpop.f32.mrf.mxu1  ;;  %v3660_v10 = vpop.f32.mrf.mxu0 }
 0x376   : > { %v3403_v62 = vpop.f32.mrf.mxu1  ;;  %v3663_v50 = vpop.f32.mrf.mxu0  ;;  %5829 = vmatmul.mubr.f32.gmra.mxu1 %v2967_v1  ;;  %v2969_v1 = vld [vmem:[#allocation2 + $0x4b] sm:$0xff] }
 0x377   : > { %v8346_v44 = vadd.f32 %v3663_v50, %v3394_v47  ;;  %5831 = vmatprep.mubr.msk.f32.mxu1 %vm6258_vm0, %v8329_v16  ;;  %v3404_v47 = vadd.f32 %v8201_v56, %v3403_v62 }
 0x378   : > { %v3405_v7 = vpop.f32.mrf.mxu1  ;;  %v3665_v41 = vpop.f32.mrf.mxu0 }
 0x37a   : > { %v3408_v14 = vpop.f32.mrf.mxu1  ;;  %v3668_v35 = vpop.f32.mrf.mxu0  ;;  %5832 = vmatmul.mubr.f32.gmra.mxu1 %v2968_v42 }
 0x37b   : > { %v8351_v32 = vadd.f32 %v3668_v35, %v3399_v36  ;;  %5834 = vmatprep.mubr.msk.f32.mxu1 %vm6258_vm0, %v8329_v16  ;;  %v3409_v35 = vadd.f32 %v8201_v56, %v3408_v14  ;;  %v2970_v36 = vld [vmem:[#allocation2 + $0x53] sm:$0xff] }
 0x37c   : > { %v3410_v26 = vpop.f32.mrf.mxu1  ;;  %v3670_v10 = vpop.f32.mrf.mxu0 }
 0x37e   : > { %v3413_v50 = vpop.f32.mrf.mxu1  ;;  %v3673_v2 = vpop.f32.mrf.mxu0  ;;  %5835 = vmatmul.mubr.f32.gmra.mxu1 %v2969_v1 }
 0x37f   : > { %v8356_v7 = vadd.f32 %v3673_v2, %v3404_v47  ;;  %5837 = vmatprep.mubr.msk.f32.mxu1 %vm6258_vm0, %v8329_v16  ;;  %v3414_v2 = vadd.f32 %v8201_v56, %v3413_v50  ;;  %v2971_v47 = vld [vmem:[#allocation2 + $0x5b] sm:$0xff] }
 0x380   : > { %v3415_v55 = vpop.f32.mrf.mxu1  ;;  %v3675_v41 = vpop.f32.mrf.mxu0 }
 0x382   : > { %v3418_v42 = vpop.f32.mrf.mxu1  ;;  %v3678_v11 = vpop.f32.mrf.mxu0  ;;  %5838 = vmatmul.mubr.f32.gmra.mxu1 %v2970_v36  ;;  %v2972_v36 = vld [vmem:[#allocation2 + $0x63] sm:$0xff] }
 0x383   : > { %v8361_v26 = vadd.f32 %v3678_v11, %v3409_v35  ;;  %5840 = vmatprep.mubr.msk.f32.mxu1 %vm6258_vm0, %v8329_v16  ;;  %v6245_v11 = vld [vmem:[%s9293_s5] ss:$0 sm:$0xff] }
 0x384   : > { %v3420_v62 = vpop.f32.mrf.mxu1  ;;  %v3680_v10 = vpop.f32.mrf.mxu0  ;;  %v3419_v35 = vadd.f32 %v6245_v11, %v3418_v42 }
 0x386   : > { %v3423_v1 = vpop.f32.mrf.mxu1  ;;  %v3683_v52 = vpop.f32.mrf.mxu0  ;;  %5841 = vmatmul.mubr.f32.gmra.mxu1 %v2971_v47 }
 0x387   : > { %v8366_v55 = vadd.f32 %v3683_v52, %v3414_v2  ;;  %5843 = vmatprep.mubr.msk.f32.mxu1 %vm6258_vm0, %v8329_v16  ;;  %v3424_v47 = vadd.f32 %v6245_v11, %v3423_v1 }
 0x388   : > { %v3425_v14 = vpop.f32.mrf.mxu1  ;;  %v3685_v41 = vpop.f32.mrf.mxu0 }
 0x389   : > { %v2973_v14 = vld [vmem:[#allocation2 + $0x6b] sm:$0xff] }
 0x38a   : > { %v3688_v62 = vpop.f32.mrf.mxu0  ;;  %v3763_v10 = vpop.f32.mrf.mxu1  ;;  %5844 = vmatmul.mubr.f32.gmra.mxu1 %v2972_v36 }
 0x38b   : > { %v8373_v56 = vadd.f32 %v3688_v62, %v3419_v35  ;;  %v3764_v50 = vadd.f32 %v3763_v10, %v8212_v12  ;;  %5846 = vmatprep.mubr.msk.f32.mxu1 %vm6258_vm0, %v8329_v16  ;;  %v2974_v12 = vld [vmem:[#allocation2 + $0x73] sm:$0xff] }
 0x38c   : > { %v3690_v52 = vpop.f32.mrf.mxu0  ;;  %v3765_v2 = vpop.f32.mrf.mxu1 }
 0x38e   : > { %v3693_v41 = vpop.f32.mrf.mxu0  ;;  %v3768_v63 = vpop.f32.mrf.mxu1  ;;  %5847 = vmatmul.mubr.f32.gmra.mxu1 %v2973_v14 }
 0x38f   : > { %v8378_v6 = vadd.f32 %v3693_v41, %v3424_v47  ;;  %v3769_v42 = vadd.f32 %v3768_v63, %v8220_v54  ;;  %5849 = vmatprep.mubr.msk.f32.mxu1 %vm6258_vm0, %v8329_v16  ;;  %v2975_v47 = vld [vmem:[#allocation2 + $0x7b] sm:$0xff] }
 0x390   : > { %v3695_v35 = vpop.f32.mrf.mxu0  ;;  %v3770_v36 = vpop.f32.mrf.mxu1 }
 0x392   : > { %v3773_v62 = vpop.f32.mrf.mxu1  ;;  %v4033_v10 = vpop.f32.mrf.mxu0  ;;  %5850 = vmatmul.mubr.f32.gmra.mxu1 %v2974_v12 }
 0x393   : > { %v3774_v52 = vadd.f32 %v3773_v62, %v8227_v27  ;;  %v8384_v1 = vadd.f32 %v4033_v10, %v3764_v50  ;;  %5852 = vmatprep.mubr.msk.f32.mxu1 %vm6258_vm0, %v8329_v16  ;;  %v2976_v50 = vld [vmem:[#allocation2 + $0x83] sm:$0xff] }
 0x394   : > { %v3775_v11 = vpop.f32.mrf.mxu1  ;;  %v4035_v2 = vpop.f32.mrf.mxu0 }
 0x396   : > { %v3778_v63 = vpop.f32.mrf.mxu1  ;;  %v4038_v54 = vpop.f32.mrf.mxu0  ;;  %5853 = vmatmul.mubr.f32.gmra.mxu1 %v2975_v47 }
 0x397   : > { %v3779_v14 = vadd.f32 %v3778_v63, %v8234_v0  ;;  %v8389_v41 = vadd.f32 %v4038_v54, %v3769_v42  ;;  %5855 = vmatprep.mubr.msk.f32.mxu1 %vm6258_vm0, %v8329_v16  ;;  %v2977_v42 = vld [vmem:[#allocation2 + $0x8b] sm:$0xff] }
 0x398   : > { %v3780_v35 = vpop.f32.mrf.mxu1  ;;  %v4040_v27 = vpop.f32.mrf.mxu0 }
 0x39a   : > { %v3783_v36 = vpop.f32.mrf.mxu1  ;;  %v4043_v12 = vpop.f32.mrf.mxu0  ;;  %5856 = vmatmul.mubr.f32.gmra.mxu1 %v2976_v50 }
 0x39b   : > { %v3784_v62 = vadd.f32 %v3783_v36, %v8241_v45  ;;  %v8394_v10 = vadd.f32 %v4043_v12, %v3774_v52  ;;  %5858 = vmatprep.mubr.msk.f32.mxu1 %vm6258_vm0, %v8329_v16  ;;  %v2978_v52 = vld [vmem:[#allocation2 + $0x93] sm:$0xff] }
 0x39c   : > { %v3785_v11 = vpop.f32.mrf.mxu1  ;;  %v4045_v0 = vpop.f32.mrf.mxu0 }
 0x39e   : > { %v3788_v2 = vpop.f32.mrf.mxu1  ;;  %v4048_v47 = vpop.f32.mrf.mxu0  ;;  %5859 = vmatmul.mubr.f32.gmra.mxu1 %v2977_v42 }
 0x39f   : > { %v3789_v63 = vadd.f32 %v3788_v2, %v8248_v30  ;;  %v8399_v54 = vadd.f32 %v4048_v47, %v3779_v14  ;;  %5861 = vmatprep.mubr.msk.f32.mxu1 %vm6258_vm0, %v8329_v16  ;;  %v2979_v14 = vld [vmem:[#allocation2 + $0x9b] sm:$0xff] }
 0x3a0   : > { %v3790_v35 = vpop.f32.mrf.mxu1  ;;  %v4050_v45 = vpop.f32.mrf.mxu0 }
 0x3a2   : > { %v3793_v27 = vpop.f32.mrf.mxu1  ;;  %v4053_v50 = vpop.f32.mrf.mxu0  ;;  %5862 = vmatmul.mubr.f32.gmra.mxu1 %v2978_v52 }
 0x3a3   : > { %v3794_v36 = vadd.f32 %v3793_v27, %v8252_v37  ;;  %v8404_v12 = vadd.f32 %v4053_v50, %v3784_v62  ;;  %5864 = vmatprep.mubr.msk.f32.mxu1 %vm6258_vm0, %v8329_v16  ;;  %v2980_v62 = vld [vmem:[#allocation2 + $0xa3] sm:$0xff] }
 0x3a4   : > { %v3795_v11 = vpop.f32.mrf.mxu1  ;;  %v4055_v30 = vpop.f32.mrf.mxu0 }
 0x3a6   : > { %v3798_v0 = vpop.f32.mrf.mxu1  ;;  %v4058_v42 = vpop.f32.mrf.mxu0  ;;  %5865 = vmatmul.mubr.f32.gmra.mxu1 %v2979_v14 }
 0x3a7   : > { %v3799_v2 = vadd.f32 %v3798_v0, %v8255_v40  ;;  %v8409_v47 = vadd.f32 %v4058_v42, %v3789_v63  ;;  %5867 = vmatprep.mubr.msk.f32.mxu1 %vm6258_vm0, %v8329_v16  ;;  %v2981_v63 = vld [vmem:[#allocation2 + $0xab] sm:$0xff] }
 0x3a8   : > { %v3800_v35 = vpop.f32.mrf.mxu1  ;;  %v4060_v37 = vpop.f32.mrf.mxu0 }
 0x3aa   : > { %v3803_v45 = vpop.f32.mrf.mxu1  ;;  %v4063_v52 = vpop.f32.mrf.mxu0  ;;  %5868 = vmatmul.mubr.f32.gmra.mxu1 %v2980_v62 }
 0x3ab   : > { %v3804_v27 = vadd.f32 %v3803_v45, %v8258_v34  ;;  %v8414_v50 = vadd.f32 %v4063_v52, %v3794_v36  ;;  %5870 = vmatprep.mubr.msk.f32.mxu1 %vm6258_vm0, %v8329_v16  ;;  %v2982_v36 = vld [vmem:[#allocation2 + $0xb3] sm:$0xff] }
 0x3ac   : > { %v3805_v11 = vpop.f32.mrf.mxu1  ;;  %v4065_v40 = vpop.f32.mrf.mxu0 }
 0x3ae   : > { %v3808_v30 = vpop.f32.mrf.mxu1  ;;  %v4068_v14 = vpop.f32.mrf.mxu0  ;;  %5871 = vmatmul.mubr.f32.gmra.mxu1 %v2981_v63 }
 0x3af   : > { %v3809_v0 = vadd.f32 %v3808_v30, %v8261_v49  ;;  %v8419_v42 = vadd.f32 %v4068_v14, %v3799_v2  ;;  %5873 = vmatprep.mubr.msk.f32.mxu1 %vm6258_vm0, %v8329_v16  ;;  %v2983_v2 = vld [vmem:[#allocation2 + $0xbb] sm:$0xff] }
 0x3b0   : > { %v3810_v35 = vpop.f32.mrf.mxu1  ;;  %v4070_v34 = vpop.f32.mrf.mxu0 }
 0x3b2   : > { %v3813_v37 = vpop.f32.mrf.mxu1  ;;  %v4073_v62 = vpop.f32.mrf.mxu0  ;;  %5874 = vmatmul.mubr.f32.gmra.mxu1 %v2982_v36 }
 0x3b3   : > { %v3814_v45 = vadd.f32 %v3813_v37, %v8264_v21  ;;  %v8424_v52 = vadd.f32 %v4073_v62, %v3804_v27  ;;  %5876 = vmatprep.mubr.msk.f32.mxu1 %vm6258_vm0, %v8329_v16  ;;  %v2984_v27 = vld [vmem:[#allocation2 + $0xc3] sm:$0xff] }
 0x3b4   : > { %v3815_v11 = vpop.f32.mrf.mxu1  ;;  %v4075_v49 = vpop.f32.mrf.mxu0 }
 0x3b6   : > { %v3818_v40 = vpop.f32.mrf.mxu1  ;;  %v4078_v63 = vpop.f32.mrf.mxu0  ;;  %5877 = vmatmul.mubr.f32.gmra.mxu1 %v2983_v2 }
 0x3b7   : > { %v3819_v30 = vadd.f32 %v3818_v40, %v8267_v51  ;;  %v8429_v14 = vadd.f32 %v4078_v63, %v3809_v0  ;;  %5879 = vmatprep.mubr.msk.f32.mxu1 %vm6258_vm0, %v8329_v16  ;;  %v2985_v0 = vld [vmem:[#allocation2 + $0xcb] sm:$0xff] }
 0x3b8   : > { %v3820_v35 = vpop.f32.mrf.mxu1  ;;  %v4080_v21 = vpop.f32.mrf.mxu0 }
 0x3ba   : > { %v3823_v34 = vpop.f32.mrf.mxu1  ;;  %v4083_v36 = vpop.f32.mrf.mxu0  ;;  %5880 = vmatmul.mubr.f32.gmra.mxu1 %v2984_v27 }
 0x3bb   : > { %v3824_v37 = vadd.f32 %v3823_v34, %v8270_v23  ;;  %v8434_v62 = vadd.f32 %v4083_v36, %v3814_v45  ;;  %5882 = vmatprep.mubr.msk.f32.mxu1 %vm6258_vm0, %v8329_v16  ;;  %v2986_v45 = vld [vmem:[#allocation2 + $0xd3] sm:$0xff] }
 0x3bc   : > { %v3825_v11 = vpop.f32.mrf.mxu1  ;;  %v4085_v51 = vpop.f32.mrf.mxu0 }
 0x3be   : > { %v3828_v49 = vpop.f32.mrf.mxu1  ;;  %v4088_v2 = vpop.f32.mrf.mxu0  ;;  %5883 = vmatmul.mubr.f32.gmra.mxu1 %v2985_v0 }
 0x3bf   : > { %v3829_v40 = vadd.f32 %v3828_v49, %v8273_v29  ;;  %v8439_v63 = vadd.f32 %v4088_v2, %v3819_v30  ;;  %5885 = vmatprep.mubr.msk.f32.mxu1 %vm6258_vm0, %v8329_v16  ;;  %v2987_v30 = vld [vmem:[#allocation2 + $0xdb] sm:$0xff] }
 0x3c0   : > { %v3830_v35 = vpop.f32.mrf.mxu1  ;;  %v4090_v23 = vpop.f32.mrf.mxu0 }
 0x3c1   : > { %9364 = vst [vmem:[#allocation36_spill] sm:$0xff] %v8439_v63 }
 0x3c2   : > { %v3833_v21 = vpop.f32.mrf.mxu1  ;;  %v4093_v27 = vpop.f32.mrf.mxu0  ;;  %5886 = vmatmul.mubr.f32.gmra.mxu1 %v2986_v45 }
 0x3c3   : > { %v3834_v34 = vadd.f32 %v3833_v21, %v8276_v9  ;;  %v8444_v36 = vadd.f32 %v4093_v27, %v3824_v37  ;;  %5888 = vmatprep.mubr.msk.f32.mxu1 %vm6258_vm0, %v8329_v16  ;;  %v2988_v37 = vld [vmem:[#allocation2 + $0xe3] sm:$0xff] }
 0x3c4   : > { %v3835_v11 = vpop.f32.mrf.mxu1  ;;  %v4095_v29 = vpop.f32.mrf.mxu0 }
 0x3c5   : > { %9365 = vst [vmem:[#allocation37_spill] sm:$0xff] %v8444_v36 }
 0x3c6   : > { %v3838_v51 = vpop.f32.mrf.mxu1  ;;  %v4098_v0 = vpop.f32.mrf.mxu0  ;;  %5889 = vmatmul.mubr.f32.gmra.mxu1 %v2987_v30 }
 0x3c7   : > { %v3839_v49 = vadd.f32 %v3838_v51, %v8279_v18  ;;  %v8449_v2 = vadd.f32 %v4098_v0, %v3829_v40  ;;  %5891 = vmatprep.mubr.msk.f32.mxu1 %vm6258_vm0, %v8329_v16  ;;  %v2989_v40 = vld [vmem:[#allocation2 + $0xeb] sm:$0xff] }
 0x3c8   : > { %v3840_v35 = vpop.f32.mrf.mxu1  ;;  %v4100_v9 = vpop.f32.mrf.mxu0 }
 0x3c9   : > { %9366 = vst [vmem:[#allocation38_spill] sm:$0xff] %v8449_v2 }
 0x3ca   : > { %v3843_v23 = vpop.f32.mrf.mxu1  ;;  %v4103_v45 = vpop.f32.mrf.mxu0  ;;  %5892 = vmatmul.mubr.f32.gmra.mxu1 %v2988_v37 }
 0x3cb   : > { %v3844_v21 = vadd.f32 %v3843_v23, %v8282_v60  ;;  %v8454_v27 = vadd.f32 %v4103_v45, %v3834_v34  ;;  %5894 = vmatprep.mubr.msk.f32.mxu1 %vm6258_vm0, %v8329_v16  ;;  %v2990_v34 = vld [vmem:[#allocation2 + $0xf3] sm:$0xff] }
 0x3cc   : > { %v3845_v11 = vpop.f32.mrf.mxu1  ;;  %v4105_v18 = vpop.f32.mrf.mxu0 }
 0x3cd   : > { %9367 = vst [vmem:[#allocation39_spill] sm:$0xff] %v8454_v27 }
 0x3ce   : > { %v3848_v29 = vpop.f32.mrf.mxu1  ;;  %v4108_v30 = vpop.f32.mrf.mxu0  ;;  %5895 = vmatmul.mubr.f32.gmra.mxu1 %v2989_v40 }
 0x3cf   : > { %v3849_v51 = vadd.f32 %v3848_v29, %v8285_v25  ;;  %v8459_v0 = vadd.f32 %v4108_v30, %v3839_v49  ;;  %5897 = vmatprep.mubr.msk.f32.mxu1 %vm6258_vm0, %v8329_v16  ;;  %v2991_v49 = vld [vmem:[#allocation2 + $0xfb] sm:$0xff] }
 0x3d0   : > { %v3850_v35 = vpop.f32.mrf.mxu1  ;;  %v4110_v60 = vpop.f32.mrf.mxu0 }
 0x3d1   : > { %9368 = vst [vmem:[#allocation40_spill] sm:$0xff] %v8459_v0 }
 0x3d2   : > { %v3853_v9 = vpop.f32.mrf.mxu1  ;;  %v4113_v37 = vpop.f32.mrf.mxu0  ;;  %5898 = vmatmul.mubr.f32.gmra.mxu1 %v2990_v34 }
 0x3d3   : > { %v3854_v23 = vadd.f32 %v3853_v9, %v8288_v46  ;;  %v8464_v45 = vadd.f32 %v4113_v37, %v3844_v21  ;;  %5900 = vmatprep.mubr.msk.f32.mxu1 %vm6258_vm0, %v8329_v16  ;;  %v2992_v21 = vld [vmem:[#allocation2 + $0x103] sm:$0xff] }
 0x3d4   : > { %v3855_v11 = vpop.f32.mrf.mxu1  ;;  %v4115_v25 = vpop.f32.mrf.mxu0 }
 0x3d5   : > { %9369 = vst [vmem:[#allocation41_spill] sm:$0xff] %v8464_v45  ;;  %v2993_v11 = vld [vmem:[#allocation2 + $0x10b] sm:$0xff] }
 0x3d6   : > { %v3858_v18 = vpop.f32.mrf.mxu1  ;;  %v4118_v40 = vpop.f32.mrf.mxu0  ;;  %5901 = vmatmul.mubr.f32.gmra.mxu1 %v2991_v49 }
 0x3d7   : > { %v3859_v29 = vadd.f32 %v3858_v18, %v8291_v5  ;;  %v8469_v30 = vadd.f32 %v4118_v40, %v3849_v51  ;;  %5903 = vmatprep.mubr.msk.f32.mxu1 %vm6258_vm0, %v8329_v16 }
 0x3d8   : > { %v3860_v35 = vpop.f32.mrf.mxu1  ;;  %v4120_v46 = vpop.f32.mrf.mxu0 }
 0x3d9   : > { %9370 = vst [vmem:[#allocation42_spill] sm:$0xff] %v8469_v30  ;;  %v2994_v35 = vld [vmem:[#allocation2 + $0x113] sm:$0xff] }
 0x3da   : > { %v3863_v60 = vpop.f32.mrf.mxu1  ;;  %v4123_v34 = vpop.f32.mrf.mxu0  ;;  %5904 = vmatmul.mubr.f32.gmra.mxu1 %v2992_v21 }
 0x3db   : > { %v3864_v9 = vadd.f32 %v3863_v60, %v8294_v4  ;;  %v8474_v37 = vadd.f32 %v4123_v34, %v3854_v23  ;;  %5906 = vmatprep.mubr.msk.f32.mxu1 %vm6258_vm0, %v8329_v16 }
 0x3dc   : > { %v3865_v5 = vpop.f32.mrf.mxu1  ;;  %v4125_v51 = vpop.f32.mrf.mxu0 }
 0x3dd   : > { %9371 = vst [vmem:[#allocation43_spill] sm:$0xff] %v8474_v37  ;;  %v2995_v5 = vld [vmem:[#allocation2 + $0x11b] sm:$0xff] }
 0x3de   : > { %v3868_v25 = vpop.f32.mrf.mxu1  ;;  %v4128_v49 = vpop.f32.mrf.mxu0  ;;  %5907 = vmatmul.mubr.f32.gmra.mxu1 %v2993_v11 }
 0x3df   : > { %v3869_v18 = vadd.f32 %v3868_v25, %v8297_v57  ;;  %v8479_v40 = vadd.f32 %v4128_v49, %v3859_v29  ;;  %5909 = vmatprep.mubr.msk.f32.mxu1 %vm6258_vm0, %v8329_v16 }
 0x3e0   : > { %v3870_v4 = vpop.f32.mrf.mxu1  ;;  %v4130_v23 = vpop.f32.mrf.mxu0 }
 0x3e1   : > { %9372 = vst [vmem:[#allocation44_spill] sm:$0xff] %v8479_v40  ;;  %v8501_v4 = vld [vmem:[%s8498_s29] sm:$0xff] }
 0x3e2   : > { %v3873_v46 = vpop.f32.mrf.mxu1  ;;  %v4133_v21 = vpop.f32.mrf.mxu0  ;;  %5910 = vmatmul.mubr.f32.gmra.mxu1 %v2994_v35  ;;  %9375 = vst [vmem:[#allocation47_spill] sm:$0xff] %v8501_v4  ;;  %v2996_v23 = vld [vmem:[#allocation2 + $0x123] sm:$0xff]  ;;  %v4940_v35 = vmul.f32 %v8501_v4, %v8501_v4 }
 0x3e3   : > { %v3874_v60 = vadd.f32 %v3873_v46, %v8300_v39  ;;  %v8485_v34 = vadd.f32 %v4133_v21, %v3864_v9  ;;  %5912 = vmatprep.mubr.msk.f32.mxu1 %vm6258_vm0, %v8329_v16 }
 0x3e4   : > { %v3875_v57 = vpop.f32.mrf.mxu1  ;;  %v4135_v29 = vpop.f32.mrf.mxu0 }
 0x3e5   : > { %9373 = vst [vmem:[#allocation45_spill] sm:$0xff] %v8485_v34  ;;  %v8514_v29 = vld [vmem:[%s8498_s29 + $0x18] sm:$0xff]  ;;  %v2997_v34 = vld [vmem:[#allocation2 + $0x12b] sm:$0xff] }
 0x3e6   : > { %v3878_v51 = vpop.f32.mrf.mxu1  ;;  %v4138_v11 = vpop.f32.mrf.mxu0  ;;  %5913 = vmatmul.mubr.f32.gmra.mxu1 %v2995_v5 }
 0x3e7   : > { %v3879_v25 = vadd.f32 %v3878_v51, %v8303_v48  ;;  %v8491_v49 = vadd.f32 %v4138_v11, %v3869_v18  ;;  %5915 = vmatprep.mubr.msk.f32.mxu1 %vm6258_vm0, %v8329_v16  ;;  %v8504_v48 = vld [vmem:[%s8498_s29 + $0x8] sm:$0xff]  ;;  %v8507_v18 = vld [vmem:[%s8498_s29 + $0x10] sm:$0xff] }
 0x3e8   : > { %v3880_v39 = vpop.f32.mrf.mxu1  ;;  %v4140_v9 = vpop.f32.mrf.mxu0  ;;  %v4941_v46 = vmul.f32 %v8504_v48, %v8504_v48  ;;  %v4942_v11 = vmul.f32 %v8507_v18, %v8507_v18 }
 0x3e9   : > { %9374 = vst [vmem:[#allocation46_spill] sm:$0xff] %v8491_v49  ;;  %v8524_v49 = vld [vmem:[%s8498_s29 + $0x20] sm:$0xff] }
 0x3ea   : > { %v3883_v21 = vpop.f32.mrf.mxu1  ;;  %v4143_v57 = vpop.f32.mrf.mxu0  ;;  %5916 = vmatmul.mubr.f32.gmra.mxu1 %v2996_v23  ;;  %v4943_v23 = vmul.f32 %v8514_v29, %v8514_v29  ;;  %v4956_v40 = vadd.f32 %v4941_v46, %v4940_v35  ;;  %v8539_v35 = vld [vmem:[%s8498_s29 + $0x30] sm:$0xff] }
 0x3eb   : > { %v3884_v5 = vadd.f32 %v3883_v21, %v8306_v19  ;;  %v8517_v51 = vadd.f32 %v4143_v57, %v3874_v60  ;;  %5918 = vmatprep.mubr.msk.f32.mxu1 %vm6258_vm0, %v8329_v16  ;;  %v8529_v60 = vld [vmem:[%s8498_s29 + $0x28] sm:$0xff] }
 0x3ec   : > { %v3885_v39 = vpop.f32.mrf.mxu1  ;;  %v4145_v9 = vpop.f32.mrf.mxu0  ;;  %v4945_v46 = vmul.f32 %v8529_v60, %v8529_v60 }
 0x3ed   : > { %9376 = vst [vmem:[#allocation48_spill] sm:$0xff] %v8517_v51  ;;  %v4944_v39 = vmul.f32 %v8524_v49, %v8524_v49  ;;  %v4957_v9 = vadd.f32 %v4956_v40, %v4942_v11 }
 0x3ee   : > { %v3888_v37 = vpop.f32.mrf.mxu1  ;;  %v4148_v19 = vpop.f32.mrf.mxu0  ;;  %5919 = vmatmul.mubr.f32.gmra.mxu1 %v2997_v34  ;;  %v2998_v34 = vld [vmem:[#allocation2 + $0x133] sm:$0xff] }
 0x3ef   : > { %v3889_v21 = vadd.f32 %v3888_v37, %v8309_v13  ;;  %v8532_v57 = vadd.f32 %v4148_v19, %v3879_v25  ;;  %5921 = vmatprep.mubr.msk.f32.mxu1 %vm6258_vm0, %v8329_v16  ;;  %v4958_v45 = vadd.f32 %v4957_v9, %v4943_v23  ;;  %v8544_v25 = vld [vmem:[%s8498_s29 + $0x38] sm:$0xff]  ;;  %v8554_v23 = vld [vmem:[%s8498_s29 + $0x40] sm:$0xff] }
 0x3f0   : > { %v3890_v51 = vpop.f32.mrf.mxu1  ;;  %v4150_v30 = vpop.f32.mrf.mxu0  ;;  %v2999_v9 = vld [vmem:[#allocation2 + $0x13b] sm:$0xff] }
 0x3f1   : > { %9377 = vst [vmem:[#allocation49_spill] sm:$0xff] %v8532_v57  ;;  %v4946_v30 = vmul.f32 %v8539_v35, %v8539_v35  ;;  %v4959_v40 = vadd.f32 %v4958_v45, %v4944_v39  ;;  %v4948_v45 = vmul.f32 %v8554_v23, %v8554_v23 }
 0x3f2   : > { %v3893_v13 = vpop.f32.mrf.mxu1  ;;  %v4153_v37 = vpop.f32.mrf.mxu0  ;;  %5922 = vmatmul.mubr.f32.gmra.mxu1 %v2998_v34  ;;  %v4947_v34 = vmul.f32 %v8544_v25, %v8544_v25 }
 0x3f3   : > { %v3894_v19 = vadd.f32 %v3893_v13, %v8312_v20  ;;  %v8547_v57 = vadd.f32 %v4153_v37, %v3884_v5  ;;  %5924 = vmatprep.mubr.msk.f32.mxu1 %vm6258_vm0, %v8329_v16  ;;  %v4960_v0 = vadd.f32 %v4959_v40, %v4945_v46  ;;  %v8559_v13 = vld [vmem:[%s8498_s29 + $0x48] sm:$0xff]  ;;  %v8569_v46 = vld [vmem:[%s8498_s29 + $0x50] sm:$0xff] }
 0x3f4   : > { %v3895_v51 = vpop.f32.mrf.mxu1  ;;  %v4155_v11 = vpop.f32.mrf.mxu0  ;;  %v3000_v40 = vld [vmem:[#allocation2 + $0x143] sm:$0xff] }
 0x3f5   : > { %9378 = vst [vmem:[#allocation50_spill] sm:$0xff] %v8547_v57  ;;  %v4961_v39 = vadd.f32 %v4960_v0, %v4946_v30  ;;  %v4950_v0 = vmul.f32 %v8569_v46, %v8569_v46 }
 0x3f6   : > { %v3898_v20 = vpop.f32.mrf.mxu1  ;;  %v4158_v5 = vpop.f32.mrf.mxu0  ;;  %5925 = vmatmul.mubr.f32.gmra.mxu1 %v2999_v9  ;;  %v4949_v9 = vmul.f32 %v8559_v13, %v8559_v13 }
 0x3f7   : > { %v3899_v37 = vadd.f32 %v3898_v20, %v8315_v58  ;;  %v8562_v57 = vadd.f32 %v4158_v5, %v3889_v21  ;;  %5927 = vmatprep.mubr.msk.f32.mxu1 %vm6258_vm0, %v8329_v16  ;;  %v4962_v27 = vadd.f32 %v4961_v39, %v4947_v34  ;;  %v8574_v20 = vld [vmem:[%s8498_s29 + $0x58] sm:$0xff]  ;;  %v8584_v34 = vld [vmem:[%s8498_s29 + $0x60] sm:$0xff]  ;;  %v3001_v39 = vld [vmem:[#allocation2 + $0x14b] sm:$0xff] }
 0x3f8   : > { %v3900_v51 = vpop.f32.mrf.mxu1  ;;  %v4160_v11 = vpop.f32.mrf.mxu0 }
 0x3f9   : > { %9379 = vst [vmem:[#allocation51_spill] sm:$0xff] %v8562_v57  ;;  %v4963_v30 = vadd.f32 %v4962_v27, %v4948_v45  ;;  %v4952_v27 = vmul.f32 %v8584_v34, %v8584_v34 }
 0x3fa   : > { %v3903_v58 = vpop.f32.mrf.mxu1  ;;  %v4163_v21 = vpop.f32.mrf.mxu0  ;;  %5928 = vmatmul.mubr.f32.gmra.mxu1 %v3000_v40  ;;  %v4951_v40 = vmul.f32 %v8574_v20, %v8574_v20 }
 0x3fb   : > { %v3904_v5 = vadd.f32 %v3903_v58, %v8318_v22  ;;  %v8577_v57 = vadd.f32 %v4163_v21, %v3894_v19  ;;  %5930 = vmatprep.mubr.msk.f32.mxu1 %vm6258_vm0, %v8329_v16  ;;  %v4964_v2 = vadd.f32 %v4963_v30, %v4949_v9  ;;  %v8589_v58 = vld [vmem:[%s8498_s29 + $0x68] sm:$0xff]  ;;  %v8599_v9 = vld [vmem:[%s8498_s29 + $0x70] sm:$0xff] }
 0x3fc   : > { %v3905_v51 = vpop.f32.mrf.mxu1  ;;  %v4165_v11 = vpop.f32.mrf.mxu0  ;;  %v3002_v30 = vld [vmem:[#allocation2 + $0x153] sm:$0xff] }
 0x3fd   : > { %9380 = vst [vmem:[#allocation52_spill] sm:$0xff] %v8577_v57  ;;  %v4965_v45 = vadd.f32 %v4964_v2, %v4950_v0  ;;  %v4954_v2 = vmul.f32 %v8599_v9, %v8599_v9 }
 0x3fe   : > { %v3908_v22 = vpop.f32.mrf.mxu1  ;;  %v4168_v19 = vpop.f32.mrf.mxu0  ;;  %5931 = vmatmul.mubr.f32.gmra.mxu1 %v3001_v39  ;;  %v4953_v39 = vmul.f32 %v8589_v58, %v8589_v58 }
 0x3ff   : > { %v3909_v21 = vadd.f32 %v3908_v22, %v8321_v8  ;;  %v8592_v57 = vadd.f32 %v4168_v19, %v3899_v37  ;;  %5933 = vmatprep.mubr.msk.f32.mxu1 %vm6258_vm0, %v8329_v16  ;;  %v4966_v36 = vadd.f32 %v4965_v45, %v4951_v40  ;;  %v8604_v37 = vld [vmem:[%s8498_s29 + $0x78] sm:$0xff] }
 0x400   : > { %v3910_v51 = vpop.f32.mrf.mxu1  ;;  %v4170_v11 = vpop.f32.mrf.mxu0  ;;  %v4955_v40 = vmul.f32 %v8604_v37, %v8604_v37 }
 0x401   : > { %9381 = vst [vmem:[#allocation53_spill] sm:$0xff] %v8592_v57  ;;  %v4967_v0 = vadd.f32 %v4966_v36, %v4952_v27  ;;  %v3003_v57 = vld [vmem:[#allocation2 + $0x15b] sm:$0xff] }
 0x402   : > { %v3913_v4 = vpop.f32.mrf.mxu1  ;;  %v4173_v8 = vpop.f32.mrf.mxu0  ;;  %5934 = vmatmul.mubr.f32.gmra.mxu1 %v3002_v30 }
 0x403   : > { %v3914_v22 = vadd.f32 %v3913_v4, %v8324_v3  ;;  %v8607_v19 = vadd.f32 %v4173_v8, %v3904_v5  ;;  %5936 = vmatprep.mubr.msk.f32.mxu1 %vm6258_vm0, %v8329_v16  ;;  %v4968_v45 = vadd.f32 %v4967_v0, %v4953_v39  ;;  %v3004_v5 = vld [vmem:[#allocation2 + $0x163] sm:$0xff] }
 0x404   : > { %v3915_v51 = vpop.f32.mrf.mxu1  ;;  %v4175_v11 = vpop.f32.mrf.mxu0 }
 0x405   : > { %9382 = vst [vmem:[#allocation54_spill] sm:$0xff] %v8607_v19  ;;  %v4969_v8 = vadd.f32 %v4968_v45, %v4954_v2 }
 0x406   : > { %v3918_v30 = vpop.f32.mrf.mxu1  ;;  %v4178_v63 = vpop.f32.mrf.mxu0  ;;  %5937 = vmatmul.mubr.f32.gmra.mxu1 %v3003_v57 }
 0x407   : > { %v3919_v3 = vadd.f32 %v3918_v30, %v8327_v17  ;;  %v8616_v4 = vadd.f32 %v4178_v63, %v3909_v21  ;;  %5939 = vmatprep.mubr.msk.f32.mxu1 %vm6258_vm0, %v8329_v16  ;;  %v4970_v51 = vadd.f32 %v4969_v8, %v4955_v40  ;;  %v3005_v17 = vld [vmem:[#allocation2 + $0x16b] sm:$0xff] }
 0x408   : > { %v3920_v36 = vpop.f32.mrf.mxu1  ;;  %v4180_v27 = vpop.f32.mrf.mxu0 }
 0x409   : > { %9383 = vst [vmem:[#allocation55_spill] sm:$0xff] %v8616_v4  ;;  %v4971_v63 = vrot.slane %v4970_v51, 4 }
 0x40a   : > { %v3923_v11 = vpop.f32.mrf.mxu1  ;;  %v4183_v19 = vpop.f32.mrf.mxu0  ;;  %5940 = vmatmul.mubr.f32.gmra.mxu1 %v3004_v5 }
 0x40b   : > { %v3924_v39 = vadd.f32 %v3923_v11, %v8334_v28  ;;  %v8621_v0 = vadd.f32 %v4183_v19, %v3914_v22  ;;  %5942 = vmatprep.mubr.msk.f32.mxu1 %vm6258_vm0, %v8329_v16  ;;  %v4972_v30 = vadd.f32 %v4971_v63, %v4970_v51 }
 0x40c   : > { %v3925_v57 = vpop.f32.mrf.mxu1  ;;  %v4185_v21 = vpop.f32.mrf.mxu0 }
 0x40d   : > { %9384 = vst [vmem:[#allocation56_spill] sm:$0xff] %v8621_v0  ;;  %v4973_v5 = vrot.slane %v4972_v30, 2 }
 0x40e   : > { %v3928_v4 = vpop.f32.mrf.mxu1  ;;  %v4188_v2 = vpop.f32.mrf.mxu0  ;;  %5943 = vmatmul.mubr.f32.gmra.mxu1 %v3005_v17 }
 0x40f   : > { %v3929_v40 = vadd.f32 %v3928_v4, %v8339_v33  ;;  %v8626_v45 = vadd.f32 %v4188_v2, %v3919_v3  ;;  %v4974_v22 = vadd.f32 %v4973_v5, %v4972_v30 }
 0x410   : > { %v3930_v8 = vpop.f32.mrf.mxu1  ;;  %v4190_v28 = vpop.f32.mrf.mxu0 }
 0x411   : > { %v4975_v57 = vrot.slane %v4974_v22, 1 }
 0x412   : > { %v3933_v19 = vpop.f32.mrf.mxu1  ;;  %v4193_v36 = vpop.f32.mrf.mxu0 }
 0x413   : > { %v3934_v27 = vadd.f32 %v3933_v19, %v8346_v44  ;;  %v8629_v11 = vadd.f32 %v4193_v36, %v3924_v39  ;;  %v4976_v63 = vadd.f32 %v4975_v57, %v4974_v22 }
 0x414   : > { %v3935_v21 = vpop.f32.mrf.mxu1  ;;  %v4195_v51 = vpop.f32.mrf.mxu0 }
 0x415   : > { %v4977_v4 = vmax.f32 %v4976_v63, 1e-24 }
 0x416   : > { %v3938_v0 = vpop.f32.mrf.mxu1  ;;  %v4198_v17 = vpop.f32.mrf.mxu0 }
 0x417   : > { %v3939_v33 = vadd.f32 %v3938_v0, %v8351_v32  ;;  %v8632_v3 = vadd.f32 %v4198_v17, %v3929_v40  ;;  %6177 = vrsqrt.f32 %v4977_v4 }
 0x418   : > { %v3940_v2 = vpop.f32.mrf.mxu1  ;;  %v4200_v8 = vpop.f32.mrf.mxu0 }
 0x41a   : > { %v3943_v30 = vpop.f32.mrf.mxu1  ;;  %v4203_v5 = vpop.f32.mrf.mxu0 }
 0x41b   : > { %v3944_v44 = vadd.f32 %v3943_v30, %v8356_v7  ;;  %v8635_v39 = vadd.f32 %v4203_v5, %v3934_v27 }
 0x41c   : > { %v3945_v28 = vpop.f32.mrf.mxu1  ;;  %v4205_v19 = vpop.f32.mrf.mxu0 }
 0x41e   : > { %v3948_v36 = vpop.f32.mrf.mxu1  ;;  %v4208_v22 = vpop.f32.mrf.mxu0 }
 0x41f   : > { %v3949_v57 = vadd.f32 %v3948_v36, %v8361_v26  ;;  %v8638_v21 = vadd.f32 %v4208_v22, %v3939_v33 }
 0x420   : > { %v3950_v32 = vpop.f32.mrf.mxu1  ;;  %v4210_v0 = vpop.f32.mrf.mxu0 }
 0x422   : > { %v3953_v40 = vpop.f32.mrf.mxu1  ;;  %v4213_v51 = vpop.f32.mrf.mxu0 }
 0x423   : > { %v3954_v63 = vadd.f32 %v3953_v40, %v8366_v55  ;;  %v8641_v17 = vadd.f32 %v4213_v51, %v3944_v44 }
 0x424   : > { %v3955_v4 = vpop.f32.mrf.mxu1  ;;  %v4215_v7 = vpop.f32.mrf.mxu0 }
 0x425   : > { %v8643_v27 = vpop.eup %6177 }
 0x426   : > { %v3958_v2 = vpop.f32.mrf.mxu1  ;;  %v4218_v8 = vpop.f32.mrf.mxu0  ;;  %v4994_v26 = vmul.f32 %v8643_v27, %v8604_v37  ;;  %v4993_v33 = vmul.f32 %v8643_v27, %v8599_v9  ;;  %v4992_v44 = vmul.f32 %v8643_v27, %v8589_v58  ;;  %v4991_v37 = vmul.f32 %v8643_v27, %v8584_v34 }
 0x427   : > { %v3959_v30 = vadd.f32 %v3958_v2, %v8373_v56  ;;  %v8646_v5 = vadd.f32 %v4218_v8, %v3949_v57  ;;  %v4990_v58 = vmul.f32 %v8643_v27, %v8574_v20  ;;  %v4989_v34 = vmul.f32 %v8643_v27, %v8569_v46 }
 0x428   : > { %v3960_v28 = vpop.f32.mrf.mxu1  ;;  %v4220_v55 = vpop.f32.mrf.mxu0  ;;  %5946 = vmatpush3.msra.mxu0 %v4994_v26  ;;  %v4988_v20 = vmul.f32 %v8643_v27, %v8559_v13 }
 0x429   : > { %5947 = vmatprep.subr.mxu0 %v8329_v16  ;;  %v4986_v28 = vmul.f32 %v8643_v27, %v8544_v25 }
 0x42a   : > { %v3963_v19 = vpop.f32.mrf.mxu1  ;;  %v4223_v36 = vpop.f32.mrf.mxu0  ;;  %5948 = vmatpush3.msra.mxu0 %v4993_v33 }
 0x42b   : > { %v3964_v56 = vadd.f32 %v3963_v19, %v8378_v6  ;;  %v8656_v22 = vadd.f32 %v4223_v36, %v3954_v63  ;;  %5949 = vmatprep.subr.mxu0 %v8329_v16 }
 0x42c   : > { %v3965_v57 = vpop.f32.mrf.mxu1  ;;  %v4225_v9 = vpop.f32.mrf.mxu0  ;;  %5950 = vmatpush3.msra.mxu0 %v4992_v44 }
 0x42d   : > { %5951 = vmatprep.subr.mxu0 %v8329_v16 }
 0x42e   : > { %v4228_v32 = vpop.f32.mrf.mxu0  ;;  %v4303_v0 = vpop.f32.mrf.mxu1  ;;  %5952 = vmatpush3.msra.mxu0 %v4991_v37 }
 0x42f   : > { %v8664_v40 = vadd.f32 %v4228_v32, %v3959_v30  ;;  %v4304_v6 = vadd.f32 %v4303_v0, %v8384_v1  ;;  %5953 = vmatprep.subr.mxu0 %v8329_v16  ;;  %v4987_v30 = vmul.f32 %v8643_v27, %v8554_v23 }
 0x430   : > { %v4230_v51 = vpop.f32.mrf.mxu0  ;;  %v5824_v63 = vpop.f32.mrf.mxu1  ;;  %5954 = vmatpush3.msra.mxu0 %v4990_v58 }
 0x431   : > { %vm4507_vm12 = vcmp.ge.f32.partialorder %v4304_v6, 0.0  ;;  %v4548_v4 = vmul.f32 0.2, %v4304_v6  ;;  %5955 = vmatprep.subr.mxu0 %v8329_v16  ;;  %v8687_v16 = vld [vmem:[#allocation2] sm:$0xff] }
 0x432   : > { %v4233_v7 = vpop.f32.mrf.mxu0  ;;  %v4308_v2 = vpop.f32.mrf.mxu1  ;;  %5956 = vmatpush3.msra.mxu0 %v4989_v34  ;;  %v4985_v34 = vmul.f32 %v8643_v27, %v8539_v35 }
 0x433   : > { %v4589_v1 = vsel %vm4507_vm12, %v4304_v6, %v4548_v4  ;;  %v8673_v8 = vadd.f32 %v4233_v7, %v3964_v56  ;;  %v4309_v46 = vadd.f32 %v4308_v2, %v8389_v41  ;;  %5957 = vmatprep.subr.mxu0 %v8687_v16 }
 0x434   : > { %v8685_v13 = vmul.f32 %v4589_v1, %v7786_v61  ;;  %v5827_v26 = vpop.f32.mrf.mxu1  ;;  %v4235_v33 = vpop.f32.mrf.mxu0  ;;  %5958 = vmatpush3.msra.mxu0 %v4988_v20 }
 0x435   : > { %vm4508_vm13 = vcmp.ge.f32.partialorder %v4309_v46, 0.0  ;;  %v4549_v41 = vmul.f32 0.2, %v4309_v46  ;;  %5959 = vmatprep.subr.mxu0 %v8687_v16 }
 0x436   : > { %4671 = vst [vmem:[#allocation2 + $0x18] sm:$0xff] %v8685_v13  ;;  %v4313_v23 = vpop.f32.mrf.mxu1  ;;  %4753 = vst [vmem:[%s8682_s9] sm:$0xff] %v8685_v13  ;;  %5960 = vmatpush3.msra.mxu0 %v4987_v30 }
 0x437   : > { %v4590_v61 = vsel %vm4508_vm13, %v4309_v46, %v4549_v41  ;;  %v4314_v55 = vadd.f32 %v4313_v23, %v8394_v10  ;;  %5961 = vmatprep.subr.mxu0 %v8687_v16  ;;  %v4984_v46 = vmul.f32 %v8643_v27, %v8529_v60 }
 0x438   : > { %v8698_v44 = vmul.f32 %v4590_v61, %v7803_v43  ;;  %v5830_v19 = vpop.f32.mrf.mxu1  ;;  %5962 = vmatpush3.msra.mxu0 %v4986_v28 }
 0x439   : > { %vm4509_vm14 = vcmp.ge.f32.partialorder %v4314_v55, 0.0  ;;  %v4550_v36 = vmul.f32 0.2, %v4314_v55  ;;  %5963 = vmatprep.subr.mxu0 %v8687_v16 }
 0x43a   : > { %4672 = vst [vmem:[#allocation2 + $0x20] sm:$0xff] %v8698_v44  ;;  %v4318_v56 = vpop.f32.mrf.mxu1  ;;  %4754 = vst [vmem:[%s8682_s9 + $0x8] sm:$0xff] %v8698_v44  ;;  %5964 = vmatpush3.msra.mxu0 %v4985_v34 }
 0x43b   : > { %v4591_v25 = vsel %vm4509_vm14, %v4314_v55, %v4550_v36  ;;  %v4319_v10 = vadd.f32 %v4318_v56, %v8399_v54  ;;  %5965 = vmatprep.subr.mxu0 %v8687_v16  ;;  %v9385_v36 = vld [vmem:[#allocation3_spill] sm:$0xff] }
 0x43c   : > { %v8707_v43 = vmul.f32 %v4591_v25, %v7810_v31  ;;  %v5833_v37 = vpop.f32.mrf.mxu1  ;;  %5966 = vmatpush3.msra.mxu0 %v4984_v46 }
 0x43d   : > { %vm4510_vm15 = vcmp.ge.f32.partialorder %v4319_v10, 0.0  ;;  %v4551_v57 = vmul.f32 0.2, %v4319_v10  ;;  %5967 = vmatprep.subr.mxu0 %v8687_v16  ;;  %v4982_v37 = vmul.f32 %v8643_v27, %v8514_v29 }
 0x43e   : > { %4673 = vst [vmem:[#allocation2 + $0x28] sm:$0xff] %v8707_v43  ;;  %v4323_v9 = vpop.f32.mrf.mxu1  ;;  %4755 = vst [vmem:[%s8682_s9 + $0x10] sm:$0xff] %v8707_v43 }
 0x43f   : > { %v4592_v58 = vsel %vm4510_vm15, %v4319_v10, %v4551_v57  ;;  %v4324_v32 = vadd.f32 %v4323_v9, %v8404_v12  ;;  %v4983_v10 = vmul.f32 %v8643_v27, %v8524_v49  ;;  %v9386_v9 = vld [vmem:[#allocation4_spill] sm:$0xff] }
 0x440   : > { %v8714_v0 = vmul.f32 %v4592_v58, %v7829_v59  ;;  %v5836_v6 = vpop.f32.mrf.mxu1 }
 0x441   : > { %vm4511_vm1 = vcmp.ge.f32.partialorder %v4324_v32, 0.0  ;;  %v4552_v31 = vmul.f32 0.2, %v4324_v32  ;;  %5968 = vmatpush3.msra.mxu0 %v4983_v10  ;;  %v4981_v6 = vmul.f32 %v8643_v27, %v8507_v18  ;;  %v9388_v18 = vld [vmem:[#allocation5_spill] sm:$0xff] }
 0x442   : > { %4674 = vst [vmem:[#allocation2 + $0x30] sm:$0xff] %v8714_v0  ;;  %v4328_v54 = vpop.f32.mrf.mxu1  ;;  %4756 = vst [vmem:[%s8682_s9 + $0x18] sm:$0xff] %v8714_v0  ;;  %5969 = vmatprep.subr.mxu0 %v8687_v16 }
 0x443   : > { %v4593_v51 = vsel %vm4511_vm1, %v4324_v32, %v4552_v31  ;;  %v4329_v63 = vadd.f32 %v4328_v54, %v8409_v47  ;;  %5970 = vmatpush3.msra.mxu0 %v4982_v37  ;;  %v9387_v54 = vld [vmem:[#allocation36_spill] sm:$0xff] }
 0x444   : > { %v8723_v12 = vmul.f32 %v4593_v51, %v7846_v15  ;;  %v5839_v59 = vpop.f32.mrf.mxu1  ;;  %5971 = vmatprep.subr.mxu0 %v8687_v16 }
 0x445   : > { %vm4512_vm2 = vcmp.ge.f32.partialorder %v4329_v63, 0.0  ;;  %v4553_v4 = vmul.f32 0.2, %v4329_v63  ;;  %5972 = vmatpush3.msra.mxu0 %v4981_v6  ;;  %v9389_v59 = vld [vmem:[#allocation47_spill] sm:$0xff] }
 0x446   : > { %4675 = vst [vmem:[#allocation2 + $0x38] sm:$0xff] %v8723_v12  ;;  %v4333_v20 = vpop.f32.mrf.mxu1  ;;  %4757 = vst [vmem:[%s8682_s9 + $0x20] sm:$0xff] %v8723_v12  ;;  %5973 = vmatprep.subr.mxu0 %v8687_v16 }
 0x447   : > { %v4594_v35 = vsel %vm4512_vm2, %v4329_v63, %v4553_v4  ;;  %v4334_v7 = vadd.f32 %v4333_v20, %v8414_v50  ;;  %v4979_v4 = vmul.f32 %v8643_v27, %v9389_v59 }
 0x448   : > { %v8731_v47 = vmul.f32 %v4594_v35, %v7861_v24  ;;  %v5842_v15 = vpop.f32.mrf.mxu1 }
 0x449   : > { %vm4513_vm3 = vcmp.ge.f32.partialorder %v4334_v7, 0.0  ;;  %v4554_v2 = vmul.f32 0.2, %v4334_v7 }
 0x44a   : > { %4676 = vst [vmem:[#allocation2 + $0x40] sm:$0xff] %v8731_v47  ;;  %v4338_v1 = vpop.f32.mrf.mxu1  ;;  %4758 = vst [vmem:[%s8682_s9 + $0x28] sm:$0xff] %v8731_v47 }
 0x44b   : > { %v4595_v30 = vsel %vm4513_vm3, %v4334_v7, %v4554_v2  ;;  %v4339_v26 = vadd.f32 %v4338_v1, %v8419_v42  ;;  %v9390_v7 = vld [vmem:[#allocation37_spill] sm:$0xff]  ;;  %v9391_v2 = vld [vmem:[#allocation6_spill] sm:$0xff] }
 0x44c   : > { %v8740_v50 = vmul.f32 %v4595_v30, %v7877_v38  ;;  %v5845_v24 = vpop.f32.mrf.mxu1 }
 0x44d   : > { %vm4514_vm4 = vcmp.ge.f32.partialorder %v4339_v26, 0.0  ;;  %v4555_v33 = vmul.f32 0.2, %v4339_v26  ;;  %v9392_v24 = vld [vmem:[#allocation38_spill] sm:$0xff] }
 0x44e   : > { %4677 = vst [vmem:[#allocation2 + $0x48] sm:$0xff] %v8740_v50  ;;  %v4343_v41 = vpop.f32.mrf.mxu1  ;;  %4759 = vst [vmem:[%s8682_s9 + $0x30] sm:$0xff] %v8740_v50 }
 0x44f   : > { %v4596_v60 = vsel %vm4514_vm4, %v4339_v26, %v4555_v33  ;;  %v4344_v23 = vadd.f32 %v4343_v41, %v8424_v52  ;;  %v9393_v41 = vld [vmem:[#allocation7_spill] sm:$0xff] }
 0x450   : > { %v8748_v42 = vmul.f32 %v4596_v60, %v7893_v53  ;;  %v5848_v38 = vpop.f32.mrf.mxu1 }
 0x451   : > { %vm4515_vm5 = vcmp.ge.f32.partialorder %v4344_v23, 0.0  ;;  %v4556_v28 = vmul.f32 0.2, %v4344_v23 }
 0x452   : > { %4678 = vst [vmem:[#allocation2 + $0x50] sm:$0xff] %v8748_v42  ;;  %v4348_v61 = vpop.f32.mrf.mxu1  ;;  %4760 = vst [vmem:[%s8682_s9 + $0x38] sm:$0xff] %v8748_v42 }
 0x453   : > { %v4597_v55 = vsel %vm4515_vm5, %v4344_v23, %v4556_v28  ;;  %v4349_v19 = vadd.f32 %v4348_v61, %v8429_v14 }
 0x454   : > { %v8755_v56 = vmul.f32 %v4597_v55, %v9385_v36  ;;  %v5851_v25 = vpop.f32.mrf.mxu1  ;;  %v9394_v55 = vld [vmem:[#allocation39_spill] sm:$0xff]  ;;  %v9395_v36 = vld [vmem:[#allocation8_spill] sm:$0xff] }
 0x455   : > { %vm4516_vm6 = vcmp.ge.f32.partialorder %v4349_v19, 0.0  ;;  %v4557_v52 = vmul.f32 0.2, %v4349_v19 }
 0x456   : > { %4679 = vst [vmem:[#allocation2 + $0x58] sm:$0xff] %v8755_v56  ;;  %v4353_v53 = vpop.f32.mrf.mxu1  ;;  %4761 = vst [vmem:[%s8682_s9 + $0x40] sm:$0xff] %v8755_v56 }
 0x457   : > { %v4598_v57 = vsel %vm4516_vm6, %v4349_v19, %v4557_v52  ;;  %v4354_v14 = vadd.f32 %v4353_v53, %v8434_v62  ;;  %v4980_v62 = vmul.f32 %v8643_v27, %v8504_v48 }
 0x458   : > { %v8766_v58 = vmul.f32 %v4598_v57, %v9386_v9  ;;  %v5854_v32 = vpop.f32.mrf.mxu1  ;;  %v9396_v57 = vld [vmem:[#allocation40_spill] sm:$0xff]  ;;  %v9397_v9 = vld [vmem:[#allocation9_spill] sm:$0xff] }
 0x459   : > { %vm4517_vm7 = vcmp.ge.f32.partialorder %v4354_v14, 0.0  ;;  %v4558_v31 = vmul.f32 0.2, %v4354_v14  ;;  %5974 = vmatpush3.msra.mxu0 %v4980_v62 }
 0x45a   : > { %4680 = vst [vmem:[#allocation2 + $0x60] sm:$0xff] %v8766_v58  ;;  %v4358_v49 = vpop.f32.mrf.mxu1  ;;  %4762 = vst [vmem:[%s8682_s9 + $0x48] sm:$0xff] %v8766_v58  ;;  %5975 = vmatprep.subr.mxu0 %v8687_v16 }
 0x45b   : > { %v4599_v29 = vsel %vm4517_vm7, %v4354_v14, %v4558_v31  ;;  %v4359_v34 = vadd.f32 %v4358_v49, %v9387_v54  ;;  %5976 = vmatpush3.msra.mxu0 %v4979_v4 }
 0x45c   : > { %v8779_v51 = vmul.f32 %v4599_v29, %v9388_v18  ;;  %v5857_v63 = vpop.f32.mrf.mxu1  ;;  %v9398_v29 = vld [vmem:[#allocation41_spill] sm:$0xff] }
 0x45d   : > { %vm4518_vm8 = vcmp.ge.f32.partialorder %v4359_v34, 0.0  ;;  %v4559_v20 = vmul.f32 0.2, %v4359_v34 }
 0x45e   : > { %4681 = vst [vmem:[#allocation2 + $0x68] sm:$0xff] %v8779_v51  ;;  %v4363_v48 = vpop.f32.mrf.mxu1  ;;  %4763 = vst [vmem:[%s8682_s9 + $0x50] sm:$0xff] %v8779_v51 }
 0x45f   : > { %v4600_v35 = vsel %vm4518_vm8, %v4359_v34, %v4559_v20  ;;  %v4364_v15 = vadd.f32 %v4363_v48, %v9390_v7  ;;  %v9399_v34 = vld [vmem:[#allocation10_spill] sm:$0xff]  ;;  %v9401_v7 = vld [vmem:[#allocation11_spill] sm:$0xff] }
 0x460   : > { %v8790_v1 = vmul.f32 %v4600_v35, %v9391_v2  ;;  %v5860_v27 = vpop.f32.mrf.mxu1  ;;  %v9400_v48 = vld [vmem:[#allocation42_spill] sm:$0xff] }
 0x461   : > { %vm4519_vm9 = vcmp.ge.f32.partialorder %v4364_v15, 0.0  ;;  %v4560_v46 = vmul.f32 0.2, %v4364_v15 }
 0x462   : > { %4682 = vst [vmem:[#allocation2 + $0x70] sm:$0xff] %v8790_v1  ;;  %v4368_v30 = vpop.f32.mrf.mxu1  ;;  %4764 = vst [vmem:[%s8682_s9 + $0x58] sm:$0xff] %v8790_v1 }
 0x463   : > { %v4601_v26 = vsel %vm4519_vm9, %v4364_v15, %v4560_v46  ;;  %v4369_v33 = vadd.f32 %v4368_v30, %v9392_v24 }
 0x464   : > { %v8797_v60 = vmul.f32 %v4601_v26, %v9393_v41  ;;  %v5863_v23 = vpop.f32.mrf.mxu1  ;;  %v9402_v26 = vld [vmem:[#allocation43_spill] sm:$0xff] }
 0x465   : > { %vm4520_vm10 = vcmp.ge.f32.partialorder %v4369_v33, 0.0  ;;  %v4561_v38 = vmul.f32 0.2, %v4369_v33 }
 0x466   : > { %4683 = vst [vmem:[#allocation2 + $0x78] sm:$0xff] %v8797_v60  ;;  %v4373_v28 = vpop.f32.mrf.mxu1  ;;  %4765 = vst [vmem:[%s8682_s9 + $0x60] sm:$0xff] %v8797_v60 }
 0x467   : > { %v4602_v61 = vsel %vm4520_vm10, %v4369_v33, %v4561_v38  ;;  %v4374_v19 = vadd.f32 %v4373_v28, %v9394_v55  ;;  %v9403_v33 = vld [vmem:[#allocation12_spill] sm:$0xff] }
 0x468   : > { %v8804_v25 = vmul.f32 %v4602_v61, %v9395_v36  ;;  %v5866_v52 = vpop.f32.mrf.mxu1  ;;  %v9404_v55 = vld [vmem:[#allocation44_spill] sm:$0xff]  ;;  %v9405_v36 = vld [vmem:[#allocation13_spill] sm:$0xff] }
 0x469   : > { %vm4521_vm11 = vcmp.ge.f32.partialorder %v4374_v19, 0.0  ;;  %v4562_v53 = vmul.f32 0.2, %v4374_v19 }
 0x46a   : > { %4684 = vst [vmem:[#allocation2 + $0x80] sm:$0xff] %v8804_v25  ;;  %v4378_v10 = vpop.f32.mrf.mxu1  ;;  %4766 = vst [vmem:[%s8682_s9 + $0x68] sm:$0xff] %v8804_v25 }
 0x46b   : > { %v4603_v37 = vsel %vm4521_vm11, %v4374_v19, %v4562_v53  ;;  %v4379_v14 = vadd.f32 %v4378_v10, %v9396_v57  ;;  %v4795_v10 = vmul.f32 %v8698_v44, %v8698_v44 }
 0x46c   : > { %v8811_v32 = vmul.f32 %v4603_v37, %v9397_v9  ;;  %v5869_v6 = vpop.f32.mrf.mxu1  ;;  %v4796_v9 = vmul.f32 %v8707_v43, %v8707_v43 }
 0x46d   : > { %vm4522_vm12 = vcmp.ge.f32.partialorder %v4379_v14, 0.0  ;;  %v4563_v31 = vmul.f32 0.2, %v4379_v14 }
 0x46e   : > { %4685 = vst [vmem:[#allocation2 + $0x88] sm:$0xff] %v8811_v32  ;;  %v4383_v49 = vpop.f32.mrf.mxu1  ;;  %4767 = vst [vmem:[%s8682_s9 + $0x70] sm:$0xff] %v8811_v32 }
 0x46f   : > { %v4604_v62 = vsel %vm4522_vm12, %v4379_v14, %v4563_v31  ;;  %v4384_v54 = vadd.f32 %v4383_v49, %v9398_v29  ;;  %v4794_v14 = vmul.f32 %v8685_v13, %v8685_v13  ;;  %v9406_v31 = vld [vmem:[#allocation45_spill] sm:$0xff] }
 0x470   : > { %v8818_v18 = vmul.f32 %v4604_v62, %v9399_v34  ;;  %v5872_v63 = vpop.f32.mrf.mxu1  ;;  %v9407_v62 = vld [vmem:[#allocation14_spill] sm:$0xff]  ;;  %v4797_v34 = vmul.f32 %v8714_v0, %v8714_v0 }
 0x471   : > { %vm4523_vm13 = vcmp.ge.f32.partialorder %v4384_v54, 0.0  ;;  %v4564_v59 = vmul.f32 0.2, %v4384_v54  ;;  %v4835_v63 = vadd.f32 %v4795_v10, %v4794_v14 }
 0x472   : > { %4686 = vst [vmem:[#allocation2 + $0x90] sm:$0xff] %v8818_v18  ;;  %v4388_v4 = vpop.f32.mrf.mxu1  ;;  %4768 = vst [vmem:[%s8682_s9 + $0x78] sm:$0xff] %v8818_v18 }
 0x473   : > { %v4605_v20 = vsel %vm4523_vm13, %v4384_v54, %v4564_v59  ;;  %v4389_v35 = vadd.f32 %v4388_v4, %v9400_v48  ;;  %v4836_v48 = vadd.f32 %v4835_v63, %v4796_v9 }
 0x474   : > { %v8825_v15 = vmul.f32 %v4605_v20, %v9401_v7  ;;  %v5875_v2 = vpop.f32.mrf.mxu1  ;;  %v4798_v20 = vmul.f32 %v8723_v12, %v8723_v12  ;;  %v9408_v7 = vld [vmem:[#allocation46_spill] sm:$0xff] }
 0x475   : > { %vm4524_vm14 = vcmp.ge.f32.partialorder %v4389_v35, 0.0  ;;  %v4565_v27 = vmul.f32 0.2, %v4389_v35 }
 0x476   : > { %4687 = vst [vmem:[#allocation2 + $0x98] sm:$0xff] %v8825_v15  ;;  %v4393_v46 = vpop.f32.mrf.mxu1  ;;  %4769 = vst [vmem:[%s8682_s9 + $0x80] sm:$0xff] %v8825_v15 }
 0x477   : > { %v4606_v30 = vsel %vm4524_vm14, %v4389_v35, %v4565_v27  ;;  %v4394_v24 = vadd.f32 %v4393_v46, %v9402_v26  ;;  %v9409_v27 = vld [vmem:[#allocation15_spill] sm:$0xff]  ;;  %v4799_v26 = vmul.f32 %v8731_v47, %v8731_v47 }
 0x478   : > { %v8832_v41 = vmul.f32 %v4606_v30, %v9403_v33  ;;  %v5878_v23 = vpop.f32.mrf.mxu1 }
 0x479   : > { %vm4525_vm15 = vcmp.ge.f32.partialorder %v4394_v24, 0.0  ;;  %v4566_v38 = vmul.f32 0.2, %v4394_v24 }
 0x47a   : > { %4688 = vst [vmem:[#allocation2 + $0xa0] sm:$0xff] %v8832_v41  ;;  %v4398_v28 = vpop.f32.mrf.mxu1  ;;  %4770 = vst [vmem:[%s8682_s9 + $0x88] sm:$0xff] %v8832_v41 }
 0x47b   : > { %v4607_v61 = vsel %vm4525_vm15, %v4394_v24, %v4566_v38  ;;  %v4399_v19 = vadd.f32 %v4398_v28, %v9404_v55  ;;  %v4837_v24 = vadd.f32 %v4836_v48, %v4797_v34  ;;  %v4800_v38 = vmul.f32 %v8740_v50, %v8740_v50  ;;  %v9410_v55 = vld [vmem:[#allocation48_spill] sm:$0xff]  ;;  %v9413_v34 = vld [vmem:[#allocation17_spill] sm:$0xff] }
 0x47c   : > { %v8839_v52 = vmul.f32 %v4607_v61, %v9405_v36  ;;  %v5881_v53 = vpop.f32.mrf.mxu1  ;;  %v9411_v36 = vld [vmem:[#allocation16_spill] sm:$0xff] }
 0x47d   : > { %vm4526_vm1 = vcmp.ge.f32.partialorder %v4399_v19, 0.0  ;;  %v4567_v37 = vmul.f32 0.2, %v4399_v19  ;;  %v4838_v28 = vadd.f32 %v4837_v24, %v4798_v20  ;;  %v9415_v24 = vld [vmem:[#allocation18_spill] sm:$0xff] }
 0x47e   : > { %4689 = vst [vmem:[#allocation2 + $0xa8] sm:$0xff] %v8839_v52  ;;  %v4403_v57 = vpop.f32.mrf.mxu1  ;;  %4771 = vst [vmem:[%s8682_s9 + $0x90] sm:$0xff] %v8839_v52 }
 0x47f   : > { %v4608_v6 = vsel %vm4526_vm1, %v4399_v19, %v4567_v37  ;;  %v4404_v49 = vadd.f32 %v4403_v57, %v9406_v31  ;;  %v4801_v37 = vmul.f32 %v8748_v42, %v8748_v42  ;;  %v4839_v57 = vadd.f32 %v4838_v28, %v4799_v26 }
 0x480   : > { %v8852_v29 = vmul.f32 %v4608_v6, %v9407_v62  ;;  %v5884_v54 = vpop.f32.mrf.mxu1  ;;  %v4802_v6 = vmul.f32 %v8755_v56, %v8755_v56  ;;  %v9412_v62 = vld [vmem:[#allocation49_spill] sm:$0xff] }
 0x481   : > { %vm4527_vm2 = vcmp.ge.f32.partialorder %v4404_v49, 0.0  ;;  %v4568_v59 = vmul.f32 0.2, %v4404_v49  ;;  %v4840_v31 = vadd.f32 %v4839_v57, %v4800_v38  ;;  %v4805_v38 = vmul.f32 %v8790_v1, %v8790_v1 }
 0x482   : > { %4690 = vst [vmem:[#allocation2 + $0xb0] sm:$0xff] %v8852_v29  ;;  %v4408_v4 = vpop.f32.mrf.mxu1  ;;  %4772 = vst [vmem:[%s8682_s9 + $0x98] sm:$0xff] %v8852_v29 }
 0x483   : > { %v4609_v35 = vsel %vm4527_vm2, %v4404_v49, %v4568_v59  ;;  %v4409_v2 = vadd.f32 %v4408_v4, %v9408_v7  ;;  %v4803_v4 = vmul.f32 %v8766_v58, %v8766_v58  ;;  %v4841_v20 = vadd.f32 %v4840_v31, %v4801_v37  ;;  %v9416_v37 = vld [vmem:[#allocation51_spill] sm:$0xff] }
 0x484   : > { %v8863_v46 = vmul.f32 %v4609_v35, %v9409_v27  ;;  %v5887_v30 = vpop.f32.mrf.mxu1  ;;  %v4804_v7 = vmul.f32 %v8779_v51, %v8779_v51  ;;  %v4807_v31 = vmul.f32 %v8804_v25, %v8804_v25 }
 0x485   : > { %vm4528_vm3 = vcmp.ge.f32.partialorder %v4409_v2, 0.0  ;;  %v4569_v33 = vmul.f32 0.2, %v4409_v2  ;;  %v9414_v30 = vld [vmem:[#allocation50_spill] sm:$0xff] }
 0x486   : > { %4691 = vst [vmem:[#allocation2 + $0xb8] sm:$0xff] %v8863_v46  ;;  %v4413_v23 = vpop.f32.mrf.mxu1  ;;  %4773 = vst [vmem:[%s8682_s9 + $0xa0] sm:$0xff] %v8863_v46 }
 0x487   : > { %v4610_v61 = vsel %vm4528_vm3, %v4409_v2, %v4569_v33  ;;  %v4414_v19 = vadd.f32 %v4413_v23, %v9410_v55  ;;  %v4842_v2 = vadd.f32 %v4841_v20, %v4802_v6  ;;  %v9418_v20 = vld [vmem:[#allocation52_spill] sm:$0xff] }
 0x488   : > { %v8874_v53 = vmul.f32 %v4610_v61, %v9411_v36  ;;  %v5890_v10 = vpop.f32.mrf.mxu1 }
 0x489   : > { %vm4529_vm4 = vcmp.ge.f32.partialorder %v4414_v19, 0.0  ;;  %v4570_v14 = vmul.f32 0.2, %v4414_v19  ;;  %v4843_v28 = vadd.f32 %v4842_v2, %v4803_v4 }
 0x48a   : > { %4692 = vst [vmem:[#allocation2 + $0xc0] sm:$0xff] %v8874_v53  ;;  %v4418_v9 = vpop.f32.mrf.mxu1  ;;  %4774 = vst [vmem:[%s8682_s9 + $0xa8] sm:$0xff] %v8874_v53 }
 0x48b   : > { %v4611_v49 = vsel %vm4529_vm4, %v4414_v19, %v4570_v14  ;;  %v4419_v54 = vadd.f32 %v4418_v9, %v9412_v62  ;;  %v4806_v19 = vmul.f32 %v8797_v60, %v8797_v60  ;;  %v4844_v36 = vadd.f32 %v4843_v28, %v4804_v7  ;;  %v9417_v14 = vld [vmem:[#allocation19_spill] sm:$0xff] }
 0x48c   : > { %v8885_v63 = vmul.f32 %v4611_v49, %v9413_v34  ;;  %v5893_v59 = vpop.f32.mrf.mxu1  ;;  %v4808_v34 = vmul.f32 %v8811_v32, %v8811_v32 }
 0x48d   : > { %vm4530_vm5 = vcmp.ge.f32.partialorder %v4419_v54, 0.0  ;;  %v4571_v48 = vmul.f32 0.2, %v4419_v54  ;;  %v4845_v49 = vadd.f32 %v4844_v36, %v4805_v38 }
 0x48e   : > { %4693 = vst [vmem:[#allocation2 + $0xc8] sm:$0xff] %v8885_v63  ;;  %v4423_v35 = vpop.f32.mrf.mxu1  ;;  %4775 = vst [vmem:[%s8682_s9 + $0xb0] sm:$0xff] %v8885_v63 }
 0x48f   : > { %v4612_v27 = vsel %vm4530_vm5, %v4419_v54, %v4571_v48  ;;  %v4424_v26 = vadd.f32 %v4423_v35, %v9414_v30  ;;  %v4846_v59 = vadd.f32 %v4845_v49, %v4806_v19  ;;  %v9419_v35 = vld [vmem:[#allocation20_spill] sm:$0xff]  ;;  %v9421_v19 = vld [vmem:[#allocation21_spill] sm:$0xff] }
 0x490   : > { %v8896_v33 = vmul.f32 %v4612_v27, %v9415_v24  ;;  %v5896_v23 = vpop.f32.mrf.mxu1  ;;  %v4809_v27 = vmul.f32 %v8818_v18, %v8818_v18 }
 0x491   : > { %vm4531_vm6 = vcmp.ge.f32.partialorder %v4424_v26, 0.0  ;;  %v4572_v61 = vmul.f32 0.2, %v4424_v26  ;;  %v4847_v30 = vadd.f32 %v4846_v59, %v4807_v31  ;;  %v4810_v23 = vmul.f32 %v8825_v15, %v8825_v15  ;;  %v9423_v59 = vld [vmem:[#allocation22_spill] sm:$0xff] }
 0x492   : > { %4694 = vst [vmem:[#allocation2 + $0xd0] sm:$0xff] %v8896_v33  ;;  %v4428_v55 = vpop.f32.mrf.mxu1  ;;  %4776 = vst [vmem:[%s8682_s9 + $0xb8] sm:$0xff] %v8896_v33  ;;  %v4812_v31 = vmul.f32 %v8839_v52, %v8839_v52 }
 0x493   : > { %v4613_v10 = vsel %vm4531_vm6, %v4424_v26, %v4572_v61  ;;  %v4429_v57 = vadd.f32 %v4428_v55, %v9416_v37  ;;  %v4848_v38 = vadd.f32 %v4847_v30, %v4808_v34  ;;  %v9420_v61 = vld [vmem:[#allocation53_spill] sm:$0xff]  ;;  %v4811_v37 = vmul.f32 %v8832_v41, %v8832_v41 }
 0x494   : > { %v8907_v9 = vmul.f32 %v4613_v10, %v9417_v14  ;;  %v5899_v6 = vpop.f32.mrf.mxu1  ;;  %v4814_v30 = vmul.f32 %v8863_v46, %v8863_v46 }
 0x495   : > { %vm4532_vm7 = vcmp.ge.f32.partialorder %v4429_v57, 0.0  ;;  %v4573_v62 = vmul.f32 0.2, %v4429_v57 }
 0x496   : > { %4695 = vst [vmem:[#allocation2 + $0xd8] sm:$0xff] %v8907_v9  ;;  %v4433_v54 = vpop.f32.mrf.mxu1  ;;  %4777 = vst [vmem:[%s8682_s9 + $0xc0] sm:$0xff] %v8907_v9 }
 0x497   : > { %v4614_v4 = vsel %vm4532_vm7, %v4429_v57, %v4573_v62  ;;  %v4434_v48 = vadd.f32 %v4433_v54, %v9418_v20  ;;  %v4849_v57 = vadd.f32 %v4848_v38, %v4809_v27  ;;  %v9422_v54 = vld [vmem:[#allocation54_spill] sm:$0xff] }
 0x498   : > { %v8918_v7 = vmul.f32 %v4614_v4, %v9419_v35  ;;  %v5902_v2 = vpop.f32.mrf.mxu1 }
 0x499   : > { %vm4533_vm8 = vcmp.ge.f32.partialorder %v4434_v48, 0.0  ;;  %v4574_v26 = vmul.f32 0.2, %v4434_v48  ;;  %v4850_v49 = vadd.f32 %v4849_v57, %v4810_v23  ;;  %v9424_v23 = vld [vmem:[#allocation55_spill] sm:$0xff] }
 0x49a   : > { %4696 = vst [vmem:[#allocation2 + $0xe0] sm:$0xff] %v8918_v7  ;;  %v4438_v24 = vpop.f32.mrf.mxu1  ;;  %4778 = vst [vmem:[%s8682_s9 + $0xc8] sm:$0xff] %v8918_v7 }
 0x49b   : > { %v4615_v28 = vsel %vm4533_vm8, %v4434_v48, %v4574_v26  ;;  %v4439_v55 = vadd.f32 %v4438_v24, %v9420_v61  ;;  %v4813_v48 = vmul.f32 %v8852_v29, %v8852_v29  ;;  %v4851_v35 = vadd.f32 %v4850_v49, %v4811_v37  ;;  %v9426_v49 = vld [vmem:[#allocation56_spill] sm:$0xff] }
 0x49c   : > { %v8929_v36 = vmul.f32 %v4615_v28, %v9421_v19  ;;  %v5905_v10 = vpop.f32.mrf.mxu1  ;;  %v9425_v28 = vld [vmem:[#allocation23_spill] sm:$0xff]  ;;  %v4815_v19 = vmul.f32 %v8874_v53, %v8874_v53 }
 0x49d   : > { %vm4534_vm9 = vcmp.ge.f32.partialorder %v4439_v55, 0.0  ;;  %v4575_v14 = vmul.f32 0.2, %v4439_v55  ;;  %v4852_v26 = vadd.f32 %v4851_v35, %v4812_v31 }
 0x49e   : > { %4697 = vst [vmem:[#allocation2 + $0xe8] sm:$0xff] %v8929_v36  ;;  %v4443_v6 = vpop.f32.mrf.mxu1  ;;  %4779 = vst [vmem:[%s8682_s9 + $0xd0] sm:$0xff] %v8929_v36 }
 0x49f   : > { %v4616_v62 = vsel %vm4534_vm9, %v4439_v55, %v4575_v14  ;;  %v4444_v34 = vadd.f32 %v4443_v6, %v9422_v54  ;;  %v4853_v10 = vadd.f32 %v4852_v26, %v4813_v48  ;;  %v4816_v14 = vmul.f32 %v8885_v63, %v8885_v63  ;;  %v9427_v54 = vld [vmem:[#allocation24_spill] sm:$0xff] }
 0x4a0   : > { %v8940_v4 = vmul.f32 %v4616_v62, %v9423_v59  ;;  %v5908_v20 = vpop.f32.mrf.mxu1 }
 0x4a1   : > { %vm4535_vm10 = vcmp.ge.f32.partialorder %v4444_v34, 0.0  ;;  %v4576_v2 = vmul.f32 0.2, %v4444_v34  ;;  %v4854_v6 = vadd.f32 %v4853_v10, %v4814_v30  ;;  %v4817_v20 = vmul.f32 %v8896_v33, %v8896_v33 }
 0x4a2   : > { %4698 = vst [vmem:[#allocation2 + $0xf0] sm:$0xff] %v8940_v4  ;;  %v4448_v27 = vpop.f32.mrf.mxu1  ;;  %4780 = vst [vmem:[%s8682_s9 + $0xd8] sm:$0xff] %v8940_v4 }
 0x4a3   : > { %v4617_v24 = vsel %vm4535_vm10, %v4444_v34, %v4576_v2  ;;  %v4449_v38 = vadd.f32 %v4448_v27, %v9424_v23  ;;  %v4855_v48 = vadd.f32 %v4854_v6, %v4815_v19  ;;  %v4818_v27 = vmul.f32 %v8907_v9, %v8907_v9  ;;  %v9428_v23 = vld [vmem:[#allocation25_spill] sm:$0xff] }
 0x4a4   : > { %v8951_v61 = vmul.f32 %v4617_v24, %v9425_v28  ;;  %v5911_v55 = vpop.f32.mrf.mxu1 }
 0x4a5   : > { %vm4536_vm11 = vcmp.ge.f32.partialorder %v4449_v38, 0.0  ;;  %v4577_v37 = vmul.f32 0.2, %v4449_v38  ;;  %v4856_v30 = vadd.f32 %v4855_v48, %v4816_v14  ;;  %v4819_v55 = vmul.f32 %v8918_v7, %v8918_v7 }
 0x4a6   : > { %4699 = vst [vmem:[#allocation2 + $0xf8] sm:$0xff] %v8951_v61  ;;  %v4453_v57 = vpop.f32.mrf.mxu1  ;;  %4781 = vst [vmem:[%s8682_s9 + $0xe0] sm:$0xff] %v8951_v61 }
 0x4a7   : > { %v4618_v31 = vsel %vm4536_vm11, %v4449_v38, %v4577_v37  ;;  %v4454_v62 = vadd.f32 %v4453_v57, %v9426_v49  ;;  %v4857_v19 = vadd.f32 %v4856_v30, %v4817_v20  ;;  %v4820_v57 = vmul.f32 %v8929_v36, %v8929_v36  ;;  %v9430_v30 = vld [vmem:[#allocation27_spill] sm:$0xff] }
 0x4a8   : > { %v8962_v34 = vmul.f32 %v4618_v31, %v9427_v54  ;;  %v5914_v59 = vpop.f32.mrf.mxu1  ;;  %v9429_v31 = vld [vmem:[#allocation26_spill] sm:$0xff]  ;;  %v4821_v54 = vmul.f32 %v8940_v4, %v8940_v4 }
 0x4a9   : > { %vm4537_vm12 = vcmp.ge.f32.partialorder %v4454_v62, 0.0  ;;  %v4578_v35 = vmul.f32 0.2, %v4454_v62 }
 0x4aa   : > { %4700 = vst [vmem:[#allocation2 + $0x100] sm:$0xff] %v8962_v34  ;;  %v4458_v2 = vpop.f32.mrf.mxu1  ;;  %4782 = vst [vmem:[%s8682_s9 + $0xe8] sm:$0xff] %v8962_v34 }
 0x4ab   : > { %v4619_v26 = vsel %vm4537_vm12, %v4454_v62, %v4578_v35  ;;  %v4459_v24 = vadd.f32 %v4458_v2, %v8626_v45  ;;  %v4858_v45 = vadd.f32 %v4857_v19, %v4818_v27  ;;  %v4822_v35 = vmul.f32 %v8951_v61, %v8951_v61 }
 0x4ac   : > { %v8973_v38 = vmul.f32 %v4619_v26, %v9428_v23  ;;  %v5917_v28 = vpop.f32.mrf.mxu1  ;;  %v4823_v23 = vmul.f32 %v8962_v34, %v8962_v34 }
 0x4ad   : > { %vm4538_vm13 = vcmp.ge.f32.partialorder %v4459_v24, 0.0  ;;  %v4579_v10 = vmul.f32 0.2, %v4459_v24  ;;  %v4859_v59 = vadd.f32 %v4858_v45, %v4819_v55  ;;  %v9431_v45 = vld [vmem:[#allocation28_spill] sm:$0xff] }
 0x4ae   : > { %4701 = vst [vmem:[#allocation2 + $0x108] sm:$0xff] %v8973_v38  ;;  %v4463_v37 = vpop.f32.mrf.mxu1  ;;  %4783 = vst [vmem:[%s8682_s9 + $0xf0] sm:$0xff] %v8973_v38 }
 0x4af   : > { %v4620_v14 = vsel %vm4538_vm13, %v4459_v24, %v4579_v10  ;;  %v4464_v6 = vadd.f32 %v4463_v37, %v8629_v11  ;;  %v4860_v11 = vadd.f32 %v4859_v59, %v4820_v57  ;;  %v4824_v10 = vmul.f32 %v8973_v38, %v8973_v38 }
 0x4b0   : > { %v8984_v49 = vmul.f32 %v4620_v14, %v9429_v31  ;;  %v5920_v62 = vpop.f32.mrf.mxu1 }
 0x4b1   : > { %vm4539_vm14 = vcmp.ge.f32.partialorder %v4464_v6, 0.0  ;;  %v4580_v20 = vmul.f32 0.2, %v4464_v6  ;;  %v4861_v28 = vadd.f32 %v4860_v11, %v4821_v54  ;;  %v9432_v11 = vld [vmem:[#allocation29_spill] sm:$0xff] }
 0x4b2   : > { %4702 = vst [vmem:[#allocation2 + $0x110] sm:$0xff] %v8984_v49  ;;  %v4468_v48 = vpop.f32.mrf.mxu1  ;;  %4784 = vst [vmem:[%s8682_s9 + $0xf8] sm:$0xff] %v8984_v49  ;;  %v4825_v31 = vmul.f32 %v8984_v49, %v8984_v49 }
 0x4b3   : > { %v4621_v2 = vsel %vm4539_vm14, %v4464_v6, %v4580_v20  ;;  %v4469_v27 = vadd.f32 %v4468_v48, %v8632_v3  ;;  %v4862_v3 = vadd.f32 %v4861_v28, %v4822_v35 }
 0x4b4   : > { %v8995_v26 = vmul.f32 %v4621_v2, %v9430_v30  ;;  %v5923_v24 = vpop.f32.mrf.mxu1 }
 0x4b5   : > { %vm4540_vm15 = vcmp.ge.f32.partialorder %v4469_v27, 0.0  ;;  %v4581_v55 = vmul.f32 0.2, %v4469_v27  ;;  %v4863_v62 = vadd.f32 %v4862_v3, %v4823_v23  ;;  %v9433_v3 = vld [vmem:[#allocation30_spill] sm:$0xff] }
 0x4b6   : > { %4703 = vst [vmem:[#allocation2 + $0x118] sm:$0xff] %v8995_v26  ;;  %v4473_v19 = vpop.f32.mrf.mxu1  ;;  %4785 = vst [vmem:[%s8682_s9 + $0x100] sm:$0xff] %v8995_v26  ;;  %v4826_v20 = vmul.f32 %v8995_v26, %v8995_v26 }
 0x4b7   : > { %v4622_v37 = vsel %vm4540_vm15, %v4469_v27, %v4581_v55  ;;  %v4474_v57 = vadd.f32 %v4473_v19, %v8635_v39  ;;  %v4864_v39 = vadd.f32 %v4863_v62, %v4824_v10 }
 0x4b8   : > { %v9006_v14 = vmul.f32 %v4622_v37, %v9431_v45  ;;  %v5926_v6 = vpop.f32.mrf.mxu1 }
 0x4b9   : > { %vm4541_vm1 = vcmp.ge.f32.partialorder %v4474_v57, 0.0  ;;  %v4582_v54 = vmul.f32 0.2, %v4474_v57  ;;  %v4865_v24 = vadd.f32 %v4864_v39, %v4825_v31 }
 0x4ba   : > { %4704 = vst [vmem:[#allocation2 + $0x120] sm:$0xff] %v9006_v14  ;;  %v4478_v59 = vpop.f32.mrf.mxu1  ;;  %4786 = vst [vmem:[%s8682_s9 + $0x108] sm:$0xff] %v9006_v14  ;;  %v4827_v30 = vmul.f32 %v9006_v14, %v9006_v14 }
 0x4bb   : > { %v4623_v48 = vsel %vm4541_vm1, %v4474_v57, %v4582_v54  ;;  %v4479_v35 = vadd.f32 %v4478_v59, %v8638_v21  ;;  %v4866_v21 = vadd.f32 %v4865_v24, %v4826_v20  ;;  %v9434_v20 = vld [vmem:[#allocation31_spill] sm:$0xff] }
 0x4bc   : > { %v9017_v2 = vmul.f32 %v4623_v48, %v9432_v11  ;;  %v5929_v27 = vpop.f32.mrf.mxu1 }
 0x4bd   : > { %vm4542_vm2 = vcmp.ge.f32.partialorder %v4479_v35, 0.0  ;;  %v4583_v23 = vmul.f32 0.2, %v4479_v35  ;;  %v4867_v45 = vadd.f32 %v4866_v21, %v4827_v30 }
 0x4be   : > { %4705 = vst [vmem:[#allocation2 + $0x128] sm:$0xff] %v9017_v2  ;;  %v4483_v28 = vpop.f32.mrf.mxu1  ;;  %4787 = vst [vmem:[%s8682_s9 + $0x110] sm:$0xff] %v9017_v2  ;;  %v4828_v55 = vmul.f32 %v9017_v2, %v9017_v2 }
 0x4bf   : > { %v4624_v19 = vsel %vm4542_vm2, %v4479_v35, %v4583_v23  ;;  %v4484_v10 = vadd.f32 %v4483_v28, %v8641_v17 }
 0x4c0   : > { %v9028_v37 = vmul.f32 %v4624_v19, %v9433_v3  ;;  %v5932_v57 = vpop.f32.mrf.mxu1  ;;  %v4868_v54 = vadd.f32 %v4867_v45, %v4828_v55 }
 0x4c1   : > { %vm4543_vm3 = vcmp.ge.f32.partialorder %v4484_v10, 0.0  ;;  %v4584_v6 = vmul.f32 0.2, %v4484_v10 }
 0x4c2   : > { %4706 = vst [vmem:[#allocation2 + $0x130] sm:$0xff] %v9028_v37  ;;  %v4488_v31 = vpop.f32.mrf.mxu1  ;;  %4788 = vst [vmem:[%s8682_s9 + $0x118] sm:$0xff] %v9028_v37  ;;  %v4829_v62 = vmul.f32 %v9028_v37, %v9028_v37 }
 0x4c3   : > { %v4625_v59 = vsel %vm4543_vm3, %v4484_v10, %v4584_v6  ;;  %v4489_v17 = vadd.f32 %v4488_v31, %v8646_v5  ;;  %v9435_v5 = vld [vmem:[#allocation32_spill] sm:$0xff]  ;;  %v9436_v6 = vld [vmem:[#allocation33_spill] sm:$0xff] }
 0x4c4   : > { %v9037_v39 = vmul.f32 %v4625_v59, %v9434_v20  ;;  %v5935_v48 = vpop.f32.mrf.mxu1  ;;  %v4869_v35 = vadd.f32 %v4868_v54, %v4829_v62 }
 0x4c5   : > { %vm4544_vm4 = vcmp.ge.f32.partialorder %v4489_v17, 0.0  ;;  %v4585_v11 = vmul.f32 0.2, %v4489_v17 }
 0x4c6   : > { %4707 = vst [vmem:[#allocation2 + $0x138] sm:$0xff] %v9037_v39  ;;  %v4493_v27 = vpop.f32.mrf.mxu1  ;;  %4789 = vst [vmem:[%s8682_s9 + $0x120] sm:$0xff] %v9037_v39  ;;  %v4830_v30 = vmul.f32 %v9037_v39, %v9037_v39 }
 0x4c7   : > { %v4626_v24 = vsel %vm4544_vm4, %v4489_v17, %v4585_v11  ;;  %v4494_v23 = vadd.f32 %v4493_v27, %v8656_v22 }
 0x4c8   : > { %v4667_v28 = vmul.f32 %v4626_v24, %v9435_v5  ;;  %v5938_v55 = vpop.f32.mrf.mxu1  ;;  %v4870_v21 = vadd.f32 %v4869_v35, %v4830_v30  ;;  %v9437_v35 = vld [vmem:[#allocation34_spill] sm:$0xff]  ;;  %v9438_v5 = vld [vmem:[#allocation35_spill] sm:$0xff] }
 0x4c9   : > { %vm4545_vm5 = vcmp.ge.f32.partialorder %v4494_v23, 0.0  ;;  %v4586_v19 = vmul.f32 0.2, %v4494_v23 }
 0x4ca   : > { %4708 = vst [vmem:[#allocation2 + $0x140] sm:$0xff] %v4667_v28  ;;  %v4498_v10 = vpop.f32.mrf.mxu1  ;;  %4790 = vst [vmem:[%s8682_s9 + $0x128] sm:$0xff] %v4667_v28  ;;  %v4831_v3 = vmul.f32 %v4667_v28, %v4667_v28 }
 0x4cb   : > { %v4627_v57 = vsel %vm4545_vm5, %v4494_v23, %v4586_v19  ;;  %v4499_v45 = vadd.f32 %v4498_v10, %v8664_v40 }
 0x4cc   : > { %v4668_v31 = vmul.f32 %v4627_v57, %v9436_v6  ;;  %v5941_v62 = vpop.f32.mrf.mxu1  ;;  %v4871_v54 = vadd.f32 %v4870_v21, %v4831_v3 }
 0x4cd   : > { %vm4546_vm6 = vcmp.ge.f32.partialorder %v4499_v45, 0.0  ;;  %v4587_v22 = vmul.f32 0.2, %v4499_v45 }
 0x4ce   : > { %4709 = vst [vmem:[#allocation2 + $0x148] sm:$0xff] %v4668_v31  ;;  %v4503_v59 = vpop.f32.mrf.mxu1  ;;  %4791 = vst [vmem:[%s8682_s9 + $0x130] sm:$0xff] %v4668_v31  ;;  %v4832_v17 = vmul.f32 %v4668_v31, %v4668_v31 }
 0x4cf   : > { %v4628_v20 = vsel %vm4546_vm6, %v4499_v45, %v4587_v22  ;;  %v4504_v48 = vadd.f32 %v4503_v59, %v8673_v8 }
 0x4d0   : > { %v4669_v11 = vmul.f32 %v4628_v20, %v9437_v35  ;;  %v5944_v27 = vpop.f32.mrf.mxu1  ;;  %v4872_v30 = vadd.f32 %v4871_v54, %v4832_v17 }
 0x4d1   : > { %vm4547_vm7 = vcmp.ge.f32.partialorder %v4504_v48, 0.0  ;;  %v4588_v40 = vmul.f32 0.2, %v4504_v48 }
 0x4d2   : > { %4710 = vst [vmem:[#allocation2 + $0x150] sm:$0xff] %v4669_v11  ;;  %4792 = vst [vmem:[%s8682_s9 + $0x138] sm:$0xff] %v4669_v11  ;;  %v4833_v24 = vmul.f32 %v4669_v11, %v4669_v11 }
 0x4d3   : > { %v4629_v23 = vsel %vm4547_vm7, %v4504_v48, %v4588_v40 }
 0x4d4   : > { %v4670_v55 = vmul.f32 %v4629_v23, %v9438_v5  ;;  %v4873_v21 = vadd.f32 %v4872_v30, %v4833_v24 }
 0x4d6   : > { %4711 = vst [vmem:[#allocation2 + $0x158] sm:$0xff] %v4670_v55  ;;  %4793 = vst [vmem:[%s8682_s9 + $0x140] sm:$0xff] %v4670_v55  ;;  %v4834_v19 = vmul.f32 %v4670_v55, %v4670_v55 }
 0x4d8   : > { %v4874_v10 = vadd.f32 %v4873_v21, %v4834_v19 }
 0x4da   : > { %v4875_v3 = vrot.slane %v4874_v10, 4 }
 0x4dc   : > { %v4876_v57 = vadd.f32 %v4875_v3, %v4874_v10 }
 0x4de   : > { %v4877_v8 = vrot.slane %v4876_v57, 2 }
 0x4e0   : > { %v4878_v45 = vadd.f32 %v4877_v8, %v4876_v57 }
 0x4e2   : > { %v4879_v6 = vrot.slane %v4878_v45, 1 }
 0x4e4   : > { %v4880_v62 = vadd.f32 %v4879_v6, %v4878_v45 }
 0x4e6   : > { %v4881_v54 = vmax.f32 %v4880_v62, 1e-24 }
 0x4e8   : > { %6179 = vrsqrt.f32 %v4881_v54 }
 0x4f5   : > { %v9055_v22 = vpop.eup %6179 }
 0x4f6   : > { %v4883_v59 = vmul.f32 %v9055_v22, %v8685_v13  ;;  %v4884_v17 = vmul.f32 %v9055_v22, %v8698_v44  ;;  %v4885_v20 = vmul.f32 %v9055_v22, %v8707_v43  ;;  %v9069_v48 = vmul.f32 %v9055_v22, %v9017_v2 }
 0x4f7   : > { %v9073_v13 = vmul.f32 %v9055_v22, %v9028_v37  ;;  %v9077_v35 = vmul.f32 %v9055_v22, %v9037_v39  ;;  %v9080_v44 = vmul.f32 %v9055_v22, %v4667_v28  ;;  %v9083_v27 = vmul.f32 %v9055_v22, %v4668_v31  ;;  %v9119_v31 = vld [vmem:[#allocation2] sm:$0xff] }
 0x4f8   : > { %5978 = vmatmul.mubr.f32.vlgmr.msra.gmra.mxu0 %v4883_v59  ;;  %v9086_v43 = vmul.f32 %v9055_v22, %v4669_v11  ;;  %v9089_v2 = vmul.f32 %v9055_v22, %v4670_v55  ;;  %v4886_v37 = vmul.f32 %v9055_v22, %v8714_v0  ;;  %v4887_v39 = vmul.f32 %v9055_v22, %v8723_v12 }
 0x4f9   : > { %5980 = vmatprep.mubr.msk.f32.mxu0 %vm6258_vm0, %v8687_v16  ;;  %v4888_v28 = vmul.f32 %v9055_v22, %v8731_v47  ;;  %v4889_v0 = vmul.f32 %v9055_v22, %v8740_v50  ;;  %v4890_v12 = vmul.f32 %v9055_v22, %v8748_v42  ;;  %v4891_v47 = vmul.f32 %v9055_v22, %v8755_v56 }
 0x4fa   : > { %v4892_v50 = vmul.f32 %v9055_v22, %v8766_v58  ;;  %v4893_v42 = vmul.f32 %v9055_v22, %v8779_v51  ;;  %v4894_v56 = vmul.f32 %v9055_v22, %v8790_v1  ;;  %v4896_v58 = vmul.f32 %v9055_v22, %v8804_v25 }
 0x4fb   : > { %v4897_v51 = vmul.f32 %v9055_v22, %v8811_v32  ;;  %v4898_v1 = vmul.f32 %v9055_v22, %v8818_v18  ;;  %v4900_v25 = vmul.f32 %v9055_v22, %v8832_v41  ;;  %v4901_v32 = vmul.f32 %v9055_v22, %v8839_v52 }
 0x4fc   : > { %5981 = vmatmul.mubr.f32.gmra.mxu0 %v4884_v17  ;;  %v4902_v18 = vmul.f32 %v9055_v22, %v8852_v29  ;;  %v4904_v41 = vmul.f32 %v9055_v22, %v8874_v53  ;;  %v4905_v52 = vmul.f32 %v9055_v22, %v8885_v63  ;;  %v4906_v29 = vmul.f32 %v9055_v22, %v8896_v33 }
 0x4fd   : > { %5983 = vmatprep.mubr.msk.f32.mxu0 %vm6258_vm0, %v8687_v16  ;;  %v4908_v53 = vmul.f32 %v9055_v22, %v8918_v7  ;;  %v4909_v63 = vmul.f32 %v9055_v22, %v8929_v36  ;;  %v4910_v33 = vmul.f32 %v9055_v22, %v8940_v4  ;;  %v4912_v7 = vmul.f32 %v9055_v22, %v8962_v34 }
 0x4fe   : > { %v4913_v36 = vmul.f32 %v9055_v22, %v8973_v38  ;;  %v4914_v4 = vmul.f32 %v9055_v22, %v8984_v49  ;;  %v4916_v34 = vmul.f32 %v9055_v22, %v9006_v14 }
 0x500   : > { %5984 = vmatmul.mubr.f32.gmra.mxu0 %v4885_v20 }
 0x501   : > { %5986 = vmatprep.mubr.msk.f32.mxu0 %vm6258_vm0, %v8687_v16 }
 0x504   : > { %5987 = vmatmul.mubr.f32.gmra.mxu0 %v4886_v37 }
 0x505   : > { %5989 = vmatprep.mubr.msk.f32.mxu0 %vm6258_vm0, %v8687_v16 }
 0x508   : > { %5990 = vmatmul.mubr.f32.gmra.mxu0 %v4887_v39 }
 0x509   : > { %5992 = vmatprep.mubr.msk.f32.mxu0 %vm6258_vm0, %v8687_v16 }
 0x50c   : > { %5993 = vmatmul.mubr.f32.gmra.mxu0 %v4888_v28 }
 0x50d   : > { %5995 = vmatprep.mubr.msk.f32.mxu0 %vm6258_vm0, %v8687_v16 }
 0x510   : > { %5996 = vmatmul.mubr.f32.gmra.mxu0 %v4889_v0 }
 0x511   : > { %5998 = vmatprep.mubr.msk.f32.mxu0 %vm6258_vm0, %v8687_v16 }
 0x514   : > { %5999 = vmatmul.mubr.f32.gmra.mxu0 %v4890_v12 }
 0x515   : > { %6001 = vmatprep.mubr.msk.f32.mxu0 %vm6258_vm0, %v8687_v16 }
 0x518   : > { %6002 = vmatmul.mubr.f32.gmra.mxu0 %v4891_v47 }
 0x519   : > { %6004 = vmatprep.mubr.msk.f32.mxu0 %vm6258_vm0, %v8687_v16  ;;  %v4895_v16 = vmul.f32 %v9055_v22, %v8797_v60  ;;  %v4899_v60 = vmul.f32 %v9055_v22, %v8825_v15  ;;  %v4903_v15 = vmul.f32 %v9055_v22, %v8863_v46  ;;  %v4907_v46 = vmul.f32 %v9055_v22, %v8907_v9 }
 0x51a   : > { %v4911_v9 = vmul.f32 %v9055_v22, %v8951_v61  ;;  %v4915_v61 = vmul.f32 %v9055_v22, %v8995_v26 }
 0x51c   : > { %6005 = vmatmul.mubr.f32.gmra.mxu0 %v4892_v50 }
 0x51d   : > { %6007 = vmatprep.mubr.msk.f32.mxu0 %vm6258_vm0, %v9119_v31 }
 0x520   : > { %6008 = vmatmul.mubr.f32.gmra.mxu0 %v4893_v42 }
 0x521   : > { %6010 = vmatprep.mubr.msk.f32.mxu0 %vm6258_vm0, %v9119_v31 }
 0x524   : > { %6011 = vmatmul.mubr.f32.gmra.mxu0 %v4894_v56 }
 0x525   : > { %6013 = vmatprep.mubr.msk.f32.mxu0 %vm6258_vm0, %v9119_v31 }
 0x528   : > { %6014 = vmatmul.mubr.f32.gmra.mxu0 %v4895_v16 }
 0x529   : > { %6016 = vmatprep.mubr.msk.f32.mxu0 %vm6258_vm0, %v9119_v31 }
 0x52c   : > { %6017 = vmatmul.mubr.f32.gmra.mxu0 %v4896_v58 }
 0x52d   : > { %6019 = vmatprep.mubr.msk.f32.mxu0 %vm6258_vm0, %v9119_v31 }
 0x530   : > { %6020 = vmatmul.mubr.f32.gmra.mxu0 %v4897_v51 }
 0x531   : > { %6022 = vmatprep.mubr.msk.f32.mxu0 %vm6258_vm0, %v9119_v31 }
 0x534   : > { %6023 = vmatmul.mubr.f32.gmra.mxu0 %v4898_v1 }
 0x535   : > { %6025 = vmatprep.mubr.msk.f32.mxu0 %vm6258_vm0, %v9119_v31 }
 0x538   : > { %6026 = vmatmul.mubr.f32.gmra.mxu0 %v4899_v60 }
 0x539   : > { %6028 = vmatprep.mubr.msk.f32.mxu0 %vm6258_vm0, %v9119_v31 }
 0x53c   : > { %6029 = vmatmul.mubr.f32.gmra.mxu0 %v4900_v25 }
 0x53d   : > { %6031 = vmatprep.mubr.msk.f32.mxu0 %vm6258_vm0, %v9119_v31 }
 0x540   : > { %6032 = vmatmul.mubr.f32.gmra.mxu0 %v4901_v32 }
 0x541   : > { %6034 = vmatprep.mubr.msk.f32.mxu0 %vm6258_vm0, %v9119_v31 }
 0x544   : > { %6035 = vmatmul.mubr.f32.gmra.mxu0 %v4902_v18 }
 0x545   : > { %6037 = vmatprep.mubr.msk.f32.mxu0 %vm6258_vm0, %v9119_v31 }
 0x548   : > { %6038 = vmatmul.mubr.f32.gmra.mxu0 %v4903_v15 }
 0x549   : > { %6040 = vmatprep.mubr.msk.f32.mxu0 %vm6258_vm0, %v9119_v31 }
 0x54c   : > { %6041 = vmatmul.mubr.f32.gmra.mxu0 %v4904_v41 }
 0x54d   : > { %6043 = vmatprep.mubr.msk.f32.mxu0 %vm6258_vm0, %v9119_v31 }
 0x550   : > { %6044 = vmatmul.mubr.f32.gmra.mxu0 %v4905_v52 }
 0x551   : > { %6046 = vmatprep.mubr.msk.f32.mxu0 %vm6258_vm0, %v9119_v31 }
 0x554   : > { %6047 = vmatmul.mubr.f32.gmra.mxu0 %v4906_v29 }
 0x555   : > { %6049 = vmatprep.mubr.msk.f32.mxu0 %vm6258_vm0, %v9119_v31 }
 0x558   : > { %6050 = vmatmul.mubr.f32.gmra.mxu0 %v4907_v46 }
 0x559   : > { %6052 = vmatprep.mubr.msk.f32.mxu0 %vm6258_vm0, %v9119_v31 }
 0x55c   : > { %6053 = vmatmul.mubr.f32.gmra.mxu0 %v4908_v53 }
 0x55d   : > { %6055 = vmatprep.mubr.msk.f32.mxu0 %vm6258_vm0, %v9119_v31 }
 0x560   : > { %6056 = vmatmul.mubr.f32.gmra.mxu0 %v4909_v63 }
 0x561   : > { %6058 = vmatprep.mubr.msk.f32.mxu0 %vm6258_vm0, %v9119_v31 }
 0x564   : > { %6059 = vmatmul.mubr.f32.gmra.mxu0 %v4910_v33 }
 0x565   : > { %6061 = vmatprep.mubr.msk.f32.mxu0 %vm6258_vm0, %v9119_v31 }
 0x568   : > { %6062 = vmatmul.mubr.f32.gmra.mxu0 %v4911_v9 }
 0x569   : > { %6064 = vmatprep.mubr.msk.f32.mxu0 %vm6258_vm0, %v9119_v31 }
 0x56c   : > { %6065 = vmatmul.mubr.f32.gmra.mxu0 %v4912_v7 }
 0x56d   : > { %6067 = vmatprep.mubr.msk.f32.mxu0 %vm6258_vm0, %v9119_v31 }
 0x570   : > { %6068 = vmatmul.mubr.f32.gmra.mxu0 %v4913_v36 }
 0x571   : > { %6070 = vmatprep.mubr.msk.f32.mxu0 %vm6258_vm0, %v9119_v31 }
 0x574   : > { %6071 = vmatmul.mubr.f32.gmra.mxu0 %v4914_v4 }
 0x575   : > { %6073 = vmatprep.mubr.msk.f32.mxu0 %vm6258_vm0, %v9119_v31 }
 0x578   : > { %6074 = vmatmul.mubr.f32.gmra.mxu0 %v4915_v61 }
 0x579   : > { %6076 = vmatprep.mubr.msk.f32.mxu0 %vm6258_vm0, %v9119_v31 }
 0x57c   : > { %6077 = vmatmul.mubr.f32.gmra.mxu0 %v4916_v34 }
 0x57d   : > { %6079 = vmatprep.mubr.msk.f32.mxu0 %vm6258_vm0, %v9119_v31 }
 0x580   : > { %6080 = vmatmul.mubr.f32.gmra.mxu0 %v9069_v48 }
 0x581   : > { %6082 = vmatprep.mubr.msk.f32.mxu0 %vm6258_vm0, %v9119_v31 }
 0x584   : > { %6083 = vmatmul.mubr.f32.gmra.mxu0 %v9073_v13 }
 0x585   : > { %6085 = vmatprep.mubr.msk.f32.mxu0 %vm6258_vm0, %v9119_v31 }
 0x588   : > { %6086 = vmatmul.mubr.f32.gmra.mxu0 %v9077_v35 }
 0x589   : > { %6088 = vmatprep.mubr.msk.f32.mxu0 %vm6258_vm0, %v9119_v31 }
 0x58c   : > { %6089 = vmatmul.mubr.f32.gmra.mxu0 %v9080_v44 }
 0x58d   : > { %6091 = vmatprep.mubr.msk.f32.mxu0 %vm6258_vm0, %v9119_v31 }
 0x590   : > { %6092 = vmatmul.mubr.f32.gmra.mxu0 %v9083_v27 }
 0x591   : > { %6094 = vmatprep.mubr.msk.f32.mxu0 %vm6258_vm0, %v9119_v31 }
 0x594   : > { %6095 = vmatmul.mubr.f32.gmra.mxu0 %v9086_v43 }
 0x595   : > { %6097 = vmatprep.mubr.msk.f32.mxu0 %vm6258_vm0, %v9119_v31 }
 0x598   : > { %6098 = vmatmul.mubr.f32.gmra.mxu0 %v9089_v2 }
 0x5b8   : > { %v5061_v38 = vpop.f32.mrf.mxu0 }
 0x5b9   : > { %v5265_v49 = vmul.f32 40.0, %v5061_v38 }
 0x5ba   : > { %v5979_v26 = vpop.f32.mrf.mxu0 }
 0x5bb   : > { %5306 = vst [vmem:[%s9242_s21] sm:$0xff] %v5265_v49 }
 0x5bc   : > { %v5066_v14 = vpop.f32.mrf.mxu0 }
 0x5bd   : > { %v5266_v11 = vmul.f32 40.0, %v5066_v14 }
 0x5be   : > { %v5982_v30 = vpop.f32.mrf.mxu0 }
 0x5bf   : > { %5307 = vst [vmem:[%s9242_s21 + $0x8] sm:$0xff] %v5266_v11 }
 0x5c0   : > { %v5071_v40 = vpop.f32.mrf.mxu0 }
 0x5c1   : > { %v5267_v24 = vmul.f32 40.0, %v5071_v40 }
 0x5c2   : > { %v5985_v23 = vpop.f32.mrf.mxu0 }
 0x5c3   : > { %5308 = vst [vmem:[%s9242_s21 + $0x10] sm:$0xff] %v5267_v24 }
 0x5c4   : > { %v5076_v5 = vpop.f32.mrf.mxu0 }
 0x5c5   : > { %v5268_v55 = vmul.f32 40.0, %v5076_v5 }
 0x5c6   : > { %v5988_v21 = vpop.f32.mrf.mxu0 }
 0x5c7   : > { %5309 = vst [vmem:[%s9242_s21 + $0x18] sm:$0xff] %v5268_v55 }
 0x5c8   : > { %v5081_v19 = vpop.f32.mrf.mxu0 }
 0x5c9   : > { %v5269_v10 = vmul.f32 40.0, %v5081_v19 }
 0x5ca   : > { %v5991_v3 = vpop.f32.mrf.mxu0 }
 0x5cb   : > { %5310 = vst [vmem:[%s9242_s21 + $0x20] sm:$0xff] %v5269_v10 }
 0x5cc   : > { %v5086_v57 = vpop.f32.mrf.mxu0 }
 0x5cd   : > { %v5270_v8 = vmul.f32 40.0, %v5086_v57 }
 0x5ce   : > { %v5994_v45 = vpop.f32.mrf.mxu0 }
 0x5cf   : > { %5311 = vst [vmem:[%s9242_s21 + $0x28] sm:$0xff] %v5270_v8 }
 0x5d0   : > { %v5091_v6 = vpop.f32.mrf.mxu0 }
 0x5d1   : > { %v5271_v62 = vmul.f32 40.0, %v5091_v6 }
 0x5d2   : > { %v5997_v54 = vpop.f32.mrf.mxu0 }
 0x5d3   : > { %5312 = vst [vmem:[%s9242_s21 + $0x30] sm:$0xff] %v5271_v62 }
 0x5d4   : > { %v5096_v22 = vpop.f32.mrf.mxu0 }
 0x5d5   : > { %v5272_v59 = vmul.f32 40.0, %v5096_v22 }
 0x5d6   : > { %v6000_v17 = vpop.f32.mrf.mxu0 }
 0x5d7   : > { %5313 = vst [vmem:[%s9242_s21 + $0x38] sm:$0xff] %v5272_v59 }
 0x5d8   : > { %v5101_v20 = vpop.f32.mrf.mxu0 }
 0x5d9   : > { %v5273_v48 = vmul.f32 40.0, %v5101_v20 }
 0x5da   : > { %v6003_v13 = vpop.f32.mrf.mxu0 }
 0x5db   : > { %5314 = vst [vmem:[%s9242_s21 + $0x40] sm:$0xff] %v5273_v48 }
 0x5dc   : > { %v5106_v35 = vpop.f32.mrf.mxu0 }
 0x5dd   : > { %v5274_v44 = vmul.f32 40.0, %v5106_v35 }
 0x5de   : > { %v6006_v27 = vpop.f32.mrf.mxu0 }
 0x5df   : > { %5315 = vst [vmem:[%s9242_s21 + $0x48] sm:$0xff] %v5274_v44 }
 0x5e0   : > { %v5111_v43 = vpop.f32.mrf.mxu0 }
 0x5e1   : > { %v5275_v2 = vmul.f32 40.0, %v5111_v43 }
 0x5e2   : > { %v6009_v37 = vpop.f32.mrf.mxu0 }
 0x5e3   : > { %5316 = vst [vmem:[%s9242_s21 + $0x50] sm:$0xff] %v5275_v2 }
 0x5e4   : > { %v5116_v39 = vpop.f32.mrf.mxu0 }
 0x5e5   : > { %v5276_v28 = vmul.f32 40.0, %v5116_v39 }
 0x5e6   : > { %v6012_v0 = vpop.f32.mrf.mxu0 }
 0x5e7   : > { %5317 = vst [vmem:[%s9242_s21 + $0x58] sm:$0xff] %v5276_v28 }
 0x5e8   : > { %v5121_v12 = vpop.f32.mrf.mxu0 }
 0x5e9   : > { %v5277_v47 = vmul.f32 40.0, %v5121_v12 }
 0x5ea   : > { %v6015_v50 = vpop.f32.mrf.mxu0 }
 0x5eb   : > { %5318 = vst [vmem:[%s9242_s21 + $0x60] sm:$0xff] %v5277_v47 }
 0x5ec   : > { %v5126_v31 = vpop.f32.mrf.mxu0 }
 0x5ed   : > { %v5278_v42 = vmul.f32 40.0, %v5126_v31 }
 0x5ee   : > { %v6018_v56 = vpop.f32.mrf.mxu0 }
 0x5ef   : > { %5319 = vst [vmem:[%s9242_s21 + $0x68] sm:$0xff] %v5278_v42 }
 0x5f0   : > { %v5131_v16 = vpop.f32.mrf.mxu0 }
 0x5f1   : > { %v5279_v58 = vmul.f32 40.0, %v5131_v16 }
 0x5f2   : > { %v6021_v51 = vpop.f32.mrf.mxu0 }
 0x5f3   : > { %5320 = vst [vmem:[%s9242_s21 + $0x70] sm:$0xff] %v5279_v58 }
 0x5f4   : > { %v5136_v1 = vpop.f32.mrf.mxu0 }
 0x5f5   : > { %v5280_v60 = vmul.f32 40.0, %v5136_v1 }
 0x5f6   : > { %v6024_v25 = vpop.f32.mrf.mxu0 }
 0x5f7   : > { %5321 = vst [vmem:[%s9242_s21 + $0x78] sm:$0xff] %v5280_v60 }
 0x5f8   : > { %v5141_v32 = vpop.f32.mrf.mxu0 }
 0x5f9   : > { %v5281_v18 = vmul.f32 40.0, %v5141_v32 }
 0x5fa   : > { %v6027_v15 = vpop.f32.mrf.mxu0 }
 0x5fb   : > { %5322 = vst [vmem:[%s9242_s21 + $0x80] sm:$0xff] %v5281_v18 }
 0x5fc   : > { %v5146_v41 = vpop.f32.mrf.mxu0 }
 0x5fd   : > { %v5282_v52 = vmul.f32 40.0, %v5146_v41 }
 0x5fe   : > { %v6030_v29 = vpop.f32.mrf.mxu0 }
 0x5ff   : > { %5323 = vst [vmem:[%s9242_s21 + $0x88] sm:$0xff] %v5282_v52 }
 0x600   : > { %v5151_v46 = vpop.f32.mrf.mxu0 }
 0x601   : > { %v5283_v53 = vmul.f32 40.0, %v5151_v46 }
 0x602   : > { %v6033_v63 = vpop.f32.mrf.mxu0 }
 0x603   : > { %5324 = vst [vmem:[%s9242_s21 + $0x90] sm:$0xff] %v5283_v53 }
 0x604   : > { %v5156_v33 = vpop.f32.mrf.mxu0 }
 0x605   : > { %v5284_v9 = vmul.f32 40.0, %v5156_v33 }
 0x606   : > { %v6036_v7 = vpop.f32.mrf.mxu0 }
 0x607   : > { %5325 = vst [vmem:[%s9242_s21 + $0x98] sm:$0xff] %v5284_v9 }
 0x608   : > { %v5161_v36 = vpop.f32.mrf.mxu0 }
 0x609   : > { %v5285_v4 = vmul.f32 40.0, %v5161_v36 }
 0x60a   : > { %v6039_v61 = vpop.f32.mrf.mxu0 }
 0x60b   : > { %5326 = vst [vmem:[%s9242_s21 + $0xa0] sm:$0xff] %v5285_v4 }
 0x60c   : > { %v5166_v34 = vpop.f32.mrf.mxu0 }
 0x60d   : > { %v5286_v38 = vmul.f32 40.0, %v5166_v34 }
 0x60e   : > { %v6042_v49 = vpop.f32.mrf.mxu0 }
 0x60f   : > { %5327 = vst [vmem:[%s9242_s21 + $0xa8] sm:$0xff] %v5286_v38 }
 0x610   : > { %v5171_v26 = vpop.f32.mrf.mxu0 }
 0x611   : > { %v5287_v14 = vmul.f32 40.0, %v5171_v26 }
 0x612   : > { %v6045_v11 = vpop.f32.mrf.mxu0 }
 0x613   : > { %5328 = vst [vmem:[%s9242_s21 + $0xb0] sm:$0xff] %v5287_v14 }
 0x614   : > { %v5176_v30 = vpop.f32.mrf.mxu0 }
 0x615   : > { %v5288_v40 = vmul.f32 40.0, %v5176_v30 }
 0x616   : > { %v6048_v24 = vpop.f32.mrf.mxu0 }
 0x617   : > { %5329 = vst [vmem:[%s9242_s21 + $0xb8] sm:$0xff] %v5288_v40 }
 0x618   : > { %v5181_v23 = vpop.f32.mrf.mxu0 }
 0x619   : > { %v5289_v5 = vmul.f32 40.0, %v5181_v23 }
 0x61a   : > { %v6051_v55 = vpop.f32.mrf.mxu0 }
 0x61b   : > { %5330 = vst [vmem:[%s9242_s21 + $0xc0] sm:$0xff] %v5289_v5 }
 0x61c   : > { %v5186_v21 = vpop.f32.mrf.mxu0 }
 0x61d   : > { %v5290_v19 = vmul.f32 40.0, %v5186_v21 }
 0x61e   : > { %v6054_v10 = vpop.f32.mrf.mxu0 }
 0x61f   : > { %5331 = vst [vmem:[%s9242_s21 + $0xc8] sm:$0xff] %v5290_v19 }
 0x620   : > { %v5191_v3 = vpop.f32.mrf.mxu0 }
 0x621   : > { %v5291_v57 = vmul.f32 40.0, %v5191_v3 }
 0x622   : > { %v6057_v8 = vpop.f32.mrf.mxu0 }
 0x623   : > { %5332 = vst [vmem:[%s9242_s21 + $0xd0] sm:$0xff] %v5291_v57 }
 0x624   : > { %v5196_v45 = vpop.f32.mrf.mxu0 }
 0x625   : > { %v5292_v6 = vmul.f32 40.0, %v5196_v45 }
 0x626   : > { %v6060_v62 = vpop.f32.mrf.mxu0 }
 0x627   : > { %5333 = vst [vmem:[%s9242_s21 + $0xd8] sm:$0xff] %v5292_v6 }
 0x628   : > { %v5201_v54 = vpop.f32.mrf.mxu0 }
 0x629   : > { %v5293_v22 = vmul.f32 40.0, %v5201_v54 }
 0x62a   : > { %v6063_v59 = vpop.f32.mrf.mxu0 }
 0x62b   : > { %5334 = vst [vmem:[%s9242_s21 + $0xe0] sm:$0xff] %v5293_v22 }
 0x62c   : > { %v5206_v17 = vpop.f32.mrf.mxu0 }
 0x62d   : > { %v5294_v20 = vmul.f32 40.0, %v5206_v17 }
 0x62e   : > { %v6066_v48 = vpop.f32.mrf.mxu0 }
 0x62f   : > { %5335 = vst [vmem:[%s9242_s21 + $0xe8] sm:$0xff] %v5294_v20 }
 0x630   : > { %v5211_v13 = vpop.f32.mrf.mxu0 }
 0x631   : > { %v5295_v35 = vmul.f32 40.0, %v5211_v13 }
 0x632   : > { %v6069_v44 = vpop.f32.mrf.mxu0 }
 0x633   : > { %5336 = vst [vmem:[%s9242_s21 + $0xf0] sm:$0xff] %v5295_v35 }
 0x634   : > { %v5216_v27 = vpop.f32.mrf.mxu0 }
 0x635   : > { %v5296_v43 = vmul.f32 40.0, %v5216_v27 }
 0x636   : > { %v6072_v2 = vpop.f32.mrf.mxu0 }
 0x637   : > { %5337 = vst [vmem:[%s9242_s21 + $0xf8] sm:$0xff] %v5296_v43 }
 0x638   : > { %v5221_v37 = vpop.f32.mrf.mxu0 }
 0x639   : > { %v5297_v39 = vmul.f32 40.0, %v5221_v37 }
 0x63a   : > { %v6075_v28 = vpop.f32.mrf.mxu0 }
 0x63b   : > { %5338 = vst [vmem:[%s9242_s21 + $0x100] sm:$0xff] %v5297_v39 }
 0x63c   : > { %v5226_v0 = vpop.f32.mrf.mxu0 }
 0x63d   : > { %v5298_v12 = vmul.f32 40.0, %v5226_v0 }
 0x63e   : > { %v6078_v47 = vpop.f32.mrf.mxu0 }
 0x63f   : > { %5339 = vst [vmem:[%s9242_s21 + $0x108] sm:$0xff] %v5298_v12 }
 0x640   : > { %v5231_v50 = vpop.f32.mrf.mxu0 }
 0x641   : > { %v5299_v31 = vmul.f32 40.0, %v5231_v50 }
 0x642   : > { %v6081_v42 = vpop.f32.mrf.mxu0 }
 0x643   : > { %5340 = vst [vmem:[%s9242_s21 + $0x110] sm:$0xff] %v5299_v31 }
 0x644   : > { %v5236_v56 = vpop.f32.mrf.mxu0 }
 0x645   : > { %v5300_v16 = vmul.f32 40.0, %v5236_v56 }
 0x646   : > { %v6084_v58 = vpop.f32.mrf.mxu0 }
 0x647   : > { %5341 = vst [vmem:[%s9242_s21 + $0x118] sm:$0xff] %v5300_v16 }
 0x648   : > { %v5241_v51 = vpop.f32.mrf.mxu0 }
 0x649   : > { %v5301_v1 = vmul.f32 40.0, %v5241_v51 }
 0x64a   : > { %v6087_v60 = vpop.f32.mrf.mxu0 }
 0x64b   : > { %5342 = vst [vmem:[%s9242_s21 + $0x120] sm:$0xff] %v5301_v1 }
 0x64c   : > { %v5246_v25 = vpop.f32.mrf.mxu0 }
 0x64d   : > { %v5302_v32 = vmul.f32 40.0, %v5246_v25 }
 0x64e   : > { %v6090_v18 = vpop.f32.mrf.mxu0 }
 0x64f   : > { %5343 = vst [vmem:[%s9242_s21 + $0x128] sm:$0xff] %v5302_v32 }
 0x650   : > { %v5251_v15 = vpop.f32.mrf.mxu0 }
 0x651   : > { %v5303_v41 = vmul.f32 40.0, %v5251_v15 }
 0x652   : > { %v6093_v52 = vpop.f32.mrf.mxu0 }
 0x653   : > { %5344 = vst [vmem:[%s9242_s21 + $0x130] sm:$0xff] %v5303_v41 }
 0x654   : > { %v5256_v29 = vpop.f32.mrf.mxu0 }
 0x655   : > { %v5304_v46 = vmul.f32 40.0, %v5256_v29 }
 0x656   : > { %v6096_v53 = vpop.f32.mrf.mxu0 }
 0x657   : > { %5345 = vst [vmem:[%s9242_s21 + $0x138] sm:$0xff] %v5304_v46 }
 0x658   : > { %v5261_v63 = vpop.f32.mrf.mxu0 }
 0x659   : > { %v5305_v33 = vmul.f32 40.0, %v5261_v63 }
 0x65a   : > { %v6099_v9 = vpop.f32.mrf.mxu0 }
 0x65b   : > { %5346 = vst [vmem:[%s9242_s21 + $0x140] sm:$0xff] %v5305_v33 }
 0x65c PF: > { %s19_s27 = sadd.s32 1, %s6254_s27  }
 0x65d   : > { %p16_p5 = scmp.ge.s32.totalorder %s19_s27, 4  }
 0x65f   :  { %18 = sbr.rel (!%p16_p5) target bundleno = 1 (0x1), region = 93 }

</bundles_post_ra>
